<compile_context>
chip_gen: v5e
topology: v5e:2x2
jax: 0.10.0
libtpu: 0.0.40
codegen_flags: <defaults>
</compile_context>

<pallas_src>
import jax
import jax.numpy as jnp
from jax.experimental import pallas as pl
from jax.experimental.pallas import tpu as pltpu

# Static network dims (fixed by fc1 = Linear(116 * 32, 120)).
L_IN = 476           # input length
N1 = 118             # conv1+pool positions per parity stream (2 * 118 = 236)
N2 = 116             # conv2+pool output positions
NPAD = 128           # lane-padded conv2 output width
C1, C2 = 16, 32      # conv channel counts
K = 5                # conv kernel width
FLAT = C2 * NPAD     # 4096: lane-padded flatten width consumed by fc1
H1, H1P = 120, 128   # fc1 width and its lane-padded width
H2 = 64              # fc2 width


# ------------------------------------------------------------------ kernel ---

def _musicnet_kernel(xp_ref, pa_ref, pb_ref, w2s_ref, w4p_ref, w5_ref, w3_hbm_ref,
                     out_ref, w3_vmem, flat_ref, dma_sem):
    B = xp_ref.shape[0]

    # Start the dominant fc1-weight DMA (HBM -> VMEM) immediately; it overlaps the
    # conv1/conv2 compute below and is only waited on right before the fc1 dot.
    w3_copy = pltpu.make_async_copy(w3_hbm_ref, w3_vmem, dma_sem)
    w3_copy.start()

    # Hoisted broadcasts (JAX does not CSE broadcast_in_dim).
    b1b = jnp.broadcast_to(pa_ref[0:C1, 0:1], (C1, N1))                    # conv1 bias
    w1b = [jnp.broadcast_to(pa_ref[0:C1, 1 + k:2 + k], (C1, N1)) for k in range(K)]
    b2b = jnp.broadcast_to(pa_ref[0:C2, 8:9], (C2, N2))                    # conv2 bias
    w2s = w2s_ref[...]                                                     # (32, 80)
    zpad = jnp.zeros((C2, NPAD - N2), jnp.float32)

    for b in range(B):
        xpb = xp_ref[b]                                                    # (4, 119)

        # ---- conv1 + relu + pool(2,2) on the VPU (channels on sublanes).
        # Phase r holds conv1 at raw positions 4m + r, so pooling is a max of
        # adjacent phases.  xsb[s][c, m] = x[4m + s], pre-broadcast over channels.
        xsb = [jnp.broadcast_to(xpb[s % 4, s // 4:s // 4 + N1][None, :], (C1, N1))
               for s in range(8)]
        y = []
        for r in range(4):
            acc = b1b
            for k in range(K):
                acc = acc + xsb[r + k] * w1b[k]
            y.append(acc)
        p1e = jnp.maximum(jnp.maximum(y[0], y[1]), 0.0)  # (16,118) pooled pos 2m
        p1o = jnp.maximum(jnp.maximum(y[2], y[3]), 0.0)  # (16,118) pooled pos 2m+1

        # ---- conv2 + relu + pool(2,2): one fused MXU dot per pooling parity.
        # The 5 taps are stacked along the contraction dim -> (32,80) @ (80,116).
        e0, e1, e2 = p1e[:, 0:N2], p1e[:, 1:N2 + 1], p1e[:, 2:N2 + 2]
        o0, o1, o2 = p1o[:, 0:N2], p1o[:, 1:N2 + 1], p1o[:, 2:N2 + 2]
        rhs_e = jnp.concatenate([e0, o0, e1, o1, e2], axis=0)              # (80, 116)
        rhs_o = jnp.concatenate([o0, e1, o1, e2, o2], axis=0)              # (80, 116)
        z_e = jnp.dot(w2s, rhs_e, preferred_element_type=jnp.float32) + b2b
        z_o = jnp.dot(w2s, rhs_o, preferred_element_type=jnp.float32) + b2b
        p2 = jnp.maximum(jnp.maximum(z_e, z_o), 0.0)                       # (32, 116)

        # ---- flatten into the lane-padded fc1 layout: flat[b, c*128 + u] = p2[c, u].
        # fc1's weight is permuted/zero-padded in the wrapper to match, so every
        # store here is lane-aligned and unmasked (no rotates, no partial lanes).
        p2p = jnp.concatenate([p2, zpad], axis=1)                          # (32, 128)
        for c in range(C2):
            flat_ref[b:b + 1, c * NPAD:(c + 1) * NPAD] = p2p[c:c + 1, :]

    # ---- fc1 -> relu -> fc2 -> relu -> fc3 -> log_softmax (all VMEM-resident).
    w3_copy.wait()
    h = flat_ref[...]                                                      # (B, 4096)
    h = jnp.maximum(jnp.dot(h, w3_vmem[...], preferred_element_type=jnp.float32)
                    + pb_ref[0:1, :], 0.0)                                 # (B, 128)
    h = jnp.maximum(jnp.dot(h, w4p_ref[...], preferred_element_type=jnp.float32)
                    + pb_ref[1:2, 0:H2], 0.0)                              # (B, 64)
    logits = (jnp.dot(h, w5_ref[...], preferred_element_type=jnp.float32)
              + pb_ref[2:3, 0:2])                                          # (B, 2)

    # 2-class log_softmax with direct two-column arithmetic (no cross-lane reduce).
    z0, z1 = logits[:, 0:1], logits[:, 1:2]
    m = jnp.maximum(z0, z1)
    lse = m + jnp.log(jnp.exp(z0 - m) + jnp.exp(z1 - m))
    out_ref[...] = logits - lse


# ------------------------------------------------------------------ wrapper --

@jax.jit
def music_net_forward(params, x):
    """x: (B, 1, 476) float32 NCL -> (B, 2) log-probabilities."""
    B = x.shape[0]

    # De-interleave the raw input mod 4 (tiny, free at trace time) so that both
    # stride-2 max-pools become max() of contiguous in-kernel slices.
    xp = jnp.transpose(x[:, 0, :].reshape(B, L_IN // 4, 4), (0, 2, 1))     # (B, 4, 119)

    # Pack the tiny conv-side params column-wise (channels on sublanes) ...
    pa = jnp.zeros((C2, 128), jnp.float32)
    pa = pa.at[0:C1, 0].set(params["conv1_b"])
    pa = pa.at[0:C1, 1:1 + K].set(params["conv1_w"][:, 0, :])
    pa = pa.at[0:C2, 8].set(params["conv2_b"])
    # ... and the fc biases row-wise, lane-padded.
    pb = jnp.zeros((8, 128), jnp.float32)
    pb = pb.at[0, 0:H1].set(params["fc1_b"])
    pb = pb.at[1, 0:H2].set(params["fc2_b"])
    pb = pb.at[2, 0:2].set(params["fc3_b"])

    # conv2 weight with its 5 taps concatenated along the contraction dim:
    # w2s[o, 16*k + c] = conv2_w[o, c, k].
    w2s = jnp.transpose(params["conv2_w"], (0, 2, 1)).reshape(C2, C1 * K)

    # fc1 weight permuted + zero-padded to the kernel's lane-padded flatten layout:
    # w3p[c*128 + u, n] = fc1_w[n, c*116 + u]; zero for u >= 116 or n >= 120.
    w3p = jnp.zeros((C2, NPAD, H1P), jnp.float32)
    w3p = w3p.at[:, 0:N2, 0:H1].set(
        params["fc1_w"].reshape(H1, C2, N2).transpose(1, 2, 0))
    w3p = w3p.reshape(FLAT, H1P)

    # fc2 weight transposed, with zero rows for fc1's lane padding.
    w4p = jnp.zeros((H1P, H2), jnp.float32).at[0:H1, :].set(params["fc2_w"].T)
    w5 = params["fc3_w"].T                                                 # (64, 2)

    flops = 2 * B * (4 * N1 * C1 * K                       # conv1
                     + 2 * N2 * C2 * C1 * K                # conv2
                     + FLAT * H1P + H1P * H2 + H2 * 2)     # fc1/fc2/fc3
    bytes_accessed = 4 * (xp.size + pa.size + pb.size + w2s.size + w3p.size
                          + w4p.size + w5.size + B * 2)

    vmem = pl.BlockSpec(memory_space=pltpu.MemorySpace.VMEM)
    return pl.pallas_call(
        _musicnet_kernel,
        out_shape=jax.ShapeDtypeStruct((B, 2), jnp.float32),
        in_specs=[vmem, vmem, vmem, vmem, vmem, vmem,
                  pl.BlockSpec(memory_space=pl.ANY)],      # fc1 weight stays in HBM
        out_specs=vmem,
        scratch_shapes=[pltpu.VMEM((FLAT, H1P), jnp.float32),   # fc1 weight landing
                        pltpu.VMEM((B, FLAT), jnp.float32),     # flattened activations
                        pltpu.SemaphoreType.DMA(())],
        cost_estimate=pl.CostEstimate(flops=flops, transcendentals=3 * B,
                                      bytes_accessed=bytes_accessed),
    )(xp, pa, pb, w2s, w4p, w5, w3p)


# ------------------------------------------------------------------- params --

def init_params(key):
    """PyTorch-default init: uniform(-1/sqrt(fan_in), +1/sqrt(fan_in))."""
    ks = jax.random.split(key, 10)

    def u(k, shape, fan_in):
        bound = 1.0 / jnp.sqrt(float(fan_in))
        return jax.random.uniform(k, shape, jnp.float32, -bound, bound)

    return {
        "conv1_w": u(ks[0], (16, 1, 5), 1 * 5),
        "conv1_b": u(ks[1], (16,), 1 * 5),
        "conv2_w": u(ks[2], (32, 16, 5), 16 * 5),
        "conv2_b": u(ks[3], (32,), 16 * 5),
        "fc1_w": u(ks[4], (120, 116 * 32), 116 * 32),
        "fc1_b": u(ks[5], (120,), 116 * 32),
        "fc2_w": u(ks[6], (64, 120), 120),
        "fc2_b": u(ks[7], (64,), 120),
        "fc3_w": u(ks[8], (2, 64), 64),
        "fc3_b": u(ks[9], (2,), 64),
    }


# --------------------------------------------------------------- reference ---

def _reference_forward(params, x):
    """Pure-jnp reference matching the PyTorch forward."""
    def conv1d(h, w, b):                     # h: (B, Cin, L), w: (Cout, Cin, K)
        k = w.shape[-1]
        l_out = h.shape[-1] - k + 1
        cols = jnp.stack([h[:, :, i:i + l_out] for i in range(k)], axis=-1)
        return jnp.einsum("bclk,ock->bol", cols, w) + b[None, :, None]

    def pool2(h):                            # (B, C, L) -> (B, C, L//2)
        b, c, l = h.shape
        return jnp.max(h[:, :, : (l // 2) * 2].reshape(b, c, l // 2, 2), axis=-1)

    h = pool2(jax.nn.relu(conv1d(x, params["conv1_w"], params["conv1_b"])))
    h = pool2(jax.nn.relu(conv1d(h, params["conv2_w"], params["conv2_b"])))
    h = h.reshape(h.shape[0], 32 * 116)
    h = jax.nn.relu(h @ params["fc1_w"].T + params["fc1_b"])
    h = jax.nn.relu(h @ params["fc2_w"].T + params["fc2_b"])
    logits = h @ params["fc3_w"].T + params["fc3_b"]
    return jax.nn.log_softmax(logits, axis=-1)


# -------------------------------------------------------------------- main ---

if __name__ == "__main__":
    key = jax.random.PRNGKey(0)
    k_params, k_x = jax.random.split(key)

    params = init_params(k_params)
    # Input length fixed to 476 by fc1's 116*32 expectation; small batch of 2.
    x = jax.random.normal(k_x, (2, 1, 476), jnp.float32)

    out = jax.block_until_ready(music_net_forward(params, x))

    assert out.shape == (2, 2), out.shape
    # log_softmax rows must (approximately) sum to 1 in prob space.
    assert bool(jnp.all(jnp.abs(jnp.sum(jnp.exp(out), axis=1) - 1.0) < 1e-4))
    # Match the pure-JAX reference (loose tol covers MXU/XLA matmul precision diffs).
    ref = _reference_forward(params, x)
    assert bool(jnp.max(jnp.abs(out - ref)) < 5e-2), (out, ref)
    print("KERNEL_OK")
</pallas_src>

<mosaic_0001>
module attributes {stable_mosaic.version = 11 : i64} {
  func.func @_musicnet_kernel(%arg0: memref<2x4x119xf32, #tpu.memory_space<vmem>>, %arg1: memref<32x128xf32, #tpu.memory_space<vmem>>, %arg2: memref<8x128xf32, #tpu.memory_space<vmem>>, %arg3: memref<32x80xf32, #tpu.memory_space<vmem>>, %arg4: memref<128x64xf32, #tpu.memory_space<vmem>>, %arg5: memref<64x2xf32, #tpu.memory_space<vmem>>, %arg6: memref<4096x128xf32, #tpu.memory_space<any>>, %arg7: memref<2x2xf32, #tpu.memory_space<vmem>>, %arg8: memref<4096x128xf32, #tpu.memory_space<vmem>>, %arg9: memref<2x4096xf32, #tpu.memory_space<vmem>>, %arg10: memref<!tpu.dma_semaphore, #tpu.memory_space<semaphore_mem>>) attributes {dimension_semantics = [], scalar_prefetch = 0 : i64, scratch_operands = 3 : i64, tpu.core_type = #tpu.core_type<tc>} {
    tpu.enqueue_dma source(%arg6 : memref<4096x128xf32, #tpu.memory_space<any>>) target(%arg8 : memref<4096x128xf32, #tpu.memory_space<vmem>>) target_semaphore(%arg10 : memref<!tpu.dma_semaphore, #tpu.memory_space<semaphore_mem>>)
    %c0 = arith.constant 0 : index
    %c0_0 = arith.constant 0 : index
    %0 = vector.load %arg1[%c0, %c0_0] : memref<32x128xf32, #tpu.memory_space<vmem>>, vector<16x1xf32>
    %1 = vector.shape_cast %0 : vector<16x1xf32> to vector<16x1xf32>
    %2 = vector.broadcast %1 : vector<16x1xf32> to vector<16x118xf32>
    %c0_1 = arith.constant 0 : index
    %c1 = arith.constant 1 : index
    %3 = vector.load %arg1[%c0_1, %c1] : memref<32x128xf32, #tpu.memory_space<vmem>>, vector<16x1xf32>
    %4 = vector.shape_cast %3 : vector<16x1xf32> to vector<16x1xf32>
    %5 = vector.broadcast %4 : vector<16x1xf32> to vector<16x118xf32>
    %c0_2 = arith.constant 0 : index
    %c2 = arith.constant 2 : index
    %6 = vector.load %arg1[%c0_2, %c2] : memref<32x128xf32, #tpu.memory_space<vmem>>, vector<16x1xf32>
    %7 = vector.shape_cast %6 : vector<16x1xf32> to vector<16x1xf32>
    %8 = vector.broadcast %7 : vector<16x1xf32> to vector<16x118xf32>
    %c0_3 = arith.constant 0 : index
    %c3 = arith.constant 3 : index
    %9 = vector.load %arg1[%c0_3, %c3] : memref<32x128xf32, #tpu.memory_space<vmem>>, vector<16x1xf32>
    %10 = vector.shape_cast %9 : vector<16x1xf32> to vector<16x1xf32>
    %11 = vector.broadcast %10 : vector<16x1xf32> to vector<16x118xf32>
    %c0_4 = arith.constant 0 : index
    %c4 = arith.constant 4 : index
    %12 = vector.load %arg1[%c0_4, %c4] : memref<32x128xf32, #tpu.memory_space<vmem>>, vector<16x1xf32>
    %13 = vector.shape_cast %12 : vector<16x1xf32> to vector<16x1xf32>
    %14 = vector.broadcast %13 : vector<16x1xf32> to vector<16x118xf32>
    %c0_5 = arith.constant 0 : index
    %c5 = arith.constant 5 : index
    %15 = vector.load %arg1[%c0_5, %c5] : memref<32x128xf32, #tpu.memory_space<vmem>>, vector<16x1xf32>
    %16 = vector.shape_cast %15 : vector<16x1xf32> to vector<16x1xf32>
    %17 = vector.broadcast %16 : vector<16x1xf32> to vector<16x118xf32>
    %c0_6 = arith.constant 0 : index
    %c8 = arith.constant 8 : index
    %18 = vector.load %arg1[%c0_6, %c8] : memref<32x128xf32, #tpu.memory_space<vmem>>, vector<32x1xf32>
    %19 = vector.shape_cast %18 : vector<32x1xf32> to vector<32x1xf32>
    %20 = vector.broadcast %19 : vector<32x1xf32> to vector<32x116xf32>
    %c0_7 = arith.constant 0 : index
    %c0_8 = arith.constant 0 : index
    %21 = vector.load %arg3[%c0_7, %c0_8] : memref<32x80xf32, #tpu.memory_space<vmem>>, vector<32x80xf32>
    %cst = arith.constant 0.000000e+00 : f32
    %22 = vector.broadcast %cst : f32 to vector<32x12xf32>
    %c0_9 = arith.constant 0 : index
    %c0_10 = arith.constant 0 : index
    %c0_11 = arith.constant 0 : index
    %23 = vector.load %arg0[%c0_9, %c0_10, %c0_11] : memref<2x4x119xf32, #tpu.memory_space<vmem>>, vector<1x4x119xf32>
    %24 = vector.shape_cast %23 : vector<1x4x119xf32> to vector<4x119xf32>
    %25 = vector.extract_strided_slice %24 {offsets = [0, 0], sizes = [1, 118], strides = [1, 1]} : vector<4x119xf32> to vector<1x118xf32>
    %26 = vector.shape_cast %25 : vector<1x118xf32> to vector<118xf32>
    %27 = vector.shape_cast %26 : vector<118xf32> to vector<1x118xf32>
    %28 = vector.shape_cast %27 : vector<1x118xf32> to vector<1x118xf32>
    %29 = vector.broadcast %28 : vector<1x118xf32> to vector<16x118xf32>
    %30 = vector.extract_strided_slice %24 {offsets = [1, 0], sizes = [1, 118], strides = [1, 1]} : vector<4x119xf32> to vector<1x118xf32>
    %31 = vector.shape_cast %30 : vector<1x118xf32> to vector<118xf32>
    %32 = vector.shape_cast %31 : vector<118xf32> to vector<1x118xf32>
    %33 = vector.shape_cast %32 : vector<1x118xf32> to vector<1x118xf32>
    %34 = vector.broadcast %33 : vector<1x118xf32> to vector<16x118xf32>
    %35 = vector.extract_strided_slice %24 {offsets = [2, 0], sizes = [1, 118], strides = [1, 1]} : vector<4x119xf32> to vector<1x118xf32>
    %36 = vector.shape_cast %35 : vector<1x118xf32> to vector<118xf32>
    %37 = vector.shape_cast %36 : vector<118xf32> to vector<1x118xf32>
    %38 = vector.shape_cast %37 : vector<1x118xf32> to vector<1x118xf32>
    %39 = vector.broadcast %38 : vector<1x118xf32> to vector<16x118xf32>
    %40 = vector.extract_strided_slice %24 {offsets = [3, 0], sizes = [1, 118], strides = [1, 1]} : vector<4x119xf32> to vector<1x118xf32>
    %41 = vector.shape_cast %40 : vector<1x118xf32> to vector<118xf32>
    %42 = vector.shape_cast %41 : vector<118xf32> to vector<1x118xf32>
    %43 = vector.shape_cast %42 : vector<1x118xf32> to vector<1x118xf32>
    %44 = vector.broadcast %43 : vector<1x118xf32> to vector<16x118xf32>
    %45 = vector.extract_strided_slice %24 {offsets = [0, 1], sizes = [1, 118], strides = [1, 1]} : vector<4x119xf32> to vector<1x118xf32>
    %46 = vector.shape_cast %45 : vector<1x118xf32> to vector<118xf32>
    %47 = vector.shape_cast %46 : vector<118xf32> to vector<1x118xf32>
    %48 = vector.shape_cast %47 : vector<1x118xf32> to vector<1x118xf32>
    %49 = vector.broadcast %48 : vector<1x118xf32> to vector<16x118xf32>
    %50 = vector.extract_strided_slice %24 {offsets = [1, 1], sizes = [1, 118], strides = [1, 1]} : vector<4x119xf32> to vector<1x118xf32>
    %51 = vector.shape_cast %50 : vector<1x118xf32> to vector<118xf32>
    %52 = vector.shape_cast %51 : vector<118xf32> to vector<1x118xf32>
    %53 = vector.shape_cast %52 : vector<1x118xf32> to vector<1x118xf32>
    %54 = vector.broadcast %53 : vector<1x118xf32> to vector<16x118xf32>
    %55 = vector.extract_strided_slice %24 {offsets = [2, 1], sizes = [1, 118], strides = [1, 1]} : vector<4x119xf32> to vector<1x118xf32>
    %56 = vector.shape_cast %55 : vector<1x118xf32> to vector<118xf32>
    %57 = vector.shape_cast %56 : vector<118xf32> to vector<1x118xf32>
    %58 = vector.shape_cast %57 : vector<1x118xf32> to vector<1x118xf32>
    %59 = vector.broadcast %58 : vector<1x118xf32> to vector<16x118xf32>
    %60 = vector.extract_strided_slice %24 {offsets = [3, 1], sizes = [1, 118], strides = [1, 1]} : vector<4x119xf32> to vector<1x118xf32>
    %61 = vector.shape_cast %60 : vector<1x118xf32> to vector<118xf32>
    %62 = vector.shape_cast %61 : vector<118xf32> to vector<1x118xf32>
    %63 = vector.shape_cast %62 : vector<1x118xf32> to vector<1x118xf32>
    %64 = vector.broadcast %63 : vector<1x118xf32> to vector<16x118xf32>
    %65 = arith.mulf %29, %5 : vector<16x118xf32>
    %66 = arith.addf %2, %65 : vector<16x118xf32>
    %67 = arith.mulf %34, %8 : vector<16x118xf32>
    %68 = arith.addf %66, %67 : vector<16x118xf32>
    %69 = arith.mulf %39, %11 : vector<16x118xf32>
    %70 = arith.addf %68, %69 : vector<16x118xf32>
    %71 = arith.mulf %44, %14 : vector<16x118xf32>
    %72 = arith.addf %70, %71 : vector<16x118xf32>
    %73 = arith.mulf %49, %17 : vector<16x118xf32>
    %74 = arith.addf %72, %73 : vector<16x118xf32>
    %75 = arith.mulf %34, %5 : vector<16x118xf32>
    %76 = arith.addf %2, %75 : vector<16x118xf32>
    %77 = arith.mulf %39, %8 : vector<16x118xf32>
    %78 = arith.addf %76, %77 : vector<16x118xf32>
    %79 = arith.mulf %44, %11 : vector<16x118xf32>
    %80 = arith.addf %78, %79 : vector<16x118xf32>
    %81 = arith.mulf %49, %14 : vector<16x118xf32>
    %82 = arith.addf %80, %81 : vector<16x118xf32>
    %83 = arith.mulf %54, %17 : vector<16x118xf32>
    %84 = arith.addf %82, %83 : vector<16x118xf32>
    %85 = arith.mulf %39, %5 : vector<16x118xf32>
    %86 = arith.addf %2, %85 : vector<16x118xf32>
    %87 = arith.mulf %44, %8 : vector<16x118xf32>
    %88 = arith.addf %86, %87 : vector<16x118xf32>
    %89 = arith.mulf %49, %11 : vector<16x118xf32>
    %90 = arith.addf %88, %89 : vector<16x118xf32>
    %91 = arith.mulf %54, %14 : vector<16x118xf32>
    %92 = arith.addf %90, %91 : vector<16x118xf32>
    %93 = arith.mulf %59, %17 : vector<16x118xf32>
    %94 = arith.addf %92, %93 : vector<16x118xf32>
    %95 = arith.mulf %44, %5 : vector<16x118xf32>
    %96 = arith.addf %2, %95 : vector<16x118xf32>
    %97 = arith.mulf %49, %8 : vector<16x118xf32>
    %98 = arith.addf %96, %97 : vector<16x118xf32>
    %99 = arith.mulf %54, %11 : vector<16x118xf32>
    %100 = arith.addf %98, %99 : vector<16x118xf32>
    %101 = arith.mulf %59, %14 : vector<16x118xf32>
    %102 = arith.addf %100, %101 : vector<16x118xf32>
    %103 = arith.mulf %64, %17 : vector<16x118xf32>
    %104 = arith.addf %102, %103 : vector<16x118xf32>
    %105 = arith.maximumf %74, %84 : vector<16x118xf32>
    %cst_12 = arith.constant 0.000000e+00 : f32
    %106 = vector.broadcast %cst_12 : f32 to vector<16x118xf32>
    %107 = arith.maximumf %105, %106 : vector<16x118xf32>
    %108 = arith.maximumf %94, %104 : vector<16x118xf32>
    %cst_13 = arith.constant 0.000000e+00 : f32
    %109 = vector.broadcast %cst_13 : f32 to vector<16x118xf32>
    %110 = arith.maximumf %108, %109 : vector<16x118xf32>
    %111 = vector.extract_strided_slice %107 {offsets = [0, 0], sizes = [16, 116], strides = [1, 1]} : vector<16x118xf32> to vector<16x116xf32>
    %112 = vector.extract_strided_slice %107 {offsets = [0, 1], sizes = [16, 116], strides = [1, 1]} : vector<16x118xf32> to vector<16x116xf32>
    %113 = vector.extract_strided_slice %107 {offsets = [0, 2], sizes = [16, 116], strides = [1, 1]} : vector<16x118xf32> to vector<16x116xf32>
    %114 = vector.extract_strided_slice %110 {offsets = [0, 0], sizes = [16, 116], strides = [1, 1]} : vector<16x118xf32> to vector<16x116xf32>
    %115 = vector.extract_strided_slice %110 {offsets = [0, 1], sizes = [16, 116], strides = [1, 1]} : vector<16x118xf32> to vector<16x116xf32>
    %116 = vector.extract_strided_slice %110 {offsets = [0, 2], sizes = [16, 116], strides = [1, 1]} : vector<16x118xf32> to vector<16x116xf32>
    %117 = tpu.concatenate %111, %114, %112, %115, %113 in 0 : vector<16x116xf32>, vector<16x116xf32>, vector<16x116xf32>, vector<16x116xf32>, vector<16x116xf32> -> vector<80x116xf32>
    %118 = tpu.concatenate %114, %112, %115, %113, %116 in 0 : vector<16x116xf32>, vector<16x116xf32>, vector<16x116xf32>, vector<16x116xf32>, vector<16x116xf32> -> vector<80x116xf32>
    %cst_14 = arith.constant dense<0.000000e+00> : vector<32x116xf32>
    %119 = tpu.matmul %21, %117, %cst_14 {dimension_numbers = #tpu.dot_dimension_numbers<[1], [0], [0], [1], [0, 0, 1, 1], [], []>} : vector<32x80xf32>, vector<80x116xf32>, vector<32x116xf32> -> vector<32x116xf32>
    %120 = arith.addf %119, %20 : vector<32x116xf32>
    %cst_15 = arith.constant dense<0.000000e+00> : vector<32x116xf32>
    %121 = tpu.matmul %21, %118, %cst_15 {dimension_numbers = #tpu.dot_dimension_numbers<[1], [0], [0], [1], [0, 0, 1, 1], [], []>} : vector<32x80xf32>, vector<80x116xf32>, vector<32x116xf32> -> vector<32x116xf32>
    %122 = arith.addf %121, %20 : vector<32x116xf32>
    %123 = arith.maximumf %120, %122 : vector<32x116xf32>
    %cst_16 = arith.constant 0.000000e+00 : f32
    %124 = vector.broadcast %cst_16 : f32 to vector<32x116xf32>
    %125 = arith.maximumf %123, %124 : vector<32x116xf32>
    %126 = tpu.concatenate %125, %22 in 1 : vector<32x116xf32>, vector<32x12xf32> -> vector<32x128xf32>
    %127 = vector.extract_strided_slice %126 {offsets = [0, 0], sizes = [1, 128], strides = [1, 1]} : vector<32x128xf32> to vector<1x128xf32>
    %c0_17 = arith.constant 0 : index
    %c0_18 = arith.constant 0 : index
    %128 = vector.load %arg9[%c0_17, %c0_18] : memref<2x4096xf32, #tpu.memory_space<vmem>>, vector<1x128xf32>
    tpu.vector_store %arg9[%c0_17, %c0_18], %127 {strides = array<i32>} : memref<2x4096xf32, #tpu.memory_space<vmem>>, vector<1x128xf32>,
    %129 = vector.extract_strided_slice %126 {offsets = [1, 0], sizes = [1, 128], strides = [1, 1]} : vector<32x128xf32> to vector<1x128xf32>
    %c0_19 = arith.constant 0 : index
    %c128 = arith.constant 128 : index
    %130 = vector.load %arg9[%c0_19, %c128] : memref<2x4096xf32, #tpu.memory_space<vmem>>, vector<1x128xf32>
    tpu.vector_store %arg9[%c0_19, %c128], %129 {strides = array<i32>} : memref<2x4096xf32, #tpu.memory_space<vmem>>, vector<1x128xf32>,
    %131 = vector.extract_strided_slice %126 {offsets = [2, 0], sizes = [1, 128], strides = [1, 1]} : vector<32x128xf32> to vector<1x128xf32>
    %c0_20 = arith.constant 0 : index
    %c256 = arith.constant 256 : index
    %132 = vector.load %arg9[%c0_20, %c256] : memref<2x4096xf32, #tpu.memory_space<vmem>>, vector<1x128xf32>
    tpu.vector_store %arg9[%c0_20, %c256], %131 {strides = array<i32>} : memref<2x4096xf32, #tpu.memory_space<vmem>>, vector<1x128xf32>,
    %133 = vector.extract_strided_slice %126 {offsets = [3, 0], sizes = [1, 128], strides = [1, 1]} : vector<32x128xf32> to vector<1x128xf32>
    %c0_21 = arith.constant 0 : index
    %c384 = arith.constant 384 : index
    %134 = vector.load %arg9[%c0_21, %c384] : memref<2x4096xf32, #tpu.memory_space<vmem>>, vector<1x128xf32>
    tpu.vector_store %arg9[%c0_21, %c384], %133 {strides = array<i32>} : memref<2x4096xf32, #tpu.memory_space<vmem>>, vector<1x128xf32>,
    %135 = vector.extract_strided_slice %126 {offsets = [4, 0], sizes = [1, 128], strides = [1, 1]} : vector<32x128xf32> to vector<1x128xf32>
    %c0_22 = arith.constant 0 : index
    %c512 = arith.constant 512 : index
    %136 = vector.load %arg9[%c0_22, %c512] : memref<2x4096xf32, #tpu.memory_space<vmem>>, vector<1x128xf32>
    tpu.vector_store %arg9[%c0_22, %c512], %135 {strides = array<i32>} : memref<2x4096xf32, #tpu.memory_space<vmem>>, vector<1x128xf32>,
    %137 = vector.extract_strided_slice %126 {offsets = [5, 0], sizes = [1, 128], strides = [1, 1]} : vector<32x128xf32> to vector<1x128xf32>
    %c0_23 = arith.constant 0 : index
    %c640 = arith.constant 640 : index
    %138 = vector.load %arg9[%c0_23, %c640] : memref<2x4096xf32, #tpu.memory_space<vmem>>, vector<1x128xf32>
    tpu.vector_store %arg9[%c0_23, %c640], %137 {strides = array<i32>} : memref<2x4096xf32, #tpu.memory_space<vmem>>, vector<1x128xf32>,
    %139 = vector.extract_strided_slice %126 {offsets = [6, 0], sizes = [1, 128], strides = [1, 1]} : vector<32x128xf32> to vector<1x128xf32>
    %c0_24 = arith.constant 0 : index
    %c768 = arith.constant 768 : index
    %140 = vector.load %arg9[%c0_24, %c768] : memref<2x4096xf32, #tpu.memory_space<vmem>>, vector<1x128xf32>
    tpu.vector_store %arg9[%c0_24, %c768], %139 {strides = array<i32>} : memref<2x4096xf32, #tpu.memory_space<vmem>>, vector<1x128xf32>,
    %141 = vector.extract_strided_slice %126 {offsets = [7, 0], sizes = [1, 128], strides = [1, 1]} : vector<32x128xf32> to vector<1x128xf32>
    %c0_25 = arith.constant 0 : index
    %c896 = arith.constant 896 : index
    %142 = vector.load %arg9[%c0_25, %c896] : memref<2x4096xf32, #tpu.memory_space<vmem>>, vector<1x128xf32>
    tpu.vector_store %arg9[%c0_25, %c896], %141 {strides = array<i32>} : memref<2x4096xf32, #tpu.memory_space<vmem>>, vector<1x128xf32>,
    %143 = vector.extract_strided_slice %126 {offsets = [8, 0], sizes = [1, 128], strides = [1, 1]} : vector<32x128xf32> to vector<1x128xf32>
    %c0_26 = arith.constant 0 : index
    %c1024 = arith.constant 1024 : index
    %144 = vector.load %arg9[%c0_26, %c1024] : memref<2x4096xf32, #tpu.memory_space<vmem>>, vector<1x128xf32>
    tpu.vector_store %arg9[%c0_26, %c1024], %143 {strides = array<i32>} : memref<2x4096xf32, #tpu.memory_space<vmem>>, vector<1x128xf32>,
    %145 = vector.extract_strided_slice %126 {offsets = [9, 0], sizes = [1, 128], strides = [1, 1]} : vector<32x128xf32> to vector<1x128xf32>
    %c0_27 = arith.constant 0 : index
    %c1152 = arith.constant 1152 : index
    %146 = vector.load %arg9[%c0_27, %c1152] : memref<2x4096xf32, #tpu.memory_space<vmem>>, vector<1x128xf32>
    tpu.vector_store %arg9[%c0_27, %c1152], %145 {strides = array<i32>} : memref<2x4096xf32, #tpu.memory_space<vmem>>, vector<1x128xf32>,
    %147 = vector.extract_strided_slice %126 {offsets = [10, 0], sizes = [1, 128], strides = [1, 1]} : vector<32x128xf32> to vector<1x128xf32>
    %c0_28 = arith.constant 0 : index
    %c1280 = arith.constant 1280 : index
    %148 = vector.load %arg9[%c0_28, %c1280] : memref<2x4096xf32, #tpu.memory_space<vmem>>, vector<1x128xf32>
    tpu.vector_store %arg9[%c0_28, %c1280], %147 {strides = array<i32>} : memref<2x4096xf32, #tpu.memory_space<vmem>>, vector<1x128xf32>,
    %149 = vector.extract_strided_slice %126 {offsets = [11, 0], sizes = [1, 128], strides = [1, 1]} : vector<32x128xf32> to vector<1x128xf32>
    %c0_29 = arith.constant 0 : index
    %c1408 = arith.constant 1408 : index
    %150 = vector.load %arg9[%c0_29, %c1408] : memref<2x4096xf32, #tpu.memory_space<vmem>>, vector<1x128xf32>
    tpu.vector_store %arg9[%c0_29, %c1408], %149 {strides = array<i32>} : memref<2x4096xf32, #tpu.memory_space<vmem>>, vector<1x128xf32>,
    %151 = vector.extract_strided_slice %126 {offsets = [12, 0], sizes = [1, 128], strides = [1, 1]} : vector<32x128xf32> to vector<1x128xf32>
    %c0_30 = arith.constant 0 : index
    %c1536 = arith.constant 1536 : index
    %152 = vector.load %arg9[%c0_30, %c1536] : memref<2x4096xf32, #tpu.memory_space<vmem>>, vector<1x128xf32>
    tpu.vector_store %arg9[%c0_30, %c1536], %151 {strides = array<i32>} : memref<2x4096xf32, #tpu.memory_space<vmem>>, vector<1x128xf32>,
    %153 = vector.extract_strided_slice %126 {offsets = [13, 0], sizes = [1, 128], strides = [1, 1]} : vector<32x128xf32> to vector<1x128xf32>
    %c0_31 = arith.constant 0 : index
    %c1664 = arith.constant 1664 : index
    %154 = vector.load %arg9[%c0_31, %c1664] : memref<2x4096xf32, #tpu.memory_space<vmem>>, vector<1x128xf32>
    tpu.vector_store %arg9[%c0_31, %c1664], %153 {strides = array<i32>} : memref<2x4096xf32, #tpu.memory_space<vmem>>, vector<1x128xf32>,
    %155 = vector.extract_strided_slice %126 {offsets = [14, 0], sizes = [1, 128], strides = [1, 1]} : vector<32x128xf32> to vector<1x128xf32>
    %c0_32 = arith.constant 0 : index
    %c1792 = arith.constant 1792 : index
    %156 = vector.load %arg9[%c0_32, %c1792] : memref<2x4096xf32, #tpu.memory_space<vmem>>, vector<1x128xf32>
    tpu.vector_store %arg9[%c0_32, %c1792], %155 {strides = array<i32>} : memref<2x4096xf32, #tpu.memory_space<vmem>>, vector<1x128xf32>,
    %157 = vector.extract_strided_slice %126 {offsets = [15, 0], sizes = [1, 128], strides = [1, 1]} : vector<32x128xf32> to vector<1x128xf32>
    %c0_33 = arith.constant 0 : index
    %c1920 = arith.constant 1920 : index
    %158 = vector.load %arg9[%c0_33, %c1920] : memref<2x4096xf32, #tpu.memory_space<vmem>>, vector<1x128xf32>
    tpu.vector_store %arg9[%c0_33, %c1920], %157 {strides = array<i32>} : memref<2x4096xf32, #tpu.memory_space<vmem>>, vector<1x128xf32>,
    %159 = vector.extract_strided_slice %126 {offsets = [16, 0], sizes = [1, 128], strides = [1, 1]} : vector<32x128xf32> to vector<1x128xf32>
    %c0_34 = arith.constant 0 : index
    %c2048 = arith.constant 2048 : index
    %160 = vector.load %arg9[%c0_34, %c2048] : memref<2x4096xf32, #tpu.memory_space<vmem>>, vector<1x128xf32>
    tpu.vector_store %arg9[%c0_34, %c2048], %159 {strides = array<i32>} : memref<2x4096xf32, #tpu.memory_space<vmem>>, vector<1x128xf32>,
    %161 = vector.extract_strided_slice %126 {offsets = [17, 0], sizes = [1, 128], strides = [1, 1]} : vector<32x128xf32> to vector<1x128xf32>
    %c0_35 = arith.constant 0 : index
    %c2176 = arith.constant 2176 : index
    %162 = vector.load %arg9[%c0_35, %c2176] : memref<2x4096xf32, #tpu.memory_space<vmem>>, vector<1x128xf32>
    tpu.vector_store %arg9[%c0_35, %c2176], %161 {strides = array<i32>} : memref<2x4096xf32, #tpu.memory_space<vmem>>, vector<1x128xf32>,
    %163 = vector.extract_strided_slice %126 {offsets = [18, 0], sizes = [1, 128], strides = [1, 1]} : vector<32x128xf32> to vector<1x128xf32>
    %c0_36 = arith.constant 0 : index
    %c2304 = arith.constant 2304 : index
    %164 = vector.load %arg9[%c0_36, %c2304] : memref<2x4096xf32, #tpu.memory_space<vmem>>, vector<1x128xf32>
    tpu.vector_store %arg9[%c0_36, %c2304], %163 {strides = array<i32>} : memref<2x4096xf32, #tpu.memory_space<vmem>>, vector<1x128xf32>,
    %165 = vector.extract_strided_slice %126 {offsets = [19, 0], sizes = [1, 128], strides = [1, 1]} : vector<32x128xf32> to vector<1x128xf32>
    %c0_37 = arith.constant 0 : index
    %c2432 = arith.constant 2432 : index
    %166 = vector.load %arg9[%c0_37, %c2432] : memref<2x4096xf32, #tpu.memory_space<vmem>>, vector<1x128xf32>
    tpu.vector_store %arg9[%c0_37, %c2432], %165 {strides = array<i32>} : memref<2x4096xf32, #tpu.memory_space<vmem>>, vector<1x128xf32>,
    %167 = vector.extract_strided_slice %126 {offsets = [20, 0], sizes = [1, 128], strides = [1, 1]} : vector<32x128xf32> to vector<1x128xf32>
    %c0_38 = arith.constant 0 : index
    %c2560 = arith.constant 2560 : index
    %168 = vector.load %arg9[%c0_38, %c2560] : memref<2x4096xf32, #tpu.memory_space<vmem>>, vector<1x128xf32>
    tpu.vector_store %arg9[%c0_38, %c2560], %167 {strides = array<i32>} : memref<2x4096xf32, #tpu.memory_space<vmem>>, vector<1x128xf32>,
    %169 = vector.extract_strided_slice %126 {offsets = [21, 0], sizes = [1, 128], strides = [1, 1]} : vector<32x128xf32> to vector<1x128xf32>
    %c0_39 = arith.constant 0 : index
    %c2688 = arith.constant 2688 : index
    %170 = vector.load %arg9[%c0_39, %c2688] : memref<2x4096xf32, #tpu.memory_space<vmem>>, vector<1x128xf32>
    tpu.vector_store %arg9[%c0_39, %c2688], %169 {strides = array<i32>} : memref<2x4096xf32, #tpu.memory_space<vmem>>, vector<1x128xf32>,
    %171 = vector.extract_strided_slice %126 {offsets = [22, 0], sizes = [1, 128], strides = [1, 1]} : vector<32x128xf32> to vector<1x128xf32>
    %c0_40 = arith.constant 0 : index
    %c2816 = arith.constant 2816 : index
    %172 = vector.load %arg9[%c0_40, %c2816] : memref<2x4096xf32, #tpu.memory_space<vmem>>, vector<1x128xf32>
    tpu.vector_store %arg9[%c0_40, %c2816], %171 {strides = array<i32>} : memref<2x4096xf32, #tpu.memory_space<vmem>>, vector<1x128xf32>,
    %173 = vector.extract_strided_slice %126 {offsets = [23, 0], sizes = [1, 128], strides = [1, 1]} : vector<32x128xf32> to vector<1x128xf32>
    %c0_41 = arith.constant 0 : index
    %c2944 = arith.constant 2944 : index
    %174 = vector.load %arg9[%c0_41, %c2944] : memref<2x4096xf32, #tpu.memory_space<vmem>>, vector<1x128xf32>
    tpu.vector_store %arg9[%c0_41, %c2944], %173 {strides = array<i32>} : memref<2x4096xf32, #tpu.memory_space<vmem>>, vector<1x128xf32>,
    %175 = vector.extract_strided_slice %126 {offsets = [24, 0], sizes = [1, 128], strides = [1, 1]} : vector<32x128xf32> to vector<1x128xf32>
    %c0_42 = arith.constant 0 : index
    %c3072 = arith.constant 3072 : index
    %176 = vector.load %arg9[%c0_42, %c3072] : memref<2x4096xf32, #tpu.memory_space<vmem>>, vector<1x128xf32>
    tpu.vector_store %arg9[%c0_42, %c3072], %175 {strides = array<i32>} : memref<2x4096xf32, #tpu.memory_space<vmem>>, vector<1x128xf32>,
    %177 = vector.extract_strided_slice %126 {offsets = [25, 0], sizes = [1, 128], strides = [1, 1]} : vector<32x128xf32> to vector<1x128xf32>
    %c0_43 = arith.constant 0 : index
    %c3200 = arith.constant 3200 : index
    %178 = vector.load %arg9[%c0_43, %c3200] : memref<2x4096xf32, #tpu.memory_space<vmem>>, vector<1x128xf32>
    tpu.vector_store %arg9[%c0_43, %c3200], %177 {strides = array<i32>} : memref<2x4096xf32, #tpu.memory_space<vmem>>, vector<1x128xf32>,
    %179 = vector.extract_strided_slice %126 {offsets = [26, 0], sizes = [1, 128], strides = [1, 1]} : vector<32x128xf32> to vector<1x128xf32>
    %c0_44 = arith.constant 0 : index
    %c3328 = arith.constant 3328 : index
    %180 = vector.load %arg9[%c0_44, %c3328] : memref<2x4096xf32, #tpu.memory_space<vmem>>, vector<1x128xf32>
    tpu.vector_store %arg9[%c0_44, %c3328], %179 {strides = array<i32>} : memref<2x4096xf32, #tpu.memory_space<vmem>>, vector<1x128xf32>,
    %181 = vector.extract_strided_slice %126 {offsets = [27, 0], sizes = [1, 128], strides = [1, 1]} : vector<32x128xf32> to vector<1x128xf32>
    %c0_45 = arith.constant 0 : index
    %c3456 = arith.constant 3456 : index
    %182 = vector.load %arg9[%c0_45, %c3456] : memref<2x4096xf32, #tpu.memory_space<vmem>>, vector<1x128xf32>
    tpu.vector_store %arg9[%c0_45, %c3456], %181 {strides = array<i32>} : memref<2x4096xf32, #tpu.memory_space<vmem>>, vector<1x128xf32>,
    %183 = vector.extract_strided_slice %126 {offsets = [28, 0], sizes = [1, 128], strides = [1, 1]} : vector<32x128xf32> to vector<1x128xf32>
    %c0_46 = arith.constant 0 : index
    %c3584 = arith.constant 3584 : index
    %184 = vector.load %arg9[%c0_46, %c3584] : memref<2x4096xf32, #tpu.memory_space<vmem>>, vector<1x128xf32>
    tpu.vector_store %arg9[%c0_46, %c3584], %183 {strides = array<i32>} : memref<2x4096xf32, #tpu.memory_space<vmem>>, vector<1x128xf32>,
    %185 = vector.extract_strided_slice %126 {offsets = [29, 0], sizes = [1, 128], strides = [1, 1]} : vector<32x128xf32> to vector<1x128xf32>
    %c0_47 = arith.constant 0 : index
    %c3712 = arith.constant 3712 : index
    %186 = vector.load %arg9[%c0_47, %c3712] : memref<2x4096xf32, #tpu.memory_space<vmem>>, vector<1x128xf32>
    tpu.vector_store %arg9[%c0_47, %c3712], %185 {strides = array<i32>} : memref<2x4096xf32, #tpu.memory_space<vmem>>, vector<1x128xf32>,
    %187 = vector.extract_strided_slice %126 {offsets = [30, 0], sizes = [1, 128], strides = [1, 1]} : vector<32x128xf32> to vector<1x128xf32>
    %c0_48 = arith.constant 0 : index
    %c3840 = arith.constant 3840 : index
    %188 = vector.load %arg9[%c0_48, %c3840] : memref<2x4096xf32, #tpu.memory_space<vmem>>, vector<1x128xf32>
    tpu.vector_store %arg9[%c0_48, %c3840], %187 {strides = array<i32>} : memref<2x4096xf32, #tpu.memory_space<vmem>>, vector<1x128xf32>,
    %189 = vector.extract_strided_slice %126 {offsets = [31, 0], sizes = [1, 128], strides = [1, 1]} : vector<32x128xf32> to vector<1x128xf32>
    %c0_49 = arith.constant 0 : index
    %c3968 = arith.constant 3968 : index
    %190 = vector.load %arg9[%c0_49, %c3968] : memref<2x4096xf32, #tpu.memory_space<vmem>>, vector<1x128xf32>
    tpu.vector_store %arg9[%c0_49, %c3968], %189 {strides = array<i32>} : memref<2x4096xf32, #tpu.memory_space<vmem>>, vector<1x128xf32>,
    %c1_50 = arith.constant 1 : index
    %c0_51 = arith.constant 0 : index
    %c0_52 = arith.constant 0 : index
    %191 = vector.load %arg0[%c1_50, %c0_51, %c0_52] : memref<2x4x119xf32, #tpu.memory_space<vmem>>, vector<1x4x119xf32>
    %192 = vector.shape_cast %191 : vector<1x4x119xf32> to vector<4x119xf32>
    %193 = vector.extract_strided_slice %192 {offsets = [0, 0], sizes = [1, 118], strides = [1, 1]} : vector<4x119xf32> to vector<1x118xf32>
    %194 = vector.shape_cast %193 : vector<1x118xf32> to vector<118xf32>
    %195 = vector.shape_cast %194 : vector<118xf32> to vector<1x118xf32>
    %196 = vector.shape_cast %195 : vector<1x118xf32> to vector<1x118xf32>
    %197 = vector.broadcast %196 : vector<1x118xf32> to vector<16x118xf32>
    %198 = vector.extract_strided_slice %192 {offsets = [1, 0], sizes = [1, 118], strides = [1, 1]} : vector<4x119xf32> to vector<1x118xf32>
    %199 = vector.shape_cast %198 : vector<1x118xf32> to vector<118xf32>
    %200 = vector.shape_cast %199 : vector<118xf32> to vector<1x118xf32>
    %201 = vector.shape_cast %200 : vector<1x118xf32> to vector<1x118xf32>
    %202 = vector.broadcast %201 : vector<1x118xf32> to vector<16x118xf32>
    %203 = vector.extract_strided_slice %192 {offsets = [2, 0], sizes = [1, 118], strides = [1, 1]} : vector<4x119xf32> to vector<1x118xf32>
    %204 = vector.shape_cast %203 : vector<1x118xf32> to vector<118xf32>
    %205 = vector.shape_cast %204 : vector<118xf32> to vector<1x118xf32>
    %206 = vector.shape_cast %205 : vector<1x118xf32> to vector<1x118xf32>
    %207 = vector.broadcast %206 : vector<1x118xf32> to vector<16x118xf32>
    %208 = vector.extract_strided_slice %192 {offsets = [3, 0], sizes = [1, 118], strides = [1, 1]} : vector<4x119xf32> to vector<1x118xf32>
    %209 = vector.shape_cast %208 : vector<1x118xf32> to vector<118xf32>
    %210 = vector.shape_cast %209 : vector<118xf32> to vector<1x118xf32>
    %211 = vector.shape_cast %210 : vector<1x118xf32> to vector<1x118xf32>
    %212 = vector.broadcast %211 : vector<1x118xf32> to vector<16x118xf32>
    %213 = vector.extract_strided_slice %192 {offsets = [0, 1], sizes = [1, 118], strides = [1, 1]} : vector<4x119xf32> to vector<1x118xf32>
    %214 = vector.shape_cast %213 : vector<1x118xf32> to vector<118xf32>
    %215 = vector.shape_cast %214 : vector<118xf32> to vector<1x118xf32>
    %216 = vector.shape_cast %215 : vector<1x118xf32> to vector<1x118xf32>
    %217 = vector.broadcast %216 : vector<1x118xf32> to vector<16x118xf32>
    %218 = vector.extract_strided_slice %192 {offsets = [1, 1], sizes = [1, 118], strides = [1, 1]} : vector<4x119xf32> to vector<1x118xf32>
    %219 = vector.shape_cast %218 : vector<1x118xf32> to vector<118xf32>
    %220 = vector.shape_cast %219 : vector<118xf32> to vector<1x118xf32>
    %221 = vector.shape_cast %220 : vector<1x118xf32> to vector<1x118xf32>
    %222 = vector.broadcast %221 : vector<1x118xf32> to vector<16x118xf32>
    %223 = vector.extract_strided_slice %192 {offsets = [2, 1], sizes = [1, 118], strides = [1, 1]} : vector<4x119xf32> to vector<1x118xf32>
    %224 = vector.shape_cast %223 : vector<1x118xf32> to vector<118xf32>
    %225 = vector.shape_cast %224 : vector<118xf32> to vector<1x118xf32>
    %226 = vector.shape_cast %225 : vector<1x118xf32> to vector<1x118xf32>
    %227 = vector.broadcast %226 : vector<1x118xf32> to vector<16x118xf32>
    %228 = vector.extract_strided_slice %192 {offsets = [3, 1], sizes = [1, 118], strides = [1, 1]} : vector<4x119xf32> to vector<1x118xf32>
    %229 = vector.shape_cast %228 : vector<1x118xf32> to vector<118xf32>
    %230 = vector.shape_cast %229 : vector<118xf32> to vector<1x118xf32>
    %231 = vector.shape_cast %230 : vector<1x118xf32> to vector<1x118xf32>
    %232 = vector.broadcast %231 : vector<1x118xf32> to vector<16x118xf32>
    %233 = arith.mulf %197, %5 : vector<16x118xf32>
    %234 = arith.addf %2, %233 : vector<16x118xf32>
    %235 = arith.mulf %202, %8 : vector<16x118xf32>
    %236 = arith.addf %234, %235 : vector<16x118xf32>
    %237 = arith.mulf %207, %11 : vector<16x118xf32>
    %238 = arith.addf %236, %237 : vector<16x118xf32>
    %239 = arith.mulf %212, %14 : vector<16x118xf32>
    %240 = arith.addf %238, %239 : vector<16x118xf32>
    %241 = arith.mulf %217, %17 : vector<16x118xf32>
    %242 = arith.addf %240, %241 : vector<16x118xf32>
    %243 = arith.mulf %202, %5 : vector<16x118xf32>
    %244 = arith.addf %2, %243 : vector<16x118xf32>
    %245 = arith.mulf %207, %8 : vector<16x118xf32>
    %246 = arith.addf %244, %245 : vector<16x118xf32>
    %247 = arith.mulf %212, %11 : vector<16x118xf32>
    %248 = arith.addf %246, %247 : vector<16x118xf32>
    %249 = arith.mulf %217, %14 : vector<16x118xf32>
    %250 = arith.addf %248, %249 : vector<16x118xf32>
    %251 = arith.mulf %222, %17 : vector<16x118xf32>
    %252 = arith.addf %250, %251 : vector<16x118xf32>
    %253 = arith.mulf %207, %5 : vector<16x118xf32>
    %254 = arith.addf %2, %253 : vector<16x118xf32>
    %255 = arith.mulf %212, %8 : vector<16x118xf32>
    %256 = arith.addf %254, %255 : vector<16x118xf32>
    %257 = arith.mulf %217, %11 : vector<16x118xf32>
    %258 = arith.addf %256, %257 : vector<16x118xf32>
    %259 = arith.mulf %222, %14 : vector<16x118xf32>
    %260 = arith.addf %258, %259 : vector<16x118xf32>
    %261 = arith.mulf %227, %17 : vector<16x118xf32>
    %262 = arith.addf %260, %261 : vector<16x118xf32>
    %263 = arith.mulf %212, %5 : vector<16x118xf32>
    %264 = arith.addf %2, %263 : vector<16x118xf32>
    %265 = arith.mulf %217, %8 : vector<16x118xf32>
    %266 = arith.addf %264, %265 : vector<16x118xf32>
    %267 = arith.mulf %222, %11 : vector<16x118xf32>
    %268 = arith.addf %266, %267 : vector<16x118xf32>
    %269 = arith.mulf %227, %14 : vector<16x118xf32>
    %270 = arith.addf %268, %269 : vector<16x118xf32>
    %271 = arith.mulf %232, %17 : vector<16x118xf32>
    %272 = arith.addf %270, %271 : vector<16x118xf32>
    %273 = arith.maximumf %242, %252 : vector<16x118xf32>
    %cst_53 = arith.constant 0.000000e+00 : f32
    %274 = vector.broadcast %cst_53 : f32 to vector<16x118xf32>
    %275 = arith.maximumf %273, %274 : vector<16x118xf32>
    %276 = arith.maximumf %262, %272 : vector<16x118xf32>
    %cst_54 = arith.constant 0.000000e+00 : f32
    %277 = vector.broadcast %cst_54 : f32 to vector<16x118xf32>
    %278 = arith.maximumf %276, %277 : vector<16x118xf32>
    %279 = vector.extract_strided_slice %275 {offsets = [0, 0], sizes = [16, 116], strides = [1, 1]} : vector<16x118xf32> to vector<16x116xf32>
    %280 = vector.extract_strided_slice %275 {offsets = [0, 1], sizes = [16, 116], strides = [1, 1]} : vector<16x118xf32> to vector<16x116xf32>
    %281 = vector.extract_strided_slice %275 {offsets = [0, 2], sizes = [16, 116], strides = [1, 1]} : vector<16x118xf32> to vector<16x116xf32>
    %282 = vector.extract_strided_slice %278 {offsets = [0, 0], sizes = [16, 116], strides = [1, 1]} : vector<16x118xf32> to vector<16x116xf32>
    %283 = vector.extract_strided_slice %278 {offsets = [0, 1], sizes = [16, 116], strides = [1, 1]} : vector<16x118xf32> to vector<16x116xf32>
    %284 = vector.extract_strided_slice %278 {offsets = [0, 2], sizes = [16, 116], strides = [1, 1]} : vector<16x118xf32> to vector<16x116xf32>
    %285 = tpu.concatenate %279, %282, %280, %283, %281 in 0 : vector<16x116xf32>, vector<16x116xf32>, vector<16x116xf32>, vector<16x116xf32>, vector<16x116xf32> -> vector<80x116xf32>
    %286 = tpu.concatenate %282, %280, %283, %281, %284 in 0 : vector<16x116xf32>, vector<16x116xf32>, vector<16x116xf32>, vector<16x116xf32>, vector<16x116xf32> -> vector<80x116xf32>
    %cst_55 = arith.constant dense<0.000000e+00> : vector<32x116xf32>
    %287 = tpu.matmul %21, %285, %cst_55 {dimension_numbers = #tpu.dot_dimension_numbers<[1], [0], [0], [1], [0, 0, 1, 1], [], []>} : vector<32x80xf32>, vector<80x116xf32>, vector<32x116xf32> -> vector<32x116xf32>
    %288 = arith.addf %287, %20 : vector<32x116xf32>
    %cst_56 = arith.constant dense<0.000000e+00> : vector<32x116xf32>
    %289 = tpu.matmul %21, %286, %cst_56 {dimension_numbers = #tpu.dot_dimension_numbers<[1], [0], [0], [1], [0, 0, 1, 1], [], []>} : vector<32x80xf32>, vector<80x116xf32>, vector<32x116xf32> -> vector<32x116xf32>
    %290 = arith.addf %289, %20 : vector<32x116xf32>
    %291 = arith.maximumf %288, %290 : vector<32x116xf32>
    %cst_57 = arith.constant 0.000000e+00 : f32
    %292 = vector.broadcast %cst_57 : f32 to vector<32x116xf32>
    %293 = arith.maximumf %291, %292 : vector<32x116xf32>
    %294 = tpu.concatenate %293, %22 in 1 : vector<32x116xf32>, vector<32x12xf32> -> vector<32x128xf32>
    %295 = vector.extract_strided_slice %294 {offsets = [0, 0], sizes = [1, 128], strides = [1, 1]} : vector<32x128xf32> to vector<1x128xf32>
    %c1_58 = arith.constant 1 : index
    %c0_59 = arith.constant 0 : index
    %296 = vector.load %arg9[%c1_58, %c0_59] : memref<2x4096xf32, #tpu.memory_space<vmem>>, vector<1x128xf32>
    tpu.vector_store %arg9[%c1_58, %c0_59], %295 {strides = array<i32>} : memref<2x4096xf32, #tpu.memory_space<vmem>>, vector<1x128xf32>,
    %297 = vector.extract_strided_slice %294 {offsets = [1, 0], sizes = [1, 128], strides = [1, 1]} : vector<32x128xf32> to vector<1x128xf32>
    %c1_60 = arith.constant 1 : index
    %c128_61 = arith.constant 128 : index
    %298 = vector.load %arg9[%c1_60, %c128_61] : memref<2x4096xf32, #tpu.memory_space<vmem>>, vector<1x128xf32>
    tpu.vector_store %arg9[%c1_60, %c128_61], %297 {strides = array<i32>} : memref<2x4096xf32, #tpu.memory_space<vmem>>, vector<1x128xf32>,
    %299 = vector.extract_strided_slice %294 {offsets = [2, 0], sizes = [1, 128], strides = [1, 1]} : vector<32x128xf32> to vector<1x128xf32>
    %c1_62 = arith.constant 1 : index
    %c256_63 = arith.constant 256 : index
    %300 = vector.load %arg9[%c1_62, %c256_63] : memref<2x4096xf32, #tpu.memory_space<vmem>>, vector<1x128xf32>
    tpu.vector_store %arg9[%c1_62, %c256_63], %299 {strides = array<i32>} : memref<2x4096xf32, #tpu.memory_space<vmem>>, vector<1x128xf32>,
    %301 = vector.extract_strided_slice %294 {offsets = [3, 0], sizes = [1, 128], strides = [1, 1]} : vector<32x128xf32> to vector<1x128xf32>
    %c1_64 = arith.constant 1 : index
    %c384_65 = arith.constant 384 : index
    %302 = vector.load %arg9[%c1_64, %c384_65] : memref<2x4096xf32, #tpu.memory_space<vmem>>, vector<1x128xf32>
    tpu.vector_store %arg9[%c1_64, %c384_65], %301 {strides = array<i32>} : memref<2x4096xf32, #tpu.memory_space<vmem>>, vector<1x128xf32>,
    %303 = vector.extract_strided_slice %294 {offsets = [4, 0], sizes = [1, 128], strides = [1, 1]} : vector<32x128xf32> to vector<1x128xf32>
    %c1_66 = arith.constant 1 : index
    %c512_67 = arith.constant 512 : index
    %304 = vector.load %arg9[%c1_66, %c512_67] : memref<2x4096xf32, #tpu.memory_space<vmem>>, vector<1x128xf32>
    tpu.vector_store %arg9[%c1_66, %c512_67], %303 {strides = array<i32>} : memref<2x4096xf32, #tpu.memory_space<vmem>>, vector<1x128xf32>,
    %305 = vector.extract_strided_slice %294 {offsets = [5, 0], sizes = [1, 128], strides = [1, 1]} : vector<32x128xf32> to vector<1x128xf32>
    %c1_68 = arith.constant 1 : index
    %c640_69 = arith.constant 640 : index
    %306 = vector.load %arg9[%c1_68, %c640_69] : memref<2x4096xf32, #tpu.memory_space<vmem>>, vector<1x128xf32>
    tpu.vector_store %arg9[%c1_68, %c640_69], %305 {strides = array<i32>} : memref<2x4096xf32, #tpu.memory_space<vmem>>, vector<1x128xf32>,
    %307 = vector.extract_strided_slice %294 {offsets = [6, 0], sizes = [1, 128], strides = [1, 1]} : vector<32x128xf32> to vector<1x128xf32>
    %c1_70 = arith.constant 1 : index
    %c768_71 = arith.constant 768 : index
    %308 = vector.load %arg9[%c1_70, %c768_71] : memref<2x4096xf32, #tpu.memory_space<vmem>>, vector<1x128xf32>
    tpu.vector_store %arg9[%c1_70, %c768_71], %307 {strides = array<i32>} : memref<2x4096xf32, #tpu.memory_space<vmem>>, vector<1x128xf32>,
    %309 = vector.extract_strided_slice %294 {offsets = [7, 0], sizes = [1, 128], strides = [1, 1]} : vector<32x128xf32> to vector<1x128xf32>
    %c1_72 = arith.constant 1 : index
    %c896_73 = arith.constant 896 : index
    %310 = vector.load %arg9[%c1_72, %c896_73] : memref<2x4096xf32, #tpu.memory_space<vmem>>, vector<1x128xf32>
    tpu.vector_store %arg9[%c1_72, %c896_73], %309 {strides = array<i32>} : memref<2x4096xf32, #tpu.memory_space<vmem>>, vector<1x128xf32>,
    %311 = vector.extract_strided_slice %294 {offsets = [8, 0], sizes = [1, 128], strides = [1, 1]} : vector<32x128xf32> to vector<1x128xf32>
    %c1_74 = arith.constant 1 : index
    %c1024_75 = arith.constant 1024 : index
    %312 = vector.load %arg9[%c1_74, %c1024_75] : memref<2x4096xf32, #tpu.memory_space<vmem>>, vector<1x128xf32>
    tpu.vector_store %arg9[%c1_74, %c1024_75], %311 {strides = array<i32>} : memref<2x4096xf32, #tpu.memory_space<vmem>>, vector<1x128xf32>,
    %313 = vector.extract_strided_slice %294 {offsets = [9, 0], sizes = [1, 128], strides = [1, 1]} : vector<32x128xf32> to vector<1x128xf32>
    %c1_76 = arith.constant 1 : index
    %c1152_77 = arith.constant 1152 : index
    %314 = vector.load %arg9[%c1_76, %c1152_77] : memref<2x4096xf32, #tpu.memory_space<vmem>>, vector<1x128xf32>
    tpu.vector_store %arg9[%c1_76, %c1152_77], %313 {strides = array<i32>} : memref<2x4096xf32, #tpu.memory_space<vmem>>, vector<1x128xf32>,
    %315 = vector.extract_strided_slice %294 {offsets = [10, 0], sizes = [1, 128], strides = [1, 1]} : vector<32x128xf32> to vector<1x128xf32>
    %c1_78 = arith.constant 1 : index
    %c1280_79 = arith.constant 1280 : index
    %316 = vector.load %arg9[%c1_78, %c1280_79] : memref<2x4096xf32, #tpu.memory_space<vmem>>, vector<1x128xf32>
    tpu.vector_store %arg9[%c1_78, %c1280_79], %315 {strides = array<i32>} : memref<2x4096xf32, #tpu.memory_space<vmem>>, vector<1x128xf32>,
    %317 = vector.extract_strided_slice %294 {offsets = [11, 0], sizes = [1, 128], strides = [1, 1]} : vector<32x128xf32> to vector<1x128xf32>
    %c1_80 = arith.constant 1 : index
    %c1408_81 = arith.constant 1408 : index
    %318 = vector.load %arg9[%c1_80, %c1408_81] : memref<2x4096xf32, #tpu.memory_space<vmem>>, vector<1x128xf32>
    tpu.vector_store %arg9[%c1_80, %c1408_81], %317 {strides = array<i32>} : memref<2x4096xf32, #tpu.memory_space<vmem>>, vector<1x128xf32>,
    %319 = vector.extract_strided_slice %294 {offsets = [12, 0], sizes = [1, 128], strides = [1, 1]} : vector<32x128xf32> to vector<1x128xf32>
    %c1_82 = arith.constant 1 : index
    %c1536_83 = arith.constant 1536 : index
    %320 = vector.load %arg9[%c1_82, %c1536_83] : memref<2x4096xf32, #tpu.memory_space<vmem>>, vector<1x128xf32>
    tpu.vector_store %arg9[%c1_82, %c1536_83], %319 {strides = array<i32>} : memref<2x4096xf32, #tpu.memory_space<vmem>>, vector<1x128xf32>,
    %321 = vector.extract_strided_slice %294 {offsets = [13, 0], sizes = [1, 128], strides = [1, 1]} : vector<32x128xf32> to vector<1x128xf32>
    %c1_84 = arith.constant 1 : index
    %c1664_85 = arith.constant 1664 : index
    %322 = vector.load %arg9[%c1_84, %c1664_85] : memref<2x4096xf32, #tpu.memory_space<vmem>>, vector<1x128xf32>
    tpu.vector_store %arg9[%c1_84, %c1664_85], %321 {strides = array<i32>} : memref<2x4096xf32, #tpu.memory_space<vmem>>, vector<1x128xf32>,
    %323 = vector.extract_strided_slice %294 {offsets = [14, 0], sizes = [1, 128], strides = [1, 1]} : vector<32x128xf32> to vector<1x128xf32>
    %c1_86 = arith.constant 1 : index
    %c1792_87 = arith.constant 1792 : index
    %324 = vector.load %arg9[%c1_86, %c1792_87] : memref<2x4096xf32, #tpu.memory_space<vmem>>, vector<1x128xf32>
    tpu.vector_store %arg9[%c1_86, %c1792_87], %323 {strides = array<i32>} : memref<2x4096xf32, #tpu.memory_space<vmem>>, vector<1x128xf32>,
    %325 = vector.extract_strided_slice %294 {offsets = [15, 0], sizes = [1, 128], strides = [1, 1]} : vector<32x128xf32> to vector<1x128xf32>
    %c1_88 = arith.constant 1 : index
    %c1920_89 = arith.constant 1920 : index
    %326 = vector.load %arg9[%c1_88, %c1920_89] : memref<2x4096xf32, #tpu.memory_space<vmem>>, vector<1x128xf32>
    tpu.vector_store %arg9[%c1_88, %c1920_89], %325 {strides = array<i32>} : memref<2x4096xf32, #tpu.memory_space<vmem>>, vector<1x128xf32>,
    %327 = vector.extract_strided_slice %294 {offsets = [16, 0], sizes = [1, 128], strides = [1, 1]} : vector<32x128xf32> to vector<1x128xf32>
    %c1_90 = arith.constant 1 : index
    %c2048_91 = arith.constant 2048 : index
    %328 = vector.load %arg9[%c1_90, %c2048_91] : memref<2x4096xf32, #tpu.memory_space<vmem>>, vector<1x128xf32>
    tpu.vector_store %arg9[%c1_90, %c2048_91], %327 {strides = array<i32>} : memref<2x4096xf32, #tpu.memory_space<vmem>>, vector<1x128xf32>,
    %329 = vector.extract_strided_slice %294 {offsets = [17, 0], sizes = [1, 128], strides = [1, 1]} : vector<32x128xf32> to vector<1x128xf32>
    %c1_92 = arith.constant 1 : index
    %c2176_93 = arith.constant 2176 : index
    %330 = vector.load %arg9[%c1_92, %c2176_93] : memref<2x4096xf32, #tpu.memory_space<vmem>>, vector<1x128xf32>
    tpu.vector_store %arg9[%c1_92, %c2176_93], %329 {strides = array<i32>} : memref<2x4096xf32, #tpu.memory_space<vmem>>, vector<1x128xf32>,
    %331 = vector.extract_strided_slice %294 {offsets = [18, 0], sizes = [1, 128], strides = [1, 1]} : vector<32x128xf32> to vector<1x128xf32>
    %c1_94 = arith.constant 1 : index
    %c2304_95 = arith.constant 2304 : index
    %332 = vector.load %arg9[%c1_94, %c2304_95] : memref<2x4096xf32, #tpu.memory_space<vmem>>, vector<1x128xf32>
    tpu.vector_store %arg9[%c1_94, %c2304_95], %331 {strides = array<i32>} : memref<2x4096xf32, #tpu.memory_space<vmem>>, vector<1x128xf32>,
    %333 = vector.extract_strided_slice %294 {offsets = [19, 0], sizes = [1, 128], strides = [1, 1]} : vector<32x128xf32> to vector<1x128xf32>
    %c1_96 = arith.constant 1 : index
    %c2432_97 = arith.constant 2432 : index
    %334 = vector.load %arg9[%c1_96, %c2432_97] : memref<2x4096xf32, #tpu.memory_space<vmem>>, vector<1x128xf32>
    tpu.vector_store %arg9[%c1_96, %c2432_97], %333 {strides = array<i32>} : memref<2x4096xf32, #tpu.memory_space<vmem>>, vector<1x128xf32>,
    %335 = vector.extract_strided_slice %294 {offsets = [20, 0], sizes = [1, 128], strides = [1, 1]} : vector<32x128xf32> to vector<1x128xf32>
    %c1_98 = arith.constant 1 : index
    %c2560_99 = arith.constant 2560 : index
    %336 = vector.load %arg9[%c1_98, %c2560_99] : memref<2x4096xf32, #tpu.memory_space<vmem>>, vector<1x128xf32>
    tpu.vector_store %arg9[%c1_98, %c2560_99], %335 {strides = array<i32>} : memref<2x4096xf32, #tpu.memory_space<vmem>>, vector<1x128xf32>,
    %337 = vector.extract_strided_slice %294 {offsets = [21, 0], sizes = [1, 128], strides = [1, 1]} : vector<32x128xf32> to vector<1x128xf32>
    %c1_100 = arith.constant 1 : index
    %c2688_101 = arith.constant 2688 : index
    %338 = vector.load %arg9[%c1_100, %c2688_101] : memref<2x4096xf32, #tpu.memory_space<vmem>>, vector<1x128xf32>
    tpu.vector_store %arg9[%c1_100, %c2688_101], %337 {strides = array<i32>} : memref<2x4096xf32, #tpu.memory_space<vmem>>, vector<1x128xf32>,
    %339 = vector.extract_strided_slice %294 {offsets = [22, 0], sizes = [1, 128], strides = [1, 1]} : vector<32x128xf32> to vector<1x128xf32>
    %c1_102 = arith.constant 1 : index
    %c2816_103 = arith.constant 2816 : index
    %340 = vector.load %arg9[%c1_102, %c2816_103] : memref<2x4096xf32, #tpu.memory_space<vmem>>, vector<1x128xf32>
    tpu.vector_store %arg9[%c1_102, %c2816_103], %339 {strides = array<i32>} : memref<2x4096xf32, #tpu.memory_space<vmem>>, vector<1x128xf32>,
    %341 = vector.extract_strided_slice %294 {offsets = [23, 0], sizes = [1, 128], strides = [1, 1]} : vector<32x128xf32> to vector<1x128xf32>
    %c1_104 = arith.constant 1 : index
    %c2944_105 = arith.constant 2944 : index
    %342 = vector.load %arg9[%c1_104, %c2944_105] : memref<2x4096xf32, #tpu.memory_space<vmem>>, vector<1x128xf32>
    tpu.vector_store %arg9[%c1_104, %c2944_105], %341 {strides = array<i32>} : memref<2x4096xf32, #tpu.memory_space<vmem>>, vector<1x128xf32>,
    %343 = vector.extract_strided_slice %294 {offsets = [24, 0], sizes = [1, 128], strides = [1, 1]} : vector<32x128xf32> to vector<1x128xf32>
    %c1_106 = arith.constant 1 : index
    %c3072_107 = arith.constant 3072 : index
    %344 = vector.load %arg9[%c1_106, %c3072_107] : memref<2x4096xf32, #tpu.memory_space<vmem>>, vector<1x128xf32>
    tpu.vector_store %arg9[%c1_106, %c3072_107], %343 {strides = array<i32>} : memref<2x4096xf32, #tpu.memory_space<vmem>>, vector<1x128xf32>,
    %345 = vector.extract_strided_slice %294 {offsets = [25, 0], sizes = [1, 128], strides = [1, 1]} : vector<32x128xf32> to vector<1x128xf32>
    %c1_108 = arith.constant 1 : index
    %c3200_109 = arith.constant 3200 : index
    %346 = vector.load %arg9[%c1_108, %c3200_109] : memref<2x4096xf32, #tpu.memory_space<vmem>>, vector<1x128xf32>
    tpu.vector_store %arg9[%c1_108, %c3200_109], %345 {strides = array<i32>} : memref<2x4096xf32, #tpu.memory_space<vmem>>, vector<1x128xf32>,
    %347 = vector.extract_strided_slice %294 {offsets = [26, 0], sizes = [1, 128], strides = [1, 1]} : vector<32x128xf32> to vector<1x128xf32>
    %c1_110 = arith.constant 1 : index
    %c3328_111 = arith.constant 3328 : index
    %348 = vector.load %arg9[%c1_110, %c3328_111] : memref<2x4096xf32, #tpu.memory_space<vmem>>, vector<1x128xf32>
    tpu.vector_store %arg9[%c1_110, %c3328_111], %347 {strides = array<i32>} : memref<2x4096xf32, #tpu.memory_space<vmem>>, vector<1x128xf32>,
    %349 = vector.extract_strided_slice %294 {offsets = [27, 0], sizes = [1, 128], strides = [1, 1]} : vector<32x128xf32> to vector<1x128xf32>
    %c1_112 = arith.constant 1 : index
    %c3456_113 = arith.constant 3456 : index
    %350 = vector.load %arg9[%c1_112, %c3456_113] : memref<2x4096xf32, #tpu.memory_space<vmem>>, vector<1x128xf32>
    tpu.vector_store %arg9[%c1_112, %c3456_113], %349 {strides = array<i32>} : memref<2x4096xf32, #tpu.memory_space<vmem>>, vector<1x128xf32>,
    %351 = vector.extract_strided_slice %294 {offsets = [28, 0], sizes = [1, 128], strides = [1, 1]} : vector<32x128xf32> to vector<1x128xf32>
    %c1_114 = arith.constant 1 : index
    %c3584_115 = arith.constant 3584 : index
    %352 = vector.load %arg9[%c1_114, %c3584_115] : memref<2x4096xf32, #tpu.memory_space<vmem>>, vector<1x128xf32>
    tpu.vector_store %arg9[%c1_114, %c3584_115], %351 {strides = array<i32>} : memref<2x4096xf32, #tpu.memory_space<vmem>>, vector<1x128xf32>,
    %353 = vector.extract_strided_slice %294 {offsets = [29, 0], sizes = [1, 128], strides = [1, 1]} : vector<32x128xf32> to vector<1x128xf32>
    %c1_116 = arith.constant 1 : index
    %c3712_117 = arith.constant 3712 : index
    %354 = vector.load %arg9[%c1_116, %c3712_117] : memref<2x4096xf32, #tpu.memory_space<vmem>>, vector<1x128xf32>
    tpu.vector_store %arg9[%c1_116, %c3712_117], %353 {strides = array<i32>} : memref<2x4096xf32, #tpu.memory_space<vmem>>, vector<1x128xf32>,
    %355 = vector.extract_strided_slice %294 {offsets = [30, 0], sizes = [1, 128], strides = [1, 1]} : vector<32x128xf32> to vector<1x128xf32>
    %c1_118 = arith.constant 1 : index
    %c3840_119 = arith.constant 3840 : index
    %356 = vector.load %arg9[%c1_118, %c3840_119] : memref<2x4096xf32, #tpu.memory_space<vmem>>, vector<1x128xf32>
    tpu.vector_store %arg9[%c1_118, %c3840_119], %355 {strides = array<i32>} : memref<2x4096xf32, #tpu.memory_space<vmem>>, vector<1x128xf32>,
    %357 = vector.extract_strided_slice %294 {offsets = [31, 0], sizes = [1, 128], strides = [1, 1]} : vector<32x128xf32> to vector<1x128xf32>
    %c1_120 = arith.constant 1 : index
    %c3968_121 = arith.constant 3968 : index
    %358 = vector.load %arg9[%c1_120, %c3968_121] : memref<2x4096xf32, #tpu.memory_space<vmem>>, vector<1x128xf32>
    tpu.vector_store %arg9[%c1_120, %c3968_121], %357 {strides = array<i32>} : memref<2x4096xf32, #tpu.memory_space<vmem>>, vector<1x128xf32>,
    tpu.wait_dma2 semaphore(%arg10 : memref<!tpu.dma_semaphore, #tpu.memory_space<semaphore_mem>>) src(%arg6 : memref<4096x128xf32, #tpu.memory_space<any>>) dst(%arg8 : memref<4096x128xf32, #tpu.memory_space<vmem>>)
    %c0_122 = arith.constant 0 : index
    %c0_123 = arith.constant 0 : index
    %359 = vector.load %arg9[%c0_122, %c0_123] : memref<2x4096xf32, #tpu.memory_space<vmem>>, vector<2x4096xf32>
    %c0_124 = arith.constant 0 : index
    %c0_125 = arith.constant 0 : index
    %360 = vector.load %arg8[%c0_124, %c0_125] : memref<4096x128xf32, #tpu.memory_space<vmem>>, vector<4096x128xf32>
    %cst_126 = arith.constant dense<0.000000e+00> : vector<2x128xf32>
    %361 = tpu.matmul %359, %360, %cst_126 {dimension_numbers = #tpu.dot_dimension_numbers<[1], [0], [0], [1], [0, 0, 1, 1], [], []>} : vector<2x4096xf32>, vector<4096x128xf32>, vector<2x128xf32> -> vector<2x128xf32>
    %c0_127 = arith.constant 0 : index
    %c0_128 = arith.constant 0 : index
    %362 = vector.load %arg2[%c0_127, %c0_128] : memref<8x128xf32, #tpu.memory_space<vmem>>, vector<1x128xf32>
    %363 = vector.broadcast %362 : vector<1x128xf32> to vector<2x128xf32>
    %364 = arith.addf %361, %363 : vector<2x128xf32>
    %cst_129 = arith.constant 0.000000e+00 : f32
    %365 = vector.broadcast %cst_129 : f32 to vector<2x128xf32>
    %366 = arith.maximumf %364, %365 : vector<2x128xf32>
    %c0_130 = arith.constant 0 : index
    %c0_131 = arith.constant 0 : index
    %367 = vector.load %arg4[%c0_130, %c0_131] : memref<128x64xf32, #tpu.memory_space<vmem>>, vector<128x64xf32>
    %cst_132 = arith.constant dense<0.000000e+00> : vector<2x64xf32>
    %368 = tpu.matmul %366, %367, %cst_132 {dimension_numbers = #tpu.dot_dimension_numbers<[1], [0], [0], [1], [0, 0, 1, 1], [], []>} : vector<2x128xf32>, vector<128x64xf32>, vector<2x64xf32> -> vector<2x64xf32>
    %c1_133 = arith.constant 1 : index
    %c0_134 = arith.constant 0 : index
    %369 = vector.load %arg2[%c1_133, %c0_134] : memref<8x128xf32, #tpu.memory_space<vmem>>, vector<1x64xf32>
    %370 = vector.broadcast %369 : vector<1x64xf32> to vector<2x64xf32>
    %371 = arith.addf %368, %370 : vector<2x64xf32>
    %cst_135 = arith.constant 0.000000e+00 : f32
    %372 = vector.broadcast %cst_135 : f32 to vector<2x64xf32>
    %373 = arith.maximumf %371, %372 : vector<2x64xf32>
    %c0_136 = arith.constant 0 : index
    %c0_137 = arith.constant 0 : index
    %374 = vector.load %arg5[%c0_136, %c0_137] : memref<64x2xf32, #tpu.memory_space<vmem>>, vector<64x2xf32>
    %cst_138 = arith.constant dense<0.000000e+00> : vector<2x2xf32>
    %375 = tpu.matmul %373, %374, %cst_138 {dimension_numbers = #tpu.dot_dimension_numbers<[1], [0], [0], [1], [0, 0, 1, 1], [], []>} : vector<2x64xf32>, vector<64x2xf32>, vector<2x2xf32> -> vector<2x2xf32>
    %c2_139 = arith.constant 2 : index
    %c0_140 = arith.constant 0 : index
    %376 = vector.load %arg2[%c2_139, %c0_140] : memref<8x128xf32, #tpu.memory_space<vmem>>, vector<1x2xf32>
    %377 = vector.broadcast %376 : vector<1x2xf32> to vector<2x2xf32>
    %378 = arith.addf %375, %377 : vector<2x2xf32>
    %379 = vector.extract_strided_slice %378 {offsets = [0, 0], sizes = [2, 1], strides = [1, 1]} : vector<2x2xf32> to vector<2x1xf32>
    %380 = vector.extract_strided_slice %378 {offsets = [0, 1], sizes = [2, 1], strides = [1, 1]} : vector<2x2xf32> to vector<2x1xf32>
    %381 = arith.maximumf %379, %380 : vector<2x1xf32>
    %382 = arith.subf %379, %381 : vector<2x1xf32>
    %383 = math.exp %382 : vector<2x1xf32>
    %384 = arith.subf %380, %381 : vector<2x1xf32>
    %385 = math.exp %384 : vector<2x1xf32>
    %386 = arith.addf %383, %385 : vector<2x1xf32>
    %387 = math.log %386 : vector<2x1xf32>
    %388 = arith.addf %381, %387 : vector<2x1xf32>
    %389 = vector.broadcast %388 : vector<2x1xf32> to vector<2x2xf32>
    %390 = arith.subf %378, %389 : vector<2x2xf32>
    %c0_141 = arith.constant 0 : index
    %c0_142 = arith.constant 0 : index
    %391 = vector.load %arg7[%c0_141, %c0_142] : memref<2x2xf32, #tpu.memory_space<vmem>>, vector<2x2xf32>
    tpu.vector_store %arg7[%c0_141, %c0_142], %390 {strides = array<i32>} : memref<2x2xf32, #tpu.memory_space<vmem>>, vector<2x2xf32>,
    return
  }
}

</mosaic_0001>

<bundles_post_ra>
// kernel: squeeze.2
= control target key start
LH: loop header
LB: loop body
LE: loop exit
PB: predicated region body
PF: predicated region fallthrough
CT: control target
= control target key end

     0   :  { %vm39_vm0 = vcmask 1047556   ;;  %s676_s14 = smov 116   ;;  %s677_s15 = smov 108   ;;  %vm392_vm1 = vcmask 1045508   ;;  %vm19_vm2 = vcmask 31744   ;;  %s1227_s0 = inlined_call_operand.vmem [shape: f32[2,476], index: 0, kind: input, shape index: {}]   ;;  %s1228_s1 = inlined_call_operand.vmem [shape: f32[2,119,4], index: 1, kind: output, shape index: {}]  }
   0x1   :  { %v523_v0 = vld [vmem:[%s1227_s0 + $0x6] sm:$0x3]  ;;  %v524_v1 = vld [vmem:[%s1227_s0 + $0x4] sm:$0x3]  ;;  %v525_v2 = vld [vmem:[%s1227_s0 + $0x2] sm:$0x3] }
   0x2   :  { %7 = vst [vmem:[#allocation0 + $0x18] sm:$0x3] %v523_v0  ;;  %v16_v3 = vld [vmem:[%s1227_s0] sm:$0x3]  ;;  %s675_s0 = smov 124   ;;  %s678_s16 = smov 120  }
   0x3   :  { %11 = vst [vmem:[#allocation0 + $0x10] sm:$0x3] %v524_v1  ;;  %s679_s17 = smov 112   ;;  %s680_s18 = smov 104  }
   0x4   :  { %15 = vst [vmem:[#allocation0 + $0x8] sm:$0x3] %v525_v2  ;;  %s681_s19 = smov 100   ;;  %s682_s20 = smov 96  }
   0x5   :  { %17 = vst [vmem:[#allocation0] sm:$0x3] %v16_v3  ;;  %s683_s21 = smov 92   ;;  %s684_s22 = smov 88  }
   0x6   :  { %s685_s23 = smov 84   ;;  %s686_s24 = smov 80  }
   0x7   :  { %s687_s25 = smov 76   ;;  %s688_s26 = smov 72  }
   0x8   :  { %s689_s27 = smov 68   ;;  %s690_s28 = smov 64  }
   0x9   :  { %s691_s29 = smov 60   ;;  %s692_s30 = smov 56   ;;  %v32_v62 = vld [vmem:[#allocation0 + $0x18] sm:$0x3]  }
   0xa   :  { %v38_v4 = vld.sshfl [vmem:[#allocation0 + $0x10] sm:$0xff pattern:$0x98100000]   ;;  %s390_s2 = smov 48  ;;  %s693_s3 = smov 52  }
   0xb   :  { %v150_v8 = vld.sshfl [vmem:[#allocation0 + $0x10] sm:$0xff pattern:$0x89011111]   ;;  %s694_s4 = smov 48   ;;  %s405_s5 = smov 48 }
   0xc   :  { %v36_v5 = vld.sshfl [vmem:[#allocation0] sm:$0xff pattern:$0x99999810]   ;;  %s695_s6 = smov 44   ;;  %v391_v10 = vld [vmem:[#allocation0 + $0x15] ss:$-1 sm:%s390_s2]  }
   0xd   :  { %v40_v6 = vsel %vm39_vm0, %v38_v4, %v36_v5  ;;  %v729_v7 = vld.sshfl [vmem:[#allocation0] sm:$0xff pattern:$0x88888901]   ;;  %v406_v11 = vld [vmem:[#allocation0 + $0x15] ss:$-1 sm:%s405_s5]   ;;  %s420_s7 = smov 48 }
   0xe   :  { %41 = vrot.lane.b32.xlu0 %v40_v6, %s675_s0  ;;  %73 = vrot.lane.b32.xlu1 %v40_v6, %s676_s14  ;;  %v152_v9 = vsel %vm39_vm0, %v150_v8, %v729_v7  ;;  %v393_v12 = vsel %vm392_vm1, %v391_v10, %v729_v7  ;;  %v408_v13 = vsel %vm392_vm1, %v406_v11, %v729_v7  ;;  %s435_s8 = smov 48  ;;  %s696_s9 = smov 40   ;;  %v421_v14 = vld [vmem:[#allocation0 + $0x15] ss:$-1 sm:%s420_s7]   ;;  %v18_v59 = vld [vmem:[#allocation0] sm:$0x3]  }
   0xf   :  { %105 = vrot.lane.b32.xlu2 %v40_v6, %s677_s15  ;;  %s697_s10 = smov 36   ;;  %s450_s11 = smov 48  ;;  %v436_v15 = vld [vmem:[#allocation0 + $0x15] ss:$-1 sm:%s435_s8]   ;;  %v423_v17 = vsel %vm392_vm1, %v421_v14, %v729_v7  ;;  %v22_v60 = vld [vmem:[#allocation0 + $0x8] sm:$0x3]  }
  0x10   :  { %s698_s12 = smov 32   ;;  %v451_v16 = vld [vmem:[#allocation0 + $0x15] ss:$-1 sm:%s450_s11]   ;;  %v438_v18 = vsel %vm392_vm1, %v436_v15, %v729_v7  ;;  %s465_s13 = smov 48 }
  0x11   :  { %v453_v19 = vsel %vm392_vm1, %v451_v16, %v729_v7  ;;  %s480_s0 = smov 48  ;;  %s699_s14 = smov 28   ;;  %v466_v20 = vld [vmem:[#allocation0 + $0x15] ss:$-1 sm:%s465_s13]  }
  0x12   :  { %s700_s15 = smov 24   ;;  %v481_v21 = vld [vmem:[#allocation0 + $0x15] ss:$-1 sm:%s480_s0]   ;;  %v468_v23 = vsel %vm392_vm1, %v466_v20, %v729_v7  ;;  %20 = vst.msk [vmem:[%s1228_s1] ss:$120 sm:$0x3] %vm19_vm2, %v18_v59  }
  0x13   :  { %v483_v24 = vsel %vm392_vm1, %v481_v21, %v729_v7  ;;  %v27_v61 = vld [vmem:[#allocation0 + $0x10] sm:$0x3]   ;;  %526 = vst.msk [vmem:[%s1228_s1 + $0x20] ss:$120 sm:$0x3] %vm19_vm2, %v22_v60  }
  0x14   :  { %527 = vst.msk [vmem:[%s1228_s1 + $0x40] ss:$120 sm:$0x3] %vm19_vm2, %v27_v61  }
  0x15   :  { %528 = vst.msk [vmem:[%s1228_s1 + $0x60] ss:$120 sm:$0x3] %vm19_vm2, %v32_v62  }
  0x16   :  { %57 = vrot.lane.b32.xlu0 %v40_v6, %s678_s16  ;;  %89 = vrot.lane.b32.xlu1 %v40_v6, %s679_s17  ;;  %s495_s16 = smov 48  ;;  %s701_s17 = smov 20  }
  0x17   :  { %121 = vrot.lane.b32.xlu2 %v40_v6, %s680_s18  ;;  %v496_v22 = vld [vmem:[#allocation0 + $0x15] ss:$-1 sm:%s495_s16]   ;;  %s510_s18 = smov 48 }
  0x18   :  { %v498_v25 = vsel %vm392_vm1, %v496_v22, %v729_v7  ;;  %v511_v26 = vld [vmem:[#allocation0 + $0x15] ss:$-1 sm:%s510_s18]  }
  0x19   :  { %v513_v27 = vsel %vm392_vm1, %v511_v26, %v729_v7 }
  0x1e   :  { %137 = vrot.lane.b32.xlu0 %v40_v6, %s681_s19  ;;  %153 = vrot.lane.b32.xlu1 %v152_v9, %s682_s20  ;;  %s702_s19 = smov 16   ;;  %s703_s20 = smov 12  }
  0x1f   :  { %169 = vrot.lane.b32.xlu2 %v152_v9, %s683_s21  ;;  %s704_s21 = smov 8  }
  0x26   :  { %185 = vrot.lane.b32.xlu0 %v152_v9, %s684_s22  ;;  %201 = vrot.lane.b32.xlu1 %v152_v9, %s685_s23  ;;  %s705_s22 = smov 4  }
  0x27   :  { %217 = vrot.lane.b32.xlu2 %v152_v9, %s686_s24 }
  0x2e   :  { %233 = vrot.lane.b32.xlu0 %v152_v9, %s687_s25  ;;  %249 = vrot.lane.b32.xlu1 %v152_v9, %s688_s26 }
  0x2f   :  { %265 = vrot.lane.b32.xlu2 %v152_v9, %s689_s27 }
  0x36   :  { %281 = vrot.lane.b32.xlu0 %v152_v9, %s690_s28  ;;  %297 = vrot.lane.b32.xlu1 %v152_v9, %s691_s29 }
  0x37   :  { %313 = vrot.lane.b32.xlu2 %v152_v9, %s692_s30 }
  0x3e   :  { %329 = vrot.lane.b32.xlu0 %v152_v9, %s693_s3  ;;  %345 = vrot.lane.b32.xlu1 %v152_v9, %s694_s4 }
  0x3f   :  { %361 = vrot.lane.b32.xlu2 %v152_v9, %s695_s6 }
  0x46   :  { %377 = vrot.lane.b32.xlu0 %v152_v9, %s696_s9  ;;  %394 = vrot.lane.b32.xlu1 %v393_v12, %s697_s10 }
  0x47   :  { %409 = vrot.lane.b32.xlu2 %v408_v13, %s698_s12 }
  0x4e   :  { %424 = vrot.lane.b32.xlu0 %v423_v17, %s699_s14  ;;  %439 = vrot.lane.b32.xlu1 %v438_v18, %s700_s15 }
  0x4f   :  { %454 = vrot.lane.b32.xlu2 %v453_v19, %s701_s17 }
  0x56   :  { %469 = vrot.lane.b32.xlu0 %v468_v23, %s702_s19  ;;  %484 = vrot.lane.b32.xlu1 %v483_v24, %s703_s20 }
  0x57   :  { %499 = vrot.lane.b32.xlu2 %v498_v25, %s704_s21 }
  0x5e   :  { %514 = vrot.lane.b32.xlu0 %v513_v27, %s705_s22 }
  0x69   :  { %v106_v28 = vpop.permute.xlu2 %105  }
  0x6a   :  { %545 = vst.msk [vmem:[%s1228_s1 + $0x5] ss:$120 sm:$0x3] %vm19_vm2, %v106_v28  }
  0x6b   :  { %546 = vst.msk [vmem:[%s1228_s1 - $0xcb] ss:$120 sm:$0xc] %vm19_vm2, %v106_v28  }
  0x6c   :  { %547 = vst.msk [vmem:[%s1228_s1 - $0x19b] ss:$120 sm:$0x30] %vm19_vm2, %v106_v28  }
  0x6d   :  { %548 = vst.msk [vmem:[%s1228_s1 - $0x26b] ss:$120 sm:$0xc0] %vm19_vm2, %v106_v28  }
  0x71   :  { %v122_v29 = vpop.permute.xlu2 %121  }
  0x72   :  { %549 = vst.msk [vmem:[%s1228_s1 + $0x6] ss:$120 sm:$0x3] %vm19_vm2, %v122_v29  }
  0x73   :  { %550 = vst.msk [vmem:[%s1228_s1 - $0xca] ss:$120 sm:$0xc] %vm19_vm2, %v122_v29  }
  0x74   :  { %551 = vst.msk [vmem:[%s1228_s1 - $0x19a] ss:$120 sm:$0x30] %vm19_vm2, %v122_v29  }
  0x75   :  { %552 = vst.msk [vmem:[%s1228_s1 - $0x26a] ss:$120 sm:$0xc0] %vm19_vm2, %v122_v29  }
  0x79   :  { %v170_v30 = vpop.permute.xlu2 %169  }
  0x7a   :  { %561 = vst.msk [vmem:[%s1228_s1 + $0x81] ss:$-120 sm:$0x3] %vm19_vm2, %v170_v30  }
  0x7b   :  { %562 = vst.msk [vmem:[%s1228_s1 + $0x191] ss:$-120 sm:$0xc] %vm19_vm2, %v170_v30  }
  0x7c   :  { %563 = vst.msk [vmem:[%s1228_s1 + $0x2a1] ss:$-120 sm:$0x30] %vm19_vm2, %v170_v30  }
  0x7d   :  { %564 = vst.msk [vmem:[%s1228_s1 + $0x3b1] ss:$-120 sm:$0xc0] %vm19_vm2, %v170_v30  }
  0x80   :  { %v42_v31 = vpop.permute.xlu0 %41   ;;  %v74_v32 = vpop.permute.xlu1 %73  }
  0x81   :  { %529 = vst.msk [vmem:[%s1228_s1 + $0x1] ss:$120 sm:$0x3] %vm19_vm2, %v42_v31   ;;  %v218_v33 = vpop.permute.xlu2 %217  }
  0x82   :  { %530 = vst.msk [vmem:[%s1228_s1 - $0xcf] ss:$120 sm:$0xc] %vm19_vm2, %v42_v31  }
  0x83   :  { %531 = vst.msk [vmem:[%s1228_s1 - $0x19f] ss:$120 sm:$0x30] %vm19_vm2, %v42_v31  }
  0x84   :  { %532 = vst.msk [vmem:[%s1228_s1 - $0x26f] ss:$120 sm:$0xc0] %vm19_vm2, %v42_v31  }
  0x85   :  { %537 = vst.msk [vmem:[%s1228_s1 + $0x3] ss:$120 sm:$0x3] %vm19_vm2, %v74_v32  }
  0x86   :  { %538 = vst.msk [vmem:[%s1228_s1 - $0xcd] ss:$120 sm:$0xc] %vm19_vm2, %v74_v32  }
  0x87   :  { %539 = vst.msk [vmem:[%s1228_s1 - $0x19d] ss:$120 sm:$0x30] %vm19_vm2, %v74_v32  }
  0x88   :  { %540 = vst.msk [vmem:[%s1228_s1 - $0x26d] ss:$120 sm:$0xc0] %vm19_vm2, %v74_v32   ;;  %v58_v34 = vpop.permute.xlu0 %57   ;;  %v90_v35 = vpop.permute.xlu1 %89  }
  0x89   :  { %533 = vst.msk [vmem:[%s1228_s1 + $0x2] ss:$120 sm:$0x3] %vm19_vm2, %v58_v34   ;;  %v266_v36 = vpop.permute.xlu2 %265  }
  0x8a   :  { %534 = vst.msk [vmem:[%s1228_s1 - $0xce] ss:$120 sm:$0xc] %vm19_vm2, %v58_v34  }
  0x8b   :  { %535 = vst.msk [vmem:[%s1228_s1 - $0x19e] ss:$120 sm:$0x30] %vm19_vm2, %v58_v34  }
  0x8c   :  { %536 = vst.msk [vmem:[%s1228_s1 - $0x26e] ss:$120 sm:$0xc0] %vm19_vm2, %v58_v34  }
  0x8d   :  { %541 = vst.msk [vmem:[%s1228_s1 + $0x4] ss:$120 sm:$0x3] %vm19_vm2, %v90_v35  }
  0x8e   :  { %542 = vst.msk [vmem:[%s1228_s1 - $0xcc] ss:$120 sm:$0xc] %vm19_vm2, %v90_v35  }
  0x8f   :  { %543 = vst.msk [vmem:[%s1228_s1 - $0x19c] ss:$120 sm:$0x30] %vm19_vm2, %v90_v35  }
  0x90   :  { %544 = vst.msk [vmem:[%s1228_s1 - $0x26c] ss:$120 sm:$0xc0] %vm19_vm2, %v90_v35   ;;  %v138_v37 = vpop.permute.xlu0 %137   ;;  %v154_v38 = vpop.permute.xlu1 %153  }
  0x91   :  { %553 = vst.msk [vmem:[%s1228_s1 + $0x7] ss:$120 sm:$0x3] %vm19_vm2, %v138_v37   ;;  %v314_v39 = vpop.permute.xlu2 %313  }
  0x92   :  { %554 = vst.msk [vmem:[%s1228_s1 - $0xc9] ss:$120 sm:$0xc] %vm19_vm2, %v138_v37  }
  0x93   :  { %555 = vst.msk [vmem:[%s1228_s1 - $0x199] ss:$120 sm:$0x30] %vm19_vm2, %v138_v37  }
  0x94   :  { %556 = vst.msk [vmem:[%s1228_s1 - $0x269] ss:$120 sm:$0xc0] %vm19_vm2, %v138_v37  }
  0x95   :  { %557 = vst.msk [vmem:[%s1228_s1 + $0x80] ss:$-120 sm:$0x3] %vm19_vm2, %v154_v38  }
  0x96   :  { %558 = vst.msk [vmem:[%s1228_s1 + $0x190] ss:$-120 sm:$0xc] %vm19_vm2, %v154_v38  }
  0x97   :  { %559 = vst.msk [vmem:[%s1228_s1 + $0x2a0] ss:$-120 sm:$0x30] %vm19_vm2, %v154_v38  }
  0x98   :  { %560 = vst.msk [vmem:[%s1228_s1 + $0x3b0] ss:$-120 sm:$0xc0] %vm19_vm2, %v154_v38   ;;  %v186_v40 = vpop.permute.xlu0 %185   ;;  %v202_v41 = vpop.permute.xlu1 %201  }
  0x99   :  { %565 = vst.msk [vmem:[%s1228_s1 + $0x82] ss:$-120 sm:$0x3] %vm19_vm2, %v186_v40   ;;  %v362_v44 = vpop.permute.xlu2 %361  }
  0x9a   :  { %566 = vst.msk [vmem:[%s1228_s1 + $0x192] ss:$-120 sm:$0xc] %vm19_vm2, %v186_v40  }
  0x9b   :  { %567 = vst.msk [vmem:[%s1228_s1 + $0x2a2] ss:$-120 sm:$0x30] %vm19_vm2, %v186_v40  }
  0x9c   :  { %568 = vst.msk [vmem:[%s1228_s1 + $0x3b2] ss:$-120 sm:$0xc0] %vm19_vm2, %v186_v40  }
  0x9d   :  { %573 = vst.msk [vmem:[%s1228_s1 + $0x84] ss:$-120 sm:$0x3] %vm19_vm2, %v218_v33  }
  0x9e   :  { %574 = vst.msk [vmem:[%s1228_s1 + $0x194] ss:$-120 sm:$0xc] %vm19_vm2, %v218_v33  }
  0x9f   :  { %575 = vst.msk [vmem:[%s1228_s1 + $0x2a4] ss:$-120 sm:$0x30] %vm19_vm2, %v218_v33  }
  0xa0   :  { %576 = vst.msk [vmem:[%s1228_s1 + $0x3b4] ss:$-120 sm:$0xc0] %vm19_vm2, %v218_v33   ;;  %v234_v42 = vpop.permute.xlu0 %233   ;;  %v250_v43 = vpop.permute.xlu1 %249  }
  0xa1   :  { %569 = vst.msk [vmem:[%s1228_s1 + $0x83] ss:$-120 sm:$0x3] %vm19_vm2, %v202_v41   ;;  %v410_v47 = vpop.permute.xlu2 %409  }
  0xa2   :  { %570 = vst.msk [vmem:[%s1228_s1 + $0x193] ss:$-120 sm:$0xc] %vm19_vm2, %v202_v41  }
  0xa3   :  { %571 = vst.msk [vmem:[%s1228_s1 + $0x2a3] ss:$-120 sm:$0x30] %vm19_vm2, %v202_v41  }
  0xa4   :  { %572 = vst.msk [vmem:[%s1228_s1 + $0x3b3] ss:$-120 sm:$0xc0] %vm19_vm2, %v202_v41  }
  0xa5   :  { %577 = vst.msk [vmem:[%s1228_s1 + $0x85] ss:$-120 sm:$0x3] %vm19_vm2, %v234_v42  }
  0xa6   :  { %578 = vst.msk [vmem:[%s1228_s1 + $0x195] ss:$-120 sm:$0xc] %vm19_vm2, %v234_v42  }
  0xa7   :  { %579 = vst.msk [vmem:[%s1228_s1 + $0x2a5] ss:$-120 sm:$0x30] %vm19_vm2, %v234_v42  }
  0xa8   :  { %580 = vst.msk [vmem:[%s1228_s1 + $0x3b5] ss:$-120 sm:$0xc0] %vm19_vm2, %v234_v42   ;;  %v282_v45 = vpop.permute.xlu0 %281   ;;  %v298_v46 = vpop.permute.xlu1 %297  }
  0xa9   :  { %585 = vst.msk [vmem:[%s1228_s1 + $0x87] ss:$-120 sm:$0x3] %vm19_vm2, %v266_v36   ;;  %v455_v50 = vpop.permute.xlu2 %454  }
  0xaa   :  { %586 = vst.msk [vmem:[%s1228_s1 + $0x197] ss:$-120 sm:$0xc] %vm19_vm2, %v266_v36  }
  0xab   :  { %587 = vst.msk [vmem:[%s1228_s1 + $0x2a7] ss:$-120 sm:$0x30] %vm19_vm2, %v266_v36  }
  0xac   :  { %588 = vst.msk [vmem:[%s1228_s1 + $0x3b7] ss:$-120 sm:$0xc0] %vm19_vm2, %v266_v36  }
  0xad   :  { %581 = vst.msk [vmem:[%s1228_s1 + $0x86] ss:$-120 sm:$0x3] %vm19_vm2, %v250_v43  }
  0xae   :  { %582 = vst.msk [vmem:[%s1228_s1 + $0x196] ss:$-120 sm:$0xc] %vm19_vm2, %v250_v43  }
  0xaf   :  { %583 = vst.msk [vmem:[%s1228_s1 + $0x2a6] ss:$-120 sm:$0x30] %vm19_vm2, %v250_v43  }
  0xb0   :  { %584 = vst.msk [vmem:[%s1228_s1 + $0x3b6] ss:$-120 sm:$0xc0] %vm19_vm2, %v250_v43   ;;  %v330_v48 = vpop.permute.xlu0 %329   ;;  %v346_v49 = vpop.permute.xlu1 %345  }
  0xb1   :  { %589 = vst.msk [vmem:[%s1228_s1 + $0x88] ss:$-120 sm:$0x3] %vm19_vm2, %v282_v45   ;;  %v500_v53 = vpop.permute.xlu2 %499  }
  0xb2   :  { %590 = vst.msk [vmem:[%s1228_s1 + $0x198] ss:$-120 sm:$0xc] %vm19_vm2, %v282_v45  }
  0xb3   :  { %591 = vst.msk [vmem:[%s1228_s1 + $0x2a8] ss:$-120 sm:$0x30] %vm19_vm2, %v282_v45  }
  0xb4   :  { %592 = vst.msk [vmem:[%s1228_s1 + $0x3b8] ss:$-120 sm:$0xc0] %vm19_vm2, %v282_v45  }
  0xb5   :  { %597 = vst.msk [vmem:[%s1228_s1 + $0x8a] ss:$-120 sm:$0x3] %vm19_vm2, %v314_v39  }
  0xb6   :  { %598 = vst.msk [vmem:[%s1228_s1 + $0x19a] ss:$-120 sm:$0xc] %vm19_vm2, %v314_v39  }
  0xb7   :  { %599 = vst.msk [vmem:[%s1228_s1 + $0x2aa] ss:$-120 sm:$0x30] %vm19_vm2, %v314_v39  }
  0xb8   :  { %600 = vst.msk [vmem:[%s1228_s1 + $0x3ba] ss:$-120 sm:$0xc0] %vm19_vm2, %v314_v39   ;;  %v378_v51 = vpop.permute.xlu0 %377   ;;  %v395_v52 = vpop.permute.xlu1 %394  }
  0xb9   :  { %593 = vst.msk [vmem:[%s1228_s1 + $0x89] ss:$-120 sm:$0x3] %vm19_vm2, %v298_v46  }
  0xba   :  { %594 = vst.msk [vmem:[%s1228_s1 + $0x199] ss:$-120 sm:$0xc] %vm19_vm2, %v298_v46  }
  0xbb   :  { %595 = vst.msk [vmem:[%s1228_s1 + $0x2a9] ss:$-120 sm:$0x30] %vm19_vm2, %v298_v46  }
  0xbc   :  { %596 = vst.msk [vmem:[%s1228_s1 + $0x3b9] ss:$-120 sm:$0xc0] %vm19_vm2, %v298_v46  }
  0xbd   :  { %601 = vst.msk [vmem:[%s1228_s1 + $0x8b] ss:$-120 sm:$0x3] %vm19_vm2, %v330_v48  }
  0xbe   :  { %602 = vst.msk [vmem:[%s1228_s1 + $0x19b] ss:$-120 sm:$0xc] %vm19_vm2, %v330_v48  }
  0xbf   :  { %603 = vst.msk [vmem:[%s1228_s1 + $0x2ab] ss:$-120 sm:$0x30] %vm19_vm2, %v330_v48  }
  0xc0   :  { %604 = vst.msk [vmem:[%s1228_s1 + $0x3bb] ss:$-120 sm:$0xc0] %vm19_vm2, %v330_v48   ;;  %v425_v54 = vpop.permute.xlu0 %424   ;;  %v440_v55 = vpop.permute.xlu1 %439  }
  0xc1   :  { %609 = vst.msk [vmem:[%s1228_s1 + $0x8d] ss:$-120 sm:$0x3] %vm19_vm2, %v362_v44  }
  0xc2   :  { %610 = vst.msk [vmem:[%s1228_s1 + $0x19d] ss:$-120 sm:$0xc] %vm19_vm2, %v362_v44  }
  0xc3   :  { %611 = vst.msk [vmem:[%s1228_s1 + $0x2ad] ss:$-120 sm:$0x30] %vm19_vm2, %v362_v44  }
  0xc4   :  { %612 = vst.msk [vmem:[%s1228_s1 + $0x3bd] ss:$-120 sm:$0xc0] %vm19_vm2, %v362_v44  }
  0xc5   :  { %605 = vst.msk [vmem:[%s1228_s1 + $0x8c] ss:$-120 sm:$0x3] %vm19_vm2, %v346_v49  }
  0xc6   :  { %606 = vst.msk [vmem:[%s1228_s1 + $0x19c] ss:$-120 sm:$0xc] %vm19_vm2, %v346_v49  }
  0xc7   :  { %607 = vst.msk [vmem:[%s1228_s1 + $0x2ac] ss:$-120 sm:$0x30] %vm19_vm2, %v346_v49  }
  0xc8   :  { %608 = vst.msk [vmem:[%s1228_s1 + $0x3bc] ss:$-120 sm:$0xc0] %vm19_vm2, %v346_v49   ;;  %v470_v56 = vpop.permute.xlu0 %469   ;;  %v485_v57 = vpop.permute.xlu1 %484  }
  0xc9   :  { %613 = vst.msk [vmem:[%s1228_s1 + $0x8e] ss:$-120 sm:$0x3] %vm19_vm2, %v378_v51  }
  0xca   :  { %614 = vst.msk [vmem:[%s1228_s1 + $0x19e] ss:$-120 sm:$0xc] %vm19_vm2, %v378_v51  }
  0xcb   :  { %615 = vst.msk [vmem:[%s1228_s1 + $0x2ae] ss:$-120 sm:$0x30] %vm19_vm2, %v378_v51  }
  0xcc   :  { %616 = vst.msk [vmem:[%s1228_s1 + $0x3be] ss:$-120 sm:$0xc0] %vm19_vm2, %v378_v51  }
  0xcd   :  { %620 = vst.msk [vmem:[%s1228_s1 + $0x90] ss:$-120 sm:$0x3] %vm19_vm2, %v410_v47  }
  0xce   :  { %621 = vst.msk [vmem:[%s1228_s1 + $0x1a0] ss:$-120 sm:$0xc] %vm19_vm2, %v410_v47  }
  0xcf   :  { %622 = vst.msk [vmem:[%s1228_s1 + $0x2b0] ss:$-120 sm:$0x30] %vm19_vm2, %v410_v47  }
  0xd0   :  { %617 = vst.msk [vmem:[%s1228_s1 + $0x8f] ss:$-120 sm:$0x3] %vm19_vm2, %v395_v52   ;;  %v515_v58 = vpop.permute.xlu0 %514  }
  0xd1   :  { %618 = vst.msk [vmem:[%s1228_s1 + $0x19f] ss:$-120 sm:$0xc] %vm19_vm2, %v395_v52  }
  0xd2   :  { %619 = vst.msk [vmem:[%s1228_s1 + $0x2af] ss:$-120 sm:$0x30] %vm19_vm2, %v395_v52  }
  0xd3   :  { %623 = vst.msk [vmem:[%s1228_s1 + $0x91] ss:$-120 sm:$0x3] %vm19_vm2, %v425_v54  }
  0xd4   :  { %624 = vst.msk [vmem:[%s1228_s1 + $0x1a1] ss:$-120 sm:$0xc] %vm19_vm2, %v425_v54  }
  0xd5   :  { %625 = vst.msk [vmem:[%s1228_s1 + $0x2b1] ss:$-120 sm:$0x30] %vm19_vm2, %v425_v54  }
  0xd6   :  { %629 = vst.msk [vmem:[%s1228_s1 + $0x93] ss:$-120 sm:$0x3] %vm19_vm2, %v455_v50  }
  0xd7   :  { %630 = vst.msk [vmem:[%s1228_s1 + $0x1a3] ss:$-120 sm:$0xc] %vm19_vm2, %v455_v50  }
  0xd8   :  { %631 = vst.msk [vmem:[%s1228_s1 + $0x2b3] ss:$-120 sm:$0x30] %vm19_vm2, %v455_v50  }
  0xd9   :  { %626 = vst.msk [vmem:[%s1228_s1 + $0x92] ss:$-120 sm:$0x3] %vm19_vm2, %v440_v55  }
  0xda   :  { %627 = vst.msk [vmem:[%s1228_s1 + $0x1a2] ss:$-120 sm:$0xc] %vm19_vm2, %v440_v55  }
  0xdb   :  { %628 = vst.msk [vmem:[%s1228_s1 + $0x2b2] ss:$-120 sm:$0x30] %vm19_vm2, %v440_v55  }
  0xdc   :  { %632 = vst.msk [vmem:[%s1228_s1 + $0x94] ss:$-120 sm:$0x3] %vm19_vm2, %v470_v56  }
  0xdd   :  { %633 = vst.msk [vmem:[%s1228_s1 + $0x1a4] ss:$-120 sm:$0xc] %vm19_vm2, %v470_v56  }
  0xde   :  { %634 = vst.msk [vmem:[%s1228_s1 + $0x2b4] ss:$-120 sm:$0x30] %vm19_vm2, %v470_v56  }
  0xdf   :  { %638 = vst.msk [vmem:[%s1228_s1 + $0x96] ss:$-120 sm:$0x3] %vm19_vm2, %v500_v53  }
  0xe0   :  { %639 = vst.msk [vmem:[%s1228_s1 + $0x1a6] ss:$-120 sm:$0xc] %vm19_vm2, %v500_v53  }
  0xe1   :  { %640 = vst.msk [vmem:[%s1228_s1 + $0x2b6] ss:$-120 sm:$0x30] %vm19_vm2, %v500_v53  }
  0xe2   :  { %635 = vst.msk [vmem:[%s1228_s1 + $0x95] ss:$-120 sm:$0x3] %vm19_vm2, %v485_v57  }
  0xe3   :  { %636 = vst.msk [vmem:[%s1228_s1 + $0x1a5] ss:$-120 sm:$0xc] %vm19_vm2, %v485_v57  }
  0xe4   :  { %637 = vst.msk [vmem:[%s1228_s1 + $0x2b5] ss:$-120 sm:$0x30] %vm19_vm2, %v485_v57  }
  0xe5   :  { %641 = vst.msk [vmem:[%s1228_s1 + $0x97] ss:$-120 sm:$0x3] %vm19_vm2, %v515_v58  }
  0xe6   :  { %642 = vst.msk [vmem:[%s1228_s1 + $0x1a7] ss:$-120 sm:$0xc] %vm19_vm2, %v515_v58  }
  0xe7   :  { %643 = vst.msk [vmem:[%s1228_s1 + $0x2b7] ss:$-120 sm:$0x30] %vm19_vm2, %v515_v58  }

// kernel: music_net_forward.1
= control target key start
LH: loop header
LB: loop body
LE: loop exit
PB: predicated region body
PF: predicated region fallthrough
CT: control target
= control target key end

     0   :  { %12 = vsyncpa [#allocation6], 0  ;;  %s7385_s0 = inlined_call_operand.vmem [shape: f32[2,4,119], index: 0, kind: input, shape index: {}]   ;;  %s7386_s1 = inlined_call_operand.vmem [shape: f32[32,128], index: 1, kind: input, shape index: {}]   ;;  %s7387_s2 = inlined_call_operand.vmem [shape: f32[8,128], index: 2, kind: input, shape index: {}]   ;;  %s7388_s3 = inlined_call_operand.vmem [shape: f32[32,80], index: 3, kind: input, shape index: {}]   ;;  %s7389_s4 = inlined_call_operand.vmem [shape: f32[128,64], index: 4, kind: input, shape index: {}]   ;;  %s7390_s5 = inlined_call_operand.vmem [shape: f32[64,2], index: 5, kind: input, shape index: {}]   ;;  %s7391_s6 = inlined_call_operand.vmem [shape: f32[4096,128], index: 6, kind: input, shape index: {}]   ;;  %s7392_s7 = inlined_call_operand.hbm [shape: f32[2,2], index: 7, kind: output, shape index: {}]  }
   0x1   :  { %v3621_v0 = vld [vmem:[%s7391_s6] sm:$0xff]  ;;  %v3626_v1 = vld [vmem:[%s7391_s6 + $0x8] sm:$0xff]  ;;  %v3631_v2 = vld [vmem:[%s7391_s6 + $0x10] sm:$0xff] }
   0x2   :  { %7403 = vst [vmem:[#allocation10_spill] sm:$0xff] %v3621_v0  ;;  %v3636_v3 = vld [vmem:[%s7391_s6 + $0x18] sm:$0xff]  ;;  %v3641_v4 = vld [vmem:[%s7391_s6 + $0x20] sm:$0xff]  ;;  %v3646_v5 = vld [vmem:[%s7391_s6 + $0x28] sm:$0xff] }
   0x3   :  { %7404 = vst [vmem:[#allocation11_spill] sm:$0xff] %v3626_v1  ;;  %v3651_v6 = vld [vmem:[%s7391_s6 + $0x30] sm:$0xff]  ;;  %v3656_v7 = vld [vmem:[%s7391_s6 + $0x38] sm:$0xff]  ;;  %v3661_v8 = vld [vmem:[%s7391_s6 + $0x40] sm:$0xff] }
   0x4   :  { %7405 = vst [vmem:[#allocation12_spill] sm:$0xff] %v3631_v2  ;;  %v3666_v9 = vld [vmem:[%s7391_s6 + $0x48] sm:$0xff]  ;;  %v3671_v10 = vld [vmem:[%s7391_s6 + $0x50] sm:$0xff]  ;;  %v3676_v11 = vld [vmem:[%s7391_s6 + $0x58] sm:$0xff] }
   0x5   :  { %7406 = vst [vmem:[#allocation13_spill] sm:$0xff] %v3636_v3  ;;  %v3681_v12 = vld [vmem:[%s7391_s6 + $0x60] sm:$0xff]  ;;  %v3686_v13 = vld [vmem:[%s7391_s6 + $0x68] sm:$0xff]  ;;  %v3691_v14 = vld [vmem:[%s7391_s6 + $0x70] sm:$0xff] }
   0x6   :  { %7407 = vst [vmem:[#allocation14_spill] sm:$0xff] %v3641_v4  ;;  %v3696_v15 = vld [vmem:[%s7391_s6 + $0x78] sm:$0xff]  ;;  %v3701_v16 = vld [vmem:[%s7391_s6 + $0x80] sm:$0xff]  ;;  %v3706_v17 = vld [vmem:[%s7391_s6 + $0x88] sm:$0xff] }
   0x7   :  { %7408 = vst [vmem:[#allocation15_spill] sm:$0xff] %v3646_v5  ;;  %v3711_v18 = vld [vmem:[%s7391_s6 + $0x90] sm:$0xff]  ;;  %v3716_v19 = vld [vmem:[%s7391_s6 + $0x98] sm:$0xff]  ;;  %v3721_v20 = vld [vmem:[%s7391_s6 + $0xa0] sm:$0xff] }
   0x8   :  { %7409 = vst [vmem:[#allocation16_spill] sm:$0xff] %v3651_v6  ;;  %v3726_v21 = vld [vmem:[%s7391_s6 + $0xa8] sm:$0xff]  ;;  %v3731_v22 = vld [vmem:[%s7391_s6 + $0xb0] sm:$0xff]  ;;  %v3736_v23 = vld [vmem:[%s7391_s6 + $0xb8] sm:$0xff] }
   0x9   :  { %7410 = vst [vmem:[#allocation17_spill] sm:$0xff] %v3656_v7  ;;  %v3741_v24 = vld [vmem:[%s7391_s6 + $0xc0] sm:$0xff]  ;;  %v3746_v25 = vld [vmem:[%s7391_s6 + $0xc8] sm:$0xff]  ;;  %v3751_v26 = vld [vmem:[%s7391_s6 + $0xd0] sm:$0xff] }
   0xa   :  { %7411 = vst [vmem:[#allocation18_spill] sm:$0xff] %v3661_v8  ;;  %v3756_v27 = vld [vmem:[%s7391_s6 + $0xd8] sm:$0xff]  ;;  %v3761_v28 = vld [vmem:[%s7391_s6 + $0xe0] sm:$0xff]  ;;  %v3766_v29 = vld [vmem:[%s7391_s6 + $0xe8] sm:$0xff] }
   0xb   :  { %7412 = vst [vmem:[#allocation19_spill] sm:$0xff] %v3666_v9  ;;  %v3771_v30 = vld [vmem:[%s7391_s6 + $0xf0] sm:$0xff]  ;;  %v3776_v31 = vld [vmem:[%s7391_s6 + $0xf8] sm:$0xff]  ;;  %v3781_v32 = vld [vmem:[%s7391_s6 + $0x100] sm:$0xff] }
   0xc   :  { %7413 = vst [vmem:[#allocation20_spill] sm:$0xff] %v3671_v10  ;;  %v3786_v33 = vld [vmem:[%s7391_s6 + $0x108] sm:$0xff]  ;;  %v3791_v34 = vld [vmem:[%s7391_s6 + $0x110] sm:$0xff]  ;;  %v3796_v35 = vld [vmem:[%s7391_s6 + $0x118] sm:$0xff] }
   0xd   :  { %7414 = vst [vmem:[#allocation21_spill] sm:$0xff] %v3676_v11  ;;  %v3801_v36 = vld [vmem:[%s7391_s6 + $0x120] sm:$0xff]  ;;  %v3806_v37 = vld [vmem:[%s7391_s6 + $0x128] sm:$0xff]  ;;  %v3811_v38 = vld [vmem:[%s7391_s6 + $0x130] sm:$0xff] }
   0xe   :  { %7415 = vst [vmem:[#allocation22_spill] sm:$0xff] %v3681_v12  ;;  %v3816_v39 = vld [vmem:[%s7391_s6 + $0x138] sm:$0xff]  ;;  %v3821_v40 = vld [vmem:[%s7391_s6 + $0x140] sm:$0xff]  ;;  %v3826_v41 = vld [vmem:[%s7391_s6 + $0x148] sm:$0xff] }
   0xf   :  { %7416 = vst [vmem:[#allocation23_spill] sm:$0xff] %v3686_v13  ;;  %v3831_v42 = vld [vmem:[%s7391_s6 + $0x150] sm:$0xff]  ;;  %v3836_v43 = vld [vmem:[%s7391_s6 + $0x158] sm:$0xff]  ;;  %v3841_v44 = vld [vmem:[%s7391_s6 + $0x160] sm:$0xff] }
  0x10   :  { %7417 = vst [vmem:[#allocation24_spill] sm:$0xff] %v3691_v14  ;;  %v3846_v45 = vld [vmem:[%s7391_s6 + $0x168] sm:$0xff]  ;;  %v3851_v46 = vld [vmem:[%s7391_s6 + $0x170] sm:$0xff]  ;;  %v3856_v47 = vld [vmem:[%s7391_s6 + $0x178] sm:$0xff] }
  0x11   :  { %7418 = vst [vmem:[#allocation25_spill] sm:$0xff] %v3696_v15  ;;  %v3861_v48 = vld [vmem:[%s7391_s6 + $0x180] sm:$0xff]  ;;  %v3866_v49 = vld [vmem:[%s7391_s6 + $0x188] sm:$0xff]  ;;  %v3871_v50 = vld [vmem:[%s7391_s6 + $0x190] sm:$0xff] }
  0x12   :  { %7419 = vst [vmem:[#allocation26_spill] sm:$0xff] %v3701_v16  ;;  %v3876_v51 = vld [vmem:[%s7391_s6 + $0x198] sm:$0xff]  ;;  %v3881_v52 = vld [vmem:[%s7391_s6 + $0x1a0] sm:$0xff]  ;;  %v3886_v53 = vld [vmem:[%s7391_s6 + $0x1a8] sm:$0xff] }
  0x13   :  { %7420 = vst [vmem:[#allocation27_spill] sm:$0xff] %v3706_v17  ;;  %v3891_v54 = vld [vmem:[%s7391_s6 + $0x1b0] sm:$0xff]  ;;  %v3896_v55 = vld [vmem:[%s7391_s6 + $0x1b8] sm:$0xff]  ;;  %v3901_v56 = vld [vmem:[%s7391_s6 + $0x1c0] sm:$0xff]  ;;  %v3568_v17 = vmov 3  }
  0x14   :  { %7421 = vst [vmem:[#allocation28_spill] sm:$0xff] %v3711_v18  ;;  %v3906_v57 = vld [vmem:[%s7391_s6 + $0x1c8] sm:$0xff]  ;;  %v3911_v58 = vld [vmem:[%s7391_s6 + $0x1d0] sm:$0xff]  ;;  %v3916_v59 = vld [vmem:[%s7391_s6 + $0x1d8] sm:$0xff]  ;;  %3478 = vset.pattern.permute.xlu1 %v3568_v17 }
  0x15   :  { %7422 = vst [vmem:[#allocation29_spill] sm:$0xff] %v3716_v19  ;;  %v3921_v60 = vld [vmem:[%s7391_s6 + $0x1e0] sm:$0xff]  ;;  %v3926_v61 = vld [vmem:[%s7391_s6 + $0x1e8] sm:$0xff]  ;;  %v3931_v62 = vld [vmem:[%s7391_s6 + $0x1f0] sm:$0xff] }
  0x16   :  { %7423 = vst [vmem:[#allocation30_spill] sm:$0xff] %v3721_v20  ;;  %v3936_v63 = vld [vmem:[%s7391_s6 + $0x1f8] sm:$0xff]  ;;  %v3946_v16 = vld [vmem:[%s7391_s6 + $0x208] sm:$0xff] }
  0x17   :  { %7424 = vst [vmem:[#allocation31_spill] sm:$0xff] %v3726_v21  ;;  %v3956_v0 = vld [vmem:[%s7391_s6 + $0x218] sm:$0xff] }
  0x18   :  { %7425 = vst [vmem:[#allocation32_spill] sm:$0xff] %v3731_v22 }
  0x19   :  { %7426 = vst [vmem:[#allocation33_spill] sm:$0xff] %v3736_v23 }
  0x1a   :  { %7427 = vst [vmem:[#allocation34_spill] sm:$0xff] %v3741_v24 }
  0x1b   :  { %7428 = vst [vmem:[#allocation35_spill] sm:$0xff] %v3746_v25 }
  0x1c   :  { %7429 = vst [vmem:[#allocation36_spill] sm:$0xff] %v3751_v26 }
  0x1d   :  { %7430 = vst [vmem:[#allocation37_spill] sm:$0xff] %v3756_v27 }
  0x1e   :  { %7431 = vst [vmem:[#allocation38_spill] sm:$0xff] %v3761_v28 }
  0x1f   :  { %7432 = vst [vmem:[#allocation39_spill] sm:$0xff] %v3766_v29 }
  0x20   :  { %7433 = vst [vmem:[#allocation40_spill] sm:$0xff] %v3771_v30 }
  0x21   :  { %7434 = vst [vmem:[#allocation41_spill] sm:$0xff] %v3776_v31 }
  0x22   :  { %7435 = vst [vmem:[#allocation42_spill] sm:$0xff] %v3781_v32  ;;  %v3951_v32 = vld [vmem:[%s7391_s6 + $0x210] sm:$0xff] }
  0x23   :  { %7436 = vst [vmem:[#allocation43_spill] sm:$0xff] %v3786_v33 }
  0x24   :  { %7437 = vst [vmem:[#allocation44_spill] sm:$0xff] %v3791_v34 }
  0x25   :  { %7438 = vst [vmem:[#allocation45_spill] sm:$0xff] %v3796_v35 }
  0x26   :  { %7439 = vst [vmem:[#allocation46_spill] sm:$0xff] %v3801_v36 }
  0x27   :  { %7440 = vst [vmem:[#allocation47_spill] sm:$0xff] %v3806_v37 }
  0x28   :  { %7441 = vst [vmem:[#allocation48_spill] sm:$0xff] %v3811_v38 }
  0x29   :  { %7442 = vst [vmem:[#allocation49_spill] sm:$0xff] %v3816_v39 }
  0x2a   :  { %7443 = vst [vmem:[#allocation50_spill] sm:$0xff] %v3821_v40 }
  0x2b   :  { %7444 = vst [vmem:[#allocation51_spill] sm:$0xff] %v3826_v41 }
  0x2c   :  { %7445 = vst [vmem:[#allocation52_spill] sm:$0xff] %v3831_v42 }
  0x2d   :  { %7446 = vst [vmem:[#allocation53_spill] sm:$0xff] %v3836_v43 }
  0x2e   :  { %7447 = vst [vmem:[#allocation54_spill] sm:$0xff] %v3841_v44 }
  0x2f   :  { %7448 = vst [vmem:[#allocation55_spill] sm:$0xff] %v3846_v45 }
  0x30   :  { %7449 = vst [vmem:[#allocation56_spill] sm:$0xff] %v3851_v46 }
  0x31   :  { %7450 = vst [vmem:[#allocation57_spill] sm:$0xff] %v3856_v47 }
  0x32   :  { %7451 = vst [vmem:[#allocation58_spill] sm:$0xff] %v3861_v48  ;;  %v3941_v48 = vld [vmem:[%s7391_s6 + $0x200] sm:$0xff] }
  0x33   :  { %7452 = vst [vmem:[#allocation59_spill] sm:$0xff] %v3866_v49  ;;  %v3961_v49 = vld [vmem:[%s7391_s6 + $0x220] sm:$0xff] }
  0x34   :  { %7453 = vst [vmem:[#allocation60_spill] sm:$0xff] %v3871_v50 }
  0x35   :  { %7454 = vst [vmem:[#allocation61_spill] sm:$0xff] %v3876_v51 }
  0x36   :  { %7455 = vst [vmem:[#allocation62_spill] sm:$0xff] %v3881_v52 }
  0x37   :  { %7456 = vst [vmem:[#allocation63_spill] sm:$0xff] %v3886_v53 }
  0x38   :  { %7457 = vst [vmem:[#allocation64_spill] sm:$0xff] %v3891_v54 }
  0x39   :  { %7458 = vst [vmem:[#allocation65_spill] sm:$0xff] %v3896_v55 }
  0x3a   :  { %7459 = vst [vmem:[#allocation66_spill] sm:$0xff] %v3901_v56 }
  0x3b   :  { %7460 = vst [vmem:[#allocation67_spill] sm:$0xff] %v3906_v57 }
  0x3c   :  { %7461 = vst [vmem:[#allocation68_spill] sm:$0xff] %v3911_v58 }
  0x3d   :  { %7462 = vst [vmem:[#allocation69_spill] sm:$0xff] %v3916_v59 }
  0x3e   :  { %7463 = vst [vmem:[#allocation70_spill] sm:$0xff] %v3921_v60 }
  0x3f   :  { %7464 = vst [vmem:[#allocation71_spill] sm:$0xff] %v3926_v61 }
  0x40   :  { %7465 = vst [vmem:[#allocation72_spill] sm:$0xff] %v3931_v62 }
  0x41   :  { %7466 = vst [vmem:[#allocation73_spill] sm:$0xff] %v3936_v63 }
  0x42   :  { %7467 = vst [vmem:[#allocation74_spill] sm:$0xff] %v3941_v48  ;;  %v3966_v48 = vld [vmem:[%s7391_s6 + $0x228] sm:$0xff] }
  0x43   :  { %7468 = vst [vmem:[#allocation75_spill] sm:$0xff] %v3946_v16  ;;  %v3971_v16 = vld [vmem:[%s7391_s6 + $0x230] sm:$0xff] }
  0x44   :  { %7469 = vst [vmem:[#allocation76_spill] sm:$0xff] %v3951_v32  ;;  %v3976_v32 = vld [vmem:[%s7391_s6 + $0x238] sm:$0xff] }
  0x45   :  { %7470 = vst [vmem:[#allocation77_spill] sm:$0xff] %v3956_v0  ;;  %v3981_v0 = vld [vmem:[%s7391_s6 + $0x240] sm:$0xff] }
  0x46   :  { %7471 = vst [vmem:[#allocation78_spill] sm:$0xff] %v3961_v49  ;;  %v3986_v49 = vld [vmem:[%s7391_s6 + $0x248] sm:$0xff] }
  0x47   :  { %7472 = vst [vmem:[#allocation79_spill] sm:$0xff] %v3966_v48  ;;  %v3991_v48 = vld [vmem:[%s7391_s6 + $0x250] sm:$0xff] }
  0x48   :  { %7473 = vst [vmem:[#allocation80_spill] sm:$0xff] %v3971_v16  ;;  %v3996_v16 = vld [vmem:[%s7391_s6 + $0x258] sm:$0xff] }
  0x49   :  { %7474 = vst [vmem:[#allocation81_spill] sm:$0xff] %v3976_v32  ;;  %v4001_v32 = vld [vmem:[%s7391_s6 + $0x260] sm:$0xff] }
  0x4a   :  { %7475 = vst [vmem:[#allocation82_spill] sm:$0xff] %v3981_v0  ;;  %v4006_v0 = vld [vmem:[%s7391_s6 + $0x268] sm:$0xff] }
  0x4b   :  { %7476 = vst [vmem:[#allocation83_spill] sm:$0xff] %v3986_v49  ;;  %v4011_v49 = vld [vmem:[%s7391_s6 + $0x270] sm:$0xff] }
  0x4c   :  { %7477 = vst [vmem:[#allocation84_spill] sm:$0xff] %v3991_v48  ;;  %v4016_v48 = vld [vmem:[%s7391_s6 + $0x278] sm:$0xff] }
  0x4d   :  { %7478 = vst [vmem:[#allocation85_spill] sm:$0xff] %v3996_v16  ;;  %v4021_v16 = vld [vmem:[%s7391_s6 + $0x280] sm:$0xff] }
  0x4e   :  { %7479 = vst [vmem:[#allocation86_spill] sm:$0xff] %v4001_v32  ;;  %v4026_v32 = vld [vmem:[%s7391_s6 + $0x288] sm:$0xff] }
  0x4f   :  { %7480 = vst [vmem:[#allocation87_spill] sm:$0xff] %v4006_v0  ;;  %v4031_v0 = vld [vmem:[%s7391_s6 + $0x290] sm:$0xff] }
  0x50   :  { %7481 = vst [vmem:[#allocation88_spill] sm:$0xff] %v4011_v49  ;;  %v4036_v49 = vld [vmem:[%s7391_s6 + $0x298] sm:$0xff] }
  0x51   :  { %7482 = vst [vmem:[#allocation89_spill] sm:$0xff] %v4016_v48  ;;  %v4041_v48 = vld [vmem:[%s7391_s6 + $0x2a0] sm:$0xff] }
  0x52   :  { %7483 = vst [vmem:[#allocation90_spill] sm:$0xff] %v4021_v16  ;;  %v4046_v16 = vld [vmem:[%s7391_s6 + $0x2a8] sm:$0xff] }
  0x53   :  { %7484 = vst [vmem:[#allocation91_spill] sm:$0xff] %v4026_v32  ;;  %v4051_v32 = vld [vmem:[%s7391_s6 + $0x2b0] sm:$0xff] }
  0x54   :  { %7485 = vst [vmem:[#allocation92_spill] sm:$0xff] %v4031_v0  ;;  %v4056_v0 = vld [vmem:[%s7391_s6 + $0x2b8] sm:$0xff] }
  0x55   :  { %7486 = vst [vmem:[#allocation93_spill] sm:$0xff] %v4036_v49  ;;  %v4061_v49 = vld [vmem:[%s7391_s6 + $0x2c0] sm:$0xff] }
  0x56   :  { %7487 = vst [vmem:[#allocation94_spill] sm:$0xff] %v4041_v48  ;;  %v4066_v48 = vld [vmem:[%s7391_s6 + $0x2c8] sm:$0xff] }
  0x57   :  { %7488 = vst [vmem:[#allocation95_spill] sm:$0xff] %v4046_v16  ;;  %v4071_v16 = vld [vmem:[%s7391_s6 + $0x2d0] sm:$0xff] }
  0x58   :  { %7489 = vst [vmem:[#allocation96_spill] sm:$0xff] %v4051_v32  ;;  %v4076_v32 = vld [vmem:[%s7391_s6 + $0x2d8] sm:$0xff] }
  0x59   :  { %7490 = vst [vmem:[#allocation97_spill] sm:$0xff] %v4056_v0  ;;  %v4081_v0 = vld [vmem:[%s7391_s6 + $0x2e0] sm:$0xff] }
  0x5a   :  { %7491 = vst [vmem:[#allocation98_spill] sm:$0xff] %v4061_v49  ;;  %v4086_v49 = vld [vmem:[%s7391_s6 + $0x2e8] sm:$0xff] }
  0x5b   :  { %7492 = vst [vmem:[#allocation99_spill] sm:$0xff] %v4066_v48  ;;  %v4091_v48 = vld [vmem:[%s7391_s6 + $0x2f0] sm:$0xff] }
  0x5c   :  { %7493 = vst [vmem:[#allocation100_spill] sm:$0xff] %v4071_v16  ;;  %v4096_v16 = vld [vmem:[%s7391_s6 + $0x2f8] sm:$0xff] }
  0x5d   :  { %7494 = vst [vmem:[#allocation101_spill] sm:$0xff] %v4076_v32  ;;  %v4101_v32 = vld [vmem:[%s7391_s6 + $0x300] sm:$0xff] }
  0x5e   :  { %7495 = vst [vmem:[#allocation102_spill] sm:$0xff] %v4081_v0  ;;  %v4106_v0 = vld [vmem:[%s7391_s6 + $0x308] sm:$0xff] }
  0x5f   :  { %7496 = vst [vmem:[#allocation103_spill] sm:$0xff] %v4086_v49  ;;  %v4111_v49 = vld [vmem:[%s7391_s6 + $0x310] sm:$0xff] }
  0x60   :  { %7497 = vst [vmem:[#allocation104_spill] sm:$0xff] %v4091_v48  ;;  %v4116_v48 = vld [vmem:[%s7391_s6 + $0x318] sm:$0xff] }
  0x61   :  { %7498 = vst [vmem:[#allocation105_spill] sm:$0xff] %v4096_v16  ;;  %v4121_v16 = vld [vmem:[%s7391_s6 + $0x320] sm:$0xff] }
  0x62   :  { %7499 = vst [vmem:[#allocation106_spill] sm:$0xff] %v4101_v32  ;;  %v4126_v32 = vld [vmem:[%s7391_s6 + $0x328] sm:$0xff] }
  0x63   :  { %7500 = vst [vmem:[#allocation107_spill] sm:$0xff] %v4106_v0  ;;  %v4131_v0 = vld [vmem:[%s7391_s6 + $0x330] sm:$0xff] }
  0x64   :  { %7501 = vst [vmem:[#allocation108_spill] sm:$0xff] %v4111_v49  ;;  %v4136_v49 = vld [vmem:[%s7391_s6 + $0x338] sm:$0xff] }
  0x65   :  { %7502 = vst [vmem:[#allocation109_spill] sm:$0xff] %v4116_v48  ;;  %v4141_v48 = vld [vmem:[%s7391_s6 + $0x340] sm:$0xff] }
  0x66   :  { %7503 = vst [vmem:[#allocation110_spill] sm:$0xff] %v4121_v16  ;;  %v4146_v16 = vld [vmem:[%s7391_s6 + $0x348] sm:$0xff] }
  0x67   :  { %7504 = vst [vmem:[#allocation111_spill] sm:$0xff] %v4126_v32  ;;  %v4151_v32 = vld [vmem:[%s7391_s6 + $0x350] sm:$0xff] }
  0x68   :  { %7505 = vst [vmem:[#allocation112_spill] sm:$0xff] %v4131_v0  ;;  %v4156_v0 = vld [vmem:[%s7391_s6 + $0x358] sm:$0xff] }
  0x69   :  { %7506 = vst [vmem:[#allocation113_spill] sm:$0xff] %v4136_v49  ;;  %v4161_v49 = vld [vmem:[%s7391_s6 + $0x360] sm:$0xff] }
  0x6a   :  { %7507 = vst [vmem:[#allocation114_spill] sm:$0xff] %v4141_v48  ;;  %v4166_v48 = vld [vmem:[%s7391_s6 + $0x368] sm:$0xff] }
  0x6b   :  { %7508 = vst [vmem:[#allocation115_spill] sm:$0xff] %v4146_v16  ;;  %v4171_v16 = vld [vmem:[%s7391_s6 + $0x370] sm:$0xff] }
  0x6c   :  { %7509 = vst [vmem:[#allocation116_spill] sm:$0xff] %v4151_v32  ;;  %v4176_v32 = vld [vmem:[%s7391_s6 + $0x378] sm:$0xff] }
  0x6d   :  { %7510 = vst [vmem:[#allocation117_spill] sm:$0xff] %v4156_v0  ;;  %v4181_v0 = vld [vmem:[%s7391_s6 + $0x380] sm:$0xff] }
  0x6e   :  { %7511 = vst [vmem:[#allocation118_spill] sm:$0xff] %v4161_v49  ;;  %v4186_v49 = vld [vmem:[%s7391_s6 + $0x388] sm:$0xff] }
  0x6f   :  { %7512 = vst [vmem:[#allocation119_spill] sm:$0xff] %v4166_v48  ;;  %v4191_v48 = vld [vmem:[%s7391_s6 + $0x390] sm:$0xff] }
  0x70   :  { %7513 = vst [vmem:[#allocation120_spill] sm:$0xff] %v4171_v16  ;;  %v4196_v16 = vld [vmem:[%s7391_s6 + $0x398] sm:$0xff] }
  0x71   :  { %7514 = vst [vmem:[#allocation121_spill] sm:$0xff] %v4176_v32  ;;  %v4201_v32 = vld [vmem:[%s7391_s6 + $0x3a0] sm:$0xff] }
  0x72   :  { %7515 = vst [vmem:[#allocation122_spill] sm:$0xff] %v4181_v0  ;;  %v4206_v0 = vld [vmem:[%s7391_s6 + $0x3a8] sm:$0xff] }
  0x73   :  { %7516 = vst [vmem:[#allocation123_spill] sm:$0xff] %v4186_v49  ;;  %v4211_v49 = vld [vmem:[%s7391_s6 + $0x3b0] sm:$0xff] }
  0x74   :  { %7517 = vst [vmem:[#allocation124_spill] sm:$0xff] %v4191_v48  ;;  %v4216_v48 = vld [vmem:[%s7391_s6 + $0x3b8] sm:$0xff] }
  0x75   :  { %7518 = vst [vmem:[#allocation125_spill] sm:$0xff] %v4196_v16  ;;  %v4221_v16 = vld [vmem:[%s7391_s6 + $0x3c0] sm:$0xff] }
  0x76   :  { %7519 = vst [vmem:[#allocation126_spill] sm:$0xff] %v4201_v32  ;;  %v4226_v32 = vld [vmem:[%s7391_s6 + $0x3c8] sm:$0xff] }
  0x77   :  { %7520 = vst [vmem:[#allocation127_spill] sm:$0xff] %v4206_v0  ;;  %v4231_v0 = vld [vmem:[%s7391_s6 + $0x3d0] sm:$0xff] }
  0x78   :  { %7521 = vst [vmem:[#allocation128_spill] sm:$0xff] %v4211_v49  ;;  %v4236_v49 = vld [vmem:[%s7391_s6 + $0x3d8] sm:$0xff] }
  0x79   :  { %7522 = vst [vmem:[#allocation129_spill] sm:$0xff] %v4216_v48  ;;  %v4241_v48 = vld [vmem:[%s7391_s6 + $0x3e0] sm:$0xff] }
  0x7a   :  { %7523 = vst [vmem:[#allocation130_spill] sm:$0xff] %v4221_v16  ;;  %v4246_v16 = vld [vmem:[%s7391_s6 + $0x3e8] sm:$0xff] }
  0x7b   :  { %7524 = vst [vmem:[#allocation131_spill] sm:$0xff] %v4226_v32  ;;  %v4251_v32 = vld [vmem:[%s7391_s6 + $0x3f0] sm:$0xff] }
  0x7c   :  { %7525 = vst [vmem:[#allocation132_spill] sm:$0xff] %v4231_v0  ;;  %v4256_v0 = vld [vmem:[%s7391_s6 + $0x3f8] sm:$0xff] }
  0x7d   :  { %7526 = vst [vmem:[#allocation133_spill] sm:$0xff] %v4236_v49  ;;  %v4261_v49 = vld [vmem:[%s7391_s6 + $0x400] sm:$0xff] }
  0x7e   :  { %7527 = vst [vmem:[#allocation134_spill] sm:$0xff] %v4241_v48  ;;  %v4266_v48 = vld [vmem:[%s7391_s6 + $0x408] sm:$0xff] }
  0x7f   :  { %7528 = vst [vmem:[#allocation135_spill] sm:$0xff] %v4246_v16  ;;  %v4271_v16 = vld [vmem:[%s7391_s6 + $0x410] sm:$0xff] }
  0x80   :  { %7529 = vst [vmem:[#allocation136_spill] sm:$0xff] %v4251_v32  ;;  %v4276_v32 = vld [vmem:[%s7391_s6 + $0x418] sm:$0xff] }
  0x81   :  { %7530 = vst [vmem:[#allocation137_spill] sm:$0xff] %v4256_v0  ;;  %v4281_v0 = vld [vmem:[%s7391_s6 + $0x420] sm:$0xff] }
  0x82   :  { %7531 = vst [vmem:[#allocation138_spill] sm:$0xff] %v4261_v49  ;;  %v4286_v49 = vld [vmem:[%s7391_s6 + $0x428] sm:$0xff] }
  0x83   :  { %7532 = vst [vmem:[#allocation139_spill] sm:$0xff] %v4266_v48  ;;  %v4291_v48 = vld [vmem:[%s7391_s6 + $0x430] sm:$0xff] }
  0x84   :  { %7533 = vst [vmem:[#allocation140_spill] sm:$0xff] %v4271_v16  ;;  %v4296_v16 = vld [vmem:[%s7391_s6 + $0x438] sm:$0xff] }
  0x85   :  { %7534 = vst [vmem:[#allocation141_spill] sm:$0xff] %v4276_v32  ;;  %v4301_v32 = vld [vmem:[%s7391_s6 + $0x440] sm:$0xff] }
  0x86   :  { %7535 = vst [vmem:[#allocation142_spill] sm:$0xff] %v4281_v0  ;;  %v4306_v0 = vld [vmem:[%s7391_s6 + $0x448] sm:$0xff] }
  0x87   :  { %7536 = vst [vmem:[#allocation143_spill] sm:$0xff] %v4286_v49  ;;  %v4311_v49 = vld [vmem:[%s7391_s6 + $0x450] sm:$0xff] }
  0x88   :  { %7537 = vst [vmem:[#allocation144_spill] sm:$0xff] %v4291_v48  ;;  %v4316_v48 = vld [vmem:[%s7391_s6 + $0x458] sm:$0xff] }
  0x89   :  { %7538 = vst [vmem:[#allocation145_spill] sm:$0xff] %v4296_v16  ;;  %v4321_v16 = vld [vmem:[%s7391_s6 + $0x460] sm:$0xff] }
  0x8a   :  { %7539 = vst [vmem:[#allocation146_spill] sm:$0xff] %v4301_v32  ;;  %v4326_v32 = vld [vmem:[%s7391_s6 + $0x468] sm:$0xff] }
  0x8b   :  { %7540 = vst [vmem:[#allocation147_spill] sm:$0xff] %v4306_v0  ;;  %v4331_v0 = vld [vmem:[%s7391_s6 + $0x470] sm:$0xff] }
  0x8c   :  { %7541 = vst [vmem:[#allocation148_spill] sm:$0xff] %v4311_v49  ;;  %v4336_v49 = vld [vmem:[%s7391_s6 + $0x478] sm:$0xff] }
  0x8d   :  { %7542 = vst [vmem:[#allocation149_spill] sm:$0xff] %v4316_v48  ;;  %v4341_v48 = vld [vmem:[%s7391_s6 + $0x480] sm:$0xff] }
  0x8e   :  { %7543 = vst [vmem:[#allocation150_spill] sm:$0xff] %v4321_v16  ;;  %v4346_v16 = vld [vmem:[%s7391_s6 + $0x488] sm:$0xff] }
  0x8f   :  { %7544 = vst [vmem:[#allocation151_spill] sm:$0xff] %v4326_v32  ;;  %v4351_v32 = vld [vmem:[%s7391_s6 + $0x490] sm:$0xff] }
  0x90   :  { %7545 = vst [vmem:[#allocation152_spill] sm:$0xff] %v4331_v0  ;;  %v4356_v0 = vld [vmem:[%s7391_s6 + $0x498] sm:$0xff] }
  0x91   :  { %7546 = vst [vmem:[#allocation153_spill] sm:$0xff] %v4336_v49  ;;  %v4361_v49 = vld [vmem:[%s7391_s6 + $0x4a0] sm:$0xff] }
  0x92   :  { %7547 = vst [vmem:[#allocation154_spill] sm:$0xff] %v4341_v48  ;;  %v4366_v48 = vld [vmem:[%s7391_s6 + $0x4a8] sm:$0xff] }
  0x93   :  { %7548 = vst [vmem:[#allocation155_spill] sm:$0xff] %v4346_v16  ;;  %v4371_v16 = vld [vmem:[%s7391_s6 + $0x4b0] sm:$0xff] }
  0x94   :  { %7549 = vst [vmem:[#allocation156_spill] sm:$0xff] %v4351_v32  ;;  %v4376_v32 = vld [vmem:[%s7391_s6 + $0x4b8] sm:$0xff] }
  0x95   :  { %7550 = vst [vmem:[#allocation157_spill] sm:$0xff] %v4356_v0  ;;  %v4381_v0 = vld [vmem:[%s7391_s6 + $0x4c0] sm:$0xff] }
  0x96   :  { %7551 = vst [vmem:[#allocation158_spill] sm:$0xff] %v4361_v49  ;;  %v4386_v49 = vld [vmem:[%s7391_s6 + $0x4c8] sm:$0xff] }
  0x97   :  { %7552 = vst [vmem:[#allocation159_spill] sm:$0xff] %v4366_v48  ;;  %v4391_v48 = vld [vmem:[%s7391_s6 + $0x4d0] sm:$0xff] }
  0x98   :  { %7553 = vst [vmem:[#allocation160_spill] sm:$0xff] %v4371_v16  ;;  %v4396_v16 = vld [vmem:[%s7391_s6 + $0x4d8] sm:$0xff] }
  0x99   :  { %7554 = vst [vmem:[#allocation161_spill] sm:$0xff] %v4376_v32  ;;  %v4401_v32 = vld [vmem:[%s7391_s6 + $0x4e0] sm:$0xff] }
  0x9a   :  { %7555 = vst [vmem:[#allocation162_spill] sm:$0xff] %v4381_v0  ;;  %v4406_v0 = vld [vmem:[%s7391_s6 + $0x4e8] sm:$0xff] }
  0x9b   :  { %7556 = vst [vmem:[#allocation163_spill] sm:$0xff] %v4386_v49  ;;  %v4411_v49 = vld [vmem:[%s7391_s6 + $0x4f0] sm:$0xff] }
  0x9c   :  { %7557 = vst [vmem:[#allocation164_spill] sm:$0xff] %v4391_v48  ;;  %v4416_v48 = vld [vmem:[%s7391_s6 + $0x4f8] sm:$0xff] }
  0x9d   :  { %7558 = vst [vmem:[#allocation165_spill] sm:$0xff] %v4396_v16  ;;  %v4421_v16 = vld [vmem:[%s7391_s6 + $0x500] sm:$0xff] }
  0x9e   :  { %7559 = vst [vmem:[#allocation166_spill] sm:$0xff] %v4401_v32  ;;  %v4426_v32 = vld [vmem:[%s7391_s6 + $0x508] sm:$0xff] }
  0x9f   :  { %7560 = vst [vmem:[#allocation167_spill] sm:$0xff] %v4406_v0  ;;  %v4431_v0 = vld [vmem:[%s7391_s6 + $0x510] sm:$0xff] }
  0xa0   :  { %7561 = vst [vmem:[#allocation168_spill] sm:$0xff] %v4411_v49  ;;  %v4436_v49 = vld [vmem:[%s7391_s6 + $0x518] sm:$0xff] }
  0xa1   :  { %7562 = vst [vmem:[#allocation169_spill] sm:$0xff] %v4416_v48  ;;  %v4441_v48 = vld [vmem:[%s7391_s6 + $0x520] sm:$0xff] }
  0xa2   :  { %7563 = vst [vmem:[#allocation170_spill] sm:$0xff] %v4421_v16  ;;  %v4446_v16 = vld [vmem:[%s7391_s6 + $0x528] sm:$0xff] }
  0xa3   :  { %7564 = vst [vmem:[#allocation171_spill] sm:$0xff] %v4426_v32  ;;  %v4451_v32 = vld [vmem:[%s7391_s6 + $0x530] sm:$0xff] }
  0xa4   :  { %7565 = vst [vmem:[#allocation172_spill] sm:$0xff] %v4431_v0  ;;  %v4456_v0 = vld [vmem:[%s7391_s6 + $0x538] sm:$0xff] }
  0xa5   :  { %7566 = vst [vmem:[#allocation173_spill] sm:$0xff] %v4436_v49  ;;  %v4461_v49 = vld [vmem:[%s7391_s6 + $0x540] sm:$0xff] }
  0xa6   :  { %7567 = vst [vmem:[#allocation174_spill] sm:$0xff] %v4441_v48  ;;  %v4466_v48 = vld [vmem:[%s7391_s6 + $0x548] sm:$0xff] }
  0xa7   :  { %7568 = vst [vmem:[#allocation175_spill] sm:$0xff] %v4446_v16  ;;  %v4471_v16 = vld [vmem:[%s7391_s6 + $0x550] sm:$0xff] }
  0xa8   :  { %7569 = vst [vmem:[#allocation176_spill] sm:$0xff] %v4451_v32  ;;  %v4476_v32 = vld [vmem:[%s7391_s6 + $0x558] sm:$0xff] }
  0xa9   :  { %7570 = vst [vmem:[#allocation177_spill] sm:$0xff] %v4456_v0  ;;  %v4481_v0 = vld [vmem:[%s7391_s6 + $0x560] sm:$0xff] }
  0xaa   :  { %7571 = vst [vmem:[#allocation178_spill] sm:$0xff] %v4461_v49  ;;  %v4486_v49 = vld [vmem:[%s7391_s6 + $0x568] sm:$0xff] }
  0xab   :  { %7572 = vst [vmem:[#allocation179_spill] sm:$0xff] %v4466_v48  ;;  %v4491_v48 = vld [vmem:[%s7391_s6 + $0x570] sm:$0xff] }
  0xac   :  { %7573 = vst [vmem:[#allocation180_spill] sm:$0xff] %v4471_v16  ;;  %v4496_v16 = vld [vmem:[%s7391_s6 + $0x578] sm:$0xff] }
  0xad   :  { %7574 = vst [vmem:[#allocation181_spill] sm:$0xff] %v4476_v32  ;;  %v4501_v32 = vld [vmem:[%s7391_s6 + $0x580] sm:$0xff] }
  0xae   :  { %7575 = vst [vmem:[#allocation182_spill] sm:$0xff] %v4481_v0  ;;  %v4506_v0 = vld [vmem:[%s7391_s6 + $0x588] sm:$0xff] }
  0xaf   :  { %7576 = vst [vmem:[#allocation183_spill] sm:$0xff] %v4486_v49  ;;  %v4511_v49 = vld [vmem:[%s7391_s6 + $0x590] sm:$0xff] }
  0xb0   :  { %7577 = vst [vmem:[#allocation184_spill] sm:$0xff] %v4491_v48  ;;  %v4516_v48 = vld [vmem:[%s7391_s6 + $0x598] sm:$0xff] }
  0xb1   :  { %7578 = vst [vmem:[#allocation185_spill] sm:$0xff] %v4496_v16  ;;  %v4521_v16 = vld [vmem:[%s7391_s6 + $0x5a0] sm:$0xff] }
  0xb2   :  { %7579 = vst [vmem:[#allocation186_spill] sm:$0xff] %v4501_v32  ;;  %v4526_v32 = vld [vmem:[%s7391_s6 + $0x5a8] sm:$0xff] }
  0xb3   :  { %7580 = vst [vmem:[#allocation187_spill] sm:$0xff] %v4506_v0  ;;  %v4531_v0 = vld [vmem:[%s7391_s6 + $0x5b0] sm:$0xff] }
  0xb4   :  { %7581 = vst [vmem:[#allocation188_spill] sm:$0xff] %v4511_v49  ;;  %v4536_v49 = vld [vmem:[%s7391_s6 + $0x5b8] sm:$0xff] }
  0xb5   :  { %7582 = vst [vmem:[#allocation189_spill] sm:$0xff] %v4516_v48  ;;  %v4541_v48 = vld [vmem:[%s7391_s6 + $0x5c0] sm:$0xff] }
  0xb6   :  { %7583 = vst [vmem:[#allocation190_spill] sm:$0xff] %v4521_v16  ;;  %v4546_v16 = vld [vmem:[%s7391_s6 + $0x5c8] sm:$0xff] }
  0xb7   :  { %7584 = vst [vmem:[#allocation191_spill] sm:$0xff] %v4526_v32  ;;  %v4551_v32 = vld [vmem:[%s7391_s6 + $0x5d0] sm:$0xff] }
  0xb8   :  { %7585 = vst [vmem:[#allocation192_spill] sm:$0xff] %v4531_v0  ;;  %v4556_v0 = vld [vmem:[%s7391_s6 + $0x5d8] sm:$0xff] }
  0xb9   :  { %7586 = vst [vmem:[#allocation193_spill] sm:$0xff] %v4536_v49  ;;  %v4561_v49 = vld [vmem:[%s7391_s6 + $0x5e0] sm:$0xff] }
  0xba   :  { %7587 = vst [vmem:[#allocation194_spill] sm:$0xff] %v4541_v48  ;;  %v4566_v48 = vld [vmem:[%s7391_s6 + $0x5e8] sm:$0xff] }
  0xbb   :  { %7588 = vst [vmem:[#allocation195_spill] sm:$0xff] %v4546_v16  ;;  %v4571_v16 = vld [vmem:[%s7391_s6 + $0x5f0] sm:$0xff] }
  0xbc   :  { %7589 = vst [vmem:[#allocation196_spill] sm:$0xff] %v4551_v32  ;;  %v4576_v32 = vld [vmem:[%s7391_s6 + $0x5f8] sm:$0xff] }
  0xbd   :  { %7590 = vst [vmem:[#allocation197_spill] sm:$0xff] %v4556_v0  ;;  %v4581_v0 = vld [vmem:[%s7391_s6 + $0x600] sm:$0xff] }
  0xbe   :  { %7591 = vst [vmem:[#allocation198_spill] sm:$0xff] %v4561_v49  ;;  %v4586_v49 = vld [vmem:[%s7391_s6 + $0x608] sm:$0xff] }
  0xbf   :  { %7592 = vst [vmem:[#allocation199_spill] sm:$0xff] %v4566_v48  ;;  %v4591_v48 = vld [vmem:[%s7391_s6 + $0x610] sm:$0xff] }
  0xc0   :  { %7593 = vst [vmem:[#allocation200_spill] sm:$0xff] %v4571_v16  ;;  %v4596_v16 = vld [vmem:[%s7391_s6 + $0x618] sm:$0xff] }
  0xc1   :  { %7594 = vst [vmem:[#allocation201_spill] sm:$0xff] %v4576_v32  ;;  %v4601_v32 = vld [vmem:[%s7391_s6 + $0x620] sm:$0xff] }
  0xc2   :  { %7595 = vst [vmem:[#allocation202_spill] sm:$0xff] %v4581_v0  ;;  %v4606_v0 = vld [vmem:[%s7391_s6 + $0x628] sm:$0xff] }
  0xc3   :  { %7596 = vst [vmem:[#allocation203_spill] sm:$0xff] %v4586_v49  ;;  %v4611_v49 = vld [vmem:[%s7391_s6 + $0x630] sm:$0xff] }
  0xc4   :  { %7597 = vst [vmem:[#allocation204_spill] sm:$0xff] %v4591_v48  ;;  %v4616_v48 = vld [vmem:[%s7391_s6 + $0x638] sm:$0xff] }
  0xc5   :  { %7598 = vst [vmem:[#allocation205_spill] sm:$0xff] %v4596_v16  ;;  %v4621_v16 = vld [vmem:[%s7391_s6 + $0x640] sm:$0xff] }
  0xc6   :  { %7599 = vst [vmem:[#allocation206_spill] sm:$0xff] %v4601_v32  ;;  %v4626_v32 = vld [vmem:[%s7391_s6 + $0x648] sm:$0xff] }
  0xc7   :  { %7600 = vst [vmem:[#allocation207_spill] sm:$0xff] %v4606_v0  ;;  %v4631_v0 = vld [vmem:[%s7391_s6 + $0x650] sm:$0xff] }
  0xc8   :  { %7601 = vst [vmem:[#allocation208_spill] sm:$0xff] %v4611_v49  ;;  %v4636_v49 = vld [vmem:[%s7391_s6 + $0x658] sm:$0xff] }
  0xc9   :  { %7602 = vst [vmem:[#allocation209_spill] sm:$0xff] %v4616_v48  ;;  %v4641_v48 = vld [vmem:[%s7391_s6 + $0x660] sm:$0xff] }
  0xca   :  { %7603 = vst [vmem:[#allocation210_spill] sm:$0xff] %v4621_v16  ;;  %v4646_v16 = vld [vmem:[%s7391_s6 + $0x668] sm:$0xff] }
  0xcb   :  { %7604 = vst [vmem:[#allocation211_spill] sm:$0xff] %v4626_v32  ;;  %v4651_v32 = vld [vmem:[%s7391_s6 + $0x670] sm:$0xff] }
  0xcc   :  { %7605 = vst [vmem:[#allocation212_spill] sm:$0xff] %v4631_v0  ;;  %v4656_v0 = vld [vmem:[%s7391_s6 + $0x678] sm:$0xff] }
  0xcd   :  { %7606 = vst [vmem:[#allocation213_spill] sm:$0xff] %v4636_v49  ;;  %v4661_v49 = vld [vmem:[%s7391_s6 + $0x680] sm:$0xff] }
  0xce   :  { %7607 = vst [vmem:[#allocation214_spill] sm:$0xff] %v4641_v48  ;;  %v4666_v48 = vld [vmem:[%s7391_s6 + $0x688] sm:$0xff] }
  0xcf   :  { %7608 = vst [vmem:[#allocation215_spill] sm:$0xff] %v4646_v16  ;;  %v4671_v16 = vld [vmem:[%s7391_s6 + $0x690] sm:$0xff] }
  0xd0   :  { %7609 = vst [vmem:[#allocation216_spill] sm:$0xff] %v4651_v32  ;;  %v4676_v32 = vld [vmem:[%s7391_s6 + $0x698] sm:$0xff] }
  0xd1   :  { %7610 = vst [vmem:[#allocation217_spill] sm:$0xff] %v4656_v0  ;;  %v4681_v0 = vld [vmem:[%s7391_s6 + $0x6a0] sm:$0xff] }
  0xd2   :  { %7611 = vst [vmem:[#allocation218_spill] sm:$0xff] %v4661_v49  ;;  %v4686_v49 = vld [vmem:[%s7391_s6 + $0x6a8] sm:$0xff] }
  0xd3   :  { %7612 = vst [vmem:[#allocation219_spill] sm:$0xff] %v4666_v48  ;;  %v4691_v48 = vld [vmem:[%s7391_s6 + $0x6b0] sm:$0xff] }
  0xd4   :  { %7613 = vst [vmem:[#allocation220_spill] sm:$0xff] %v4671_v16  ;;  %v4696_v16 = vld [vmem:[%s7391_s6 + $0x6b8] sm:$0xff] }
  0xd5   :  { %7614 = vst [vmem:[#allocation221_spill] sm:$0xff] %v4676_v32  ;;  %v4701_v32 = vld [vmem:[%s7391_s6 + $0x6c0] sm:$0xff] }
  0xd6   :  { %7615 = vst [vmem:[#allocation222_spill] sm:$0xff] %v4681_v0  ;;  %v4706_v0 = vld [vmem:[%s7391_s6 + $0x6c8] sm:$0xff] }
  0xd7   :  { %7616 = vst [vmem:[#allocation223_spill] sm:$0xff] %v4686_v49  ;;  %v4711_v49 = vld [vmem:[%s7391_s6 + $0x6d0] sm:$0xff] }
  0xd8   :  { %7617 = vst [vmem:[#allocation224_spill] sm:$0xff] %v4691_v48  ;;  %v4716_v48 = vld [vmem:[%s7391_s6 + $0x6d8] sm:$0xff] }
  0xd9   :  { %7618 = vst [vmem:[#allocation225_spill] sm:$0xff] %v4696_v16  ;;  %v4721_v16 = vld [vmem:[%s7391_s6 + $0x6e0] sm:$0xff] }
  0xda   :  { %7619 = vst [vmem:[#allocation226_spill] sm:$0xff] %v4701_v32  ;;  %v4726_v32 = vld [vmem:[%s7391_s6 + $0x6e8] sm:$0xff] }
  0xdb   :  { %7620 = vst [vmem:[#allocation227_spill] sm:$0xff] %v4706_v0  ;;  %v4731_v0 = vld [vmem:[%s7391_s6 + $0x6f0] sm:$0xff] }
  0xdc   :  { %7621 = vst [vmem:[#allocation228_spill] sm:$0xff] %v4711_v49  ;;  %v4736_v49 = vld [vmem:[%s7391_s6 + $0x6f8] sm:$0xff] }
  0xdd   :  { %7622 = vst [vmem:[#allocation229_spill] sm:$0xff] %v4716_v48  ;;  %v4741_v48 = vld [vmem:[%s7391_s6 + $0x700] sm:$0xff] }
  0xde   :  { %7623 = vst [vmem:[#allocation230_spill] sm:$0xff] %v4721_v16  ;;  %v4746_v16 = vld [vmem:[%s7391_s6 + $0x708] sm:$0xff] }
  0xdf   :  { %7624 = vst [vmem:[#allocation231_spill] sm:$0xff] %v4726_v32  ;;  %v4751_v32 = vld [vmem:[%s7391_s6 + $0x710] sm:$0xff] }
  0xe0   :  { %7625 = vst [vmem:[#allocation232_spill] sm:$0xff] %v4731_v0  ;;  %v4756_v0 = vld [vmem:[%s7391_s6 + $0x718] sm:$0xff] }
  0xe1   :  { %7626 = vst [vmem:[#allocation233_spill] sm:$0xff] %v4736_v49  ;;  %v4761_v49 = vld [vmem:[%s7391_s6 + $0x720] sm:$0xff] }
  0xe2   :  { %7627 = vst [vmem:[#allocation234_spill] sm:$0xff] %v4741_v48  ;;  %v4766_v48 = vld [vmem:[%s7391_s6 + $0x728] sm:$0xff] }
  0xe3   :  { %7628 = vst [vmem:[#allocation235_spill] sm:$0xff] %v4746_v16  ;;  %v4771_v16 = vld [vmem:[%s7391_s6 + $0x730] sm:$0xff] }
  0xe4   :  { %7629 = vst [vmem:[#allocation236_spill] sm:$0xff] %v4751_v32  ;;  %v4776_v32 = vld [vmem:[%s7391_s6 + $0x738] sm:$0xff] }
  0xe5   :  { %7630 = vst [vmem:[#allocation237_spill] sm:$0xff] %v4756_v0  ;;  %v4781_v0 = vld [vmem:[%s7391_s6 + $0x740] sm:$0xff] }
  0xe6   :  { %7631 = vst [vmem:[#allocation238_spill] sm:$0xff] %v4761_v49  ;;  %v4786_v49 = vld [vmem:[%s7391_s6 + $0x748] sm:$0xff] }
  0xe7   :  { %7632 = vst [vmem:[#allocation239_spill] sm:$0xff] %v4766_v48  ;;  %v4791_v48 = vld [vmem:[%s7391_s6 + $0x750] sm:$0xff] }
  0xe8   :  { %7633 = vst [vmem:[#allocation240_spill] sm:$0xff] %v4771_v16  ;;  %v4796_v16 = vld [vmem:[%s7391_s6 + $0x758] sm:$0xff] }
  0xe9   :  { %7634 = vst [vmem:[#allocation241_spill] sm:$0xff] %v4776_v32  ;;  %v4801_v32 = vld [vmem:[%s7391_s6 + $0x760] sm:$0xff] }
  0xea   :  { %7635 = vst [vmem:[#allocation242_spill] sm:$0xff] %v4781_v0  ;;  %v4806_v0 = vld [vmem:[%s7391_s6 + $0x768] sm:$0xff] }
  0xeb   :  { %7636 = vst [vmem:[#allocation243_spill] sm:$0xff] %v4786_v49  ;;  %v4811_v49 = vld [vmem:[%s7391_s6 + $0x770] sm:$0xff] }
  0xec   :  { %7637 = vst [vmem:[#allocation244_spill] sm:$0xff] %v4791_v48  ;;  %v4816_v48 = vld [vmem:[%s7391_s6 + $0x778] sm:$0xff] }
  0xed   :  { %7638 = vst [vmem:[#allocation245_spill] sm:$0xff] %v4796_v16  ;;  %v4821_v16 = vld [vmem:[%s7391_s6 + $0x780] sm:$0xff] }
  0xee   :  { %7639 = vst [vmem:[#allocation246_spill] sm:$0xff] %v4801_v32  ;;  %v4826_v32 = vld [vmem:[%s7391_s6 + $0x788] sm:$0xff] }
  0xef   :  { %7640 = vst [vmem:[#allocation247_spill] sm:$0xff] %v4806_v0  ;;  %v4831_v0 = vld [vmem:[%s7391_s6 + $0x790] sm:$0xff] }
  0xf0   :  { %7641 = vst [vmem:[#allocation248_spill] sm:$0xff] %v4811_v49  ;;  %v4836_v49 = vld [vmem:[%s7391_s6 + $0x798] sm:$0xff] }
  0xf1   :  { %7642 = vst [vmem:[#allocation249_spill] sm:$0xff] %v4816_v48  ;;  %v4841_v48 = vld [vmem:[%s7391_s6 + $0x7a0] sm:$0xff] }
  0xf2   :  { %7643 = vst [vmem:[#allocation250_spill] sm:$0xff] %v4821_v16  ;;  %v4846_v16 = vld [vmem:[%s7391_s6 + $0x7a8] sm:$0xff] }
  0xf3   :  { %7644 = vst [vmem:[#allocation251_spill] sm:$0xff] %v4826_v32  ;;  %v4851_v32 = vld [vmem:[%s7391_s6 + $0x7b0] sm:$0xff] }
  0xf4   :  { %7645 = vst [vmem:[#allocation252_spill] sm:$0xff] %v4831_v0  ;;  %v4856_v0 = vld [vmem:[%s7391_s6 + $0x7b8] sm:$0xff] }
  0xf5   :  { %7646 = vst [vmem:[#allocation253_spill] sm:$0xff] %v4836_v49  ;;  %v4861_v49 = vld [vmem:[%s7391_s6 + $0x7c0] sm:$0xff] }
  0xf6   :  { %7647 = vst [vmem:[#allocation254_spill] sm:$0xff] %v4841_v48  ;;  %v4866_v48 = vld [vmem:[%s7391_s6 + $0x7c8] sm:$0xff] }
  0xf7   :  { %7648 = vst [vmem:[#allocation255_spill] sm:$0xff] %v4846_v16  ;;  %v4871_v16 = vld [vmem:[%s7391_s6 + $0x7d0] sm:$0xff] }
  0xf8   :  { %7649 = vst [vmem:[#allocation256_spill] sm:$0xff] %v4851_v32  ;;  %v4876_v32 = vld [vmem:[%s7391_s6 + $0x7d8] sm:$0xff] }
  0xf9   :  { %7650 = vst [vmem:[#allocation257_spill] sm:$0xff] %v4856_v0  ;;  %v4881_v0 = vld [vmem:[%s7391_s6 + $0x7e0] sm:$0xff] }
  0xfa   :  { %7651 = vst [vmem:[#allocation258_spill] sm:$0xff] %v4861_v49  ;;  %v4886_v49 = vld [vmem:[%s7391_s6 + $0x7e8] sm:$0xff] }
  0xfb   :  { %7652 = vst [vmem:[#allocation259_spill] sm:$0xff] %v4866_v48  ;;  %v4891_v48 = vld [vmem:[%s7391_s6 + $0x7f0] sm:$0xff] }
  0xfc   :  { %7653 = vst [vmem:[#allocation260_spill] sm:$0xff] %v4871_v16  ;;  %v4896_v16 = vld [vmem:[%s7391_s6 + $0x7f8] sm:$0xff] }
  0xfd   :  { %7654 = vst [vmem:[#allocation261_spill] sm:$0xff] %v4876_v32  ;;  %v4901_v32 = vld [vmem:[%s7391_s6 + $0x800] sm:$0xff] }
  0xfe   :  { %7655 = vst [vmem:[#allocation262_spill] sm:$0xff] %v4881_v0  ;;  %v4906_v0 = vld [vmem:[%s7391_s6 + $0x808] sm:$0xff] }
  0xff   :  { %7656 = vst [vmem:[#allocation263_spill] sm:$0xff] %v4886_v49  ;;  %v4911_v49 = vld [vmem:[%s7391_s6 + $0x810] sm:$0xff] }
 0x100   :  { %7657 = vst [vmem:[#allocation264_spill] sm:$0xff] %v4891_v48  ;;  %v4916_v48 = vld [vmem:[%s7391_s6 + $0x818] sm:$0xff] }
 0x101   :  { %7658 = vst [vmem:[#allocation265_spill] sm:$0xff] %v4896_v16  ;;  %v4921_v16 = vld [vmem:[%s7391_s6 + $0x820] sm:$0xff] }
 0x102   :  { %7659 = vst [vmem:[#allocation266_spill] sm:$0xff] %v4901_v32  ;;  %v4926_v32 = vld [vmem:[%s7391_s6 + $0x828] sm:$0xff] }
 0x103   :  { %7660 = vst [vmem:[#allocation267_spill] sm:$0xff] %v4906_v0  ;;  %v4931_v0 = vld [vmem:[%s7391_s6 + $0x830] sm:$0xff] }
 0x104   :  { %7661 = vst [vmem:[#allocation268_spill] sm:$0xff] %v4911_v49  ;;  %v4936_v49 = vld [vmem:[%s7391_s6 + $0x838] sm:$0xff] }
 0x105   :  { %7662 = vst [vmem:[#allocation269_spill] sm:$0xff] %v4916_v48  ;;  %v4941_v48 = vld [vmem:[%s7391_s6 + $0x840] sm:$0xff] }
 0x106   :  { %7663 = vst [vmem:[#allocation270_spill] sm:$0xff] %v4921_v16  ;;  %v4946_v16 = vld [vmem:[%s7391_s6 + $0x848] sm:$0xff] }
 0x107   :  { %7664 = vst [vmem:[#allocation271_spill] sm:$0xff] %v4926_v32  ;;  %v4951_v32 = vld [vmem:[%s7391_s6 + $0x850] sm:$0xff] }
 0x108   :  { %7665 = vst [vmem:[#allocation272_spill] sm:$0xff] %v4931_v0  ;;  %v4956_v0 = vld [vmem:[%s7391_s6 + $0x858] sm:$0xff] }
 0x109   :  { %7666 = vst [vmem:[#allocation273_spill] sm:$0xff] %v4936_v49  ;;  %v4961_v49 = vld [vmem:[%s7391_s6 + $0x860] sm:$0xff] }
 0x10a   :  { %7667 = vst [vmem:[#allocation274_spill] sm:$0xff] %v4941_v48  ;;  %v4966_v48 = vld [vmem:[%s7391_s6 + $0x868] sm:$0xff] }
 0x10b   :  { %7668 = vst [vmem:[#allocation275_spill] sm:$0xff] %v4946_v16  ;;  %v4971_v16 = vld [vmem:[%s7391_s6 + $0x870] sm:$0xff] }
 0x10c   :  { %7669 = vst [vmem:[#allocation276_spill] sm:$0xff] %v4951_v32  ;;  %v4976_v32 = vld [vmem:[%s7391_s6 + $0x878] sm:$0xff] }
 0x10d   :  { %7670 = vst [vmem:[#allocation277_spill] sm:$0xff] %v4956_v0  ;;  %v4981_v0 = vld [vmem:[%s7391_s6 + $0x880] sm:$0xff] }
 0x10e   :  { %7671 = vst [vmem:[#allocation278_spill] sm:$0xff] %v4961_v49  ;;  %v4986_v49 = vld [vmem:[%s7391_s6 + $0x888] sm:$0xff] }
 0x10f   :  { %7672 = vst [vmem:[#allocation279_spill] sm:$0xff] %v4966_v48  ;;  %v4991_v48 = vld [vmem:[%s7391_s6 + $0x890] sm:$0xff] }
 0x110   :  { %7673 = vst [vmem:[#allocation280_spill] sm:$0xff] %v4971_v16  ;;  %v4996_v16 = vld [vmem:[%s7391_s6 + $0x898] sm:$0xff] }
 0x111   :  { %7674 = vst [vmem:[#allocation281_spill] sm:$0xff] %v4976_v32  ;;  %v5001_v32 = vld [vmem:[%s7391_s6 + $0x8a0] sm:$0xff] }
 0x112   :  { %7675 = vst [vmem:[#allocation282_spill] sm:$0xff] %v4981_v0  ;;  %v5006_v0 = vld [vmem:[%s7391_s6 + $0x8a8] sm:$0xff] }
 0x113   :  { %7676 = vst [vmem:[#allocation283_spill] sm:$0xff] %v4986_v49  ;;  %v5011_v49 = vld [vmem:[%s7391_s6 + $0x8b0] sm:$0xff] }
 0x114   :  { %7677 = vst [vmem:[#allocation284_spill] sm:$0xff] %v4991_v48  ;;  %v5016_v48 = vld [vmem:[%s7391_s6 + $0x8b8] sm:$0xff] }
 0x115   :  { %7678 = vst [vmem:[#allocation285_spill] sm:$0xff] %v4996_v16  ;;  %v5021_v16 = vld [vmem:[%s7391_s6 + $0x8c0] sm:$0xff] }
 0x116   :  { %7679 = vst [vmem:[#allocation286_spill] sm:$0xff] %v5001_v32  ;;  %v5026_v32 = vld [vmem:[%s7391_s6 + $0x8c8] sm:$0xff] }
 0x117   :  { %7680 = vst [vmem:[#allocation287_spill] sm:$0xff] %v5006_v0  ;;  %v5031_v0 = vld [vmem:[%s7391_s6 + $0x8d0] sm:$0xff] }
 0x118   :  { %7681 = vst [vmem:[#allocation288_spill] sm:$0xff] %v5011_v49  ;;  %v5036_v49 = vld [vmem:[%s7391_s6 + $0x8d8] sm:$0xff] }
 0x119   :  { %7682 = vst [vmem:[#allocation289_spill] sm:$0xff] %v5016_v48  ;;  %v5041_v48 = vld [vmem:[%s7391_s6 + $0x8e0] sm:$0xff] }
 0x11a   :  { %7683 = vst [vmem:[#allocation290_spill] sm:$0xff] %v5021_v16  ;;  %v5046_v16 = vld [vmem:[%s7391_s6 + $0x8e8] sm:$0xff] }
 0x11b   :  { %7684 = vst [vmem:[#allocation291_spill] sm:$0xff] %v5026_v32  ;;  %v5051_v32 = vld [vmem:[%s7391_s6 + $0x8f0] sm:$0xff] }
 0x11c   :  { %7685 = vst [vmem:[#allocation292_spill] sm:$0xff] %v5031_v0  ;;  %v5056_v0 = vld [vmem:[%s7391_s6 + $0x8f8] sm:$0xff] }
 0x11d   :  { %7686 = vst [vmem:[#allocation293_spill] sm:$0xff] %v5036_v49  ;;  %v5061_v49 = vld [vmem:[%s7391_s6 + $0x900] sm:$0xff] }
 0x11e   :  { %7687 = vst [vmem:[#allocation294_spill] sm:$0xff] %v5041_v48  ;;  %v5066_v48 = vld [vmem:[%s7391_s6 + $0x908] sm:$0xff] }
 0x11f   :  { %7688 = vst [vmem:[#allocation295_spill] sm:$0xff] %v5046_v16  ;;  %v5071_v16 = vld [vmem:[%s7391_s6 + $0x910] sm:$0xff] }
 0x120   :  { %7689 = vst [vmem:[#allocation296_spill] sm:$0xff] %v5051_v32  ;;  %v5076_v32 = vld [vmem:[%s7391_s6 + $0x918] sm:$0xff] }
 0x121   :  { %7690 = vst [vmem:[#allocation297_spill] sm:$0xff] %v5056_v0  ;;  %v5081_v0 = vld [vmem:[%s7391_s6 + $0x920] sm:$0xff] }
 0x122   :  { %7691 = vst [vmem:[#allocation298_spill] sm:$0xff] %v5061_v49  ;;  %v5086_v49 = vld [vmem:[%s7391_s6 + $0x928] sm:$0xff] }
 0x123   :  { %7692 = vst [vmem:[#allocation299_spill] sm:$0xff] %v5066_v48  ;;  %v5091_v48 = vld [vmem:[%s7391_s6 + $0x930] sm:$0xff] }
 0x124   :  { %7693 = vst [vmem:[#allocation300_spill] sm:$0xff] %v5071_v16  ;;  %v5096_v16 = vld [vmem:[%s7391_s6 + $0x938] sm:$0xff] }
 0x125   :  { %7694 = vst [vmem:[#allocation301_spill] sm:$0xff] %v5076_v32  ;;  %v5101_v32 = vld [vmem:[%s7391_s6 + $0x940] sm:$0xff] }
 0x126   :  { %7695 = vst [vmem:[#allocation302_spill] sm:$0xff] %v5081_v0  ;;  %v5106_v0 = vld [vmem:[%s7391_s6 + $0x948] sm:$0xff] }
 0x127   :  { %7696 = vst [vmem:[#allocation303_spill] sm:$0xff] %v5086_v49  ;;  %v5111_v49 = vld [vmem:[%s7391_s6 + $0x950] sm:$0xff] }
 0x128   :  { %7697 = vst [vmem:[#allocation304_spill] sm:$0xff] %v5091_v48  ;;  %v5116_v48 = vld [vmem:[%s7391_s6 + $0x958] sm:$0xff] }
 0x129   :  { %7698 = vst [vmem:[#allocation305_spill] sm:$0xff] %v5096_v16  ;;  %v5121_v16 = vld [vmem:[%s7391_s6 + $0x960] sm:$0xff] }
 0x12a   :  { %7699 = vst [vmem:[#allocation306_spill] sm:$0xff] %v5101_v32  ;;  %v5126_v32 = vld [vmem:[%s7391_s6 + $0x968] sm:$0xff] }
 0x12b   :  { %7700 = vst [vmem:[#allocation307_spill] sm:$0xff] %v5106_v0  ;;  %v5131_v0 = vld [vmem:[%s7391_s6 + $0x970] sm:$0xff] }
 0x12c   :  { %7701 = vst [vmem:[#allocation308_spill] sm:$0xff] %v5111_v49  ;;  %v5136_v49 = vld [vmem:[%s7391_s6 + $0x978] sm:$0xff] }
 0x12d   :  { %7702 = vst [vmem:[#allocation309_spill] sm:$0xff] %v5116_v48  ;;  %v5141_v48 = vld [vmem:[%s7391_s6 + $0x980] sm:$0xff] }
 0x12e   :  { %7703 = vst [vmem:[#allocation310_spill] sm:$0xff] %v5121_v16  ;;  %v5146_v16 = vld [vmem:[%s7391_s6 + $0x988] sm:$0xff] }
 0x12f   :  { %7704 = vst [vmem:[#allocation311_spill] sm:$0xff] %v5126_v32  ;;  %v5151_v32 = vld [vmem:[%s7391_s6 + $0x990] sm:$0xff] }
 0x130   :  { %7705 = vst [vmem:[#allocation312_spill] sm:$0xff] %v5131_v0  ;;  %v5156_v0 = vld [vmem:[%s7391_s6 + $0x998] sm:$0xff] }
 0x131   :  { %7706 = vst [vmem:[#allocation313_spill] sm:$0xff] %v5136_v49  ;;  %v5161_v49 = vld [vmem:[%s7391_s6 + $0x9a0] sm:$0xff] }
 0x132   :  { %7707 = vst [vmem:[#allocation314_spill] sm:$0xff] %v5141_v48  ;;  %v5166_v48 = vld [vmem:[%s7391_s6 + $0x9a8] sm:$0xff] }
 0x133   :  { %7708 = vst [vmem:[#allocation315_spill] sm:$0xff] %v5146_v16  ;;  %v5171_v16 = vld [vmem:[%s7391_s6 + $0x9b0] sm:$0xff] }
 0x134   :  { %7709 = vst [vmem:[#allocation316_spill] sm:$0xff] %v5151_v32  ;;  %v5176_v32 = vld [vmem:[%s7391_s6 + $0x9b8] sm:$0xff] }
 0x135   :  { %7710 = vst [vmem:[#allocation317_spill] sm:$0xff] %v5156_v0  ;;  %v5181_v0 = vld [vmem:[%s7391_s6 + $0x9c0] sm:$0xff] }
 0x136   :  { %7711 = vst [vmem:[#allocation318_spill] sm:$0xff] %v5161_v49  ;;  %v5186_v49 = vld [vmem:[%s7391_s6 + $0x9c8] sm:$0xff] }
 0x137   :  { %7712 = vst [vmem:[#allocation319_spill] sm:$0xff] %v5166_v48  ;;  %v5191_v48 = vld [vmem:[%s7391_s6 + $0x9d0] sm:$0xff] }
 0x138   :  { %7713 = vst [vmem:[#allocation320_spill] sm:$0xff] %v5171_v16  ;;  %v5196_v16 = vld [vmem:[%s7391_s6 + $0x9d8] sm:$0xff] }
 0x139   :  { %7714 = vst [vmem:[#allocation321_spill] sm:$0xff] %v5176_v32  ;;  %v5201_v32 = vld [vmem:[%s7391_s6 + $0x9e0] sm:$0xff] }
 0x13a   :  { %7715 = vst [vmem:[#allocation322_spill] sm:$0xff] %v5181_v0  ;;  %v5206_v0 = vld [vmem:[%s7391_s6 + $0x9e8] sm:$0xff] }
 0x13b   :  { %7716 = vst [vmem:[#allocation323_spill] sm:$0xff] %v5186_v49  ;;  %v5211_v49 = vld [vmem:[%s7391_s6 + $0x9f0] sm:$0xff] }
 0x13c   :  { %7717 = vst [vmem:[#allocation324_spill] sm:$0xff] %v5191_v48  ;;  %v5216_v48 = vld [vmem:[%s7391_s6 + $0x9f8] sm:$0xff] }
 0x13d   :  { %7718 = vst [vmem:[#allocation325_spill] sm:$0xff] %v5196_v16  ;;  %v5221_v16 = vld [vmem:[%s7391_s6 + $0xa00] sm:$0xff] }
 0x13e   :  { %7719 = vst [vmem:[#allocation326_spill] sm:$0xff] %v5201_v32  ;;  %v5226_v32 = vld [vmem:[%s7391_s6 + $0xa08] sm:$0xff] }
 0x13f   :  { %7720 = vst [vmem:[#allocation327_spill] sm:$0xff] %v5206_v0  ;;  %v5231_v0 = vld [vmem:[%s7391_s6 + $0xa10] sm:$0xff] }
 0x140   :  { %7721 = vst [vmem:[#allocation328_spill] sm:$0xff] %v5211_v49  ;;  %v5236_v49 = vld [vmem:[%s7391_s6 + $0xa18] sm:$0xff] }
 0x141   :  { %7722 = vst [vmem:[#allocation329_spill] sm:$0xff] %v5216_v48  ;;  %v5241_v48 = vld [vmem:[%s7391_s6 + $0xa20] sm:$0xff] }
 0x142   :  { %7723 = vst [vmem:[#allocation330_spill] sm:$0xff] %v5221_v16  ;;  %v5246_v16 = vld [vmem:[%s7391_s6 + $0xa28] sm:$0xff] }
 0x143   :  { %7724 = vst [vmem:[#allocation331_spill] sm:$0xff] %v5226_v32  ;;  %v5251_v32 = vld [vmem:[%s7391_s6 + $0xa30] sm:$0xff] }
 0x144   :  { %7725 = vst [vmem:[#allocation332_spill] sm:$0xff] %v5231_v0  ;;  %v5256_v0 = vld [vmem:[%s7391_s6 + $0xa38] sm:$0xff] }
 0x145   :  { %7726 = vst [vmem:[#allocation333_spill] sm:$0xff] %v5236_v49  ;;  %v5261_v49 = vld [vmem:[%s7391_s6 + $0xa40] sm:$0xff] }
 0x146   :  { %7727 = vst [vmem:[#allocation334_spill] sm:$0xff] %v5241_v48  ;;  %v5266_v48 = vld [vmem:[%s7391_s6 + $0xa48] sm:$0xff] }
 0x147   :  { %7728 = vst [vmem:[#allocation335_spill] sm:$0xff] %v5246_v16  ;;  %v5271_v16 = vld [vmem:[%s7391_s6 + $0xa50] sm:$0xff] }
 0x148   :  { %7729 = vst [vmem:[#allocation336_spill] sm:$0xff] %v5251_v32  ;;  %v5276_v32 = vld [vmem:[%s7391_s6 + $0xa58] sm:$0xff] }
 0x149   :  { %7730 = vst [vmem:[#allocation337_spill] sm:$0xff] %v5256_v0  ;;  %v5281_v0 = vld [vmem:[%s7391_s6 + $0xa60] sm:$0xff] }
 0x14a   :  { %7731 = vst [vmem:[#allocation338_spill] sm:$0xff] %v5261_v49  ;;  %v5286_v49 = vld [vmem:[%s7391_s6 + $0xa68] sm:$0xff] }
 0x14b   :  { %7732 = vst [vmem:[#allocation339_spill] sm:$0xff] %v5266_v48  ;;  %v5291_v48 = vld [vmem:[%s7391_s6 + $0xa70] sm:$0xff] }
 0x14c   :  { %7733 = vst [vmem:[#allocation340_spill] sm:$0xff] %v5271_v16  ;;  %v5296_v16 = vld [vmem:[%s7391_s6 + $0xa78] sm:$0xff] }
 0x14d   :  { %7734 = vst [vmem:[#allocation341_spill] sm:$0xff] %v5276_v32  ;;  %v5301_v32 = vld [vmem:[%s7391_s6 + $0xa80] sm:$0xff] }
 0x14e   :  { %7735 = vst [vmem:[#allocation342_spill] sm:$0xff] %v5281_v0  ;;  %v5306_v0 = vld [vmem:[%s7391_s6 + $0xa88] sm:$0xff] }
 0x14f   :  { %7736 = vst [vmem:[#allocation343_spill] sm:$0xff] %v5286_v49  ;;  %v5311_v49 = vld [vmem:[%s7391_s6 + $0xa90] sm:$0xff] }
 0x150   :  { %7737 = vst [vmem:[#allocation344_spill] sm:$0xff] %v5291_v48  ;;  %v5316_v48 = vld [vmem:[%s7391_s6 + $0xa98] sm:$0xff] }
 0x151   :  { %7738 = vst [vmem:[#allocation345_spill] sm:$0xff] %v5296_v16  ;;  %v5321_v16 = vld [vmem:[%s7391_s6 + $0xaa0] sm:$0xff] }
 0x152   :  { %7739 = vst [vmem:[#allocation346_spill] sm:$0xff] %v5301_v32  ;;  %v5326_v32 = vld [vmem:[%s7391_s6 + $0xaa8] sm:$0xff] }
 0x153   :  { %7740 = vst [vmem:[#allocation347_spill] sm:$0xff] %v5306_v0  ;;  %v5331_v0 = vld [vmem:[%s7391_s6 + $0xab0] sm:$0xff] }
 0x154   :  { %7741 = vst [vmem:[#allocation348_spill] sm:$0xff] %v5311_v49  ;;  %v5336_v49 = vld [vmem:[%s7391_s6 + $0xab8] sm:$0xff] }
 0x155   :  { %7742 = vst [vmem:[#allocation349_spill] sm:$0xff] %v5316_v48  ;;  %v5341_v48 = vld [vmem:[%s7391_s6 + $0xac0] sm:$0xff] }
 0x156   :  { %7743 = vst [vmem:[#allocation350_spill] sm:$0xff] %v5321_v16  ;;  %v5346_v16 = vld [vmem:[%s7391_s6 + $0xac8] sm:$0xff] }
 0x157   :  { %7744 = vst [vmem:[#allocation351_spill] sm:$0xff] %v5326_v32  ;;  %v5351_v32 = vld [vmem:[%s7391_s6 + $0xad0] sm:$0xff] }
 0x158   :  { %7745 = vst [vmem:[#allocation352_spill] sm:$0xff] %v5331_v0  ;;  %v5356_v0 = vld [vmem:[%s7391_s6 + $0xad8] sm:$0xff] }
 0x159   :  { %7746 = vst [vmem:[#allocation353_spill] sm:$0xff] %v5336_v49  ;;  %v5361_v49 = vld [vmem:[%s7391_s6 + $0xae0] sm:$0xff] }
 0x15a   :  { %7747 = vst [vmem:[#allocation354_spill] sm:$0xff] %v5341_v48  ;;  %v5366_v48 = vld [vmem:[%s7391_s6 + $0xae8] sm:$0xff] }
 0x15b   :  { %7748 = vst [vmem:[#allocation355_spill] sm:$0xff] %v5346_v16  ;;  %v5371_v16 = vld [vmem:[%s7391_s6 + $0xaf0] sm:$0xff] }
 0x15c   :  { %7749 = vst [vmem:[#allocation356_spill] sm:$0xff] %v5351_v32  ;;  %v5376_v32 = vld [vmem:[%s7391_s6 + $0xaf8] sm:$0xff] }
 0x15d   :  { %7750 = vst [vmem:[#allocation357_spill] sm:$0xff] %v5356_v0  ;;  %v5381_v0 = vld [vmem:[%s7391_s6 + $0xb00] sm:$0xff] }
 0x15e   :  { %7751 = vst [vmem:[#allocation358_spill] sm:$0xff] %v5361_v49  ;;  %v5386_v49 = vld [vmem:[%s7391_s6 + $0xb08] sm:$0xff] }
 0x15f   :  { %7752 = vst [vmem:[#allocation359_spill] sm:$0xff] %v5366_v48  ;;  %v5391_v48 = vld [vmem:[%s7391_s6 + $0xb10] sm:$0xff] }
 0x160   :  { %7753 = vst [vmem:[#allocation360_spill] sm:$0xff] %v5371_v16  ;;  %v5396_v16 = vld [vmem:[%s7391_s6 + $0xb18] sm:$0xff] }
 0x161   :  { %7754 = vst [vmem:[#allocation361_spill] sm:$0xff] %v5376_v32  ;;  %v5401_v32 = vld [vmem:[%s7391_s6 + $0xb20] sm:$0xff] }
 0x162   :  { %7755 = vst [vmem:[#allocation362_spill] sm:$0xff] %v5381_v0  ;;  %v5406_v0 = vld [vmem:[%s7391_s6 + $0xb28] sm:$0xff] }
 0x163   :  { %7756 = vst [vmem:[#allocation363_spill] sm:$0xff] %v5386_v49  ;;  %v5411_v49 = vld [vmem:[%s7391_s6 + $0xb30] sm:$0xff] }
 0x164   :  { %7757 = vst [vmem:[#allocation364_spill] sm:$0xff] %v5391_v48  ;;  %v5416_v48 = vld [vmem:[%s7391_s6 + $0xb38] sm:$0xff] }
 0x165   :  { %7758 = vst [vmem:[#allocation365_spill] sm:$0xff] %v5396_v16  ;;  %v5421_v16 = vld [vmem:[%s7391_s6 + $0xb40] sm:$0xff] }
 0x166   :  { %7759 = vst [vmem:[#allocation366_spill] sm:$0xff] %v5401_v32  ;;  %v5426_v32 = vld [vmem:[%s7391_s6 + $0xb48] sm:$0xff] }
 0x167   :  { %7760 = vst [vmem:[#allocation367_spill] sm:$0xff] %v5406_v0  ;;  %v5431_v0 = vld [vmem:[%s7391_s6 + $0xb50] sm:$0xff] }
 0x168   :  { %7761 = vst [vmem:[#allocation368_spill] sm:$0xff] %v5411_v49  ;;  %v5436_v49 = vld [vmem:[%s7391_s6 + $0xb58] sm:$0xff] }
 0x169   :  { %7762 = vst [vmem:[#allocation369_spill] sm:$0xff] %v5416_v48  ;;  %v5441_v48 = vld [vmem:[%s7391_s6 + $0xb60] sm:$0xff] }
 0x16a   :  { %7763 = vst [vmem:[#allocation370_spill] sm:$0xff] %v5421_v16  ;;  %v5446_v16 = vld [vmem:[%s7391_s6 + $0xb68] sm:$0xff] }
 0x16b   :  { %7764 = vst [vmem:[#allocation371_spill] sm:$0xff] %v5426_v32  ;;  %v5451_v32 = vld [vmem:[%s7391_s6 + $0xb70] sm:$0xff] }
 0x16c   :  { %7765 = vst [vmem:[#allocation372_spill] sm:$0xff] %v5431_v0  ;;  %v5456_v0 = vld [vmem:[%s7391_s6 + $0xb78] sm:$0xff] }
 0x16d   :  { %7766 = vst [vmem:[#allocation373_spill] sm:$0xff] %v5436_v49  ;;  %v5461_v49 = vld [vmem:[%s7391_s6 + $0xb80] sm:$0xff] }
 0x16e   :  { %7767 = vst [vmem:[#allocation374_spill] sm:$0xff] %v5441_v48  ;;  %v5466_v48 = vld [vmem:[%s7391_s6 + $0xb88] sm:$0xff] }
 0x16f   :  { %7768 = vst [vmem:[#allocation375_spill] sm:$0xff] %v5446_v16  ;;  %v5471_v16 = vld [vmem:[%s7391_s6 + $0xb90] sm:$0xff] }
 0x170   :  { %7769 = vst [vmem:[#allocation376_spill] sm:$0xff] %v5451_v32  ;;  %v5476_v32 = vld [vmem:[%s7391_s6 + $0xb98] sm:$0xff] }
 0x171   :  { %7770 = vst [vmem:[#allocation377_spill] sm:$0xff] %v5456_v0  ;;  %v5481_v0 = vld [vmem:[%s7391_s6 + $0xba0] sm:$0xff] }
 0x172   :  { %7771 = vst [vmem:[#allocation378_spill] sm:$0xff] %v5461_v49  ;;  %v5486_v49 = vld [vmem:[%s7391_s6 + $0xba8] sm:$0xff] }
 0x173   :  { %7772 = vst [vmem:[#allocation379_spill] sm:$0xff] %v5466_v48  ;;  %v5491_v48 = vld [vmem:[%s7391_s6 + $0xbb0] sm:$0xff] }
 0x174   :  { %7773 = vst [vmem:[#allocation380_spill] sm:$0xff] %v5471_v16  ;;  %v5496_v16 = vld [vmem:[%s7391_s6 + $0xbb8] sm:$0xff] }
 0x175   :  { %7774 = vst [vmem:[#allocation381_spill] sm:$0xff] %v5476_v32  ;;  %v5501_v32 = vld [vmem:[%s7391_s6 + $0xbc0] sm:$0xff] }
 0x176   :  { %7775 = vst [vmem:[#allocation382_spill] sm:$0xff] %v5481_v0  ;;  %v5506_v0 = vld [vmem:[%s7391_s6 + $0xbc8] sm:$0xff] }
 0x177   :  { %7776 = vst [vmem:[#allocation383_spill] sm:$0xff] %v5486_v49  ;;  %v5511_v49 = vld [vmem:[%s7391_s6 + $0xbd0] sm:$0xff] }
 0x178   :  { %7777 = vst [vmem:[#allocation384_spill] sm:$0xff] %v5491_v48  ;;  %v5516_v48 = vld [vmem:[%s7391_s6 + $0xbd8] sm:$0xff] }
 0x179   :  { %7778 = vst [vmem:[#allocation385_spill] sm:$0xff] %v5496_v16  ;;  %v5521_v16 = vld [vmem:[%s7391_s6 + $0xbe0] sm:$0xff] }
 0x17a   :  { %7779 = vst [vmem:[#allocation386_spill] sm:$0xff] %v5501_v32  ;;  %v5526_v32 = vld [vmem:[%s7391_s6 + $0xbe8] sm:$0xff] }
 0x17b   :  { %7780 = vst [vmem:[#allocation387_spill] sm:$0xff] %v5506_v0  ;;  %v5531_v0 = vld [vmem:[%s7391_s6 + $0xbf0] sm:$0xff] }
 0x17c   :  { %7781 = vst [vmem:[#allocation388_spill] sm:$0xff] %v5511_v49  ;;  %v5536_v49 = vld [vmem:[%s7391_s6 + $0xbf8] sm:$0xff] }
 0x17d   :  { %7782 = vst [vmem:[#allocation389_spill] sm:$0xff] %v5516_v48  ;;  %v5541_v48 = vld [vmem:[%s7391_s6 + $0xc00] sm:$0xff] }
 0x17e   :  { %7783 = vst [vmem:[#allocation390_spill] sm:$0xff] %v5521_v16  ;;  %v5546_v16 = vld [vmem:[%s7391_s6 + $0xc08] sm:$0xff] }
 0x17f   :  { %7784 = vst [vmem:[#allocation391_spill] sm:$0xff] %v5526_v32  ;;  %v5551_v32 = vld [vmem:[%s7391_s6 + $0xc10] sm:$0xff] }
 0x180   :  { %7785 = vst [vmem:[#allocation392_spill] sm:$0xff] %v5531_v0  ;;  %v5556_v0 = vld [vmem:[%s7391_s6 + $0xc18] sm:$0xff] }
 0x181   :  { %7786 = vst [vmem:[#allocation393_spill] sm:$0xff] %v5536_v49  ;;  %v5561_v49 = vld [vmem:[%s7391_s6 + $0xc20] sm:$0xff] }
 0x182   :  { %7787 = vst [vmem:[#allocation394_spill] sm:$0xff] %v5541_v48  ;;  %v5566_v48 = vld [vmem:[%s7391_s6 + $0xc28] sm:$0xff] }
 0x183   :  { %7788 = vst [vmem:[#allocation395_spill] sm:$0xff] %v5546_v16  ;;  %v5571_v16 = vld [vmem:[%s7391_s6 + $0xc30] sm:$0xff] }
 0x184   :  { %7789 = vst [vmem:[#allocation396_spill] sm:$0xff] %v5551_v32  ;;  %v5576_v32 = vld [vmem:[%s7391_s6 + $0xc38] sm:$0xff] }
 0x185   :  { %7790 = vst [vmem:[#allocation397_spill] sm:$0xff] %v5556_v0  ;;  %v5581_v0 = vld [vmem:[%s7391_s6 + $0xc40] sm:$0xff] }
 0x186   :  { %7791 = vst [vmem:[#allocation398_spill] sm:$0xff] %v5561_v49  ;;  %v5586_v49 = vld [vmem:[%s7391_s6 + $0xc48] sm:$0xff] }
 0x187   :  { %7792 = vst [vmem:[#allocation399_spill] sm:$0xff] %v5566_v48  ;;  %v5591_v48 = vld [vmem:[%s7391_s6 + $0xc50] sm:$0xff] }
 0x188   :  { %7793 = vst [vmem:[#allocation400_spill] sm:$0xff] %v5571_v16  ;;  %v5596_v16 = vld [vmem:[%s7391_s6 + $0xc58] sm:$0xff] }
 0x189   :  { %7794 = vst [vmem:[#allocation401_spill] sm:$0xff] %v5576_v32  ;;  %v5601_v32 = vld [vmem:[%s7391_s6 + $0xc60] sm:$0xff] }
 0x18a   :  { %7795 = vst [vmem:[#allocation402_spill] sm:$0xff] %v5581_v0  ;;  %v5606_v0 = vld [vmem:[%s7391_s6 + $0xc68] sm:$0xff] }
 0x18b   :  { %7796 = vst [vmem:[#allocation403_spill] sm:$0xff] %v5586_v49  ;;  %v5611_v49 = vld [vmem:[%s7391_s6 + $0xc70] sm:$0xff] }
 0x18c   :  { %7797 = vst [vmem:[#allocation404_spill] sm:$0xff] %v5591_v48  ;;  %v5616_v48 = vld [vmem:[%s7391_s6 + $0xc78] sm:$0xff] }
 0x18d   :  { %7798 = vst [vmem:[#allocation405_spill] sm:$0xff] %v5596_v16  ;;  %v5621_v16 = vld [vmem:[%s7391_s6 + $0xc80] sm:$0xff] }
 0x18e   :  { %7799 = vst [vmem:[#allocation406_spill] sm:$0xff] %v5601_v32  ;;  %v5626_v32 = vld [vmem:[%s7391_s6 + $0xc88] sm:$0xff] }
 0x18f   :  { %7800 = vst [vmem:[#allocation407_spill] sm:$0xff] %v5606_v0  ;;  %v5631_v0 = vld [vmem:[%s7391_s6 + $0xc90] sm:$0xff] }
 0x190   :  { %7801 = vst [vmem:[#allocation408_spill] sm:$0xff] %v5611_v49  ;;  %v5636_v49 = vld [vmem:[%s7391_s6 + $0xc98] sm:$0xff] }
 0x191   :  { %7802 = vst [vmem:[#allocation409_spill] sm:$0xff] %v5616_v48  ;;  %v5641_v48 = vld [vmem:[%s7391_s6 + $0xca0] sm:$0xff] }
 0x192   :  { %7803 = vst [vmem:[#allocation410_spill] sm:$0xff] %v5621_v16  ;;  %v5646_v16 = vld [vmem:[%s7391_s6 + $0xca8] sm:$0xff] }
 0x193   :  { %7804 = vst [vmem:[#allocation411_spill] sm:$0xff] %v5626_v32  ;;  %v5651_v32 = vld [vmem:[%s7391_s6 + $0xcb0] sm:$0xff] }
 0x194   :  { %7805 = vst [vmem:[#allocation412_spill] sm:$0xff] %v5631_v0  ;;  %v5656_v0 = vld [vmem:[%s7391_s6 + $0xcb8] sm:$0xff] }
 0x195   :  { %7806 = vst [vmem:[#allocation413_spill] sm:$0xff] %v5636_v49  ;;  %v5661_v49 = vld [vmem:[%s7391_s6 + $0xcc0] sm:$0xff] }
 0x196   :  { %7807 = vst [vmem:[#allocation414_spill] sm:$0xff] %v5641_v48  ;;  %v5666_v48 = vld [vmem:[%s7391_s6 + $0xcc8] sm:$0xff] }
 0x197   :  { %7808 = vst [vmem:[#allocation415_spill] sm:$0xff] %v5646_v16  ;;  %v5671_v16 = vld [vmem:[%s7391_s6 + $0xcd0] sm:$0xff] }
 0x198   :  { %7809 = vst [vmem:[#allocation416_spill] sm:$0xff] %v5651_v32  ;;  %v5676_v32 = vld [vmem:[%s7391_s6 + $0xcd8] sm:$0xff] }
 0x199   :  { %7810 = vst [vmem:[#allocation417_spill] sm:$0xff] %v5656_v0  ;;  %v5681_v0 = vld [vmem:[%s7391_s6 + $0xce0] sm:$0xff] }
 0x19a   :  { %7811 = vst [vmem:[#allocation418_spill] sm:$0xff] %v5661_v49  ;;  %v5686_v49 = vld [vmem:[%s7391_s6 + $0xce8] sm:$0xff] }
 0x19b   :  { %7812 = vst [vmem:[#allocation419_spill] sm:$0xff] %v5666_v48  ;;  %v5691_v48 = vld [vmem:[%s7391_s6 + $0xcf0] sm:$0xff] }
 0x19c   :  { %7813 = vst [vmem:[#allocation420_spill] sm:$0xff] %v5671_v16  ;;  %v5696_v16 = vld [vmem:[%s7391_s6 + $0xcf8] sm:$0xff] }
 0x19d   :  { %7814 = vst [vmem:[#allocation421_spill] sm:$0xff] %v5676_v32  ;;  %v5701_v32 = vld [vmem:[%s7391_s6 + $0xd00] sm:$0xff] }
 0x19e   :  { %7815 = vst [vmem:[#allocation422_spill] sm:$0xff] %v5681_v0  ;;  %v5706_v0 = vld [vmem:[%s7391_s6 + $0xd08] sm:$0xff] }
 0x19f   :  { %7816 = vst [vmem:[#allocation423_spill] sm:$0xff] %v5686_v49  ;;  %v5711_v49 = vld [vmem:[%s7391_s6 + $0xd10] sm:$0xff] }
 0x1a0   :  { %7817 = vst [vmem:[#allocation424_spill] sm:$0xff] %v5691_v48  ;;  %v5716_v48 = vld [vmem:[%s7391_s6 + $0xd18] sm:$0xff] }
 0x1a1   :  { %7818 = vst [vmem:[#allocation425_spill] sm:$0xff] %v5696_v16  ;;  %v5721_v16 = vld [vmem:[%s7391_s6 + $0xd20] sm:$0xff] }
 0x1a2   :  { %7819 = vst [vmem:[#allocation426_spill] sm:$0xff] %v5701_v32  ;;  %v5726_v32 = vld [vmem:[%s7391_s6 + $0xd28] sm:$0xff] }
 0x1a3   :  { %7820 = vst [vmem:[#allocation427_spill] sm:$0xff] %v5706_v0  ;;  %v5731_v0 = vld [vmem:[%s7391_s6 + $0xd30] sm:$0xff] }
 0x1a4   :  { %7821 = vst [vmem:[#allocation428_spill] sm:$0xff] %v5711_v49  ;;  %v5736_v49 = vld [vmem:[%s7391_s6 + $0xd38] sm:$0xff] }
 0x1a5   :  { %7822 = vst [vmem:[#allocation429_spill] sm:$0xff] %v5716_v48  ;;  %v5741_v48 = vld [vmem:[%s7391_s6 + $0xd40] sm:$0xff] }
 0x1a6   :  { %7823 = vst [vmem:[#allocation430_spill] sm:$0xff] %v5721_v16  ;;  %v5746_v16 = vld [vmem:[%s7391_s6 + $0xd48] sm:$0xff] }
 0x1a7   :  { %7824 = vst [vmem:[#allocation431_spill] sm:$0xff] %v5726_v32  ;;  %v5751_v32 = vld [vmem:[%s7391_s6 + $0xd50] sm:$0xff] }
 0x1a8   :  { %7825 = vst [vmem:[#allocation432_spill] sm:$0xff] %v5731_v0  ;;  %v5756_v0 = vld [vmem:[%s7391_s6 + $0xd58] sm:$0xff] }
 0x1a9   :  { %7826 = vst [vmem:[#allocation433_spill] sm:$0xff] %v5736_v49  ;;  %v5761_v49 = vld [vmem:[%s7391_s6 + $0xd60] sm:$0xff] }
 0x1aa   :  { %7827 = vst [vmem:[#allocation434_spill] sm:$0xff] %v5741_v48  ;;  %v5766_v48 = vld [vmem:[%s7391_s6 + $0xd68] sm:$0xff] }
 0x1ab   :  { %7828 = vst [vmem:[#allocation435_spill] sm:$0xff] %v5746_v16  ;;  %v5771_v16 = vld [vmem:[%s7391_s6 + $0xd70] sm:$0xff] }
 0x1ac   :  { %7829 = vst [vmem:[#allocation436_spill] sm:$0xff] %v5751_v32  ;;  %v5776_v32 = vld [vmem:[%s7391_s6 + $0xd78] sm:$0xff] }
 0x1ad   :  { %7830 = vst [vmem:[#allocation437_spill] sm:$0xff] %v5756_v0  ;;  %v5781_v0 = vld [vmem:[%s7391_s6 + $0xd80] sm:$0xff] }
 0x1ae   :  { %7831 = vst [vmem:[#allocation438_spill] sm:$0xff] %v5761_v49  ;;  %v5786_v49 = vld [vmem:[%s7391_s6 + $0xd88] sm:$0xff] }
 0x1af   :  { %7832 = vst [vmem:[#allocation439_spill] sm:$0xff] %v5766_v48  ;;  %v5791_v48 = vld [vmem:[%s7391_s6 + $0xd90] sm:$0xff] }
 0x1b0   :  { %7833 = vst [vmem:[#allocation440_spill] sm:$0xff] %v5771_v16  ;;  %v5796_v16 = vld [vmem:[%s7391_s6 + $0xd98] sm:$0xff] }
 0x1b1   :  { %7834 = vst [vmem:[#allocation441_spill] sm:$0xff] %v5776_v32  ;;  %v5801_v32 = vld [vmem:[%s7391_s6 + $0xda0] sm:$0xff] }
 0x1b2   :  { %7835 = vst [vmem:[#allocation442_spill] sm:$0xff] %v5781_v0  ;;  %v5806_v0 = vld [vmem:[%s7391_s6 + $0xda8] sm:$0xff] }
 0x1b3   :  { %7836 = vst [vmem:[#allocation443_spill] sm:$0xff] %v5786_v49  ;;  %v5811_v49 = vld [vmem:[%s7391_s6 + $0xdb0] sm:$0xff] }
 0x1b4   :  { %7837 = vst [vmem:[#allocation444_spill] sm:$0xff] %v5791_v48  ;;  %v5816_v48 = vld [vmem:[%s7391_s6 + $0xdb8] sm:$0xff] }
 0x1b5   :  { %7838 = vst [vmem:[#allocation445_spill] sm:$0xff] %v5796_v16  ;;  %v5821_v16 = vld [vmem:[%s7391_s6 + $0xdc0] sm:$0xff] }
 0x1b6   :  { %7839 = vst [vmem:[#allocation446_spill] sm:$0xff] %v5801_v32  ;;  %v5826_v32 = vld [vmem:[%s7391_s6 + $0xdc8] sm:$0xff] }
 0x1b7   :  { %7840 = vst [vmem:[#allocation447_spill] sm:$0xff] %v5806_v0  ;;  %v5831_v0 = vld [vmem:[%s7391_s6 + $0xdd0] sm:$0xff] }
 0x1b8   :  { %7841 = vst [vmem:[#allocation448_spill] sm:$0xff] %v5811_v49  ;;  %v5836_v49 = vld [vmem:[%s7391_s6 + $0xdd8] sm:$0xff] }
 0x1b9   :  { %7842 = vst [vmem:[#allocation449_spill] sm:$0xff] %v5816_v48  ;;  %v5841_v48 = vld [vmem:[%s7391_s6 + $0xde0] sm:$0xff] }
 0x1ba   :  { %7843 = vst [vmem:[#allocation450_spill] sm:$0xff] %v5821_v16  ;;  %v5846_v16 = vld [vmem:[%s7391_s6 + $0xde8] sm:$0xff] }
 0x1bb   :  { %7844 = vst [vmem:[#allocation451_spill] sm:$0xff] %v5826_v32  ;;  %v5851_v32 = vld [vmem:[%s7391_s6 + $0xdf0] sm:$0xff] }
 0x1bc   :  { %7845 = vst [vmem:[#allocation452_spill] sm:$0xff] %v5831_v0  ;;  %v5856_v0 = vld [vmem:[%s7391_s6 + $0xdf8] sm:$0xff] }
 0x1bd   :  { %7846 = vst [vmem:[#allocation453_spill] sm:$0xff] %v5836_v49  ;;  %v5861_v49 = vld [vmem:[%s7391_s6 + $0xe00] sm:$0xff] }
 0x1be   :  { %7847 = vst [vmem:[#allocation454_spill] sm:$0xff] %v5841_v48  ;;  %v5866_v48 = vld [vmem:[%s7391_s6 + $0xe08] sm:$0xff] }
 0x1bf   :  { %7848 = vst [vmem:[#allocation455_spill] sm:$0xff] %v5846_v16  ;;  %v5871_v16 = vld [vmem:[%s7391_s6 + $0xe10] sm:$0xff] }
 0x1c0   :  { %7849 = vst [vmem:[#allocation456_spill] sm:$0xff] %v5851_v32  ;;  %v5876_v32 = vld [vmem:[%s7391_s6 + $0xe18] sm:$0xff] }
 0x1c1   :  { %7850 = vst [vmem:[#allocation457_spill] sm:$0xff] %v5856_v0  ;;  %v5881_v0 = vld [vmem:[%s7391_s6 + $0xe20] sm:$0xff] }
 0x1c2   :  { %7851 = vst [vmem:[#allocation458_spill] sm:$0xff] %v5861_v49  ;;  %v5886_v49 = vld [vmem:[%s7391_s6 + $0xe28] sm:$0xff] }
 0x1c3   :  { %7852 = vst [vmem:[#allocation459_spill] sm:$0xff] %v5866_v48  ;;  %v5891_v48 = vld [vmem:[%s7391_s6 + $0xe30] sm:$0xff] }
 0x1c4   :  { %7853 = vst [vmem:[#allocation460_spill] sm:$0xff] %v5871_v16  ;;  %v5896_v16 = vld [vmem:[%s7391_s6 + $0xe38] sm:$0xff] }
 0x1c5   :  { %7854 = vst [vmem:[#allocation461_spill] sm:$0xff] %v5876_v32  ;;  %v5901_v32 = vld [vmem:[%s7391_s6 + $0xe40] sm:$0xff] }
 0x1c6   :  { %7855 = vst [vmem:[#allocation462_spill] sm:$0xff] %v5881_v0  ;;  %v5906_v0 = vld [vmem:[%s7391_s6 + $0xe48] sm:$0xff] }
 0x1c7   :  { %7856 = vst [vmem:[#allocation463_spill] sm:$0xff] %v5886_v49  ;;  %v5911_v49 = vld [vmem:[%s7391_s6 + $0xe50] sm:$0xff] }
 0x1c8   :  { %7857 = vst [vmem:[#allocation464_spill] sm:$0xff] %v5891_v48  ;;  %v5916_v48 = vld [vmem:[%s7391_s6 + $0xe58] sm:$0xff] }
 0x1c9   :  { %7858 = vst [vmem:[#allocation465_spill] sm:$0xff] %v5896_v16  ;;  %v5921_v16 = vld [vmem:[%s7391_s6 + $0xe60] sm:$0xff] }
 0x1ca   :  { %7859 = vst [vmem:[#allocation466_spill] sm:$0xff] %v5901_v32  ;;  %v5926_v32 = vld [vmem:[%s7391_s6 + $0xe68] sm:$0xff] }
 0x1cb   :  { %7860 = vst [vmem:[#allocation467_spill] sm:$0xff] %v5906_v0  ;;  %v5931_v0 = vld [vmem:[%s7391_s6 + $0xe70] sm:$0xff] }
 0x1cc   :  { %7861 = vst [vmem:[#allocation468_spill] sm:$0xff] %v5911_v49  ;;  %v5936_v49 = vld [vmem:[%s7391_s6 + $0xe78] sm:$0xff] }
 0x1cd   :  { %7862 = vst [vmem:[#allocation469_spill] sm:$0xff] %v5916_v48  ;;  %v5941_v48 = vld [vmem:[%s7391_s6 + $0xe80] sm:$0xff] }
 0x1ce   :  { %7863 = vst [vmem:[#allocation470_spill] sm:$0xff] %v5921_v16  ;;  %v5946_v16 = vld [vmem:[%s7391_s6 + $0xe88] sm:$0xff] }
 0x1cf   :  { %7864 = vst [vmem:[#allocation471_spill] sm:$0xff] %v5926_v32  ;;  %v5951_v32 = vld [vmem:[%s7391_s6 + $0xe90] sm:$0xff] }
 0x1d0   :  { %7865 = vst [vmem:[#allocation472_spill] sm:$0xff] %v5931_v0  ;;  %v5956_v0 = vld [vmem:[%s7391_s6 + $0xe98] sm:$0xff] }
 0x1d1   :  { %7866 = vst [vmem:[#allocation473_spill] sm:$0xff] %v5936_v49  ;;  %v5961_v49 = vld [vmem:[%s7391_s6 + $0xea0] sm:$0xff] }
 0x1d2   :  { %7867 = vst [vmem:[#allocation474_spill] sm:$0xff] %v5941_v48  ;;  %v5966_v48 = vld [vmem:[%s7391_s6 + $0xea8] sm:$0xff] }
 0x1d3   :  { %7868 = vst [vmem:[#allocation475_spill] sm:$0xff] %v5946_v16  ;;  %v5971_v16 = vld [vmem:[%s7391_s6 + $0xeb0] sm:$0xff] }
 0x1d4   :  { %7869 = vst [vmem:[#allocation476_spill] sm:$0xff] %v5951_v32  ;;  %v5976_v32 = vld [vmem:[%s7391_s6 + $0xeb8] sm:$0xff] }
 0x1d5   :  { %7870 = vst [vmem:[#allocation477_spill] sm:$0xff] %v5956_v0  ;;  %v5981_v0 = vld [vmem:[%s7391_s6 + $0xec0] sm:$0xff] }
 0x1d6   :  { %7871 = vst [vmem:[#allocation478_spill] sm:$0xff] %v5961_v49  ;;  %v5986_v49 = vld [vmem:[%s7391_s6 + $0xec8] sm:$0xff] }
 0x1d7   :  { %7872 = vst [vmem:[#allocation479_spill] sm:$0xff] %v5966_v48  ;;  %v5991_v48 = vld [vmem:[%s7391_s6 + $0xed0] sm:$0xff] }
 0x1d8   :  { %7873 = vst [vmem:[#allocation480_spill] sm:$0xff] %v5971_v16  ;;  %v5996_v16 = vld [vmem:[%s7391_s6 + $0xed8] sm:$0xff] }
 0x1d9   :  { %7874 = vst [vmem:[#allocation481_spill] sm:$0xff] %v5976_v32  ;;  %v6001_v32 = vld [vmem:[%s7391_s6 + $0xee0] sm:$0xff] }
 0x1da   :  { %7875 = vst [vmem:[#allocation482_spill] sm:$0xff] %v5981_v0  ;;  %v6006_v0 = vld [vmem:[%s7391_s6 + $0xee8] sm:$0xff] }
 0x1db   :  { %7876 = vst [vmem:[#allocation483_spill] sm:$0xff] %v5986_v49  ;;  %v6011_v49 = vld [vmem:[%s7391_s6 + $0xef0] sm:$0xff] }
 0x1dc   :  { %7877 = vst [vmem:[#allocation484_spill] sm:$0xff] %v5991_v48  ;;  %v6016_v48 = vld [vmem:[%s7391_s6 + $0xef8] sm:$0xff] }
 0x1dd   :  { %7878 = vst [vmem:[#allocation485_spill] sm:$0xff] %v5996_v16  ;;  %v6021_v16 = vld [vmem:[%s7391_s6 + $0xf00] sm:$0xff] }
 0x1de   :  { %7879 = vst [vmem:[#allocation486_spill] sm:$0xff] %v6001_v32  ;;  %v6026_v32 = vld [vmem:[%s7391_s6 + $0xf08] sm:$0xff] }
 0x1df   :  { %7880 = vst [vmem:[#allocation487_spill] sm:$0xff] %v6006_v0  ;;  %v6031_v0 = vld [vmem:[%s7391_s6 + $0xf10] sm:$0xff] }
 0x1e0   :  { %7881 = vst [vmem:[#allocation488_spill] sm:$0xff] %v6011_v49  ;;  %v6036_v49 = vld [vmem:[%s7391_s6 + $0xf18] sm:$0xff] }
 0x1e1   :  { %7882 = vst [vmem:[#allocation489_spill] sm:$0xff] %v6016_v48  ;;  %v6041_v48 = vld [vmem:[%s7391_s6 + $0xf20] sm:$0xff] }
 0x1e2   :  { %7883 = vst [vmem:[#allocation490_spill] sm:$0xff] %v6021_v16  ;;  %v6046_v16 = vld [vmem:[%s7391_s6 + $0xf28] sm:$0xff] }
 0x1e3   :  { %7884 = vst [vmem:[#allocation491_spill] sm:$0xff] %v6026_v32  ;;  %v6051_v32 = vld [vmem:[%s7391_s6 + $0xf30] sm:$0xff] }
 0x1e4   :  { %7885 = vst [vmem:[#allocation492_spill] sm:$0xff] %v6031_v0  ;;  %v6056_v0 = vld [vmem:[%s7391_s6 + $0xf38] sm:$0xff] }
 0x1e5   :  { %7886 = vst [vmem:[#allocation493_spill] sm:$0xff] %v6036_v49  ;;  %v6061_v49 = vld [vmem:[%s7391_s6 + $0xf40] sm:$0xff] }
 0x1e6   :  { %7887 = vst [vmem:[#allocation494_spill] sm:$0xff] %v6041_v48  ;;  %v6066_v48 = vld [vmem:[%s7391_s6 + $0xf48] sm:$0xff] }
 0x1e7   :  { %7888 = vst [vmem:[#allocation495_spill] sm:$0xff] %v6046_v16  ;;  %v6071_v16 = vld [vmem:[%s7391_s6 + $0xf50] sm:$0xff] }
 0x1e8   :  { %7889 = vst [vmem:[#allocation496_spill] sm:$0xff] %v6051_v32  ;;  %v6076_v32 = vld [vmem:[%s7391_s6 + $0xf58] sm:$0xff] }
 0x1e9   :  { %7890 = vst [vmem:[#allocation497_spill] sm:$0xff] %v6056_v0  ;;  %v6081_v0 = vld [vmem:[%s7391_s6 + $0xf60] sm:$0xff] }
 0x1ea   :  { %7891 = vst [vmem:[#allocation498_spill] sm:$0xff] %v6061_v49  ;;  %v6086_v49 = vld [vmem:[%s7391_s6 + $0xf68] sm:$0xff] }
 0x1eb   :  { %7892 = vst [vmem:[#allocation499_spill] sm:$0xff] %v6066_v48  ;;  %v6091_v48 = vld [vmem:[%s7391_s6 + $0xf70] sm:$0xff] }
 0x1ec   :  { %7893 = vst [vmem:[#allocation500_spill] sm:$0xff] %v6071_v16  ;;  %v6096_v16 = vld [vmem:[%s7391_s6 + $0xf78] sm:$0xff] }
 0x1ed   :  { %7894 = vst [vmem:[#allocation501_spill] sm:$0xff] %v6076_v32  ;;  %v6101_v32 = vld [vmem:[%s7391_s6 + $0xf80] sm:$0xff] }
 0x1ee   :  { %7895 = vst [vmem:[#allocation502_spill] sm:$0xff] %v6081_v0  ;;  %v6106_v0 = vld [vmem:[%s7391_s6 + $0xf88] sm:$0xff] }
 0x1ef   :  { %7896 = vst [vmem:[#allocation503_spill] sm:$0xff] %v6086_v49  ;;  %v6111_v49 = vld [vmem:[%s7391_s6 + $0xf90] sm:$0xff] }
 0x1f0   :  { %7897 = vst [vmem:[#allocation504_spill] sm:$0xff] %v6091_v48  ;;  %v6116_v48 = vld [vmem:[%s7391_s6 + $0xf98] sm:$0xff] }
 0x1f1   :  { %7898 = vst [vmem:[#allocation505_spill] sm:$0xff] %v6096_v16  ;;  %v6121_v16 = vld [vmem:[%s7391_s6 + $0xfa0] sm:$0xff] }
 0x1f2   :  { %7899 = vst [vmem:[#allocation506_spill] sm:$0xff] %v6101_v32  ;;  %v6126_v32 = vld [vmem:[%s7391_s6 + $0xfa8] sm:$0xff] }
 0x1f3   :  { %7900 = vst [vmem:[#allocation507_spill] sm:$0xff] %v6106_v0  ;;  %v6131_v0 = vld [vmem:[%s7391_s6 + $0xfb0] sm:$0xff] }
 0x1f4   :  { %7901 = vst [vmem:[#allocation508_spill] sm:$0xff] %v6111_v49  ;;  %v6136_v49 = vld [vmem:[%s7391_s6 + $0xfb8] sm:$0xff] }
 0x1f5   :  { %7902 = vst [vmem:[#allocation509_spill] sm:$0xff] %v6116_v48  ;;  %v6141_v48 = vld [vmem:[%s7391_s6 + $0xfc0] sm:$0xff] }
 0x1f6   :  { %7903 = vst [vmem:[#allocation510_spill] sm:$0xff] %v6121_v16  ;;  %v6146_v16 = vld [vmem:[%s7391_s6 + $0xfc8] sm:$0xff] }
 0x1f7   :  { %7904 = vst [vmem:[#allocation511_spill] sm:$0xff] %v6126_v32  ;;  %v6151_v32 = vld [vmem:[%s7391_s6 + $0xfd0] sm:$0xff] }
 0x1f8   :  { %7905 = vst [vmem:[#allocation512_spill] sm:$0xff] %v6131_v0  ;;  %v6156_v0 = vld [vmem:[%s7391_s6 + $0xfd8] sm:$0xff] }
 0x1f9   :  { %7906 = vst [vmem:[#allocation513_spill] sm:$0xff] %v6136_v49  ;;  %v6161_v49 = vld [vmem:[%s7391_s6 + $0xfe0] sm:$0xff] }
 0x1fa   :  { %7907 = vst [vmem:[#allocation514_spill] sm:$0xff] %v6141_v48  ;;  %v6166_v48 = vld [vmem:[%s7391_s6 + $0xfe8] sm:$0xff] }
 0x1fb   :  { %7908 = vst [vmem:[#allocation515_spill] sm:$0xff] %v6146_v16  ;;  %v6171_v16 = vld [vmem:[%s7391_s6 + $0xff0] sm:$0xff] }
 0x1fc   :  { %7909 = vst [vmem:[#allocation516_spill] sm:$0xff] %v6151_v32  ;;  %v6176_v32 = vld [vmem:[%s7391_s6 + $0xff8] sm:$0xff] }
 0x1fd   :  { %7910 = vst [vmem:[#allocation517_spill] sm:$0xff] %v6156_v0  ;;  %v6181_v0 = vld [vmem:[%s7386_s1 + $0x8] sm:$0xff] }
 0x1fe   :  { %7911 = vst [vmem:[#allocation518_spill] sm:$0xff] %v6161_v49  ;;  %v3567_v49 = vmov 4  }
 0x1ff   :  { %7912 = vst [vmem:[#allocation519_spill] sm:$0xff] %v6166_v48  ;;  %3479 = vset.pattern.permute.xlu2 %v3567_v49 }
 0x200   :  { %7913 = vst [vmem:[#allocation520_spill] sm:$0xff] %v6171_v16 }
 0x201   :  { %7914 = vst [vmem:[#allocation521_spill] sm:$0xff] %v6176_v32 }
 0x202   :  { %7915 = vst [vmem:[#allocation522_spill] sm:$0xff] %v6181_v0 }
 0x203   :  { %1064 = vsyncadd [#allocation4], 65536  ;;  %v3569_v48 = vmov 2   ;;  %1106 = vperm.xlu2 %3479, %v6181_v0   ;;  %1098 = vperm.xlu1 %3478, %v6181_v0   ;;  %v6189_v16 = vld [vmem:[%s7386_s1] sm:$0xff]  ;;  %v3570_v17 = vmov 1   ;;  %v7393_v49 = vmov 0  }
 0x204   :  { %3477 = vset.pattern.permute.xlu0 %v3569_v48  ;;  %7916 = vst [vmem:[#allocation523_spill] sm:$0xff] %v6189_v16  ;;  %v3571_v48 = vmov 5   ;;  %s3573_s18 = smov 127   ;;  %v3439_v50 = vld [vmem:[%s7385_s0 + $0x4] sm:$0xf]  ;;  %vm1346_vm0 = vcmask 654336  }
 0x205   :  { %1090 = vperm.xlu0 %3477, %v6181_v0   ;;  %v6227_v19 = vperm.slane %v3439_v50, 1  ;;  %v6310_v40 = vperm.slane %v3439_v50, 3  ;;  %v6314_v8 = vperm.slane %v3439_v50, 0  ;;  %vm1425_vm1 = vcmask 949248  }
 0x207   :  { %7917 = vst [vmem:[#allocation524_spill] sm:$0xff] %v6227_v19 }
 0x20b   :  { %1102 = vperm.xlu2 %3479, %v6189_v16   ;;  %1094 = vperm.xlu1 %3478, %v6189_v16  }
 0x20d   :  { %1086 = vperm.xlu0 %3477, %v6189_v16  }
 0x213   :  { %3482 = vset.pattern.permute.xlu2 %v3570_v17  ;;  %3481 = vset.pattern.permute.xlu1 %v3571_v48  ;;  %v1145_v17 = vld [vmem:[%s7385_s0] sm:$0xf]  ;;  %s3574_s0 = smov 126  }
 0x214   :  { %1110 = vperm.xlu1 %3481, %v6189_v16   ;;  %1082 = vperm.xlu2 %3482, %v6181_v0   ;;  %v6214_v1 = vperm.slane %v1145_v17, 2  ;;  %v6308_v24 = vperm.slane %v1145_v17, 3 }
 0x215   :  { %3480 = vset.pattern.permute.xlu0 %v3571_v48  ;;  %v6205_v48 = vperm.slane %v1145_v17, 0 }
 0x216   :  { %1114 = vperm.xlu0 %3480, %v6181_v0  }
 0x21c   :  { %3483 = vset.pattern.permute.xlu1 %v7393_v49  ;;  %1078 = vperm.xlu2 %3482, %v6189_v16  }
 0x21d   :  { %1074 = vperm.xlu1 %3483, %v6181_v0  }
 0x21e   :  { %3484 = vset.pattern.permute.xlu0 %v7393_v49  ;;  %v6212_v49 = vperm.slane %v1145_v17, 1 }
 0x21f   :  { %1069 = vperm.xlu0 %3484, %v6189_v16  }
 0x25d   :  { %v6207_v32 = vpop.permute.xlu2 %1106 }
 0x25e   :  { %v1191_v33 = vmul.f32 %v6205_v48, %v6207_v32  ;;  %v1287_v25 = vmul.f32 %v6214_v1, %v6207_v32  ;;  %v1163_v17 = vmul.f32 %v6308_v24, %v6207_v32 }
 0x260   :  { %1196 = vrot.lane.b32.xlu0 %v1191_v33, %s3573_s18  ;;  %v6229_v33 = vperm.slane %v3439_v50, 2 }
 0x262   :  { %7918 = vst [vmem:[#allocation525_spill] sm:$0xff] %v6229_v33 }
 0x265   :  { %v6231_v35 = vpop.permute.xlu2 %1102 }
 0x266   :  { %v6323_v41 = vmul.f32 %v6212_v49, %v6231_v35  ;;  %v1162_v9 = vmul.f32 %v6308_v24, %v6231_v35 }
 0x26e   :  { %v6269_v54 = vpop.permute.xlu2 %1082 }
 0x26f   :  { %v1215_v50 = vmul.f32 %v6214_v1, %v6269_v54  ;;  %v1669_v26 = vmul.f32 %v6229_v33, %v6269_v54  ;;  %v1605_v42 = vmul.f32 %v6314_v8, %v6269_v54  ;;  %v1633_v10 = vmul.f32 %v6227_v19, %v6269_v54 }
 0x275   :  { %v6219_v18 = vpop.permute.xlu1 %1098 }
 0x276   :  { %v1223_v2 = vmul.f32 %v6205_v48, %v6219_v18  ;;  %v6243_v20 = vmul.f32 %v6214_v1, %v6219_v18  ;;  %v6253_v4 = vmul.f32 %v6229_v33, %v6219_v18  ;;  %v6317_v57 = vpop.permute.xlu2 %1078  ;;  %v1187_v43 = vmul.f32 %v6308_v24, %v6219_v18 }
 0x277   :  { %v6221_v34 = vpop.permute.xlu0 %1090  ;;  %v1214_v11 = vmul.f32 %v6214_v1, %v6317_v57  ;;  %v1178_v60 = vmul.f32 %v6212_v49, %v6317_v57  ;;  %v1150_v28 = vmul.f32 %v6205_v48, %v6317_v57  ;;  %v1641_v12 = vmul.f32 %v6310_v40, %v6219_v18 }
 0x278   :  { %v1263_v51 = vmul.f32 %v6205_v48, %v6221_v34  ;;  %v6235_v3 = vmul.f32 %v6214_v1, %v6221_v34  ;;  %v6239_v52 = vmul.f32 %v6212_v49, %v6221_v34  ;;  %1228 = vrot.lane.b32.xlu2 %v1223_v2, %s3573_s18  ;;  %v6249_v36 = vmul.f32 %v6227_v19, %v6221_v34 }
 0x279   :  { %v6257_v53 = vmul.f32 %v6229_v33, %v6221_v34  ;;  %v1275_v2 = vmul.f32 %v6212_v49, %v6219_v18  ;;  %v1219_v58 = vmul.f32 %v6308_v24, %v6221_v34  ;;  %v1673_v44 = vmul.f32 %v6310_v40, %v6221_v34 }
 0x27a   :  { %1268 = vrot.lane.b32.xlu1 %v1263_v51, %s3573_s18  ;;  %v1668_v29 = vmul.f32 %v6229_v33, %v6317_v57  ;;  %v1632_v45 = vmul.f32 %v6227_v19, %v6317_v57  ;;  %v1604_v13 = vmul.f32 %v6314_v8, %v6317_v57 }
 0x27d   :  { %v6259_v21 = vpop.permute.xlu1 %1094 }
 0x27e   :  { %7919 = vst [vmem:[#allocation526_spill] sm:$0xff] %v6259_v21  ;;  %v1274_v51 = vmul.f32 %v6212_v49, %v6259_v21  ;;  %v6281_v6 = vmul.f32 %v6214_v1, %v6259_v21  ;;  %v6296_v39 = vmul.f32 %v6229_v33, %v6259_v21  ;;  %v1186_v14 = vmul.f32 %v6308_v24, %v6259_v21 }
 0x27f   :  { %v6261_v37 = vpop.permute.xlu0 %1086  ;;  %v1640_v31 = vmul.f32 %v6310_v40, %v6259_v21 }
 0x280   :  { %v1262_v5 = vmul.f32 %v6205_v48, %v6261_v37  ;;  %v6273_v22 = vmul.f32 %v6214_v1, %v6261_v37  ;;  %v6277_v38 = vmul.f32 %v6212_v49, %v6261_v37  ;;  %1280 = vrot.lane.b32.xlu2 %v1275_v2, %s3573_s18  ;;  %1278 = vrot.lane.b32.xlu0 %v1274_v51, %s3573_s18 }
 0x281   :  { %v6288_v55 = vmul.f32 %v6229_v33, %v6261_v37  ;;  %v6292_v23 = vmul.f32 %v6227_v19, %v6261_v37  ;;  %v1235_v2 = vmul.f32 %v6212_v49, %v6207_v32  ;;  %v1222_v51 = vmul.f32 %v6205_v48, %v6259_v21 }
 0x282   :  { %1266 = vrot.lane.b32.xlu1 %v1262_v5, %s3573_s18  ;;  %v1190_v5 = vmul.f32 %v6205_v48, %v6231_v35  ;;  %v1218_v61 = vmul.f32 %v6308_v24, %v6261_v37  ;;  %v1672_v63 = vmul.f32 %v6310_v40, %v6261_v37 }
 0x286   :  { %v6298_v7 = vpop.permute.xlu1 %1110 }
 0x287   :  { %v1166_v46 = vmul.f32 %v6205_v48, %v6298_v7 }
 0x288   :  { %v6300_v56 = vpop.permute.xlu0 %1114  ;;  %1240 = vrot.lane.b32.xlu2 %v1235_v2, %s3573_s18  ;;  %1194 = vrot.lane.b32.xlu0 %v1190_v5, %s3573_s18  ;;  %v6329_v2 = vmul.f32 %v6310_v40, %v6207_v32  ;;  %v1179_v5 = vmul.f32 %v6212_v49, %v6269_v54 }
 0x289   :  { %v1247_v59 = vmul.f32 %v6214_v1, %v6300_v56  ;;  %v1167_v27 = vmul.f32 %v6205_v48, %v6300_v56 }
 0x28a   :  { %1226 = vrot.lane.b32.xlu1 %v1222_v51, %s3573_s18  ;;  %v1151_v51 = vmul.f32 %v6205_v48, %v6269_v54 }
 0x28f   :  { %v6371_v62 = vpop.permute.xlu1 %1074 }
 0x290   :  { %1252 = vrot.lane.b32.xlu0 %v1247_v59, %s3573_s18  ;;  %1172 = vrot.lane.b32.xlu2 %v1167_v27, %s3573_s18  ;;  %v1217_v47 = vadd.f32 %v1215_v50, %v6371_v62  ;;  %v1181_v15 = vadd.f32 %v1179_v5, %v6371_v62  ;;  %v1153_v0 = vadd.f32 %v1151_v51, %v6371_v62 }
 0x291   :  { %v6373_v30 = vpop.permute.xlu0 %1069  ;;  %v1671_v19 = vadd.f32 %v1669_v26, %v6371_v62  ;;  %v1607_v50 = vadd.f32 %v1605_v42, %v6371_v62 }
 0x292   :  { %1292 = vrot.lane.b32.xlu1 %v1287_v25, %s3573_s18  ;;  %v1216_v48 = vadd.f32 %v1214_v11, %v6373_v30  ;;  %v1180_v16 = vadd.f32 %v1178_v60, %v6373_v30  ;;  %v1152_v33 = vadd.f32 %v1150_v28, %v6373_v30  ;;  %v1221_v21 = vadd.f32 %v1219_v58, %v1217_v47 }
 0x293   :  { %v1185_v59 = vadd.f32 %v6235_v3, %v1181_v15  ;;  %v1157_v27 = vadd.f32 %v6239_v52, %v1153_v0  ;;  %v6400_v11 = vadd.f32 %v1673_v44, %v1671_v19  ;;  %v1611_v26 = vadd.f32 %v6249_v36, %v1607_v50 }
 0x294   :  { %v6396_v5 = vadd.f32 %v1218_v61, %v1216_v48  ;;  %v1184_v51 = vadd.f32 %v6273_v22, %v1180_v16  ;;  %v1156_v25 = vadd.f32 %v6277_v38, %v1152_v33  ;;  %v1635_v47 = vadd.f32 %v1633_v10, %v6371_v62 }
 0x295   :  { %v1189_v60 = vadd.f32 %v1187_v43, %v1185_v59  ;;  %v1161_v28 = vadd.f32 %v6243_v20, %v1157_v27  ;;  %v1670_v15 = vadd.f32 %v1668_v29, %v6373_v30  ;;  %v1634_v42 = vadd.f32 %v1632_v45, %v6373_v30 }
 0x296   :  { %v6405_v3 = vadd.f32 %v1186_v14, %v1184_v51  ;;  %v1160_v0 = vadd.f32 %v6281_v6, %v1156_v25  ;;  %v1615_v22 = vadd.f32 %v6253_v4, %v1611_v26  ;;  %v1639_v19 = vadd.f32 %v6257_v53, %v1635_v47 }
 0x297   :  { %v1165_v16 = vadd.f32 %v1163_v17, %v1161_v28  ;;  %v1606_v38 = vadd.f32 %v1604_v13, %v6373_v30  ;;  %v1203_v20 = vmul.f32 %v6212_v49, %v6300_v56  ;;  %v6417_v10 = vadd.f32 %v1672_v63, %v1670_v15 }
 0x298   :  { %v6415_v36 = vadd.f32 %v1162_v9, %v1160_v0  ;;  %v1638_v6 = vadd.f32 %v6288_v55, %v1634_v42  ;;  %1170 = vrot.lane.b32.xlu0 %v1166_v46, %s3573_s18  ;;  %1238 = vrot.lane.b32.xlu2 %v6323_v41, %s3573_s18  ;;  %v6424_v4 = vadd.f32 %v6329_v2, %v1615_v22 }
 0x299   :  { %v6426_v14 = vadd.f32 %v1641_v12, %v1639_v19  ;;  %v1610_v13 = vadd.f32 %v6292_v23, %v1606_v38  ;;  %v1616_v43 = vmul.f32 %v6310_v40, %v6231_v35  ;;  %v1298_v41 = vmul.f32 %v6308_v24, %v6298_v7 }
 0x29a   :  { %1208 = vrot.lane.b32.xlu1 %v1203_v20, %s3573_s18  ;;  %v6430_v9 = vadd.f32 %v1640_v31, %v1638_v6  ;;  %v1299_v12 = vmul.f32 %v6308_v24, %v6300_v56  ;;  %v1286_v23 = vmul.f32 %v6214_v1, %v6231_v35  ;;  %v1246_v31 = vmul.f32 %v6214_v1, %v6298_v7 }
 0x29b   :  { %v1614_v29 = vadd.f32 %v6296_v39, %v1610_v13  ;;  %v1202_v39 = vmul.f32 %v6212_v49, %v6298_v7  ;;  %v1259_v33 = vmul.f32 %v6308_v24, %v6269_v54  ;;  %v1258_v47 = vmul.f32 %v6308_v24, %v6317_v57 }
 0x29d   :  { %v6435_v44 = vadd.f32 %v1616_v43, %v1614_v29  ;;  %v1261_v2 = vadd.f32 %v1259_v33, %v6371_v62  ;;  %v1260_v20 = vadd.f32 %v1258_v47, %v6373_v30 }
 0x2a0   :  { %1302 = vrot.lane.b32.xlu0 %v1298_v41, %s3573_s18  ;;  %1304 = vrot.lane.b32.xlu2 %v1299_v12, %s3573_s18 }
 0x2a2   :  { %1290 = vrot.lane.b32.xlu1 %v1286_v23, %s3573_s18 }
 0x2a8   :  { %1250 = vrot.lane.b32.xlu2 %v1246_v31, %s3573_s18 }
 0x2aa   :  { %1206 = vrot.lane.b32.xlu1 %v1202_v39, %s3573_s18 }
 0x2d2   :  { %v1229_v45 = vpop.permute.xlu2 %1228  ;;  %v1197_v53 = vpop.permute.xlu0 %1196 }
 0x2d3   :  { %v1233_v25 = vadd.f32 %v1229_v45, %v1221_v21  ;;  %v1201_v15 = vadd.f32 %v1197_v53, %v1189_v60 }
 0x2da   :  { %v1281_v46 = vpop.permute.xlu2 %1280 }
 0x2e2   :  { %v1241_v52 = vpop.permute.xlu2 %1240 }
 0x2e3   :  { %v1245_v26 = vadd.f32 %v1241_v52, %v1233_v25 }
 0x2ea   :  { %v1173_v61 = vpop.permute.xlu2 %1172 }
 0x2eb   :  { %v1177_v38 = vadd.f32 %v1173_v61, %v1165_v16 }
 0x2ec   :  { %v1269_v55 = vpop.permute.xlu1 %1268 }
 0x2ed   :  { %v1273_v48 = vadd.f32 %v1269_v55, %v1261_v2 }
 0x2ef   :  { %v1285_v59 = vadd.f32 %v1281_v46, %v1273_v48  ;;  %v1717_v48 = vmul.f32 %v6314_v8, %v6221_v34 }
 0x2f2   :  { %v1279_v58 = vpop.permute.xlu0 %1278  ;;  %v1239_v49 = vpop.permute.xlu2 %1238 }
 0x2f4   :  { %v1267_v63 = vpop.permute.xlu1 %1266 }
 0x2f5   :  { %v1272_v29 = vadd.f32 %v1267_v63, %v1260_v20 }
 0x2f7   :  { %v1284_v23 = vadd.f32 %v1279_v58, %v1272_v29 }
 0x2fa   :  { %v1195_v17 = vpop.permute.xlu0 %1194  ;;  %v1305_v28 = vpop.permute.xlu2 %1304 }
 0x2fc   :  { %v1227_v1 = vpop.permute.xlu1 %1226 }
 0x2fd   :  { %v1232_v41 = vadd.f32 %v1227_v1, %v6396_v5  ;;  %v1200_v5 = vadd.f32 %v1195_v17, %v6405_v3  ;;  %v1716_v17 = vmul.f32 %v6314_v8, %v6261_v37  ;;  %v7922_v37 = vld [vmem:[#allocation525_spill] sm:$0xff] }
 0x2ff   :  { %v1244_v39 = vadd.f32 %v1239_v49, %v1232_v41 }
 0x302   :  { %v1253_v27 = vpop.permute.xlu0 %1252  ;;  %v1251_v60 = vpop.permute.xlu2 %1250 }
 0x303   :  { %v1257_v42 = vadd.f32 %v1253_v27, %v1245_v26  ;;  %v1256_v46 = vadd.f32 %v1251_v60, %v1244_v39  ;;  %v7920_v27 = vld [vmem:[#allocation526_spill] sm:$0xff] }
 0x304   :  { %v1293_v50 = vpop.permute.xlu1 %1292 }
 0x305   :  { %v1297_v51 = vadd.f32 %v1293_v50, %v1285_v59  ;;  %v1645_v59 = vmul.f32 %v6314_v8, %v6207_v32  ;;  %v1676_v50 = vmul.f32 %v6314_v8, %v7920_v27 }
 0x307   :  { %v1309_v0 = vadd.f32 %v1305_v28, %v1297_v51  ;;  %v7921_v51 = vld [vmem:[#allocation524_spill] sm:$0xff]  ;;  %v1741_v28 = vmul.f32 %v7922_v37, %v6207_v32 }
 0x308   :  { %v1729_v25 = vmul.f32 %v7921_v51, %v6219_v18  ;;  %v1728_v34 = vmul.f32 %v7921_v51, %v7920_v27  ;;  %v1689_v26 = vmul.f32 %v7921_v51, %v6207_v32  ;;  %v1657_v47 = vmul.f32 %v7921_v51, %v6300_v56 }
 0x309   :  { %v1315_v6 = vmax.f32 %v1257_v42, %v1309_v0  ;;  %v1621_v0 = vmul.f32 %v6314_v8, %v6300_v56  ;;  %v1701_v32 = vmul.f32 %v7922_v37, %v6300_v56  ;;  %v1688_v42 = vmul.f32 %v7921_v51, %v6231_v35 }
 0x30a   :  { %v1171_v19 = vpop.permute.xlu0 %1170 }
 0x30b   :  { %v6459_v21 = vmax.f32 %v1315_v6, 0.0  ;;  %v1176_v58 = vadd.f32 %v1171_v19, %v6415_v36  ;;  %v1677_v36 = vmul.f32 %v6314_v8, %v6219_v18  ;;  %v1644_v18 = vmul.f32 %v6314_v8, %v6231_v35 }
 0x30c   :  { %v1209_v22 = vpop.permute.xlu1 %1208  ;;  %v1656_v19 = vmul.f32 %v7921_v51, %v6298_v7 }
 0x30d   :  { %v1213_v13 = vadd.f32 %v1209_v22, %v1201_v15  ;;  %v1740_v15 = vmul.f32 %v7922_v37, %v6231_v35  ;;  %v1620_v22 = vmul.f32 %v6314_v8, %v6298_v7  ;;  %v1752_v35 = vmul.f32 %v6310_v40, %v6298_v7 }
 0x30e   :  { %v1700_v8 = vmul.f32 %v7922_v37, %v6298_v7 }
 0x30f   :  { %v1311_v43 = vmax.f32 %v1177_v38, %v1213_v13  ;;  %v1753_v38 = vmul.f32 %v6310_v40, %v6300_v56 }
 0x311   :  { %v6461_v12 = vmax.f32 %v1311_v43, 0.0 }
 0x312   :  { %v1303_v45 = vpop.permute.xlu0 %1302 }
 0x313   :  { %v3485_v24 = vpack.i.bf16 %v6459_v21, %v6461_v12 }
 0x314   :  { %v1291_v31 = vpop.permute.xlu1 %1290 }
 0x315   :  { %v1296_v16 = vadd.f32 %v1291_v31, %v1284_v23  ;;  %3486 = vrot.lane.b32.xlu1 %v3485_v24, %s3574_s0  ;;  %v3575_v23 = vmov 8   ;;  %v7923_v24 = vld [vmem:[#allocation523_spill] sm:$0xff] }
 0x316   :  { %3505 = vset.pattern.permute.xlu1 %v3575_v23  ;;  %3521 = vset.pattern.permute.xlu2 %v3575_v23 }
 0x317   :  { %v1308_v52 = vadd.f32 %v1303_v45, %v1296_v16  ;;  %3527 = vset.pattern.permute.xlu0 %v3575_v23 }
 0x319   :  { %v1314_v53 = vmax.f32 %v1256_v46, %v1308_v52 }
 0x31b   :  { %v6467_v55 = vmax.f32 %v1314_v53, 0.0 }
 0x31c   :  { %v1207_v61 = vpop.permute.xlu1 %1206 }
 0x31d   :  { %v1212_v63 = vadd.f32 %v1207_v61, %v1200_v5  ;;  %v3495_v33 = vpack.i.bf16 %v6467_v55, %v6459_v21  ;;  %v6547_v5 = vld [vmem:[%s7388_s3] sm:$0xff] }
 0x31f   :  { %v1310_v1 = vmax.f32 %v1176_v58, %v1212_v63  ;;  %3496 = vrot.lane.b32.xlu0 %v3495_v33, %s3573_s18  ;;  %v6560_v63 = vld [vmem:[%s7388_s3 + $0x8] sm:$0xff] }
 0x321   :  { %v6473_v2 = vmax.f32 %v1310_v1, 0.0 }
 0x323   :  { %v3500_v49 = vpack.i.bf16 %v6473_v2, %v6461_v12  ;;  %v3490_v3 = vpack.i.bf16 %v6467_v55, %v6473_v2 }
 0x325   :  { %3501 = vrot.lane.b32.xlu1 %v3500_v49, %s3573_s18  ;;  %3491 = vrot.lane.b32.xlu2 %v3490_v3, %s3574_s0 }
 0x327   :  { %1682 = vrot.lane.b32.xlu0 %v1677_v36, %s3573_s18 }
 0x32d   :  { %1720 = vrot.lane.b32.xlu1 %v1716_v17, %s3573_s18  ;;  %1722 = vrot.lane.b32.xlu2 %v1717_v48, %s3573_s18 }
 0x32f   :  { %1650 = vrot.lane.b32.xlu0 %v1645_v59, %s3573_s18 }
 0x335   :  { %1680 = vrot.lane.b32.xlu1 %v1676_v50, %s3573_s18  ;;  %1734 = vrot.lane.b32.xlu2 %v1729_v25, %s3573_s18  ;;  %v6583_v50 = vld [vmem:[%s7388_s3 + $0x18] sm:$0xff] }
 0x337   :  { %1732 = vrot.lane.b32.xlu0 %v1728_v34, %s3573_s18 }
 0x33d   :  { %1746 = vrot.lane.b32.xlu1 %v1741_v28, %s3573_s18  ;;  %1694 = vrot.lane.b32.xlu2 %v1689_v26, %s3573_s18 }
 0x33f   :  { %1648 = vrot.lane.b32.xlu0 %v1644_v18, %s3573_s18 }
 0x345   :  { %1662 = vrot.lane.b32.xlu1 %v1657_v47, %s3573_s18  ;;  %1626 = vrot.lane.b32.xlu2 %v1621_v0, %s3573_s18  ;;  %v1712_v47 = vmul.f32 %v6310_v40, %v6317_v57 }
 0x347   :  { %1706 = vrot.lane.b32.xlu0 %v1701_v32, %s3573_s18 }
 0x34d   :  { %1744 = vrot.lane.b32.xlu1 %v1740_v15, %s3573_s18  ;;  %1692 = vrot.lane.b32.xlu2 %v1688_v42, %s3573_s18 }
 0x34f   :  { %1624 = vrot.lane.b32.xlu0 %v1620_v22, %s3573_s18  ;;  %v1714_v22 = vadd.f32 %v1712_v47, %v6373_v30  ;;  %v7924_v30 = vld [vmem:[#allocation522_spill] sm:$0xff] }
 0x355   :  { %1660 = vrot.lane.b32.xlu1 %v1656_v19, %s3573_s18  ;;  %1758 = vrot.lane.b32.xlu2 %v1753_v38, %s3573_s18 }
 0x357   :  { %1756 = vrot.lane.b32.xlu0 %v1752_v35, %s3573_s18 }
 0x35d   :  { %1704 = vrot.lane.b32.xlu2 %v1700_v8, %s3573_s18  ;;  %1123 = vperm.xlu1 %3505, %v7923_v24  }
 0x37f   :  { %v3492_v20 = vpop.permute.xlu2 %3491 }
 0x380   :  { %v3493_v56 = vunpack.i.l.bf16 %v3492_v20  ;;  %v3494_v41 = vunpack.i.h.bf16 %v3492_v20 }
 0x387   :  { %v3487_v6 = vpop.permute.xlu1 %3486  ;;  %v1723_v13 = vpop.permute.xlu2 %1722 }
 0x388   :  { %v3488_v29 = vunpack.i.l.bf16 %v3487_v6  ;;  %v3489_v43 = vunpack.i.h.bf16 %v3487_v6 }
 0x38a   :  { %1365 = vmatpush.msra.mxu0 %v3488_v29  ;;  %1394 = vmatpush.msra.mxu1 %v3489_v43 }
 0x38c   :  { %1366 = vmatpush.msra.mxu0 %v3493_v56  ;;  %1395 = vmatpush.msra.mxu1 %v3494_v41 }
 0x38e   :  { %1396 = vmatpush.msra.mxu1 %v3488_v29 }
 0x38f   :  { %v1735_v7 = vpop.permute.xlu2 %1734 }
 0x390   :  { %1397 = vmatpush.msra.mxu1 %v3493_v56 }
 0x391   :  { %v3497_v60 = vpop.permute.xlu0 %3496 }
 0x392   :  { %v3498_v31 = vunpack.i.l.bf16 %v3497_v60  ;;  %v3499_v39 = vunpack.i.h.bf16 %v3497_v60 }
 0x394   :  { %1367 = vmatpush.msra.mxu0 %v3498_v31  ;;  %1398 = vmatpush.msra.mxu1 %v3498_v31  ;;  %v1119_v31 = vld [vmem:[%s7386_s1 + $0x10] sm:$0xff] }
 0x396   :  { %1368 = vmatpush.msra.mxu0 %v3499_v39  ;;  %1399 = vmatpush.msra.mxu1 %v3499_v39 }
 0x397   :  { %v3502_v16 = vpop.permute.xlu1 %3501  ;;  %v1695_v53 = vpop.permute.xlu2 %1694 }
 0x398   :  { %v3503_v45 = vunpack.i.l.bf16 %v3502_v16  ;;  %v3504_v52 = vunpack.i.h.bf16 %v3502_v16 }
 0x399   :  { %v1683_v46 = vpop.permute.xlu0 %1682 }
 0x39a   :  { %1369 = vmatpush.msra.mxu0 %v3503_v45  ;;  %1400 = vmatpush.msra.mxu1 %v3503_v45 }
 0x39c   :  { %1370 = vmatpush.msra.mxu0 %v3504_v52  ;;  %1401 = vmatpush.msra.mxu1 %v3504_v52 }
 0x39e   :  { %1371 = vmatpush.msra.mxu0 %v6459_v21  ;;  %1402 = vmatpush.msra.mxu1 %v6459_v21 }
 0x39f   :  { %v1721_v61 = vpop.permute.xlu1 %1720  ;;  %v1627_v21 = vpop.permute.xlu2 %1626 }
 0x3a0   :  { %1372 = vmatpush.msra.mxu0 %v6467_v55  ;;  %1403 = vmatpush.msra.mxu1 %v6467_v55  ;;  %v1713_v55 = vmul.f32 %v6310_v40, %v6269_v54  ;;  %v1687_v54 = vadd.f32 %v1683_v46, %v6400_v11  ;;  %v1631_v51 = vadd.f32 %v1627_v21, %v6424_v4 }
 0x3a1   :  { %v1651_v58 = vpop.permute.xlu0 %1650  ;;  %3419 = vmatmul.msk.f32.vlgmr.msra.gmra.mxu1 %vm1346_vm0, %v6547_v5  ;;  %v1726_v19 = vadd.f32 %v1721_v61, %v1714_v22 }
 0x3a2   :  { %1373 = vmatpush.msra.mxu0 %v6461_v12  ;;  %v6571_v12 = vld [vmem:[%s7388_s3 + $0x10] sm:$0xff]  ;;  %v1715_v3 = vadd.f32 %v1713_v55, %v6371_v62  ;;  %v1655_v59 = vadd.f32 %v1651_v58, %v6426_v14  ;;  %v1699_v34 = vadd.f32 %v1695_v53, %v1687_v54 }
 0x3a4   :  { %1374 = vmatpush.msra.mxu0 %v6473_v2  ;;  %v1727_v17 = vadd.f32 %v1723_v13, %v1715_v3 }
 0x3a5   :  { %3415 = vmatmul.msk.f32.vlgmr.msra.gmra.mxu0 %vm1346_vm0, %v6547_v5 }
 0x3a6   :  { %v1739_v48 = vadd.f32 %v1735_v7, %v1727_v17 }
 0x3a7   :  { %v1681_v33 = vpop.permute.xlu1 %1680  ;;  %v1693_v2 = vpop.permute.xlu2 %1692 }
 0x3a8   :  { %v1686_v38 = vadd.f32 %v1681_v33, %v6417_v10 }
 0x3a9   :  { %v1733_v1 = vpop.permute.xlu0 %1732  ;;  %3420 = vmatmul.msk.f32.gmra.mxu1 %vm1346_vm0, %v6560_v63 }
 0x3aa   :  { %v1738_v35 = vadd.f32 %v1733_v1, %v1726_v19  ;;  %v1698_v20 = vadd.f32 %v1693_v2, %v1686_v38 }
 0x3ad   :  { %3416 = vmatmul.msk.f32.gmra.mxu0 %vm1346_vm0, %v6560_v63 }
 0x3af   :  { %v1747_v49 = vpop.permute.xlu1 %1746  ;;  %v1759_v37 = vpop.permute.xlu2 %1758 }
 0x3b0   :  { %v1751_v27 = vadd.f32 %v1747_v49, %v1739_v48 }
 0x3b1   :  { %v1649_v36 = vpop.permute.xlu0 %1648  ;;  %3421 = vmatmul.msk.f32.gmra.mxu1 %vm1346_vm0, %v6571_v12 }
 0x3b2   :  { %v1763_v11 = vadd.f32 %v1759_v37, %v1751_v27  ;;  %v1654_v8 = vadd.f32 %v1649_v36, %v6430_v9 }
 0x3b5   :  { %3417 = vmatmul.msk.f32.gmra.mxu0 %vm1346_vm0, %v6571_v12 }
 0x3b7   :  { %v1663_v62 = vpop.permute.xlu1 %1662  ;;  %v1705_v40 = vpop.permute.xlu2 %1704 }
 0x3b8   :  { %v1667_v25 = vadd.f32 %v1663_v62, %v1655_v59  ;;  %v1710_v56 = vadd.f32 %v1705_v40, %v1698_v20 }
 0x3b9   :  { %v1707_v28 = vpop.permute.xlu0 %1706  ;;  %3422 = vmatmul.msk.f32.gmra.mxu1 %vm1346_vm0, %v6583_v50 }
 0x3ba   :  { %v1765_v26 = vmax.f32 %v1631_v51, %v1667_v25  ;;  %v1711_v18 = vadd.f32 %v1707_v28, %v1699_v34 }
 0x3bc   :  { %v1769_v14 = vmax.f32 %v1711_v18, %v1763_v11  ;;  %v6592_v0 = vmax.f32 %v1765_v26, 0.0 }
 0x3bd   :  { %3418 = vmatmul.msk.f32.gmra.mxu0 %vm1346_vm0, %v6583_v50 }
 0x3be   :  { %v6594_v4 = vmax.f32 %v1769_v14, 0.0 }
 0x3bf   :  { %v1745_v32 = vpop.permute.xlu1 %1744 }
 0x3c0   :  { %v3506_v15 = vpack.i.bf16 %v6594_v4, %v6592_v0  ;;  %v1750_v6 = vadd.f32 %v1745_v32, %v1738_v35 }
 0x3c1   :  { %v1625_v42 = vpop.permute.xlu0 %1624 }
 0x3c2   :  { %3507 = vrot.lane.b32.xlu2 %v3506_v15, %s3574_s0  ;;  %v1630_v13 = vadd.f32 %v1625_v42, %v6435_v44  ;;  %v1120_v44 = vld [vmem:[%s7386_s1 + $0x18] sm:$0xff] }
 0x3c7   :  { %v1661_v57 = vpop.permute.xlu1 %1660 }
 0x3c8   :  { %v1666_v29 = vadd.f32 %v1661_v57, %v1654_v8 }
 0x3c9   :  { %v1757_v43 = vpop.permute.xlu0 %1756 }
 0x3ca   :  { %v1764_v41 = vmax.f32 %v1630_v13, %v1666_v29  ;;  %v1762_v23 = vadd.f32 %v1757_v43, %v1750_v6  ;;  %1128 = vperm.xlu2 %3521, %v7924_v30  }
 0x3cc   :  { %v1768_v24 = vmax.f32 %v1710_v56, %v1762_v23  ;;  %v6604_v7 = vmax.f32 %v1764_v41, 0.0 }
 0x3ce   :  { %v6606_v10 = vmax.f32 %v1768_v24, 0.0  ;;  %v3522_v39 = vpack.i.bf16 %v6604_v7, %v6592_v0 }
 0x3cf   :  { %v6623_v52 = vpop.permute.xlu1 %1123 }
 0x3d0   :  { %v3516_v9 = vpack.i.bf16 %v6606_v10, %v6594_v4  ;;  %v3511_v60 = vpack.i.bf16 %v6606_v10, %v6604_v7 }
 0x3d2   :  { %3517 = vrot.lane.b32.xlu1 %v3516_v9, %s3573_s18  ;;  %3512 = vrot.lane.b32.xlu0 %v3511_v60, %s3574_s0 }
 0x3d3   :  { %1138 = vperm.xlu2 %3521, %v1120_v44  }
 0x3da   :  { %1133 = vperm.xlu1 %3505, %v1119_v31   ;;  %3523 = vrot.lane.b32.xlu0 %v3522_v39, %s3573_s18 }
 0x41c   :  { %v3508_v16 = vpop.permute.xlu2 %3507 }
 0x41d   :  { %v3509_v45 = vunpack.i.l.bf16 %v3508_v16  ;;  %v3510_v46 = vunpack.i.h.bf16 %v3508_v16 }
 0x41e   :  { %v1405_v53 = vpop.f32.mrf.mxu1 }
 0x41f   :  { %1806 = vmatpush.msra.mxu2 %v3509_v45  ;;  %1835 = vmatpush.msra.mxu3 %v3510_v46  ;;  %v1406_v61 = vadd.f32 %v1405_v53, %v6623_v52 }
 0x422   :  { %v1376_v58 = vpop.f32.mrf.mxu0 }
 0x423   :  { %v1377_v21 = vadd.f32 %v1376_v58, %v6623_v52 }
 0x424   :  { %v6633_v17 = vpop.permute.xlu2 %1128 }
 0x425   :  { %v1417_v33 = vmax.f32 %v1377_v21, %v1406_v61 }
 0x426   :  { %v1408_v2 = vpop.f32.mrf.mxu1 }
 0x427   :  { %v1421_v1 = vmax.f32 %v1417_v33, 0.0  ;;  %v1409_v27 = vadd.f32 %v1408_v2, %v6633_v17 }
 0x429   :  { %v6628_v55 = vsel %vm1425_vm1, %v1421_v1, 0.0 }
 0x42a   :  { %1430 = vst [vmem:[#allocation3] sm:$0x1] %v6628_v55  ;;  %v3423_v49 = vrot.slane %v6628_v55, 9  ;;  %v1379_v3 = vpop.f32.mrf.mxu0 }
 0x42b   :  { %1436 = vst.sshfl [vmem:[#allocation1] sm:$0xff pattern:$0x73625140] %v6628_v55  ;;  %v1380_v59 = vadd.f32 %v1379_v3, %v6633_v17 }
 0x42c   :  { %1435 = vst [vmem:[#allocation3 + $0x2] sm:$0x1] %v3423_v49 }
 0x42d   :  { %v1418_v62 = vmax.f32 %v1380_v59, %v1409_v27  ;;  %v6639_v37 = vpop.permute.xlu2 %1138 }
 0x42e   :  { %v1411_v54 = vpop.f32.mrf.mxu1 }
 0x42f   :  { %v1422_v34 = vmax.f32 %v1418_v62, 0.0 }
 0x431   :  { %v6643_v18 = vsel %vm1425_vm1, %v1422_v34, 0.0 }
 0x432   :  { %v1438_v36 = vld [vmem:[#allocation1 + $0x1] ss:$4 sm:$0xff]  ;;  %v1382_v48 = vpop.f32.mrf.mxu0  ;;  %1472 = vst [vmem:[#allocation3 + $0x10] sm:$0x1] %v6643_v18  ;;  %v3427_v47 = vrot.slane %v6643_v18, 9 }
 0x433   :  { %1440 = vst [vmem:[#allocation3 + $0x4] sm:$0x1] %v1438_v36 }
 0x434   :  { %1441 = vst.sshfl [vmem:[#allocation1] sm:$0xff pattern:$0x73625140] %v6628_v55 }
 0x435   :  { %1477 = vst [vmem:[#allocation3 + $0x12] sm:$0x1] %v3427_v47 }
 0x436   :  { %v1414_v26 = vpop.f32.mrf.mxu1 }
 0x437   :  { %v1415_v14 = vadd.f32 %v1414_v26, %v6639_v37 }
 0x43a   :  { %v1385_v28 = vpop.f32.mrf.mxu0 }
 0x43b   :  { %v1443_v51 = vld [vmem:[#allocation1 + $0x1] ss:$4 sm:$0xff]  ;;  %v1386_v11 = vadd.f32 %v1385_v28, %v6639_v37 }
 0x43c   :  { %v3424_v25 = vrot.slane %v1443_v51, 9  ;;  %1448 = vst.sshfl [vmem:[#allocation1] sm:$0xff pattern:$0x73625140] %v6628_v55 }
 0x43d   :  { %v1420_v32 = vmax.f32 %v1386_v11, %v1415_v14 }
 0x43e   :  { %1447 = vst [vmem:[#allocation3 + $0x6] sm:$0x1] %v3424_v25 }
 0x43f   :  { %v1424_v15 = vmax.f32 %v1420_v32, 0.0 }
 0x441   :  { %v6649_v38 = vsel %vm1425_vm1, %v1424_v15, 0.0 }
 0x442   :  { %1556 = vst [vmem:[#allocation3 + $0x30] sm:$0x1] %v6649_v38  ;;  %v3435_v40 = vrot.slane %v6649_v38, 9 }
 0x443   :  { %v1450_v42 = vld [vmem:[#allocation1 + $0x2] ss:$4 sm:$0xff] }
 0x444   :  { %1452 = vst [vmem:[#allocation3 + $0x8] sm:$0x1] %v1450_v42  ;;  %v3518_v22 = vpop.permute.xlu1 %3517  ;;  %v3513_v19 = vpop.permute.xlu0 %3512 }
 0x445   :  { %1453 = vst.sshfl [vmem:[#allocation1] sm:$0xff pattern:$0x73625140] %v6628_v55  ;;  %v3514_v35 = vunpack.i.l.bf16 %v3513_v19  ;;  %v3515_v8 = vunpack.i.h.bf16 %v3513_v19  ;;  %v3519_v57 = vunpack.i.l.bf16 %v3518_v22  ;;  %v3520_v20 = vunpack.i.h.bf16 %v3518_v22 }
 0x446   :  { %1561 = vst [vmem:[#allocation3 + $0x32] sm:$0x1] %v3435_v40 }
 0x447   :  { %1807 = vmatpush.msra.mxu2 %v3514_v35  ;;  %1836 = vmatpush.msra.mxu3 %v3515_v8 }
 0x449   :  { %1808 = vmatpush.msra.mxu2 %v3519_v57  ;;  %1837 = vmatpush.msra.mxu3 %v3509_v45 }
 0x44b   :  { %1809 = vmatpush.msra.mxu2 %v3520_v20  ;;  %1838 = vmatpush.msra.mxu3 %v3514_v35 }
 0x44c   :  { %v1455_v6 = vld [vmem:[#allocation1 + $0x2] ss:$4 sm:$0xff]  ;;  %v6654_v13 = vpop.permute.xlu1 %1133  ;;  %v3524_v29 = vpop.permute.xlu0 %3523 }
 0x44d   :  { %v3425_v43 = vrot.slane %v1455_v6, 9  ;;  %1460 = vst.sshfl [vmem:[#allocation1] sm:$0xff pattern:$0x73625140] %v6628_v55  ;;  %v1383_v56 = vadd.f32 %v1382_v48, %v6654_v13  ;;  %v1412_v41 = vadd.f32 %v1411_v54, %v6654_v13  ;;  %1839 = vmatpush.msra.mxu3 %v3519_v57  ;;  %v3525_v23 = vunpack.i.l.bf16 %v3524_v29 }
 0x44e   :  { %v3526_v24 = vunpack.i.h.bf16 %v3524_v29 }
 0x44f   :  { %1459 = vst [vmem:[#allocation3 + $0xa] sm:$0x1] %v3425_v43  ;;  %v1419_v30 = vmax.f32 %v1383_v56, %v1412_v41  ;;  %1840 = vmatpush.msra.mxu3 %v3520_v20  ;;  %1810 = vmatpush.msra.mxu2 %v3525_v23 }
 0x451   :  { %v1423_v9 = vmax.f32 %v1419_v30, 0.0  ;;  %1841 = vmatpush.msra.mxu3 %v3525_v23  ;;  %1811 = vmatpush.msra.mxu2 %v3526_v24 }
 0x453   :  { %v1428_v60 = vsel %vm1425_vm1, %v1423_v9, 0.0  ;;  %1842 = vmatpush.msra.mxu3 %v3526_v24  ;;  %1812 = vmatpush.msra.mxu2 %v6594_v4 }
 0x454   :  { %v1462_v44 = vld [vmem:[#allocation1 + $0x3] ss:$4 sm:$0xff]  ;;  %1514 = vst [vmem:[#allocation3 + $0x20] sm:$0x1] %v1428_v60  ;;  %v3431_v31 = vrot.slane %v1428_v60, 9 }
 0x455   :  { %1464 = vst [vmem:[#allocation3 + $0xc] sm:$0x1] %v1462_v44  ;;  %1843 = vmatpush.msra.mxu3 %v6594_v4  ;;  %1813 = vmatpush.msra.mxu2 %v6606_v10 }
 0x456   :  { %1465 = vst.sshfl [vmem:[#allocation1] sm:$0xff pattern:$0x73625140] %v6628_v55 }
 0x457   :  { %1519 = vst [vmem:[#allocation3 + $0x22] sm:$0x1] %v3431_v31  ;;  %1844 = vmatpush.msra.mxu3 %v6606_v10  ;;  %1814 = vmatpush.msra.mxu2 %v6592_v0 }
 0x458   :  { %3444 = vmatmul.msk.f32.vlgmr.msra.gmra.mxu3 %vm1346_vm0, %v6547_v5 }
 0x459   :  { %1815 = vmatpush.msra.mxu2 %v6604_v7 }
 0x45a   :  { %3440 = vmatmul.msk.f32.vlgmr.msra.gmra.mxu2 %vm1346_vm0, %v6547_v5 }
 0x45d   :  { %v1467_v39 = vld [vmem:[#allocation1 + $0x3] ss:$4 sm:$0xff] }
 0x45e   :  { %v3426_v16 = vrot.slane %v1467_v39, 9  ;;  %1478 = vst.sshfl [vmem:[#allocation1] sm:$0xff pattern:$0x73625140] %v6643_v18 }
 0x460   :  { %1471 = vst [vmem:[#allocation3 + $0xe] sm:$0x1] %v3426_v16  ;;  %3445 = vmatmul.msk.f32.gmra.mxu3 %vm1346_vm0, %v6560_v63 }
 0x462   :  { %3441 = vmatmul.msk.f32.gmra.mxu2 %vm1346_vm0, %v6560_v63 }
 0x465   :  { %v1480_v0 = vld [vmem:[#allocation1 + $0x1] ss:$4 sm:$0xff] }
 0x466   :  { %1482 = vst [vmem:[#allocation3 + $0x14] sm:$0x1] %v1480_v0 }
 0x467   :  { %1483 = vst.sshfl [vmem:[#allocation1] sm:$0xff pattern:$0x73625140] %v6643_v18 }
 0x468   :  { %3446 = vmatmul.msk.f32.gmra.mxu3 %vm1346_vm0, %v6571_v12 }
 0x46a   :  { %3442 = vmatmul.msk.f32.gmra.mxu2 %vm1346_vm0, %v6571_v12 }
 0x46e   :  { %v1485_v5 = vld [vmem:[#allocation1 + $0x1] ss:$4 sm:$0xff] }
 0x46f   :  { %v3428_v4 = vrot.slane %v1485_v5, 9  ;;  %1490 = vst.sshfl [vmem:[#allocation1] sm:$0xff pattern:$0x73625140] %v6643_v18 }
 0x470   :  { %3447 = vmatmul.msk.f32.gmra.mxu3 %vm1346_vm0, %v6583_v50 }
 0x471   :  { %1489 = vst [vmem:[#allocation3 + $0x16] sm:$0x1] %v3428_v4 }
 0x472   :  { %3443 = vmatmul.msk.f32.gmra.mxu2 %vm1346_vm0, %v6583_v50 }
 0x476   :  { %v1492_v63 = vld [vmem:[#allocation1 + $0x2] ss:$4 sm:$0xff] }
 0x477   :  { %1494 = vst [vmem:[#allocation3 + $0x18] sm:$0x1] %v1492_v63 }
 0x478   :  { %1495 = vst.sshfl [vmem:[#allocation1] sm:$0xff pattern:$0x73625140] %v6643_v18 }
 0x47f   :  { %v1497_v7 = vld [vmem:[#allocation1 + $0x2] ss:$4 sm:$0xff] }
 0x480   :  { %v3429_v10 = vrot.slane %v1497_v7, 9  ;;  %1502 = vst.sshfl [vmem:[#allocation1] sm:$0xff pattern:$0x73625140] %v6643_v18 }
 0x482   :  { %1501 = vst [vmem:[#allocation3 + $0x1a] sm:$0x1] %v3429_v10 }
 0x487   :  { %v1504_v12 = vld [vmem:[#allocation1 + $0x3] ss:$4 sm:$0xff] }
 0x488   :  { %1506 = vst [vmem:[#allocation3 + $0x1c] sm:$0x1] %v1504_v12 }
 0x489   :  { %1507 = vst.sshfl [vmem:[#allocation1] sm:$0xff pattern:$0x73625140] %v6643_v18 }
 0x490   :  { %v1509_v45 = vld [vmem:[#allocation1 + $0x3] ss:$4 sm:$0xff] }
 0x491   :  { %v3430_v46 = vrot.slane %v1509_v45, 9  ;;  %1520 = vst.sshfl [vmem:[#allocation1] sm:$0xff pattern:$0x73625140] %v1428_v60 }
 0x493   :  { %1513 = vst [vmem:[#allocation3 + $0x1e] sm:$0x1] %v3430_v46 }
 0x498   :  { %v1522_v53 = vld [vmem:[#allocation1 + $0x1] ss:$4 sm:$0xff] }
 0x499   :  { %1524 = vst [vmem:[#allocation3 + $0x24] sm:$0x1] %v1522_v53 }
 0x49a   :  { %1525 = vst.sshfl [vmem:[#allocation1] sm:$0xff pattern:$0x73625140] %v1428_v60 }
 0x4a1   :  { %v1527_v50 = vld [vmem:[#allocation1 + $0x1] ss:$4 sm:$0xff] }
 0x4a2   :  { %v3432_v61 = vrot.slane %v1527_v50, 9  ;;  %1532 = vst.sshfl [vmem:[#allocation1] sm:$0xff pattern:$0x73625140] %v1428_v60 }
 0x4a4   :  { %1531 = vst [vmem:[#allocation3 + $0x26] sm:$0x1] %v3432_v61 }
 0x4a9   :  { %v1534_v58 = vld [vmem:[#allocation1 + $0x2] ss:$4 sm:$0xff] }
 0x4aa   :  { %1536 = vst [vmem:[#allocation3 + $0x28] sm:$0x1] %v1534_v58 }
 0x4ab   :  { %1537 = vst.sshfl [vmem:[#allocation1] sm:$0xff pattern:$0x73625140] %v1428_v60 }
 0x4b2   :  { %v1539_v21 = vld [vmem:[#allocation1 + $0x2] ss:$4 sm:$0xff] }
 0x4b3   :  { %v3433_v33 = vrot.slane %v1539_v21, 9  ;;  %1544 = vst.sshfl [vmem:[#allocation1] sm:$0xff pattern:$0x73625140] %v1428_v60 }
 0x4b5   :  { %1543 = vst [vmem:[#allocation3 + $0x2a] sm:$0x1] %v3433_v33 }
 0x4ba   :  { %v1546_v1 = vld [vmem:[#allocation1 + $0x3] ss:$4 sm:$0xff] }
 0x4bb   :  { %1548 = vst [vmem:[#allocation3 + $0x2c] sm:$0x1] %v1546_v1 }
 0x4bc   :  { %1549 = vst.sshfl [vmem:[#allocation1] sm:$0xff pattern:$0x73625140] %v1428_v60 }
 0x4c3   :  { %v1551_v55 = vld [vmem:[#allocation1 + $0x3] ss:$4 sm:$0xff] }
 0x4c4   :  { %v3434_v2 = vrot.slane %v1551_v55, 9  ;;  %1562 = vst.sshfl [vmem:[#allocation1] sm:$0xff pattern:$0x73625140] %v6649_v38 }
 0x4c6   :  { %1555 = vst [vmem:[#allocation3 + $0x2e] sm:$0x1] %v3434_v2 }
 0x4cb   :  { %v1564_v49 = vld [vmem:[#allocation1 + $0x1] ss:$4 sm:$0xff] }
 0x4cc   :  { %1566 = vst [vmem:[#allocation3 + $0x34] sm:$0x1] %v1564_v49 }
 0x4cd   :  { %1567 = vst.sshfl [vmem:[#allocation1] sm:$0xff pattern:$0x73625140] %v6649_v38 }
 0x4d4   :  { %v1569_v3 = vld [vmem:[#allocation1 + $0x1] ss:$4 sm:$0xff] }
 0x4d5   :  { %v3436_v36 = vrot.slane %v1569_v3, 9  ;;  %1574 = vst.sshfl [vmem:[#allocation1] sm:$0xff pattern:$0x73625140] %v6649_v38 }
 0x4d7   :  { %1573 = vst [vmem:[#allocation3 + $0x36] sm:$0x1] %v3436_v36 }
 0x4db   :  { %v1846_v48 = vpop.f32.mrf.mxu3 }
 0x4dc   :  { %v1576_v54 = vld [vmem:[#allocation1 + $0x2] ss:$4 sm:$0xff]  ;;  %v1847_v27 = vadd.f32 %v1846_v48, %v6623_v52 }
 0x4dd   :  { %1578 = vst [vmem:[#allocation3 + $0x38] sm:$0x1] %v1576_v54  ;;  %v1817_v59 = vpop.f32.mrf.mxu2 }
 0x4de   :  { %1579 = vst.sshfl [vmem:[#allocation1] sm:$0xff pattern:$0x73625140] %v6649_v38  ;;  %v1818_v62 = vadd.f32 %v1817_v59, %v6623_v52 }
 0x4e0   :  { %v1858_v51 = vmax.f32 %v1818_v62, %v1847_v27 }
 0x4e2   :  { %v1862_v25 = vmax.f32 %v1858_v51, 0.0 }
 0x4e3   :  { %v1849_v34 = vpop.f32.mrf.mxu3 }
 0x4e4   :  { %v1866_v11 = vsel %vm1425_vm1, %v1862_v25, 0.0  ;;  %v1850_v47 = vadd.f32 %v1849_v34, %v6633_v17 }
 0x4e5   :  { %v1581_v28 = vld [vmem:[#allocation1 + $0x2] ss:$4 sm:$0xff]  ;;  %v3448_v18 = vrot.slane %v1866_v11, 9  ;;  %v1820_v14 = vpop.f32.mrf.mxu2  ;;  %1870 = vst [vmem:[#allocation3 + $0x1] sm:$0x1] %v1866_v11 }
 0x4e6   :  { %v3437_v26 = vrot.slane %v1581_v28, 9  ;;  %1586 = vst.sshfl [vmem:[#allocation1] sm:$0xff pattern:$0x73625140] %v6649_v38  ;;  %v1821_v32 = vadd.f32 %v1820_v14, %v6633_v17 }
 0x4e7   :  { %1875 = vst [vmem:[#allocation3 + $0x3] sm:$0x1] %v3448_v18  ;;  %v7926_v18 = vld [vmem:[#allocation57_spill] sm:$0xff] }
 0x4e8   :  { %1585 = vst [vmem:[#allocation3 + $0x3a] sm:$0x1] %v3437_v26  ;;  %v1859_v15 = vmax.f32 %v1821_v32, %v1850_v47  ;;  %v7925_v26 = vld [vmem:[#allocation25_spill] sm:$0xff]  ;;  %2684 = vmatpush.msrb.mxu2 %v7926_v18 }
 0x4e9   :  { %2644 = vmatpush.msrb.mxu0 %v7925_v26 }
 0x4ea   :  { %v1863_v52 = vmax.f32 %v1859_v15, 0.0 }
 0x4eb   :  { %v1852_v42 = vpop.f32.mrf.mxu3 }
 0x4ec   :  { %v6700_v19 = vsel %vm1425_vm1, %v1863_v52, 0.0  ;;  %v1853_v40 = vadd.f32 %v1852_v42, %v6654_v13 }
 0x4ed   :  { %v1588_v22 = vld [vmem:[#allocation1 + $0x3] ss:$4 sm:$0xff]  ;;  %v3452_v35 = vrot.slane %v6700_v19, 9  ;;  %v1823_v8 = vpop.f32.mrf.mxu2  ;;  %1912 = vst [vmem:[#allocation3 + $0x11] sm:$0x1] %v6700_v19 }
 0x4ee   :  { %1590 = vst [vmem:[#allocation3 + $0x3c] sm:$0x1] %v1588_v22  ;;  %v1824_v57 = vadd.f32 %v1823_v8, %v6654_v13 }
 0x4ef   :  { %1591 = vst.sshfl [vmem:[#allocation1] sm:$0xff pattern:$0x73625140] %v6649_v38 }
 0x4f0   :  { %1917 = vst [vmem:[#allocation3 + $0x13] sm:$0x1] %v3452_v35  ;;  %v1860_v17 = vmax.f32 %v1824_v57, %v1853_v40 }
 0x4f2   :  { %v1864_v20 = vmax.f32 %v1860_v17, 0.0 }
 0x4f3   :  { %v1855_v6 = vpop.f32.mrf.mxu3 }
 0x4f4   :  { %v6708_v29 = vsel %vm1425_vm1, %v1864_v20, 0.0  ;;  %v1856_v23 = vadd.f32 %v1855_v6, %v6639_v37 }
 0x4f5   :  { %1954 = vst [vmem:[#allocation3 + $0x21] sm:$0x1] %v6708_v29  ;;  %v3456_v56 = vrot.slane %v6708_v29, 9  ;;  %v1826_v41 = vpop.f32.mrf.mxu2 }
 0x4f6   :  { %v1593_v43 = vld [vmem:[#allocation1 + $0x3] ss:$4 sm:$0xff]  ;;  %v1827_v13 = vadd.f32 %v1826_v41, %v6639_v37 }
 0x4f7   :  { %v3438_v38 = vrot.slane %v1593_v43, 9  ;;  %1876 = vst.sshfl [vmem:[#allocation1] sm:$0xff pattern:$0x73625140] %v1866_v11 }
 0x4f8   :  { %1959 = vst [vmem:[#allocation3 + $0x23] sm:$0x1] %v3456_v56  ;;  %v1861_v30 = vmax.f32 %v1827_v13, %v1856_v23 }
 0x4f9   :  { %1597 = vst [vmem:[#allocation3 + $0x3e] sm:$0x1] %v3438_v38 }
 0x4fa   :  { %v1865_v24 = vmax.f32 %v1861_v30, 0.0 }
 0x4fc   :  { %v6715_v9 = vsel %vm1425_vm1, %v1865_v24, 0.0 }
 0x4fd   :  { %1996 = vst [vmem:[#allocation3 + $0x31] sm:$0x1] %v6715_v9  ;;  %v3460_v44 = vrot.slane %v6715_v9, 9 }
 0x4fe   :  { %v1878_v60 = vld [vmem:[#allocation1 + $0x1] ss:$4 sm:$0xff] }
 0x4ff   :  { %1880 = vst [vmem:[#allocation3 + $0x5] sm:$0x1] %v1878_v60 }
 0x500   :  { %1881 = vst.sshfl [vmem:[#allocation1] sm:$0xff pattern:$0x73625140] %v1866_v11 }
 0x501   :  { %2001 = vst [vmem:[#allocation3 + $0x33] sm:$0x1] %v3460_v44 }
 0x507   :  { %v1883_v31 = vld [vmem:[#allocation1 + $0x1] ss:$4 sm:$0xff] }
 0x508   :  { %v3449_v39 = vrot.slane %v1883_v31, 9  ;;  %1888 = vst.sshfl [vmem:[#allocation1] sm:$0xff pattern:$0x73625140] %v1866_v11 }
 0x50a   :  { %1887 = vst [vmem:[#allocation3 + $0x7] sm:$0x1] %v3449_v39 }
 0x50f   :  { %v1890_v37 = vld [vmem:[#allocation1 + $0x2] ss:$4 sm:$0xff] }
 0x510   :  { %1892 = vst [vmem:[#allocation3 + $0x9] sm:$0x1] %v1890_v37 }
 0x511   :  { %1893 = vst.sshfl [vmem:[#allocation1] sm:$0xff pattern:$0x73625140] %v1866_v11 }
 0x518   :  { %v1895_v16 = vld [vmem:[#allocation1 + $0x2] ss:$4 sm:$0xff] }
 0x519   :  { %v3450_v0 = vrot.slane %v1895_v16, 9  ;;  %1900 = vst.sshfl [vmem:[#allocation1] sm:$0xff pattern:$0x73625140] %v1866_v11 }
 0x51b   :  { %1899 = vst [vmem:[#allocation3 + $0xb] sm:$0x1] %v3450_v0 }
 0x520   :  { %v1902_v5 = vld [vmem:[#allocation1 + $0x3] ss:$4 sm:$0xff] }
 0x521   :  { %1904 = vst [vmem:[#allocation3 + $0xd] sm:$0x1] %v1902_v5 }
 0x522   :  { %1905 = vst.sshfl [vmem:[#allocation1] sm:$0xff pattern:$0x73625140] %v1866_v11 }
 0x529   :  { %v1907_v4 = vld [vmem:[#allocation1 + $0x3] ss:$4 sm:$0xff] }
 0x52a   :  { %v3451_v63 = vrot.slane %v1907_v4, 9  ;;  %1918 = vst.sshfl [vmem:[#allocation1] sm:$0xff pattern:$0x73625140] %v6700_v19 }
 0x52c   :  { %1911 = vst [vmem:[#allocation3 + $0xf] sm:$0x1] %v3451_v63 }
 0x531   :  { %v1920_v7 = vld [vmem:[#allocation1 + $0x1] ss:$4 sm:$0xff] }
 0x532   :  { %1922 = vst [vmem:[#allocation3 + $0x15] sm:$0x1] %v1920_v7 }
 0x533   :  { %1923 = vst.sshfl [vmem:[#allocation1] sm:$0xff pattern:$0x73625140] %v6700_v19 }
 0x53a   :  { %v1925_v10 = vld [vmem:[#allocation1 + $0x1] ss:$4 sm:$0xff] }
 0x53b   :  { %v3453_v12 = vrot.slane %v1925_v10, 9  ;;  %1930 = vst.sshfl [vmem:[#allocation1] sm:$0xff pattern:$0x73625140] %v6700_v19 }
 0x53d   :  { %1929 = vst [vmem:[#allocation3 + $0x17] sm:$0x1] %v3453_v12 }
 0x542   :  { %v1932_v45 = vld [vmem:[#allocation1 + $0x2] ss:$4 sm:$0xff] }
 0x543   :  { %1934 = vst [vmem:[#allocation3 + $0x19] sm:$0x1] %v1932_v45 }
 0x544   :  { %1935 = vst.sshfl [vmem:[#allocation1] sm:$0xff pattern:$0x73625140] %v6700_v19 }
 0x54b   :  { %v1937_v46 = vld [vmem:[#allocation1 + $0x2] ss:$4 sm:$0xff] }
 0x54c   :  { %v3454_v53 = vrot.slane %v1937_v46, 9  ;;  %1942 = vst.sshfl [vmem:[#allocation1] sm:$0xff pattern:$0x73625140] %v6700_v19 }
 0x54e   :  { %1941 = vst [vmem:[#allocation3 + $0x1b] sm:$0x1] %v3454_v53 }
 0x553   :  { %v1944_v50 = vld [vmem:[#allocation1 + $0x3] ss:$4 sm:$0xff] }
 0x554   :  { %1946 = vst [vmem:[#allocation3 + $0x1d] sm:$0x1] %v1944_v50 }
 0x555   :  { %1947 = vst.sshfl [vmem:[#allocation1] sm:$0xff pattern:$0x73625140] %v6700_v19 }
 0x55c   :  { %v1949_v61 = vld [vmem:[#allocation1 + $0x3] ss:$4 sm:$0xff] }
 0x55d   :  { %v3455_v58 = vrot.slane %v1949_v61, 9  ;;  %1960 = vst.sshfl [vmem:[#allocation1] sm:$0xff pattern:$0x73625140] %v6708_v29 }
 0x55f   :  { %1953 = vst [vmem:[#allocation3 + $0x1f] sm:$0x1] %v3455_v58 }
 0x564   :  { %v1962_v21 = vld [vmem:[#allocation1 + $0x1] ss:$4 sm:$0xff] }
 0x565   :  { %1964 = vst [vmem:[#allocation3 + $0x25] sm:$0x1] %v1962_v21 }
 0x566   :  { %1965 = vst.sshfl [vmem:[#allocation1] sm:$0xff pattern:$0x73625140] %v6708_v29 }
 0x56d   :  { %v1967_v33 = vld [vmem:[#allocation1 + $0x1] ss:$4 sm:$0xff] }
 0x56e   :  { %v3457_v1 = vrot.slane %v1967_v33, 9  ;;  %1972 = vst.sshfl [vmem:[#allocation1] sm:$0xff pattern:$0x73625140] %v6708_v29 }
 0x570   :  { %1971 = vst [vmem:[#allocation3 + $0x27] sm:$0x1] %v3457_v1 }
 0x575   :  { %v1974_v55 = vld [vmem:[#allocation1 + $0x2] ss:$4 sm:$0xff] }
 0x576   :  { %1976 = vst [vmem:[#allocation3 + $0x29] sm:$0x1] %v1974_v55 }
 0x577   :  { %1977 = vst.sshfl [vmem:[#allocation1] sm:$0xff pattern:$0x73625140] %v6708_v29 }
 0x57e   :  { %v1979_v2 = vld [vmem:[#allocation1 + $0x2] ss:$4 sm:$0xff] }
 0x57f   :  { %v3458_v49 = vrot.slane %v1979_v2, 9  ;;  %1984 = vst.sshfl [vmem:[#allocation1] sm:$0xff pattern:$0x73625140] %v6708_v29 }
 0x581   :  { %1983 = vst [vmem:[#allocation3 + $0x2b] sm:$0x1] %v3458_v49 }
 0x586   :  { %v1986_v3 = vld [vmem:[#allocation1 + $0x3] ss:$4 sm:$0xff] }
 0x587   :  { %1988 = vst [vmem:[#allocation3 + $0x2d] sm:$0x1] %v1986_v3 }
 0x588   :  { %1989 = vst.sshfl [vmem:[#allocation1] sm:$0xff pattern:$0x73625140] %v6708_v29 }
 0x58f   :  { %v1991_v36 = vld [vmem:[#allocation1 + $0x3] ss:$4 sm:$0xff] }
 0x590   :  { %v3459_v48 = vrot.slane %v1991_v36, 9  ;;  %2002 = vst.sshfl [vmem:[#allocation1] sm:$0xff pattern:$0x73625140] %v6715_v9 }
 0x592   :  { %1995 = vst [vmem:[#allocation3 + $0x2f] sm:$0x1] %v3459_v48 }
 0x597   :  { %v2004_v54 = vld [vmem:[#allocation1 + $0x1] ss:$4 sm:$0xff] }
 0x598   :  { %2006 = vst [vmem:[#allocation3 + $0x35] sm:$0x1] %v2004_v54 }
 0x599   :  { %2007 = vst.sshfl [vmem:[#allocation1] sm:$0xff pattern:$0x73625140] %v6715_v9 }
 0x5a0   :  { %v2009_v59 = vld [vmem:[#allocation1 + $0x1] ss:$4 sm:$0xff] }
 0x5a1   :  { %v3461_v27 = vrot.slane %v2009_v59, 9  ;;  %2014 = vst.sshfl [vmem:[#allocation1] sm:$0xff pattern:$0x73625140] %v6715_v9 }
 0x5a3   :  { %2013 = vst [vmem:[#allocation3 + $0x37] sm:$0x1] %v3461_v27 }
 0x5a8   :  { %v2016_v62 = vld [vmem:[#allocation1 + $0x2] ss:$4 sm:$0xff] }
 0x5a9   :  { %2018 = vst [vmem:[#allocation3 + $0x39] sm:$0x1] %v2016_v62 }
 0x5aa   :  { %2019 = vst.sshfl [vmem:[#allocation1] sm:$0xff pattern:$0x73625140] %v6715_v9 }
 0x5b1   :  { %v2021_v51 = vld [vmem:[#allocation1 + $0x2] ss:$4 sm:$0xff] }
 0x5b2   :  { %v3462_v25 = vrot.slane %v2021_v51, 9  ;;  %2026 = vst.sshfl [vmem:[#allocation1] sm:$0xff pattern:$0x73625140] %v6715_v9 }
 0x5b4   :  { %2025 = vst [vmem:[#allocation3 + $0x3b] sm:$0x1] %v3462_v25 }
 0x5b9   :  { %v2028_v34 = vld [vmem:[#allocation1 + $0x3] ss:$4 sm:$0xff] }
 0x5ba   :  { %2030 = vst [vmem:[#allocation3 + $0x3d] sm:$0x1] %v2028_v34 }
 0x5bb   :  { %2031 = vst.sshfl [vmem:[#allocation1] sm:$0xff pattern:$0x73625140] %v6715_v9 }
 0x5c2   :  { %v2033_v28 = vld [vmem:[#allocation1 + $0x3] ss:$4 sm:$0xff] }
 0x5c3   :  { %v3463_v11 = vrot.slane %v2033_v28, 9 }
 0x5c5   :  { %2037 = vst [vmem:[#allocation3 + $0x3f] sm:$0x1] %v3463_v11 }
 0x5c6   :  { %3563 = dma.done.wait [#allocation4], 65536 }
 0x5c7   :  { %3564 = vsyncadd [#allocation4], 4294901760  ;;  %v7927_v14 = vld [vmem:[#allocation41_spill] sm:$0xff]  ;;  %v7929_v32 = vld [vmem:[#allocation24_spill] sm:$0xff]  ;;  %vm3334_vm2 = vcmask 523264   ;;  %s3396_s12 = sshll.u32 %s7392_s7, 4  ;;  %s3397_s12 = int_to_ptr.hbm [resolvable:$true] %s3396_s12 }
 0x5c8   :  { %2664 = vmatpush.msrb.mxu1 %v7927_v14  ;;  %v7928_v47 = vld [vmem:[#allocation73_spill] sm:$0xff]  ;;  %2645 = vmatpush.msrb.mxu0 %v7929_v32  ;;  %v7930_v15 = vld [vmem:[#allocation56_spill] sm:$0xff]  ;;  %v7933_v22 = vld [vmem:[#allocation23_spill] sm:$0xff]  ;;  %vm3387_vm3 = vcmask 9216  }
 0x5c9   :  { %2704 = vmatpush.msrb.mxu3 %v7928_v47  ;;  %2685 = vmatpush.msrb.mxu2 %v7930_v15  ;;  %v7931_v52 = vld [vmem:[#allocation40_spill] sm:$0xff]  ;;  %v7934_v19 = vld [vmem:[#allocation55_spill] sm:$0xff]  ;;  %v7937_v40 = vld [vmem:[#allocation22_spill] sm:$0xff] }
 0x5ca   :  { %2665 = vmatpush.msrb.mxu1 %v7931_v52  ;;  %v7932_v42 = vld [vmem:[#allocation72_spill] sm:$0xff]  ;;  %2646 = vmatpush.msrb.mxu0 %v7933_v22  ;;  %v7935_v35 = vld [vmem:[#allocation39_spill] sm:$0xff]  ;;  %v7938_v57 = vld [vmem:[#allocation54_spill] sm:$0xff] }
 0x5cb   :  { %2705 = vmatpush.msrb.mxu3 %v7932_v42  ;;  %2686 = vmatpush.msrb.mxu2 %v7934_v19  ;;  %v7936_v8 = vld [vmem:[#allocation71_spill] sm:$0xff]  ;;  %v7939_v17 = vld [vmem:[#allocation38_spill] sm:$0xff]  ;;  %v7941_v6 = vld [vmem:[#allocation21_spill] sm:$0xff] }
 0x5cc   :  { %2666 = vmatpush.msrb.mxu1 %v7935_v35  ;;  %2647 = vmatpush.msrb.mxu0 %v7937_v40  ;;  %v7940_v20 = vld [vmem:[#allocation70_spill] sm:$0xff]  ;;  %v7942_v29 = vld [vmem:[#allocation53_spill] sm:$0xff]  ;;  %v7945_v41 = vld [vmem:[#allocation20_spill] sm:$0xff] }
 0x5cd   :  { %2706 = vmatpush.msrb.mxu3 %v7936_v8  ;;  %2687 = vmatpush.msrb.mxu2 %v7938_v57  ;;  %v7943_v43 = vld [vmem:[#allocation37_spill] sm:$0xff]  ;;  %v7946_v38 = vld [vmem:[#allocation52_spill] sm:$0xff]  ;;  %v7949_v30 = vld [vmem:[#allocation19_spill] sm:$0xff] }
 0x5ce   :  { %2667 = vmatpush.msrb.mxu1 %v7939_v17  ;;  %2648 = vmatpush.msrb.mxu0 %v7941_v6  ;;  %v7944_v56 = vld [vmem:[#allocation69_spill] sm:$0xff]  ;;  %v7947_v23 = vld [vmem:[#allocation36_spill] sm:$0xff]  ;;  %v7950_v24 = vld [vmem:[#allocation51_spill] sm:$0xff] }
 0x5cf   :  { %2707 = vmatpush.msrb.mxu3 %v7940_v20  ;;  %2688 = vmatpush.msrb.mxu2 %v7942_v29  ;;  %v7948_v13 = vld [vmem:[#allocation68_spill] sm:$0xff]  ;;  %v7951_v9 = vld [vmem:[#allocation35_spill] sm:$0xff]  ;;  %v7953_v44 = vld [vmem:[#allocation18_spill] sm:$0xff] }
 0x5d0   :  { %2668 = vmatpush.msrb.mxu1 %v7943_v43  ;;  %2649 = vmatpush.msrb.mxu0 %v7945_v41  ;;  %v7952_v60 = vld [vmem:[#allocation67_spill] sm:$0xff]  ;;  %v7954_v31 = vld [vmem:[#allocation50_spill] sm:$0xff]  ;;  %v7957_v16 = vld [vmem:[#allocation17_spill] sm:$0xff] }
 0x5d1   :  { %2708 = vmatpush.msrb.mxu3 %v7944_v56  ;;  %2689 = vmatpush.msrb.mxu2 %v7946_v38  ;;  %v7955_v39 = vld [vmem:[#allocation34_spill] sm:$0xff]  ;;  %v7958_v0 = vld [vmem:[#allocation49_spill] sm:$0xff]  ;;  %v7961_v63 = vld [vmem:[#allocation16_spill] sm:$0xff] }
 0x5d2   :  { %2669 = vmatpush.msrb.mxu1 %v7947_v23  ;;  %2650 = vmatpush.msrb.mxu0 %v7949_v30  ;;  %v7956_v37 = vld [vmem:[#allocation66_spill] sm:$0xff]  ;;  %v7959_v5 = vld [vmem:[#allocation33_spill] sm:$0xff]  ;;  %v7962_v7 = vld [vmem:[#allocation48_spill] sm:$0xff] }
 0x5d3   :  { %2709 = vmatpush.msrb.mxu3 %v7948_v13  ;;  %2690 = vmatpush.msrb.mxu2 %v7950_v24  ;;  %v7960_v4 = vld [vmem:[#allocation65_spill] sm:$0xff]  ;;  %v7963_v10 = vld [vmem:[#allocation32_spill] sm:$0xff]  ;;  %v7965_v45 = vld [vmem:[#allocation15_spill] sm:$0xff] }
 0x5d4   :  { %2670 = vmatpush.msrb.mxu1 %v7951_v9  ;;  %2651 = vmatpush.msrb.mxu0 %v7953_v44  ;;  %v7964_v12 = vld [vmem:[#allocation64_spill] sm:$0xff]  ;;  %v7966_v46 = vld [vmem:[#allocation47_spill] sm:$0xff]  ;;  %v7969_v61 = vld [vmem:[#allocation14_spill] sm:$0xff] }
 0x5d5   :  { %2710 = vmatpush.msrb.mxu3 %v7952_v60  ;;  %2691 = vmatpush.msrb.mxu2 %v7954_v31  ;;  %v7967_v53 = vld [vmem:[#allocation31_spill] sm:$0xff]  ;;  %v7970_v58 = vld [vmem:[#allocation46_spill] sm:$0xff]  ;;  %v7973_v55 = vld [vmem:[#allocation13_spill] sm:$0xff] }
 0x5d6   :  { %2671 = vmatpush.msrb.mxu1 %v7955_v39  ;;  %2652 = vmatpush.msrb.mxu0 %v7957_v16  ;;  %v7968_v50 = vld [vmem:[#allocation63_spill] sm:$0xff]  ;;  %v2041_v21 = vld [vmem:[#allocation3] sm:$0xff]  ;;  %v7977_v36 = vld [vmem:[#allocation12_spill] sm:$0xff] }
 0x5d7   :  { %2711 = vmatpush.msrb.mxu3 %v7956_v37  ;;  %2692 = vmatpush.msrb.mxu2 %v7958_v0  ;;  %v7971_v33 = vld [vmem:[#allocation30_spill] sm:$0xff]  ;;  %2571 = vst [vmem:[#allocation1] ss:$4 sm:$0xff] %v2041_v21  ;;  %v7974_v2 = vld [vmem:[#allocation45_spill] sm:$0xff]  ;;  %v7978_v48 = vld [vmem:[#allocation44_spill] sm:$0xff] }
 0x5d8   :  { %2672 = vmatpush.msrb.mxu1 %v7959_v5  ;;  %2653 = vmatpush.msrb.mxu0 %v7961_v63  ;;  %v7972_v1 = vld [vmem:[#allocation62_spill] sm:$0xff]  ;;  %v7975_v49 = vld [vmem:[#allocation29_spill] sm:$0xff]  ;;  %v7979_v54 = vld [vmem:[#allocation28_spill] sm:$0xff] }
 0x5d9   :  { %2712 = vmatpush.msrb.mxu3 %v7960_v4  ;;  %2693 = vmatpush.msrb.mxu2 %v7962_v7  ;;  %v7976_v3 = vld [vmem:[#allocation61_spill] sm:$0xff]  ;;  %v7980_v59 = vld [vmem:[#allocation60_spill] sm:$0xff]  ;;  %v7981_v27 = vld [vmem:[#allocation11_spill] sm:$0xff] }
 0x5da   :  { %2673 = vmatpush.msrb.mxu1 %v7963_v10  ;;  %2654 = vmatpush.msrb.mxu0 %v7965_v45  ;;  %v7982_v62 = vld [vmem:[#allocation43_spill] sm:$0xff]  ;;  %v7985_v34 = vld [vmem:[#allocation10_spill] sm:$0xff]  ;;  %v7987_v11 = vld [vmem:[#allocation89_spill] sm:$0xff] }
 0x5db   :  { %2713 = vmatpush.msrb.mxu3 %v7964_v12  ;;  %2694 = vmatpush.msrb.mxu2 %v7966_v46  ;;  %v7983_v51 = vld [vmem:[#allocation27_spill] sm:$0xff]  ;;  %v7986_v28 = vld [vmem:[#allocation42_spill] sm:$0xff]  ;;  %v7988_v26 = vld [vmem:[#allocation121_spill] sm:$0xff] }
 0x5dc   :  { %2674 = vmatpush.msrb.mxu1 %v7967_v53  ;;  %2655 = vmatpush.msrb.mxu0 %v7969_v61  ;;  %v7984_v25 = vld [vmem:[#allocation59_spill] sm:$0xff]  ;;  %v7989_v18 = vld [vmem:[#allocation26_spill] sm:$0xff]  ;;  %v7991_v32 = vld [vmem:[#allocation88_spill] sm:$0xff] }
 0x5dd   :  { %2714 = vmatpush.msrb.mxu3 %v7968_v50  ;;  %2695 = vmatpush.msrb.mxu2 %v7970_v58  ;;  %v7990_v14 = vld [vmem:[#allocation58_spill] sm:$0xff]  ;;  %v7992_v15 = vld [vmem:[#allocation105_spill] sm:$0xff]  ;;  %v7993_v22 = vld [vmem:[#allocation120_spill] sm:$0xff] }
 0x5de   :  { %2675 = vmatpush.msrb.mxu1 %v7971_v33  ;;  %2656 = vmatpush.msrb.mxu0 %v7973_v55  ;;  %v6803_v47 = vld.sshfl [vmem:[#allocation1] sm:$0xff pattern:$0x73625140]  ;;  %v6807_v52 = vld.sshfl [vmem:[#allocation1 + $0x10] sm:$0xff pattern:$0x73625140] }
 0x5df   :  { %2715 = vmatpush.msrb.mxu3 %v7972_v1  ;;  %2696 = vmatpush.msrb.mxu2 %v7974_v2  ;;  %v6809_v42 = vld.sshfl [vmem:[#allocation1 + $0x8] sm:$0xff pattern:$0x73625140]  ;;  %v2043_v35 = vld [vmem:[#allocation3 + $0x10] sm:$0xff]  ;;  %v2042_v40 = vld [vmem:[#allocation3 + $0x8] sm:$0xff] }
 0x5e0   :  { %2676 = vmatpush.msrb.mxu1 %v7975_v49  ;;  %2657 = vmatpush.msrb.mxu0 %v7977_v36  ;;  %v7994_v19 = vld [vmem:[#allocation137_spill] sm:$0xff]  ;;  %v6813_v8 = vld.sshfl [vmem:[#allocation1 + $0x18] sm:$0xff pattern:$0x73625140]  ;;  %2573 = vst [vmem:[#allocation1 + $0x20] ss:$4 sm:$0xff] %v2042_v40 }
 0x5e1   :  { %2716 = vmatpush.msrb.mxu3 %v7976_v3  ;;  %2697 = vmatpush.msrb.mxu2 %v7978_v48  ;;  %v7995_v57 = vld [vmem:[#allocation87_spill] sm:$0xff]  ;;  %v7996_v17 = vld [vmem:[#allocation104_spill] sm:$0xff]  ;;  %2582 = vst [vmem:[#allocation1] ss:$4 sm:$0xff] %v2043_v35  ;;  %v7999_v29 = vld [vmem:[#allocation86_spill] sm:$0xff] }
 0x5e2   :  { %2677 = vmatpush.msrb.mxu1 %v7979_v54  ;;  %2658 = vmatpush.msrb.mxu0 %v7981_v27  ;;  %v7997_v20 = vld [vmem:[#allocation119_spill] sm:$0xff]  ;;  %v7998_v6 = vld [vmem:[#allocation136_spill] sm:$0xff]  ;;  %v8001_v56 = vld [vmem:[#allocation118_spill] sm:$0xff] }
 0x5e3   :  { %2717 = vmatpush.msrb.mxu3 %v7980_v59  ;;  %2698 = vmatpush.msrb.mxu2 %v7982_v62  ;;  %v8000_v43 = vld [vmem:[#allocation103_spill] sm:$0xff]  ;;  %v8003_v38 = vld [vmem:[#allocation85_spill] sm:$0xff]  ;;  %v8004_v23 = vld [vmem:[#allocation102_spill] sm:$0xff] }
 0x5e4   :  { %2678 = vmatpush.msrb.mxu1 %v7983_v51  ;;  %2659 = vmatpush.msrb.mxu0 %v7985_v34  ;;  %v8002_v41 = vld [vmem:[#allocation135_spill] sm:$0xff]  ;;  %v8005_v13 = vld [vmem:[#allocation117_spill] sm:$0xff]  ;;  %v8006_v30 = vld [vmem:[#allocation134_spill] sm:$0xff] }
 0x5e5   :  { %2718 = vmatpush.msrb.mxu3 %v7984_v25  ;;  %2699 = vmatpush.msrb.mxu2 %v7986_v28  ;;  %v8007_v24 = vld [vmem:[#allocation84_spill] sm:$0xff]  ;;  %v8008_v9 = vld [vmem:[#allocation101_spill] sm:$0xff]  ;;  %v8011_v31 = vld [vmem:[#allocation83_spill] sm:$0xff] }
 0x5e6   :  { %2724 = vmatpush.msra.mxu0 %v7987_v11  ;;  %2679 = vmatpush.msrb.mxu1 %v7989_v18  ;;  %v8009_v60 = vld [vmem:[#allocation116_spill] sm:$0xff]  ;;  %v8010_v44 = vld [vmem:[#allocation133_spill] sm:$0xff]  ;;  %v8013_v37 = vld [vmem:[#allocation115_spill] sm:$0xff] }
 0x5e7   :  { %2764 = vmatpush.msra.mxu2 %v7988_v26  ;;  %2719 = vmatpush.msrb.mxu3 %v7990_v14  ;;  %v8012_v39 = vld [vmem:[#allocation100_spill] sm:$0xff]  ;;  %v6835_v0 = vld.sshfl [vmem:[#allocation1 + $0x30] sm:$0xff pattern:$0x73625140]  ;;  %v8019_v53 = vld [vmem:[#allocation81_spill] sm:$0xff] }
 0x5e8   :  { %2725 = vmatpush.msra.mxu0 %v7991_v32  ;;  %2744 = vmatpush.msra.mxu1 %v7992_v15  ;;  %v8014_v16 = vld [vmem:[#allocation132_spill] sm:$0xff]  ;;  %v8015_v5 = vld [vmem:[#allocation82_spill] sm:$0xff]  ;;  %v8016_v4 = vld [vmem:[#allocation99_spill] sm:$0xff] }
 0x5e9   :  { %2765 = vmatpush.msra.mxu2 %v7993_v22  ;;  %2784 = vmatpush.msra.mxu3 %v7994_v19  ;;  %v6839_v63 = vld.sshfl [vmem:[#allocation1 + $0x20] sm:$0xff pattern:$0x73625140]  ;;  %v6841_v7 = vld.sshfl [vmem:[#allocation1 + $0x38] sm:$0xff pattern:$0x73625140] }
 0x5ea   :  { %2726 = vmatpush.msra.mxu0 %v7995_v57  ;;  %2745 = vmatpush.msra.mxu1 %v7996_v17  ;;  %v8017_v10 = vld [vmem:[#allocation114_spill] sm:$0xff]  ;;  %v8018_v12 = vld [vmem:[#allocation131_spill] sm:$0xff]  ;;  %v2044_v45 = vld [vmem:[#allocation3 + $0x18] sm:$0xff] }
 0x5eb   :  { %2766 = vmatpush.msra.mxu2 %v7997_v20  ;;  %2785 = vmatpush.msra.mxu3 %v7998_v6  ;;  %v6845_v46 = vld.sshfl [vmem:[#allocation1 + $0x28] sm:$0xff pattern:$0x73625140]  ;;  %v8023_v21 = vld [vmem:[#allocation80_spill] sm:$0xff]  ;;  %v8027_v2 = vld [vmem:[#allocation79_spill] sm:$0xff] }
 0x5ec   :  { %2727 = vmatpush.msra.mxu0 %v7999_v29  ;;  %2746 = vmatpush.msra.mxu1 %v8000_v43  ;;  %v8020_v50 = vld [vmem:[#allocation98_spill] sm:$0xff]  ;;  %2583 = vst [vmem:[#allocation1 + $0x20] ss:$4 sm:$0xff] %v2044_v45  ;;  %v8021_v61 = vld [vmem:[#allocation113_spill] sm:$0xff]  ;;  %v8025_v1 = vld [vmem:[#allocation112_spill] sm:$0xff] }
 0x5ed   :  { %2767 = vmatpush.msra.mxu2 %v8001_v56  ;;  %2786 = vmatpush.msra.mxu3 %v8002_v41  ;;  %v8022_v58 = vld [vmem:[#allocation130_spill] sm:$0xff]  ;;  %v8024_v33 = vld [vmem:[#allocation97_spill] sm:$0xff]  ;;  %v8028_v49 = vld [vmem:[#allocation96_spill] sm:$0xff] }
 0x5ee   :  { %2728 = vmatpush.msra.mxu0 %v8003_v38  ;;  %2747 = vmatpush.msra.mxu1 %v8004_v23  ;;  %v8026_v55 = vld [vmem:[#allocation129_spill] sm:$0xff]  ;;  %v8029_v3 = vld [vmem:[#allocation111_spill] sm:$0xff]  ;;  %v8030_v36 = vld [vmem:[#allocation128_spill] sm:$0xff] }
 0x5ef   :  { %2768 = vmatpush.msra.mxu2 %v8005_v13  ;;  %2787 = vmatpush.msra.mxu3 %v8006_v30  ;;  %v8031_v48 = vld [vmem:[#allocation78_spill] sm:$0xff]  ;;  %v8032_v54 = vld [vmem:[#allocation95_spill] sm:$0xff]  ;;  %v8035_v62 = vld [vmem:[#allocation77_spill] sm:$0xff] }
 0x5f0   :  { %2729 = vmatpush.msra.mxu0 %v8007_v24  ;;  %2748 = vmatpush.msra.mxu1 %v8008_v9  ;;  %v8033_v59 = vld [vmem:[#allocation110_spill] sm:$0xff]  ;;  %v8034_v27 = vld [vmem:[#allocation127_spill] sm:$0xff]  ;;  %v8037_v25 = vld [vmem:[#allocation109_spill] sm:$0xff] }
 0x5f1   :  { %2769 = vmatpush.msra.mxu2 %v8009_v60  ;;  %2788 = vmatpush.msra.mxu3 %v8010_v44  ;;  %v8036_v51 = vld [vmem:[#allocation94_spill] sm:$0xff]  ;;  %v8039_v28 = vld [vmem:[#allocation76_spill] sm:$0xff]  ;;  %v8040_v11 = vld [vmem:[#allocation93_spill] sm:$0xff] }
 0x5f2   :  { %2730 = vmatpush.msra.mxu0 %v8011_v31  ;;  %2749 = vmatpush.msra.mxu1 %v8012_v39  ;;  %v8038_v34 = vld [vmem:[#allocation126_spill] sm:$0xff]  ;;  %v8041_v26 = vld [vmem:[#allocation108_spill] sm:$0xff]  ;;  %v8042_v18 = vld [vmem:[#allocation125_spill] sm:$0xff] }
 0x5f3   :  { %2770 = vmatpush.msra.mxu2 %v8013_v37  ;;  %2789 = vmatpush.msra.mxu3 %v8014_v16  ;;  %v8043_v14 = vld [vmem:[#allocation75_spill] sm:$0xff]  ;;  %v8044_v32 = vld [vmem:[#allocation92_spill] sm:$0xff]  ;;  %v8047_v19 = vld [vmem:[#allocation74_spill] sm:$0xff] }
 0x5f4   :  { %2731 = vmatpush.msra.mxu0 %v8015_v5  ;;  %2750 = vmatpush.msra.mxu1 %v8016_v4  ;;  %v8045_v15 = vld [vmem:[#allocation107_spill] sm:$0xff]  ;;  %v8046_v22 = vld [vmem:[#allocation124_spill] sm:$0xff]  ;;  %v8049_v40 = vld [vmem:[#allocation106_spill] sm:$0xff] }
 0x5f5   :  { %2771 = vmatpush.msra.mxu2 %v8017_v10  ;;  %2790 = vmatpush.msra.mxu3 %v8018_v12  ;;  %v8048_v35 = vld [vmem:[#allocation91_spill] sm:$0xff]  ;;  %v8051_v17 = vld [vmem:[#allocation153_spill] sm:$0xff]  ;;  %v8053_v6 = vld [vmem:[#allocation90_spill] sm:$0xff] }
 0x5f6   :  { %2732 = vmatpush.msra.mxu0 %v8019_v53  ;;  %2751 = vmatpush.msra.mxu1 %v8020_v50  ;;  %v8050_v57 = vld [vmem:[#allocation123_spill] sm:$0xff]  ;;  %v8052_v20 = vld [vmem:[#allocation185_spill] sm:$0xff]  ;;  %v8054_v29 = vld [vmem:[#allocation122_spill] sm:$0xff] }
 0x5f7   :  { %2772 = vmatpush.msra.mxu2 %v8021_v61  ;;  %2791 = vmatpush.msra.mxu3 %v8022_v58  ;;  %v8055_v43 = vld [vmem:[#allocation152_spill] sm:$0xff]  ;;  %v8056_v56 = vld [vmem:[#allocation169_spill] sm:$0xff]  ;;  %v8059_v38 = vld [vmem:[#allocation151_spill] sm:$0xff] }
 0x5f8   :  { %2733 = vmatpush.msra.mxu0 %v8023_v21  ;;  %2752 = vmatpush.msra.mxu1 %v8024_v33  ;;  %v8057_v41 = vld [vmem:[#allocation184_spill] sm:$0xff]  ;;  %v6895_v13 = vld.sshfl [vmem:[#allocation1 + $0x10] sm:$0xff pattern:$0x73625140]  ;;  %v2045_v24 = vld [vmem:[#allocation3 + $0x20] sm:$0xff] }
 0x5f9   :  { %2773 = vmatpush.msra.mxu2 %v8025_v1  ;;  %2792 = vmatpush.msra.mxu3 %v8026_v55  ;;  %v8060_v23 = vld [vmem:[#allocation168_spill] sm:$0xff]  ;;  %v6897_v30 = vld.sshfl [vmem:[#allocation1 + $0x8] sm:$0xff pattern:$0x73625140]  ;;  %v8064_v44 = vld [vmem:[#allocation167_spill] sm:$0xff] }
 0x5fa   :  { %2734 = vmatpush.msra.mxu0 %v8027_v2  ;;  %2753 = vmatpush.msra.mxu1 %v8028_v49  ;;  %v6901_v9 = vld.sshfl [vmem:[#allocation1 + $0x18] sm:$0xff pattern:$0x73625140]  ;;  %v8063_v60 = vld [vmem:[#allocation150_spill] sm:$0xff]  ;;  %v8067_v37 = vld [vmem:[#allocation149_spill] sm:$0xff] }
 0x5fb   :  { %2774 = vmatpush.msra.mxu2 %v8029_v3  ;;  %2793 = vmatpush.msra.mxu3 %v8030_v36  ;;  %v8065_v31 = vld [vmem:[#allocation182_spill] sm:$0xff]  ;;  %v8066_v39 = vld [vmem:[#allocation199_spill] sm:$0xff]  ;;  %v8069_v5 = vld [vmem:[#allocation181_spill] sm:$0xff] }
 0x5fc   :  { %2735 = vmatpush.msra.mxu0 %v8031_v48  ;;  %2754 = vmatpush.msra.mxu1 %v8032_v54  ;;  %v8068_v16 = vld [vmem:[#allocation166_spill] sm:$0xff]  ;;  %v8071_v10 = vld [vmem:[#allocation148_spill] sm:$0xff]  ;;  %v8072_v12 = vld [vmem:[#allocation165_spill] sm:$0xff] }
 0x5fd   :  { %2775 = vmatpush.msra.mxu2 %v8033_v59  ;;  %2794 = vmatpush.msra.mxu3 %v8034_v27  ;;  %v8070_v4 = vld [vmem:[#allocation198_spill] sm:$0xff]  ;;  %v8073_v45 = vld [vmem:[#allocation180_spill] sm:$0xff]  ;;  %v8074_v53 = vld [vmem:[#allocation197_spill] sm:$0xff] }
 0x5fe   :  { %2736 = vmatpush.msra.mxu0 %v8035_v62  ;;  %2755 = vmatpush.msra.mxu1 %v8036_v51  ;;  %v8076_v50 = vld [vmem:[#allocation164_spill] sm:$0xff]  ;;  %v8077_v61 = vld [vmem:[#allocation179_spill] sm:$0xff]  ;;  %v8081_v21 = vld [vmem:[#allocation178_spill] sm:$0xff] }
 0x5ff   :  { %2776 = vmatpush.msra.mxu2 %v8037_v25  ;;  %2795 = vmatpush.msra.mxu3 %v8038_v34  ;;  %v8078_v58 = vld [vmem:[#allocation196_spill] sm:$0xff]  ;;  %v8082_v33 = vld [vmem:[#allocation195_spill] sm:$0xff]  ;;  %v8083_v1 = vld [vmem:[#allocation145_spill] sm:$0xff] }
 0x600   :  { %2737 = vmatpush.msra.mxu0 %v8039_v28  ;;  %2756 = vmatpush.msra.mxu1 %v8040_v11  ;;  %v8084_v55 = vld [vmem:[#allocation162_spill] sm:$0xff]  ;;  %v8087_v49 = vld [vmem:[#allocation144_spill] sm:$0xff]  ;;  %v8088_v3 = vld [vmem:[#allocation161_spill] sm:$0xff] }
 0x601   :  { %2777 = vmatpush.msra.mxu2 %v8041_v26  ;;  %2796 = vmatpush.msra.mxu3 %v8042_v18  ;;  %v8086_v2 = vld [vmem:[#allocation194_spill] sm:$0xff]  ;;  %v8089_v36 = vld [vmem:[#allocation176_spill] sm:$0xff]  ;;  %v8090_v48 = vld [vmem:[#allocation193_spill] sm:$0xff] }
 0x602   :  { %2738 = vmatpush.msra.mxu0 %v8043_v14  ;;  %2757 = vmatpush.msra.mxu1 %v8044_v32  ;;  %v8091_v54 = vld [vmem:[#allocation143_spill] sm:$0xff]  ;;  %v8092_v59 = vld [vmem:[#allocation160_spill] sm:$0xff]  ;;  %v8095_v51 = vld [vmem:[#allocation142_spill] sm:$0xff] }
 0x603   :  { %2778 = vmatpush.msra.mxu2 %v8045_v15  ;;  %2797 = vmatpush.msra.mxu3 %v8046_v22  ;;  %v8093_v27 = vld [vmem:[#allocation175_spill] sm:$0xff]  ;;  %v8094_v62 = vld [vmem:[#allocation192_spill] sm:$0xff]  ;;  %v8097_v34 = vld [vmem:[#allocation174_spill] sm:$0xff] }
 0x604   :  { %2739 = vmatpush.msra.mxu0 %v8047_v19  ;;  %2758 = vmatpush.msra.mxu1 %v8048_v35  ;;  %v8096_v25 = vld [vmem:[#allocation159_spill] sm:$0xff]  ;;  %v8099_v11 = vld [vmem:[#allocation141_spill] sm:$0xff]  ;;  %v8100_v26 = vld [vmem:[#allocation158_spill] sm:$0xff] }
 0x605   :  { %2779 = vmatpush.msra.mxu2 %v8049_v40  ;;  %2798 = vmatpush.msra.mxu3 %v8050_v57  ;;  %v8098_v28 = vld [vmem:[#allocation191_spill] sm:$0xff]  ;;  %v8101_v18 = vld [vmem:[#allocation173_spill] sm:$0xff]  ;;  %v8102_v14 = vld [vmem:[#allocation190_spill] sm:$0xff] }
 0x606   :  { %2660 = vmatmul.f32.vlgmr.msrb.gmra.mxu0 %v6803_v47  ;;  %2700 = vmatmul.f32.vlgmr.msrb.gmra.mxu2 %v6807_v52  ;;  %v8058_v47 = vld [vmem:[#allocation201_spill] sm:$0xff]  ;;  %v8103_v32 = vld [vmem:[#allocation140_spill] sm:$0xff]  ;;  %v8107_v35 = vld [vmem:[#allocation139_spill] sm:$0xff] }
 0x607   :  { %2804 = vmatpush.msrb.mxu0 %v8051_v17  ;;  %2844 = vmatpush.msrb.mxu2 %v8052_v20  ;;  %v6891_v52 = vld.sshfl [vmem:[#allocation1] sm:$0xff pattern:$0x73625140]  ;;  %v8109_v57 = vld [vmem:[#allocation171_spill] sm:$0xff]  ;;  %v8111_v20 = vld [vmem:[#allocation138_spill] sm:$0xff] }
 0x608   :  { %2759 = vmatpush.msra.mxu1 %v8053_v6  ;;  %2799 = vmatpush.msra.mxu3 %v8054_v29  ;;  %2592 = vst [vmem:[#allocation1] ss:$4 sm:$0xff] %v2045_v24  ;;  %v8104_v15 = vld [vmem:[#allocation157_spill] sm:$0xff]  ;;  %v8105_v22 = vld [vmem:[#allocation172_spill] sm:$0xff]  ;;  %v8112_v6 = vld [vmem:[#allocation155_spill] sm:$0xff] }
 0x609   :  { %2680 = vmatmul.f32.vlgmr.msrb.gmra.mxu1 %v6809_v42  ;;  %2720 = vmatmul.f32.vlgmr.msrb.gmra.mxu3 %v6813_v8  ;;  %v8061_v42 = vld [vmem:[#allocation183_spill] sm:$0xff]  ;;  %v8062_v8 = vld [vmem:[#allocation200_spill] sm:$0xff]  ;;  %v8106_v19 = vld [vmem:[#allocation189_spill] sm:$0xff] }
 0x60a   :  { %2805 = vmatpush.msrb.mxu0 %v8055_v43  ;;  %2824 = vmatpush.msrb.mxu1 %v8056_v56  ;;  %v8108_v40 = vld [vmem:[#allocation156_spill] sm:$0xff]  ;;  %v8113_v29 = vld [vmem:[#allocation170_spill] sm:$0xff]  ;;  %v8114_v43 = vld [vmem:[#allocation187_spill] sm:$0xff] }
 0x60b   :  { %2845 = vmatpush.msrb.mxu2 %v8057_v41  ;;  %2864 = vmatpush.msrb.mxu3 %v8058_v47  ;;  %v8110_v17 = vld [vmem:[#allocation188_spill] sm:$0xff]  ;;  %v8115_v56 = vld [vmem:[#allocation217_spill] sm:$0xff]  ;;  %v8117_v47 = vld [vmem:[#allocation154_spill] sm:$0xff] }
 0x60c   :  { %2806 = vmatpush.msrb.mxu0 %v8059_v38  ;;  %2825 = vmatpush.msrb.mxu1 %v8060_v23  ;;  %v8116_v41 = vld [vmem:[#allocation249_spill] sm:$0xff]  ;;  %v8118_v38 = vld [vmem:[#allocation186_spill] sm:$0xff]  ;;  %v8121_v24 = vld [vmem:[#allocation248_spill] sm:$0xff] }
 0x60d   :  { %2846 = vmatpush.msrb.mxu2 %v8061_v42  ;;  %2865 = vmatpush.msrb.mxu3 %v8062_v8  ;;  %v6967_v23 = vld.sshfl [vmem:[#allocation1 + $0x20] sm:$0xff pattern:$0x73625140] }
 0x60e   :  { %2807 = vmatpush.msrb.mxu0 %v8063_v60  ;;  %2826 = vmatpush.msrb.mxu1 %v8064_v44  ;;  %v8119_v42 = vld [vmem:[#allocation216_spill] sm:$0xff]  ;;  %v8120_v8 = vld [vmem:[#allocation233_spill] sm:$0xff]  ;;  %v2046_v44 = vld [vmem:[#allocation3 + $0x28] sm:$0xff] }
 0x60f   :  { %2847 = vmatpush.msrb.mxu2 %v8065_v31  ;;  %2866 = vmatpush.msrb.mxu3 %v8066_v39  ;;  %v8122_v60 = vld [vmem:[#allocation265_spill] sm:$0xff]  ;;  %v6977_v31 = vld.sshfl [vmem:[#allocation1 + $0x38] sm:$0xff pattern:$0x73625140] }
 0x610   :  { %2780 = vmatmul.f32.vlgmr.msra.gmra.mxu2 %v6835_v0  ;;  %2808 = vmatpush.msrb.mxu0 %v8067_v37  ;;  %v8075_v0 = vld [vmem:[#allocation147_spill] sm:$0xff]  ;;  %v8126_v37 = vld [vmem:[#allocation264_spill] sm:$0xff] }
 0x611   :  { %2827 = vmatpush.msrb.mxu1 %v8068_v16  ;;  %2848 = vmatpush.msrb.mxu2 %v8069_v5  ;;  %v8125_v39 = vld [vmem:[#allocation247_spill] sm:$0xff]  ;;  %v8127_v16 = vld [vmem:[#allocation214_spill] sm:$0xff] }
 0x612   :  { %2867 = vmatpush.msrb.mxu3 %v8070_v4  ;;  %2740 = vmatmul.f32.vlgmr.msra.gmra.mxu0 %v6839_v63  ;;  %v8079_v63 = vld [vmem:[#allocation146_spill] sm:$0xff]  ;;  %v8128_v5 = vld [vmem:[#allocation231_spill] sm:$0xff] }
 0x613   :  { %2800 = vmatmul.f32.vlgmr.msra.gmra.mxu3 %v6841_v7  ;;  %2809 = vmatpush.msrb.mxu0 %v8071_v10  ;;  %v8080_v7 = vld [vmem:[#allocation163_spill] sm:$0xff]  ;;  %v8129_v4 = vld [vmem:[#allocation246_spill] sm:$0xff] }
 0x614   :  { %2828 = vmatpush.msrb.mxu1 %v8072_v12  ;;  %2849 = vmatpush.msrb.mxu2 %v8073_v45  ;;  %v8130_v10 = vld [vmem:[#allocation263_spill] sm:$0xff]  ;;  %v8131_v12 = vld [vmem:[#allocation213_spill] sm:$0xff]  ;;  %v8132_v45 = vld [vmem:[#allocation230_spill] sm:$0xff] }
 0x615   :  { %2868 = vmatpush.msrb.mxu3 %v8074_v53  ;;  %2760 = vmatmul.f32.vlgmr.msra.gmra.mxu1 %v6845_v46  ;;  %v8085_v46 = vld [vmem:[#allocation177_spill] sm:$0xff] }
 0x616   :  { %2810 = vmatpush.msrb.mxu0 %v8075_v0  ;;  %2829 = vmatpush.msrb.mxu1 %v8076_v50  ;;  %v8133_v53 = vld [vmem:[#allocation245_spill] sm:$0xff]  ;;  %v8134_v0 = vld [vmem:[#allocation262_spill] sm:$0xff]  ;;  %v8135_v50 = vld [vmem:[#allocation212_spill] sm:$0xff] }
 0x617   :  { %2850 = vmatpush.msrb.mxu2 %v8077_v61  ;;  %2869 = vmatpush.msrb.mxu3 %v8078_v58  ;;  %v8136_v61 = vld [vmem:[#allocation229_spill] sm:$0xff]  ;;  %v8137_v58 = vld [vmem:[#allocation244_spill] sm:$0xff] }
 0x618   :  { %2811 = vmatpush.msrb.mxu0 %v8079_v63  ;;  %2830 = vmatpush.msrb.mxu1 %v8080_v7  ;;  %v8138_v63 = vld [vmem:[#allocation261_spill] sm:$0xff]  ;;  %v8139_v7 = vld [vmem:[#allocation211_spill] sm:$0xff] }
 0x619   :  { %2851 = vmatpush.msrb.mxu2 %v8081_v21  ;;  %2870 = vmatpush.msrb.mxu3 %v8082_v33  ;;  %v8140_v21 = vld [vmem:[#allocation228_spill] sm:$0xff]  ;;  %v8141_v33 = vld [vmem:[#allocation243_spill] sm:$0xff] }
 0x61a   :  { %2812 = vmatpush.msrb.mxu0 %v8083_v1  ;;  %2831 = vmatpush.msrb.mxu1 %v8084_v55  ;;  %v8142_v1 = vld [vmem:[#allocation260_spill] sm:$0xff]  ;;  %v8143_v55 = vld [vmem:[#allocation210_spill] sm:$0xff] }
 0x61b   :  { %2852 = vmatpush.msrb.mxu2 %v8085_v46  ;;  %2871 = vmatpush.msrb.mxu3 %v8086_v2  ;;  %v8144_v46 = vld [vmem:[#allocation227_spill] sm:$0xff]  ;;  %v8145_v2 = vld [vmem:[#allocation242_spill] sm:$0xff] }
 0x61c   :  { %2813 = vmatpush.msrb.mxu0 %v8087_v49  ;;  %2832 = vmatpush.msrb.mxu1 %v8088_v3  ;;  %v8146_v49 = vld [vmem:[#allocation259_spill] sm:$0xff]  ;;  %v8147_v3 = vld [vmem:[#allocation209_spill] sm:$0xff] }
 0x61d   :  { %2853 = vmatpush.msrb.mxu2 %v8089_v36  ;;  %2872 = vmatpush.msrb.mxu3 %v8090_v48  ;;  %v8148_v36 = vld [vmem:[#allocation226_spill] sm:$0xff]  ;;  %v8149_v48 = vld [vmem:[#allocation241_spill] sm:$0xff] }
 0x61e   :  { %2814 = vmatpush.msrb.mxu0 %v8091_v54  ;;  %2833 = vmatpush.msrb.mxu1 %v8092_v59  ;;  %v8150_v54 = vld [vmem:[#allocation258_spill] sm:$0xff]  ;;  %v8151_v59 = vld [vmem:[#allocation208_spill] sm:$0xff] }
 0x61f   :  { %2854 = vmatpush.msrb.mxu2 %v8093_v27  ;;  %2873 = vmatpush.msrb.mxu3 %v8094_v62  ;;  %v8152_v27 = vld [vmem:[#allocation225_spill] sm:$0xff]  ;;  %v8153_v62 = vld [vmem:[#allocation240_spill] sm:$0xff] }
 0x620   :  { %2815 = vmatpush.msrb.mxu0 %v8095_v51  ;;  %2834 = vmatpush.msrb.mxu1 %v8096_v25  ;;  %v8154_v51 = vld [vmem:[#allocation257_spill] sm:$0xff]  ;;  %v8155_v25 = vld [vmem:[#allocation207_spill] sm:$0xff] }
 0x621   :  { %2855 = vmatpush.msrb.mxu2 %v8097_v34  ;;  %2874 = vmatpush.msrb.mxu3 %v8098_v28  ;;  %v8156_v34 = vld [vmem:[#allocation224_spill] sm:$0xff]  ;;  %v8157_v28 = vld [vmem:[#allocation239_spill] sm:$0xff] }
 0x622   :  { %2816 = vmatpush.msrb.mxu0 %v8099_v11  ;;  %2835 = vmatpush.msrb.mxu1 %v8100_v26  ;;  %v8158_v11 = vld [vmem:[#allocation256_spill] sm:$0xff]  ;;  %v8159_v26 = vld [vmem:[#allocation206_spill] sm:$0xff] }
 0x623   :  { %2856 = vmatpush.msrb.mxu2 %v8101_v18  ;;  %2875 = vmatpush.msrb.mxu3 %v8102_v14  ;;  %v8160_v18 = vld [vmem:[#allocation223_spill] sm:$0xff]  ;;  %v8161_v14 = vld [vmem:[#allocation238_spill] sm:$0xff] }
 0x624   :  { %2817 = vmatpush.msrb.mxu0 %v8103_v32  ;;  %2836 = vmatpush.msrb.mxu1 %v8104_v15  ;;  %v8162_v32 = vld [vmem:[#allocation255_spill] sm:$0xff]  ;;  %v8163_v15 = vld [vmem:[#allocation205_spill] sm:$0xff] }
 0x625   :  { %2857 = vmatpush.msrb.mxu2 %v8105_v22  ;;  %2876 = vmatpush.msrb.mxu3 %v8106_v19  ;;  %v8164_v22 = vld [vmem:[#allocation222_spill] sm:$0xff]  ;;  %v8165_v19 = vld [vmem:[#allocation237_spill] sm:$0xff] }
 0x626   :  { %2818 = vmatpush.msrb.mxu0 %v8107_v35  ;;  %2837 = vmatpush.msrb.mxu1 %v8108_v40  ;;  %v8166_v35 = vld [vmem:[#allocation254_spill] sm:$0xff]  ;;  %v8167_v40 = vld [vmem:[#allocation204_spill] sm:$0xff] }
 0x627   :  { %2858 = vmatpush.msrb.mxu2 %v8109_v57  ;;  %2877 = vmatpush.msrb.mxu3 %v8110_v17  ;;  %v8168_v57 = vld [vmem:[#allocation221_spill] sm:$0xff]  ;;  %v8169_v17 = vld [vmem:[#allocation236_spill] sm:$0xff] }
 0x628   :  { %2819 = vmatpush.msrb.mxu0 %v8111_v20  ;;  %2838 = vmatpush.msrb.mxu1 %v8112_v6  ;;  %v8170_v20 = vld [vmem:[#allocation253_spill] sm:$0xff]  ;;  %v8171_v6 = vld [vmem:[#allocation203_spill] sm:$0xff] }
 0x629   :  { %2859 = vmatpush.msrb.mxu2 %v8113_v29  ;;  %2878 = vmatpush.msrb.mxu3 %v8114_v43  ;;  %v8172_v29 = vld [vmem:[#allocation220_spill] sm:$0xff]  ;;  %v8173_v43 = vld [vmem:[#allocation235_spill] sm:$0xff] }
 0x62a   :  { %2820 = vmatmul.f32.vlgmr.msrb.gmra.mxu0 %v6891_v52  ;;  %2860 = vmatmul.f32.vlgmr.msrb.gmra.mxu2 %v6895_v13  ;;  %v6971_v52 = vld.sshfl [vmem:[#allocation1 + $0x30] sm:$0xff pattern:$0x73625140]  ;;  %v6973_v13 = vld.sshfl [vmem:[#allocation1 + $0x28] sm:$0xff pattern:$0x73625140] }
 0x62b   :  { %2884 = vmatpush.msra.mxu0 %v8115_v56  ;;  %2924 = vmatpush.msra.mxu2 %v8116_v41  ;;  %2593 = vst [vmem:[#allocation1 + $0x20] ss:$4 sm:$0xff] %v2046_v44  ;;  %v8174_v56 = vld [vmem:[#allocation252_spill] sm:$0xff]  ;;  %v8175_v41 = vld [vmem:[#allocation202_spill] sm:$0xff] }
 0x62c   :  { %2839 = vmatpush.msrb.mxu1 %v8117_v47  ;;  %2879 = vmatpush.msrb.mxu3 %v8118_v38  ;;  %v8176_v47 = vld [vmem:[#allocation219_spill] sm:$0xff]  ;;  %v8177_v38 = vld [vmem:[#allocation234_spill] sm:$0xff] }
 0x62d   :  { %2840 = vmatmul.f32.vlgmr.msrb.gmra.mxu1 %v6897_v30  ;;  %2880 = vmatmul.f32.vlgmr.msrb.gmra.mxu3 %v6901_v9  ;;  %v8123_v30 = vld [vmem:[#allocation215_spill] sm:$0xff]  ;;  %v8124_v9 = vld [vmem:[#allocation232_spill] sm:$0xff]  ;;  %v8182_v44 = vld [vmem:[#allocation250_spill] sm:$0xff] }
 0x62e   :  { %2885 = vmatpush.msra.mxu0 %v8119_v42  ;;  %2904 = vmatpush.msra.mxu1 %v8120_v8  ;;  %v8178_v42 = vld [vmem:[#allocation251_spill] sm:$0xff]  ;;  %v8179_v8 = vld [vmem:[#allocation281_spill] sm:$0xff] }
 0x62f   :  { %2925 = vmatpush.msra.mxu2 %v8121_v24  ;;  %2944 = vmatpush.msra.mxu3 %v8122_v60  ;;  %v8180_v24 = vld [vmem:[#allocation313_spill] sm:$0xff]  ;;  %v8181_v60 = vld [vmem:[#allocation218_spill] sm:$0xff] }
 0x630   :  { %2886 = vmatpush.msra.mxu0 %v8123_v30  ;;  %2905 = vmatpush.msra.mxu1 %v8124_v9  ;;  %v8183_v30 = vld [vmem:[#allocation280_spill] sm:$0xff]  ;;  %v8184_v9 = vld [vmem:[#allocation297_spill] sm:$0xff] }
 0x631   :  { %2926 = vmatpush.msra.mxu2 %v8125_v39  ;;  %2945 = vmatpush.msra.mxu3 %v8126_v37  ;;  %v8185_v39 = vld [vmem:[#allocation312_spill] sm:$0xff] }
 0x632   :  { %2887 = vmatpush.msra.mxu0 %v8127_v16  ;;  %2906 = vmatpush.msra.mxu1 %v8128_v5  ;;  %v8188_v37 = vld [vmem:[#allocation296_spill] sm:$0xff]  ;;  %v8189_v16 = vld [vmem:[#allocation311_spill] sm:$0xff] }
 0x633   :  { %2927 = vmatpush.msra.mxu2 %v8129_v4  ;;  %2946 = vmatpush.msra.mxu3 %v8130_v10  ;;  %v8190_v5 = vld [vmem:[#allocation328_spill] sm:$0xff]  ;;  %v8191_v4 = vld [vmem:[#allocation278_spill] sm:$0xff]  ;;  %v8194_v10 = vld [vmem:[#allocation327_spill] sm:$0xff] }
 0x634   :  { %2888 = vmatpush.msra.mxu0 %v8131_v12  ;;  %2907 = vmatpush.msra.mxu1 %v8132_v45  ;;  %v8195_v12 = vld [vmem:[#allocation277_spill] sm:$0xff]  ;;  %v8196_v45 = vld [vmem:[#allocation294_spill] sm:$0xff] }
 0x635   :  { %2928 = vmatpush.msra.mxu2 %v8133_v53  ;;  %2947 = vmatpush.msra.mxu3 %v8134_v0  ;;  %v8197_v53 = vld [vmem:[#allocation309_spill] sm:$0xff]  ;;  %v8198_v0 = vld [vmem:[#allocation326_spill] sm:$0xff] }
 0x636   :  { %2889 = vmatpush.msra.mxu0 %v8135_v50  ;;  %2908 = vmatpush.msra.mxu1 %v8136_v61  ;;  %v8199_v50 = vld [vmem:[#allocation276_spill] sm:$0xff]  ;;  %v8200_v61 = vld [vmem:[#allocation293_spill] sm:$0xff] }
 0x637   :  { %2929 = vmatpush.msra.mxu2 %v8137_v58  ;;  %2948 = vmatpush.msra.mxu3 %v8138_v63  ;;  %v8201_v58 = vld [vmem:[#allocation308_spill] sm:$0xff]  ;;  %v8202_v63 = vld [vmem:[#allocation325_spill] sm:$0xff] }
 0x638   :  { %2890 = vmatpush.msra.mxu0 %v8139_v7  ;;  %2909 = vmatpush.msra.mxu1 %v8140_v21  ;;  %v8203_v7 = vld [vmem:[#allocation275_spill] sm:$0xff]  ;;  %v8204_v21 = vld [vmem:[#allocation292_spill] sm:$0xff] }
 0x639   :  { %2930 = vmatpush.msra.mxu2 %v8141_v33  ;;  %2949 = vmatpush.msra.mxu3 %v8142_v1  ;;  %v8205_v33 = vld [vmem:[#allocation307_spill] sm:$0xff]  ;;  %v8206_v1 = vld [vmem:[#allocation324_spill] sm:$0xff] }
 0x63a   :  { %2891 = vmatpush.msra.mxu0 %v8143_v55  ;;  %2910 = vmatpush.msra.mxu1 %v8144_v46  ;;  %v8207_v55 = vld [vmem:[#allocation274_spill] sm:$0xff]  ;;  %v8208_v46 = vld [vmem:[#allocation291_spill] sm:$0xff] }
 0x63b   :  { %2931 = vmatpush.msra.mxu2 %v8145_v2  ;;  %2950 = vmatpush.msra.mxu3 %v8146_v49  ;;  %v8209_v2 = vld [vmem:[#allocation306_spill] sm:$0xff]  ;;  %v8210_v49 = vld [vmem:[#allocation323_spill] sm:$0xff] }
 0x63c   :  { %2892 = vmatpush.msra.mxu0 %v8147_v3  ;;  %2911 = vmatpush.msra.mxu1 %v8148_v36  ;;  %v8211_v3 = vld [vmem:[#allocation273_spill] sm:$0xff]  ;;  %v8212_v36 = vld [vmem:[#allocation290_spill] sm:$0xff] }
 0x63d   :  { %2932 = vmatpush.msra.mxu2 %v8149_v48  ;;  %2951 = vmatpush.msra.mxu3 %v8150_v54  ;;  %v8213_v48 = vld [vmem:[#allocation305_spill] sm:$0xff]  ;;  %v8214_v54 = vld [vmem:[#allocation322_spill] sm:$0xff] }
 0x63e   :  { %2893 = vmatpush.msra.mxu0 %v8151_v59  ;;  %2912 = vmatpush.msra.mxu1 %v8152_v27  ;;  %v8215_v59 = vld [vmem:[#allocation272_spill] sm:$0xff]  ;;  %v8216_v27 = vld [vmem:[#allocation289_spill] sm:$0xff] }
 0x63f   :  { %2933 = vmatpush.msra.mxu2 %v8153_v62  ;;  %2952 = vmatpush.msra.mxu3 %v8154_v51  ;;  %v8217_v62 = vld [vmem:[#allocation304_spill] sm:$0xff]  ;;  %v8218_v51 = vld [vmem:[#allocation321_spill] sm:$0xff] }
 0x640   :  { %2894 = vmatpush.msra.mxu0 %v8155_v25  ;;  %2913 = vmatpush.msra.mxu1 %v8156_v34  ;;  %v8219_v25 = vld [vmem:[#allocation271_spill] sm:$0xff]  ;;  %v8220_v34 = vld [vmem:[#allocation288_spill] sm:$0xff] }
 0x641   :  { %2934 = vmatpush.msra.mxu2 %v8157_v28  ;;  %2953 = vmatpush.msra.mxu3 %v8158_v11  ;;  %v8221_v28 = vld [vmem:[#allocation303_spill] sm:$0xff]  ;;  %v8222_v11 = vld [vmem:[#allocation320_spill] sm:$0xff] }
 0x642   :  { %2895 = vmatpush.msra.mxu0 %v8159_v26  ;;  %2914 = vmatpush.msra.mxu1 %v8160_v18  ;;  %v8223_v26 = vld [vmem:[#allocation270_spill] sm:$0xff]  ;;  %v8224_v18 = vld [vmem:[#allocation287_spill] sm:$0xff] }
 0x643   :  { %2935 = vmatpush.msra.mxu2 %v8161_v14  ;;  %2954 = vmatpush.msra.mxu3 %v8162_v32  ;;  %v8225_v14 = vld [vmem:[#allocation302_spill] sm:$0xff]  ;;  %v8226_v32 = vld [vmem:[#allocation319_spill] sm:$0xff] }
 0x644   :  { %2896 = vmatpush.msra.mxu0 %v8163_v15  ;;  %2915 = vmatpush.msra.mxu1 %v8164_v22  ;;  %v8227_v15 = vld [vmem:[#allocation269_spill] sm:$0xff]  ;;  %v8228_v22 = vld [vmem:[#allocation286_spill] sm:$0xff] }
 0x645   :  { %2936 = vmatpush.msra.mxu2 %v8165_v19  ;;  %2955 = vmatpush.msra.mxu3 %v8166_v35  ;;  %v8229_v19 = vld [vmem:[#allocation301_spill] sm:$0xff]  ;;  %v8230_v35 = vld [vmem:[#allocation318_spill] sm:$0xff] }
 0x646   :  { %2897 = vmatpush.msra.mxu0 %v8167_v40  ;;  %2916 = vmatpush.msra.mxu1 %v8168_v57  ;;  %v8231_v40 = vld [vmem:[#allocation268_spill] sm:$0xff]  ;;  %v8232_v57 = vld [vmem:[#allocation285_spill] sm:$0xff] }
 0x647   :  { %2937 = vmatpush.msra.mxu2 %v8169_v17  ;;  %2956 = vmatpush.msra.mxu3 %v8170_v20  ;;  %v8233_v17 = vld [vmem:[#allocation300_spill] sm:$0xff]  ;;  %v8234_v20 = vld [vmem:[#allocation317_spill] sm:$0xff] }
 0x648   :  { %2898 = vmatpush.msra.mxu0 %v8171_v6  ;;  %2917 = vmatpush.msra.mxu1 %v8172_v29  ;;  %v8235_v6 = vld [vmem:[#allocation267_spill] sm:$0xff]  ;;  %v8236_v29 = vld [vmem:[#allocation284_spill] sm:$0xff] }
 0x649   :  { %2938 = vmatpush.msra.mxu2 %v8173_v43  ;;  %2957 = vmatpush.msra.mxu3 %v8174_v56  ;;  %v8237_v43 = vld [vmem:[#allocation299_spill] sm:$0xff]  ;;  %v8238_v56 = vld [vmem:[#allocation316_spill] sm:$0xff] }
 0x64a   :  { %2899 = vmatpush.msra.mxu0 %v8175_v41  ;;  %2918 = vmatpush.msra.mxu1 %v8176_v47  ;;  %v2594_v41 = vld.sshfl [vmem:[#allocation1] sm:$0xff pattern:$0x73625140]  ;;  %v2596_v47 = vld.sshfl [vmem:[#allocation1 + $0x10] sm:$0xff pattern:$0x73625140] }
 0x64b   :  { %2939 = vmatpush.msra.mxu2 %v8177_v38  ;;  %2958 = vmatpush.msra.mxu3 %v8178_v42  ;;  %v8239_v38 = vld [vmem:[#allocation266_spill] sm:$0xff]  ;;  %v8240_v42 = vld [vmem:[#allocation283_spill] sm:$0xff] }
 0x64c   :  { %2900 = vmatmul.f32.vlgmr.msra.gmra.mxu0 %v6967_v23  ;;  %2940 = vmatmul.f32.vlgmr.msra.gmra.mxu2 %v6971_v52  ;;  %v8186_v23 = vld [vmem:[#allocation329_spill] sm:$0xff]  ;;  %v8187_v52 = vld [vmem:[#allocation279_spill] sm:$0xff] }
 0x64d   :  { %2964 = vmatpush.msrb.mxu0 %v8179_v8  ;;  %3004 = vmatpush.msrb.mxu2 %v8180_v24  ;;  %v8241_v8 = vld [vmem:[#allocation298_spill] sm:$0xff]  ;;  %v8242_v24 = vld [vmem:[#allocation315_spill] sm:$0xff] }
 0x64e   :  { %2919 = vmatpush.msra.mxu1 %v8181_v60  ;;  %2959 = vmatpush.msra.mxu3 %v8182_v44  ;;  %v2595_v60 = vld.sshfl [vmem:[#allocation1 + $0x8] sm:$0xff pattern:$0x73625140]  ;;  %v2597_v44 = vld.sshfl [vmem:[#allocation1 + $0x18] sm:$0xff pattern:$0x73625140] }
 0x64f   :  { %2920 = vmatmul.f32.vlgmr.msra.gmra.mxu1 %v6973_v13  ;;  %2960 = vmatmul.f32.vlgmr.msra.gmra.mxu3 %v6977_v31  ;;  %v8192_v13 = vld [vmem:[#allocation295_spill] sm:$0xff]  ;;  %v8193_v31 = vld [vmem:[#allocation310_spill] sm:$0xff] }
 0x650   :  { %2965 = vmatpush.msrb.mxu0 %v8183_v30  ;;  %2984 = vmatpush.msrb.mxu1 %v8184_v9  ;;  %v8243_v30 = vld [vmem:[#allocation345_spill] sm:$0xff] }
 0x651   :  { %3005 = vmatpush.msrb.mxu2 %v8185_v39  ;;  %3024 = vmatpush.msrb.mxu3 %v8186_v23  ;;  %v8244_v9 = vld [vmem:[#allocation377_spill] sm:$0xff]  ;;  %v8245_v39 = vld [vmem:[#allocation282_spill] sm:$0xff] }
 0x652   :  { %2966 = vmatpush.msrb.mxu0 %v8187_v52  ;;  %2985 = vmatpush.msrb.mxu1 %v8188_v37  ;;  %v8246_v23 = vld [vmem:[#allocation314_spill] sm:$0xff]  ;;  %v8247_v52 = vld [vmem:[#allocation344_spill] sm:$0xff]  ;;  %v8248_v37 = vld [vmem:[#allocation361_spill] sm:$0xff] }
 0x653   :  { %3006 = vmatpush.msrb.mxu2 %v8189_v16  ;;  %3025 = vmatpush.msrb.mxu3 %v8190_v5  ;;  %v8249_v16 = vld [vmem:[#allocation376_spill] sm:$0xff]  ;;  %v8250_v5 = vld [vmem:[#allocation393_spill] sm:$0xff] }
 0x654   :  { %2967 = vmatpush.msrb.mxu0 %v8191_v4  ;;  %2986 = vmatpush.msrb.mxu1 %v8192_v13  ;;  %v8251_v4 = vld [vmem:[#allocation343_spill] sm:$0xff]  ;;  %v8252_v13 = vld [vmem:[#allocation360_spill] sm:$0xff] }
 0x655   :  { %3007 = vmatpush.msrb.mxu2 %v8193_v31  ;;  %3026 = vmatpush.msrb.mxu3 %v8194_v10  ;;  %v8253_v31 = vld [vmem:[#allocation375_spill] sm:$0xff]  ;;  %v8254_v10 = vld [vmem:[#allocation392_spill] sm:$0xff] }
 0x656   :  { %2968 = vmatpush.msrb.mxu0 %v8195_v12  ;;  %2987 = vmatpush.msrb.mxu1 %v8196_v45  ;;  %v8255_v12 = vld [vmem:[#allocation342_spill] sm:$0xff]  ;;  %v8256_v45 = vld [vmem:[#allocation359_spill] sm:$0xff] }
 0x657   :  { %3008 = vmatpush.msrb.mxu2 %v8197_v53  ;;  %3027 = vmatpush.msrb.mxu3 %v8198_v0  ;;  %v8257_v53 = vld [vmem:[#allocation374_spill] sm:$0xff]  ;;  %v8258_v0 = vld [vmem:[#allocation391_spill] sm:$0xff] }
 0x658   :  { %2969 = vmatpush.msrb.mxu0 %v8199_v50  ;;  %2988 = vmatpush.msrb.mxu1 %v8200_v61  ;;  %v8259_v50 = vld [vmem:[#allocation341_spill] sm:$0xff]  ;;  %v8260_v61 = vld [vmem:[#allocation358_spill] sm:$0xff] }
 0x659   :  { %3009 = vmatpush.msrb.mxu2 %v8201_v58  ;;  %3028 = vmatpush.msrb.mxu3 %v8202_v63  ;;  %v8261_v58 = vld [vmem:[#allocation373_spill] sm:$0xff]  ;;  %v8262_v63 = vld [vmem:[#allocation390_spill] sm:$0xff] }
 0x65a   :  { %2970 = vmatpush.msrb.mxu0 %v8203_v7  ;;  %2989 = vmatpush.msrb.mxu1 %v8204_v21  ;;  %v8263_v7 = vld [vmem:[#allocation340_spill] sm:$0xff]  ;;  %v8264_v21 = vld [vmem:[#allocation357_spill] sm:$0xff] }
 0x65b   :  { %3010 = vmatpush.msrb.mxu2 %v8205_v33  ;;  %3029 = vmatpush.msrb.mxu3 %v8206_v1  ;;  %v8265_v33 = vld [vmem:[#allocation372_spill] sm:$0xff]  ;;  %v8266_v1 = vld [vmem:[#allocation389_spill] sm:$0xff] }
 0x65c   :  { %2971 = vmatpush.msrb.mxu0 %v8207_v55  ;;  %2990 = vmatpush.msrb.mxu1 %v8208_v46  ;;  %v8267_v55 = vld [vmem:[#allocation339_spill] sm:$0xff]  ;;  %v8268_v46 = vld [vmem:[#allocation356_spill] sm:$0xff] }
 0x65d   :  { %3011 = vmatpush.msrb.mxu2 %v8209_v2  ;;  %3030 = vmatpush.msrb.mxu3 %v8210_v49  ;;  %v8269_v2 = vld [vmem:[#allocation371_spill] sm:$0xff]  ;;  %v8270_v49 = vld [vmem:[#allocation388_spill] sm:$0xff] }
 0x65e   :  { %2972 = vmatpush.msrb.mxu0 %v8211_v3  ;;  %2991 = vmatpush.msrb.mxu1 %v8212_v36  ;;  %v8271_v3 = vld [vmem:[#allocation338_spill] sm:$0xff]  ;;  %v8272_v36 = vld [vmem:[#allocation355_spill] sm:$0xff] }
 0x65f   :  { %3012 = vmatpush.msrb.mxu2 %v8213_v48  ;;  %3031 = vmatpush.msrb.mxu3 %v8214_v54  ;;  %v8273_v48 = vld [vmem:[#allocation370_spill] sm:$0xff]  ;;  %v8274_v54 = vld [vmem:[#allocation387_spill] sm:$0xff] }
 0x660   :  { %2973 = vmatpush.msrb.mxu0 %v8215_v59  ;;  %2992 = vmatpush.msrb.mxu1 %v8216_v27  ;;  %v8275_v59 = vld [vmem:[#allocation337_spill] sm:$0xff]  ;;  %v8276_v27 = vld [vmem:[#allocation354_spill] sm:$0xff] }
 0x661   :  { %3013 = vmatpush.msrb.mxu2 %v8217_v62  ;;  %3032 = vmatpush.msrb.mxu3 %v8218_v51  ;;  %v8277_v62 = vld [vmem:[#allocation369_spill] sm:$0xff]  ;;  %v8278_v51 = vld [vmem:[#allocation386_spill] sm:$0xff] }
 0x662   :  { %2974 = vmatpush.msrb.mxu0 %v8219_v25  ;;  %2993 = vmatpush.msrb.mxu1 %v8220_v34  ;;  %v8279_v25 = vld [vmem:[#allocation336_spill] sm:$0xff]  ;;  %v8280_v34 = vld [vmem:[#allocation353_spill] sm:$0xff] }
 0x663   :  { %3014 = vmatpush.msrb.mxu2 %v8221_v28  ;;  %3033 = vmatpush.msrb.mxu3 %v8222_v11  ;;  %v8281_v28 = vld [vmem:[#allocation368_spill] sm:$0xff]  ;;  %v8282_v11 = vld [vmem:[#allocation385_spill] sm:$0xff] }
 0x664   :  { %2975 = vmatpush.msrb.mxu0 %v8223_v26  ;;  %2994 = vmatpush.msrb.mxu1 %v8224_v18  ;;  %v8283_v26 = vld [vmem:[#allocation335_spill] sm:$0xff]  ;;  %v8284_v18 = vld [vmem:[#allocation352_spill] sm:$0xff] }
 0x665   :  { %3015 = vmatpush.msrb.mxu2 %v8225_v14  ;;  %3034 = vmatpush.msrb.mxu3 %v8226_v32  ;;  %v8285_v14 = vld [vmem:[#allocation367_spill] sm:$0xff]  ;;  %v8286_v32 = vld [vmem:[#allocation384_spill] sm:$0xff] }
 0x666   :  { %2976 = vmatpush.msrb.mxu0 %v8227_v15  ;;  %2995 = vmatpush.msrb.mxu1 %v8228_v22  ;;  %v8287_v15 = vld [vmem:[#allocation334_spill] sm:$0xff]  ;;  %v8288_v22 = vld [vmem:[#allocation351_spill] sm:$0xff] }
 0x667   :  { %3016 = vmatpush.msrb.mxu2 %v8229_v19  ;;  %3035 = vmatpush.msrb.mxu3 %v8230_v35  ;;  %v8289_v19 = vld [vmem:[#allocation366_spill] sm:$0xff]  ;;  %v8290_v35 = vld [vmem:[#allocation383_spill] sm:$0xff] }
 0x668   :  { %2977 = vmatpush.msrb.mxu0 %v8231_v40  ;;  %2996 = vmatpush.msrb.mxu1 %v8232_v57  ;;  %v8291_v40 = vld [vmem:[#allocation333_spill] sm:$0xff]  ;;  %v8292_v57 = vld [vmem:[#allocation350_spill] sm:$0xff] }
 0x669   :  { %3017 = vmatpush.msrb.mxu2 %v8233_v17  ;;  %3036 = vmatpush.msrb.mxu3 %v8234_v20  ;;  %v8293_v17 = vld [vmem:[#allocation365_spill] sm:$0xff]  ;;  %v8294_v20 = vld [vmem:[#allocation382_spill] sm:$0xff] }
 0x66a   :  { %2978 = vmatpush.msrb.mxu0 %v8235_v6  ;;  %2997 = vmatpush.msrb.mxu1 %v8236_v29  ;;  %v2047_v6 = vld [vmem:[#allocation3 + $0x30] sm:$0xff] }
 0x66b   :  { %3018 = vmatpush.msrb.mxu2 %v8237_v43  ;;  %3037 = vmatpush.msrb.mxu3 %v8238_v56  ;;  %v8295_v29 = vld [vmem:[#allocation332_spill] sm:$0xff]  ;;  %v8296_v43 = vld [vmem:[#allocation349_spill] sm:$0xff]  ;;  %2602 = vst [vmem:[#allocation1] ss:$4 sm:$0xff] %v2047_v6  ;;  %v8354_v6 = vld [vmem:[#allocation447_spill] sm:$0xff] }
 0x66c   :  { %2979 = vmatpush.msrb.mxu0 %v8239_v38  ;;  %2998 = vmatpush.msrb.mxu1 %v8240_v42  ;;  %v8297_v56 = vld [vmem:[#allocation364_spill] sm:$0xff]  ;;  %v8301_v42 = vld [vmem:[#allocation363_spill] sm:$0xff] }
 0x66d   :  { %3019 = vmatpush.msrb.mxu2 %v8241_v8  ;;  %3038 = vmatpush.msrb.mxu3 %v8242_v24  ;;  %v8300_v38 = vld [vmem:[#allocation348_spill] sm:$0xff] }
 0x66e   :  { %2980 = vmatmul.f32.vlgmr.msrb.gmra.mxu0 %v2594_v41  ;;  %3020 = vmatmul.f32.vlgmr.msrb.gmra.mxu2 %v2596_v47  ;;  %v8298_v41 = vld [vmem:[#allocation381_spill] sm:$0xff]  ;;  %v8299_v47 = vld [vmem:[#allocation331_spill] sm:$0xff]  ;;  %v8302_v8 = vld [vmem:[#allocation380_spill] sm:$0xff] }
 0x66f   :  { %3044 = vmatpush.msra.mxu0 %v8243_v30  ;;  %3084 = vmatpush.msra.mxu2 %v8244_v9  ;;  %v2598_v24 = vld.sshfl [vmem:[#allocation1 + $0x20] sm:$0xff pattern:$0x73625140]  ;;  %v8304_v30 = vld [vmem:[#allocation347_spill] sm:$0xff]  ;;  %v8305_v9 = vld [vmem:[#allocation362_spill] sm:$0xff] }
 0x670   :  { %2999 = vmatpush.msrb.mxu1 %v8245_v39  ;;  %3039 = vmatpush.msrb.mxu3 %v8246_v23  ;;  %v8306_v39 = vld [vmem:[#allocation379_spill] sm:$0xff]  ;;  %v2599_v23 = vld.sshfl [vmem:[#allocation1 + $0x28] sm:$0xff pattern:$0x73625140] }
 0x671   :  { %3000 = vmatmul.f32.vlgmr.msrb.gmra.mxu1 %v2595_v60  ;;  %3040 = vmatmul.f32.vlgmr.msrb.gmra.mxu3 %v2597_v44  ;;  %v2600_v60 = vld.sshfl [vmem:[#allocation1 + $0x30] sm:$0xff pattern:$0x73625140] }
 0x672   :  { %3045 = vmatpush.msra.mxu0 %v8247_v52  ;;  %3064 = vmatpush.msra.mxu1 %v8248_v37  ;;  %v8303_v44 = vld [vmem:[#allocation330_spill] sm:$0xff]  ;;  %v2601_v52 = vld.sshfl [vmem:[#allocation1 + $0x38] sm:$0xff pattern:$0x73625140]  ;;  %v8307_v37 = vld [vmem:[#allocation409_spill] sm:$0xff] }
 0x673   :  { %3085 = vmatpush.msra.mxu2 %v8249_v16  ;;  %3104 = vmatpush.msra.mxu3 %v8250_v5  ;;  %v8308_v16 = vld [vmem:[#allocation441_spill] sm:$0xff]  ;;  %v8309_v5 = vld [vmem:[#allocation346_spill] sm:$0xff] }
 0x674   :  { %3046 = vmatpush.msra.mxu0 %v8251_v4  ;;  %3065 = vmatpush.msra.mxu1 %v8252_v13  ;;  %v8310_v4 = vld [vmem:[#allocation378_spill] sm:$0xff]  ;;  %v8311_v13 = vld [vmem:[#allocation408_spill] sm:$0xff] }
 0x675   :  { %3086 = vmatpush.msra.mxu2 %v8253_v31  ;;  %3105 = vmatpush.msra.mxu3 %v8254_v10  ;;  %v8312_v31 = vld [vmem:[#allocation425_spill] sm:$0xff]  ;;  %v8313_v10 = vld [vmem:[#allocation440_spill] sm:$0xff] }
 0x676   :  { %3047 = vmatpush.msra.mxu0 %v8255_v12  ;;  %3066 = vmatpush.msra.mxu1 %v8256_v45  ;;  %v8314_v12 = vld [vmem:[#allocation457_spill] sm:$0xff]  ;;  %v8315_v45 = vld [vmem:[#allocation407_spill] sm:$0xff] }
 0x677   :  { %3087 = vmatpush.msra.mxu2 %v8257_v53  ;;  %3106 = vmatpush.msra.mxu3 %v8258_v0  ;;  %v8316_v53 = vld [vmem:[#allocation424_spill] sm:$0xff]  ;;  %v8317_v0 = vld [vmem:[#allocation439_spill] sm:$0xff] }
 0x678   :  { %3048 = vmatpush.msra.mxu0 %v8259_v50  ;;  %3067 = vmatpush.msra.mxu1 %v8260_v61  ;;  %v8318_v50 = vld [vmem:[#allocation456_spill] sm:$0xff]  ;;  %v8319_v61 = vld [vmem:[#allocation406_spill] sm:$0xff] }
 0x679   :  { %3088 = vmatpush.msra.mxu2 %v8261_v58  ;;  %3107 = vmatpush.msra.mxu3 %v8262_v63  ;;  %v8320_v58 = vld [vmem:[#allocation423_spill] sm:$0xff]  ;;  %v8321_v63 = vld [vmem:[#allocation438_spill] sm:$0xff] }
 0x67a   :  { %3049 = vmatpush.msra.mxu0 %v8263_v7  ;;  %3068 = vmatpush.msra.mxu1 %v8264_v21  ;;  %v8322_v7 = vld [vmem:[#allocation455_spill] sm:$0xff]  ;;  %v8323_v21 = vld [vmem:[#allocation405_spill] sm:$0xff] }
 0x67b   :  { %3089 = vmatpush.msra.mxu2 %v8265_v33  ;;  %3108 = vmatpush.msra.mxu3 %v8266_v1  ;;  %v8324_v33 = vld [vmem:[#allocation422_spill] sm:$0xff]  ;;  %v8325_v1 = vld [vmem:[#allocation437_spill] sm:$0xff] }
 0x67c   :  { %3050 = vmatpush.msra.mxu0 %v8267_v55  ;;  %3069 = vmatpush.msra.mxu1 %v8268_v46  ;;  %v8326_v55 = vld [vmem:[#allocation454_spill] sm:$0xff]  ;;  %v8327_v46 = vld [vmem:[#allocation404_spill] sm:$0xff] }
 0x67d   :  { %3090 = vmatpush.msra.mxu2 %v8269_v2  ;;  %3109 = vmatpush.msra.mxu3 %v8270_v49  ;;  %v8328_v2 = vld [vmem:[#allocation421_spill] sm:$0xff]  ;;  %v8329_v49 = vld [vmem:[#allocation436_spill] sm:$0xff] }
 0x67e   :  { %3051 = vmatpush.msra.mxu0 %v8271_v3  ;;  %3070 = vmatpush.msra.mxu1 %v8272_v36  ;;  %v8330_v3 = vld [vmem:[#allocation453_spill] sm:$0xff]  ;;  %v8331_v36 = vld [vmem:[#allocation403_spill] sm:$0xff] }
 0x67f   :  { %3091 = vmatpush.msra.mxu2 %v8273_v48  ;;  %3110 = vmatpush.msra.mxu3 %v8274_v54  ;;  %v8332_v48 = vld [vmem:[#allocation420_spill] sm:$0xff]  ;;  %v8333_v54 = vld [vmem:[#allocation435_spill] sm:$0xff] }
 0x680   :  { %3052 = vmatpush.msra.mxu0 %v8275_v59  ;;  %3071 = vmatpush.msra.mxu1 %v8276_v27  ;;  %v8334_v59 = vld [vmem:[#allocation452_spill] sm:$0xff]  ;;  %v8335_v27 = vld [vmem:[#allocation402_spill] sm:$0xff] }
 0x681   :  { %3092 = vmatpush.msra.mxu2 %v8277_v62  ;;  %3111 = vmatpush.msra.mxu3 %v8278_v51  ;;  %v8336_v62 = vld [vmem:[#allocation419_spill] sm:$0xff]  ;;  %v8337_v51 = vld [vmem:[#allocation434_spill] sm:$0xff] }
 0x682   :  { %3053 = vmatpush.msra.mxu0 %v8279_v25  ;;  %3072 = vmatpush.msra.mxu1 %v8280_v34  ;;  %v8338_v25 = vld [vmem:[#allocation451_spill] sm:$0xff]  ;;  %v8339_v34 = vld [vmem:[#allocation401_spill] sm:$0xff] }
 0x683   :  { %3093 = vmatpush.msra.mxu2 %v8281_v28  ;;  %3112 = vmatpush.msra.mxu3 %v8282_v11  ;;  %v8340_v28 = vld [vmem:[#allocation418_spill] sm:$0xff]  ;;  %v8341_v11 = vld [vmem:[#allocation433_spill] sm:$0xff] }
 0x684   :  { %3054 = vmatpush.msra.mxu0 %v8283_v26  ;;  %3073 = vmatpush.msra.mxu1 %v8284_v18  ;;  %v8342_v26 = vld [vmem:[#allocation450_spill] sm:$0xff]  ;;  %v8343_v18 = vld [vmem:[#allocation400_spill] sm:$0xff] }
 0x685   :  { %3094 = vmatpush.msra.mxu2 %v8285_v14  ;;  %3113 = vmatpush.msra.mxu3 %v8286_v32  ;;  %v8344_v14 = vld [vmem:[#allocation417_spill] sm:$0xff]  ;;  %v8345_v32 = vld [vmem:[#allocation432_spill] sm:$0xff] }
 0x686   :  { %3055 = vmatpush.msra.mxu0 %v8287_v15  ;;  %3074 = vmatpush.msra.mxu1 %v8288_v22  ;;  %v8346_v15 = vld [vmem:[#allocation449_spill] sm:$0xff]  ;;  %v8347_v22 = vld [vmem:[#allocation399_spill] sm:$0xff] }
 0x687   :  { %3095 = vmatpush.msra.mxu2 %v8289_v19  ;;  %3114 = vmatpush.msra.mxu3 %v8290_v35  ;;  %v8348_v19 = vld [vmem:[#allocation416_spill] sm:$0xff]  ;;  %v8349_v35 = vld [vmem:[#allocation431_spill] sm:$0xff] }
 0x688   :  { %3056 = vmatpush.msra.mxu0 %v8291_v40  ;;  %3075 = vmatpush.msra.mxu1 %v8292_v57  ;;  %v8350_v40 = vld [vmem:[#allocation448_spill] sm:$0xff]  ;;  %v8351_v57 = vld [vmem:[#allocation398_spill] sm:$0xff] }
 0x689   :  { %3096 = vmatpush.msra.mxu2 %v8293_v17  ;;  %3115 = vmatpush.msra.mxu3 %v8294_v20  ;;  %v8352_v17 = vld [vmem:[#allocation415_spill] sm:$0xff]  ;;  %v8353_v20 = vld [vmem:[#allocation430_spill] sm:$0xff] }
 0x68a   :  { %3057 = vmatpush.msra.mxu0 %v8295_v29  ;;  %3076 = vmatpush.msra.mxu1 %v8296_v43  ;;  %v8355_v29 = vld [vmem:[#allocation397_spill] sm:$0xff]  ;;  %v8356_v43 = vld [vmem:[#allocation414_spill] sm:$0xff] }
 0x68b   :  { %3097 = vmatpush.msra.mxu2 %v8297_v56  ;;  %3116 = vmatpush.msra.mxu3 %v8298_v41  ;;  %v8357_v56 = vld [vmem:[#allocation429_spill] sm:$0xff]  ;;  %v8358_v41 = vld [vmem:[#allocation446_spill] sm:$0xff] }
 0x68c   :  { %3058 = vmatpush.msra.mxu0 %v8299_v47  ;;  %3077 = vmatpush.msra.mxu1 %v8300_v38  ;;  %v2048_v47 = vld [vmem:[#allocation3 + $0x38] sm:$0xff] }
 0x68d   :  { %3098 = vmatpush.msra.mxu2 %v8301_v42  ;;  %3117 = vmatpush.msra.mxu3 %v8302_v8  ;;  %v8359_v38 = vld [vmem:[#allocation396_spill] sm:$0xff]  ;;  %v8360_v42 = vld [vmem:[#allocation413_spill] sm:$0xff]  ;;  %2603 = vst [vmem:[#allocation1 + $0x20] ss:$4 sm:$0xff] %v2048_v47  ;;  %v8418_v47 = vld [vmem:[#allocation511_spill] sm:$0xff] }
 0x68e   :  { %3059 = vmatpush.msra.mxu0 %v8303_v44  ;;  %3078 = vmatpush.msra.mxu1 %v8304_v30  ;;  %v8361_v8 = vld [vmem:[#allocation428_spill] sm:$0xff]  ;;  %v8365_v30 = vld [vmem:[#allocation427_spill] sm:$0xff] }
 0x68f   :  { %3099 = vmatpush.msra.mxu2 %v8305_v9  ;;  %3118 = vmatpush.msra.mxu3 %v8306_v39  ;;  %v8364_v44 = vld [vmem:[#allocation412_spill] sm:$0xff] }
 0x690   :  { %3060 = vmatmul.f32.vlgmr.msra.gmra.mxu0 %v2598_v24  ;;  %3100 = vmatmul.f32.vlgmr.msra.gmra.mxu2 %v2600_v60  ;;  %v8362_v24 = vld [vmem:[#allocation445_spill] sm:$0xff]  ;;  %v8363_v60 = vld [vmem:[#allocation395_spill] sm:$0xff]  ;;  %v8366_v9 = vld [vmem:[#allocation444_spill] sm:$0xff] }
 0x691   :  { %3124 = vmatpush.msrb.mxu0 %v8307_v37  ;;  %3164 = vmatpush.msrb.mxu2 %v8308_v16  ;;  %v2604_v39 = vld.sshfl [vmem:[#allocation1] sm:$0xff pattern:$0x73625140]  ;;  %v8368_v37 = vld [vmem:[#allocation411_spill] sm:$0xff]  ;;  %v8369_v16 = vld [vmem:[#allocation426_spill] sm:$0xff] }
 0x692   :  { %3079 = vmatpush.msra.mxu1 %v8309_v5  ;;  %3119 = vmatpush.msra.mxu3 %v8310_v4  ;;  %v8370_v5 = vld [vmem:[#allocation443_spill] sm:$0xff]  ;;  %v2605_v4 = vld.sshfl [vmem:[#allocation1 + $0x8] sm:$0xff pattern:$0x73625140] }
 0x693   :  { %3080 = vmatmul.f32.vlgmr.msra.gmra.mxu1 %v2599_v23  ;;  %3120 = vmatmul.f32.vlgmr.msra.gmra.mxu3 %v2601_v52  ;;  %v2606_v23 = vld.sshfl [vmem:[#allocation1 + $0x10] sm:$0xff pattern:$0x73625140] }
 0x694   :  { %3125 = vmatpush.msrb.mxu0 %v8311_v13  ;;  %3144 = vmatpush.msrb.mxu1 %v8312_v31  ;;  %v8367_v52 = vld [vmem:[#allocation394_spill] sm:$0xff]  ;;  %v2607_v13 = vld.sshfl [vmem:[#allocation1 + $0x18] sm:$0xff pattern:$0x73625140]  ;;  %v8371_v31 = vld [vmem:[#allocation473_spill] sm:$0xff] }
 0x695   :  { %3165 = vmatpush.msrb.mxu2 %v8313_v10  ;;  %3184 = vmatpush.msrb.mxu3 %v8314_v12  ;;  %v8372_v10 = vld [vmem:[#allocation505_spill] sm:$0xff]  ;;  %v8373_v12 = vld [vmem:[#allocation410_spill] sm:$0xff] }
 0x696   :  { %3126 = vmatpush.msrb.mxu0 %v8315_v45  ;;  %3145 = vmatpush.msrb.mxu1 %v8316_v53  ;;  %v8374_v45 = vld [vmem:[#allocation442_spill] sm:$0xff]  ;;  %v8375_v53 = vld [vmem:[#allocation472_spill] sm:$0xff] }
 0x697   :  { %3166 = vmatpush.msrb.mxu2 %v8317_v0  ;;  %3185 = vmatpush.msrb.mxu3 %v8318_v50  ;;  %v8376_v0 = vld [vmem:[#allocation489_spill] sm:$0xff]  ;;  %v8377_v50 = vld [vmem:[#allocation504_spill] sm:$0xff] }
 0x698   :  { %3127 = vmatpush.msrb.mxu0 %v8319_v61  ;;  %3146 = vmatpush.msrb.mxu1 %v8320_v58  ;;  %v8378_v61 = vld [vmem:[#allocation521_spill] sm:$0xff]  ;;  %v8379_v58 = vld [vmem:[#allocation471_spill] sm:$0xff] }
 0x699   :  { %3167 = vmatpush.msrb.mxu2 %v8321_v63  ;;  %3186 = vmatpush.msrb.mxu3 %v8322_v7  ;;  %v8380_v63 = vld [vmem:[#allocation488_spill] sm:$0xff]  ;;  %v8381_v7 = vld [vmem:[#allocation503_spill] sm:$0xff] }
 0x69a   :  { %3128 = vmatpush.msrb.mxu0 %v8323_v21  ;;  %3147 = vmatpush.msrb.mxu1 %v8324_v33  ;;  %v8382_v21 = vld [vmem:[#allocation520_spill] sm:$0xff]  ;;  %v8383_v33 = vld [vmem:[#allocation470_spill] sm:$0xff] }
 0x69b   :  { %3168 = vmatpush.msrb.mxu2 %v8325_v1  ;;  %3187 = vmatpush.msrb.mxu3 %v8326_v55  ;;  %v8384_v1 = vld [vmem:[#allocation487_spill] sm:$0xff]  ;;  %v8385_v55 = vld [vmem:[#allocation502_spill] sm:$0xff] }
 0x69c   :  { %3129 = vmatpush.msrb.mxu0 %v8327_v46  ;;  %3148 = vmatpush.msrb.mxu1 %v8328_v2  ;;  %v8386_v46 = vld [vmem:[#allocation519_spill] sm:$0xff]  ;;  %v8387_v2 = vld [vmem:[#allocation469_spill] sm:$0xff] }
 0x69d   :  { %3169 = vmatpush.msrb.mxu2 %v8329_v49  ;;  %3188 = vmatpush.msrb.mxu3 %v8330_v3  ;;  %v8388_v49 = vld [vmem:[#allocation486_spill] sm:$0xff]  ;;  %v8389_v3 = vld [vmem:[#allocation501_spill] sm:$0xff] }
 0x69e   :  { %3130 = vmatpush.msrb.mxu0 %v8331_v36  ;;  %3149 = vmatpush.msrb.mxu1 %v8332_v48  ;;  %v8390_v36 = vld [vmem:[#allocation518_spill] sm:$0xff]  ;;  %v8391_v48 = vld [vmem:[#allocation468_spill] sm:$0xff] }
 0x69f   :  { %3170 = vmatpush.msrb.mxu2 %v8333_v54  ;;  %3189 = vmatpush.msrb.mxu3 %v8334_v59  ;;  %v8392_v54 = vld [vmem:[#allocation485_spill] sm:$0xff]  ;;  %v8393_v59 = vld [vmem:[#allocation500_spill] sm:$0xff] }
 0x6a0   :  { %3131 = vmatpush.msrb.mxu0 %v8335_v27  ;;  %3150 = vmatpush.msrb.mxu1 %v8336_v62  ;;  %v8394_v27 = vld [vmem:[#allocation517_spill] sm:$0xff]  ;;  %v8395_v62 = vld [vmem:[#allocation467_spill] sm:$0xff] }
 0x6a1   :  { %3171 = vmatpush.msrb.mxu2 %v8337_v51  ;;  %3190 = vmatpush.msrb.mxu3 %v8338_v25  ;;  %v8396_v51 = vld [vmem:[#allocation484_spill] sm:$0xff]  ;;  %v8397_v25 = vld [vmem:[#allocation499_spill] sm:$0xff] }
 0x6a2   :  { %3132 = vmatpush.msrb.mxu0 %v8339_v34  ;;  %3151 = vmatpush.msrb.mxu1 %v8340_v28  ;;  %v8398_v34 = vld [vmem:[#allocation516_spill] sm:$0xff]  ;;  %v8399_v28 = vld [vmem:[#allocation466_spill] sm:$0xff] }
 0x6a3   :  { %3172 = vmatpush.msrb.mxu2 %v8341_v11  ;;  %3191 = vmatpush.msrb.mxu3 %v8342_v26  ;;  %v8400_v11 = vld [vmem:[#allocation483_spill] sm:$0xff]  ;;  %v8401_v26 = vld [vmem:[#allocation498_spill] sm:$0xff] }
 0x6a4   :  { %3133 = vmatpush.msrb.mxu0 %v8343_v18  ;;  %3152 = vmatpush.msrb.mxu1 %v8344_v14  ;;  %v8402_v18 = vld [vmem:[#allocation515_spill] sm:$0xff]  ;;  %v8403_v14 = vld [vmem:[#allocation465_spill] sm:$0xff] }
 0x6a5   :  { %3173 = vmatpush.msrb.mxu2 %v8345_v32  ;;  %3192 = vmatpush.msrb.mxu3 %v8346_v15  ;;  %v8404_v32 = vld [vmem:[#allocation482_spill] sm:$0xff]  ;;  %v8405_v15 = vld [vmem:[#allocation497_spill] sm:$0xff] }
 0x6a6   :  { %3134 = vmatpush.msrb.mxu0 %v8347_v22  ;;  %3153 = vmatpush.msrb.mxu1 %v8348_v19  ;;  %v8406_v22 = vld [vmem:[#allocation514_spill] sm:$0xff]  ;;  %v8407_v19 = vld [vmem:[#allocation464_spill] sm:$0xff] }
 0x6a7   :  { %3174 = vmatpush.msrb.mxu2 %v8349_v35  ;;  %3193 = vmatpush.msrb.mxu3 %v8350_v40  ;;  %v8408_v35 = vld [vmem:[#allocation481_spill] sm:$0xff]  ;;  %v8409_v40 = vld [vmem:[#allocation496_spill] sm:$0xff] }
 0x6a8   :  { %3135 = vmatpush.msrb.mxu0 %v8351_v57  ;;  %3154 = vmatpush.msrb.mxu1 %v8352_v17  ;;  %v8410_v57 = vld [vmem:[#allocation513_spill] sm:$0xff]  ;;  %v8411_v17 = vld [vmem:[#allocation463_spill] sm:$0xff] }
 0x6a9   :  { %3175 = vmatpush.msrb.mxu2 %v8353_v20  ;;  %3194 = vmatpush.msrb.mxu3 %v8354_v6  ;;  %v8412_v20 = vld [vmem:[#allocation480_spill] sm:$0xff]  ;;  %v8413_v6 = vld [vmem:[#allocation495_spill] sm:$0xff] }
 0x6aa   :  { %3136 = vmatpush.msrb.mxu0 %v8355_v29  ;;  %3155 = vmatpush.msrb.mxu1 %v8356_v43  ;;  %v8414_v29 = vld [vmem:[#allocation512_spill] sm:$0xff]  ;;  %v8415_v43 = vld [vmem:[#allocation462_spill] sm:$0xff] }
 0x6ab   :  { %3176 = vmatpush.msrb.mxu2 %v8357_v56  ;;  %3195 = vmatpush.msrb.mxu3 %v8358_v41  ;;  %v8416_v56 = vld [vmem:[#allocation479_spill] sm:$0xff]  ;;  %v8417_v41 = vld [vmem:[#allocation494_spill] sm:$0xff] }
 0x6ac   :  { %3137 = vmatpush.msrb.mxu0 %v8359_v38  ;;  %3156 = vmatpush.msrb.mxu1 %v8360_v42  ;;  %v8419_v38 = vld [vmem:[#allocation461_spill] sm:$0xff]  ;;  %v8420_v42 = vld [vmem:[#allocation478_spill] sm:$0xff] }
 0x6ad   :  { %3177 = vmatpush.msrb.mxu2 %v8361_v8  ;;  %3196 = vmatpush.msrb.mxu3 %v8362_v24  ;;  %v8421_v8 = vld [vmem:[#allocation493_spill] sm:$0xff]  ;;  %v8422_v24 = vld [vmem:[#allocation510_spill] sm:$0xff] }
 0x6ae   :  { %3138 = vmatpush.msrb.mxu0 %v8363_v60  ;;  %3157 = vmatpush.msrb.mxu1 %v8364_v44  ;;  %v8423_v60 = vld [vmem:[#allocation460_spill] sm:$0xff]  ;;  %v8424_v44 = vld [vmem:[#allocation477_spill] sm:$0xff] }
 0x6af   :  { %3178 = vmatpush.msrb.mxu2 %v8365_v30  ;;  %3197 = vmatpush.msrb.mxu3 %v8366_v9  ;;  %v8425_v30 = vld [vmem:[#allocation492_spill] sm:$0xff]  ;;  %v8426_v9 = vld [vmem:[#allocation509_spill] sm:$0xff] }
 0x6b0   :  { %3139 = vmatpush.msrb.mxu0 %v8367_v52  ;;  %3158 = vmatpush.msrb.mxu1 %v8368_v37  ;;  %v8429_v52 = vld [vmem:[#allocation491_spill] sm:$0xff]  ;;  %v8430_v37 = vld [vmem:[#allocation508_spill] sm:$0xff] }
 0x6b1   :  { %3179 = vmatpush.msrb.mxu2 %v8369_v16  ;;  %3198 = vmatpush.msrb.mxu3 %v8370_v5  ;;  %v2608_v16 = vld.sshfl [vmem:[#allocation1 + $0x20] sm:$0xff pattern:$0x73625140]  ;;  %v2610_v5 = vld.sshfl [vmem:[#allocation1 + $0x30] sm:$0xff pattern:$0x73625140] }
 0x6b2   :  { %3140 = vmatmul.f32.vlgmr.msrb.gmra.mxu0 %v2604_v39  ;;  %3180 = vmatmul.f32.vlgmr.msrb.gmra.mxu2 %v2606_v23  ;;  %v8427_v39 = vld [vmem:[#allocation459_spill] sm:$0xff]  ;;  %v8428_v23 = vld [vmem:[#allocation476_spill] sm:$0xff] }
 0x6b3   :  { %3204 = vmatpush.msra.mxu0 %v8371_v31  ;;  %3244 = vmatpush.msra.mxu2 %v8372_v10  ;;  %v8433_v31 = vld [vmem:[#allocation490_spill] sm:$0xff]  ;;  %v8434_v10 = vld [vmem:[#allocation507_spill] sm:$0xff] }
 0x6b4   :  { %3159 = vmatpush.msrb.mxu1 %v8373_v12  ;;  %3199 = vmatpush.msrb.mxu3 %v8374_v45  ;;  %v2609_v12 = vld.sshfl [vmem:[#allocation1 + $0x28] sm:$0xff pattern:$0x73625140]  ;;  %v2611_v45 = vld.sshfl [vmem:[#allocation1 + $0x38] sm:$0xff pattern:$0x73625140] }
 0x6b5   :  { %3160 = vmatmul.f32.vlgmr.msrb.gmra.mxu1 %v2605_v4  ;;  %3200 = vmatmul.f32.vlgmr.msrb.gmra.mxu3 %v2607_v13  ;;  %v8431_v4 = vld [vmem:[#allocation458_spill] sm:$0xff]  ;;  %v8432_v13 = vld [vmem:[#allocation475_spill] sm:$0xff] }
 0x6b6   :  { %3205 = vmatpush.msra.mxu0 %v8375_v53  ;;  %3224 = vmatpush.msra.mxu1 %v8376_v0  ;;  %v8435_v53 = vld [vmem:[#allocation474_spill] sm:$0xff] }
 0x6b7   :  { %3245 = vmatpush.msra.mxu2 %v8377_v50  ;;  %3264 = vmatpush.msra.mxu3 %v8378_v61  ;;  %v8436_v0 = vld [vmem:[#allocation506_spill] sm:$0xff]  ;;  %v8437_v50 = vmov 0   ;;  %v3530_v61 = vld [vmem:[%s7387_s2] ss:$0 sm:$0xff] }
 0x6b8   :  { %3206 = vmatpush.msra.mxu0 %v8379_v58  ;;  %3225 = vmatpush.msra.mxu1 %v8380_v63  ;;  %v2661_v58 = vpop.f32.mrf.mxu0 }
 0x6b9   :  { %3246 = vmatpush.msra.mxu2 %v8381_v7  ;;  %3265 = vmatpush.msra.mxu3 %v8382_v21  ;;  %v2662_v63 = vadd.f32 %v3530_v61, %v2661_v58  ;;  %v2681_v7 = vpop.f32.mrf.mxu1  ;;  %v3329_v58 = vld [vmem:[%s7390_s5 + $0x28] sm:$0xff] }
 0x6ba   :  { %3207 = vmatpush.msra.mxu0 %v8383_v33  ;;  %3226 = vmatpush.msra.mxu1 %v8384_v1  ;;  %v2701_v33 = vpop.f32.mrf.mxu2 }
 0x6bb   :  { %3247 = vmatpush.msra.mxu2 %v8385_v55  ;;  %3266 = vmatpush.msra.mxu3 %v8386_v46  ;;  %v2682_v21 = vadd.f32 %v2681_v7, %v2662_v63  ;;  %v2721_v55 = vpop.f32.mrf.mxu3  ;;  %v3328_v7 = vld [vmem:[%s7390_s5 + $0x20] sm:$0xff] }
 0x6bc   :  { %3208 = vmatpush.msra.mxu0 %v8387_v2  ;;  %3227 = vmatpush.msra.mxu1 %v8388_v49 }
 0x6bd   :  { %3248 = vmatpush.msra.mxu2 %v8389_v3  ;;  %3267 = vmatpush.msra.mxu3 %v8390_v36  ;;  %v2702_v1 = vadd.f32 %v2701_v33, %v2682_v21 }
 0x6be   :  { %3209 = vmatpush.msra.mxu0 %v8391_v48  ;;  %3228 = vmatpush.msra.mxu1 %v8392_v54 }
 0x6bf   :  { %3249 = vmatpush.msra.mxu2 %v8393_v59  ;;  %3268 = vmatpush.msra.mxu3 %v8394_v27  ;;  %v2722_v46 = vadd.f32 %v2721_v55, %v2702_v1  ;;  %v3327_v1 = vld [vmem:[%s7390_s5 + $0x18] sm:$0xff] }
 0x6c0   :  { %3210 = vmatpush.msra.mxu0 %v8395_v62  ;;  %3229 = vmatpush.msra.mxu1 %v8396_v51  ;;  %v2741_v2 = vpop.f32.mrf.mxu0 }
 0x6c1   :  { %3250 = vmatpush.msra.mxu2 %v8397_v25  ;;  %3269 = vmatpush.msra.mxu3 %v8398_v34  ;;  %v2742_v49 = vadd.f32 %v2741_v2, %v2722_v46  ;;  %v2761_v3 = vpop.f32.mrf.mxu1 }
 0x6c2   :  { %3211 = vmatpush.msra.mxu0 %v8399_v28  ;;  %3230 = vmatpush.msra.mxu1 %v8400_v11  ;;  %v2781_v48 = vpop.f32.mrf.mxu2  ;;  %v3300_v28 = vld [vmem:[%s7389_s4 + $0x78] sm:$0xff]  ;;  %v3299_v11 = vld [vmem:[%s7389_s4 + $0x70] sm:$0xff] }
 0x6c3   :  { %3251 = vmatpush.msra.mxu2 %v8401_v26  ;;  %3270 = vmatpush.msra.mxu3 %v8402_v18  ;;  %v2762_v36 = vadd.f32 %v2761_v3, %v2742_v49  ;;  %v2801_v59 = vpop.f32.mrf.mxu3  ;;  %v3298_v18 = vld [vmem:[%s7389_s4 + $0x68] sm:$0xff] }
 0x6c4   :  { %3212 = vmatpush.msra.mxu0 %v8403_v14  ;;  %3231 = vmatpush.msra.mxu1 %v8404_v32 }
 0x6c5   :  { %3252 = vmatpush.msra.mxu2 %v8405_v15  ;;  %3271 = vmatpush.msra.mxu3 %v8406_v22  ;;  %v2782_v54 = vadd.f32 %v2781_v48, %v2762_v36  ;;  %v3297_v15 = vld [vmem:[%s7389_s4 + $0x60] sm:$0xff] }
 0x6c6   :  { %3213 = vmatpush.msra.mxu0 %v8407_v19  ;;  %3232 = vmatpush.msra.mxu1 %v8408_v35  ;;  %v3296_v19 = vld [vmem:[%s7389_s4 + $0x58] sm:$0xff] }
 0x6c7   :  { %3253 = vmatpush.msra.mxu2 %v8409_v40  ;;  %3272 = vmatpush.msra.mxu3 %v8410_v57  ;;  %v2802_v62 = vadd.f32 %v2801_v59, %v2782_v54  ;;  %v3295_v40 = vld [vmem:[%s7389_s4 + $0x50] sm:$0xff] }
 0x6c8   :  { %3214 = vmatpush.msra.mxu0 %v8411_v17  ;;  %3233 = vmatpush.msra.mxu1 %v8412_v20  ;;  %v2821_v27 = vpop.f32.mrf.mxu0  ;;  %v3294_v20 = vld [vmem:[%s7389_s4 + $0x48] sm:$0xff] }
 0x6c9   :  { %3254 = vmatpush.msra.mxu2 %v8413_v6  ;;  %3273 = vmatpush.msra.mxu3 %v8414_v29  ;;  %v2822_v51 = vadd.f32 %v2821_v27, %v2802_v62  ;;  %v2841_v25 = vpop.f32.mrf.mxu1  ;;  %v3293_v29 = vld [vmem:[%s7389_s4 + $0x40] sm:$0xff] }
 0x6ca   :  { %3215 = vmatpush.msra.mxu0 %v8415_v43  ;;  %3234 = vmatpush.msra.mxu1 %v8416_v56  ;;  %v2861_v34 = vpop.f32.mrf.mxu2  ;;  %v3292_v56 = vld [vmem:[%s7389_s4 + $0x38] sm:$0xff] }
 0x6cb   :  { %3255 = vmatpush.msra.mxu2 %v8417_v41  ;;  %3274 = vmatpush.msra.mxu3 %v8418_v47  ;;  %v2842_v26 = vadd.f32 %v2841_v25, %v2822_v51  ;;  %v2881_v32 = vpop.f32.mrf.mxu3 }
 0x6cc   :  { %3216 = vmatpush.msra.mxu0 %v8419_v38  ;;  %3235 = vmatpush.msra.mxu1 %v8420_v42 }
 0x6cd   :  { %3256 = vmatpush.msra.mxu2 %v8421_v8  ;;  %3275 = vmatpush.msra.mxu3 %v8422_v24  ;;  %v2862_v14 = vadd.f32 %v2861_v34, %v2842_v26  ;;  %v3326_v26 = vld [vmem:[%s7390_s5 + $0x10] sm:$0xff] }
 0x6ce   :  { %3217 = vmatpush.msra.mxu0 %v8423_v60  ;;  %3236 = vmatpush.msra.mxu1 %v8424_v44  ;;  %v3291_v60 = vld [vmem:[%s7389_s4 + $0x30] sm:$0xff] }
 0x6cf   :  { %3257 = vmatpush.msra.mxu2 %v8425_v30  ;;  %3276 = vmatpush.msra.mxu3 %v8426_v9  ;;  %v2882_v35 = vadd.f32 %v2881_v32, %v2862_v14  ;;  %v3290_v9 = vld [vmem:[%s7389_s4 + $0x28] sm:$0xff]  ;;  %v3324_v14 = vld [vmem:[%s7390_s5] sm:$0xff] }
 0x6d0   :  { %3218 = vmatpush.msra.mxu0 %v8427_v39  ;;  %3237 = vmatpush.msra.mxu1 %v8428_v23  ;;  %v2901_v22 = vpop.f32.mrf.mxu0  ;;  %v3289_v23 = vld [vmem:[%s7389_s4 + $0x20] sm:$0xff] }
 0x6d1   :  { %3258 = vmatpush.msra.mxu2 %v8429_v52  ;;  %3277 = vmatpush.msra.mxu3 %v8430_v37  ;;  %v2902_v57 = vadd.f32 %v2901_v22, %v2882_v35  ;;  %v2921_v17 = vpop.f32.mrf.mxu1  ;;  %v3288_v37 = vld [vmem:[%s7389_s4 + $0x18] sm:$0xff]  ;;  %v3531_v32 = vld [vmem:[%s7387_s2 + $0x1] ss:$0 sm:$0xff]  ;;  %v3532_v35 = vld [vmem:[%s7387_s2 + $0x2] ss:$0 sm:$0xff]  ;;  %s3577_s2 = smov [#allocation5]  }
 0x6d2   :  { %3219 = vmatpush.msra.mxu0 %v8431_v4  ;;  %3238 = vmatpush.msra.mxu1 %v8432_v13  ;;  %v2941_v6 = vpop.f32.mrf.mxu2  ;;  %v3287_v4 = vld [vmem:[%s7389_s4 + $0x10] sm:$0xff]  ;;  %s3394_s9 = sshll.u32 %s3577_s2, 4  ;;  %s3395_s9 = int_to_ptr.vmem [resolvable:$true] %s3394_s9 }
 0x6d3   :  { %3259 = vmatpush.msra.mxu2 %v8433_v31  ;;  %3278 = vmatpush.msra.mxu3 %v8434_v10  ;;  %v2922_v43 = vadd.f32 %v2921_v17, %v2902_v57  ;;  %v2961_v47 = vpop.f32.mrf.mxu3  ;;  %v3286_v31 = vld [vmem:[%s7389_s4 + $0x8] sm:$0xff] }
 0x6d4   :  { %3220 = vmatmul.f32.vlgmr.msra.gmra.mxu0 %v2608_v16  ;;  %3260 = vmatmul.f32.vlgmr.msra.gmra.mxu2 %v2610_v5 }
 0x6d5   :  { %3239 = vmatpush.msra.mxu1 %v8435_v53  ;;  %3279 = vmatpush.msra.mxu3 %v8436_v0  ;;  %v2942_v41 = vadd.f32 %v2941_v6, %v2922_v43  ;;  %v3331_v0 = vld [vmem:[%s7390_s5 + $0x38] sm:$0xff] }
 0x6d6   :  { %3240 = vmatmul.f32.vlgmr.msra.gmra.mxu1 %v2609_v12  ;;  %3280 = vmatmul.f32.vlgmr.msra.gmra.mxu3 %v2611_v45  ;;  %v3285_v12 = vld [vmem:[%s7389_s4] sm:$0xff] }
 0x6d7   :  { %3528 = vset.pattern.permute.xlu1 %v8437_v50  ;;  %3529 = vset.pattern.permute.xlu0 %v8437_v50  ;;  %v2962_v42 = vadd.f32 %v2961_v47, %v2942_v41  ;;  %v3330_v50 = vld [vmem:[%s7390_s5 + $0x30] sm:$0xff] }
 0x6d8   :  { %3303 = vmatpush.msrb.mxu0 %v3300_v28  ;;  %3346 = vmatpush.msrb.mxu1 %v3331_v0 }
 0x6da   :  { %3304 = vmatpush.msrb.mxu0 %v3299_v11  ;;  %3347 = vmatpush.msrb.mxu1 %v3330_v50 }
 0x6dc   :  { %3305 = vmatpush.msrb.mxu0 %v3298_v18  ;;  %3348 = vmatpush.msrb.mxu1 %v3329_v58  ;;  %v3325_v18 = vld [vmem:[%s7390_s5 + $0x8] sm:$0xff]  ;;  %s3576_s5 = smov 1  }
 0x6de   :  { %3306 = vmatpush.msrb.mxu0 %v3297_v15  ;;  %3349 = vmatpush.msrb.mxu1 %v3328_v7 }
 0x6e0   :  { %3307 = vmatpush.msrb.mxu0 %v3296_v19  ;;  %3350 = vmatpush.msrb.mxu1 %v3327_v1 }
 0x6e2   :  { %3308 = vmatpush.msrb.mxu0 %v3295_v40  ;;  %3351 = vmatpush.msrb.mxu1 %v3326_v26 }
 0x6e4   :  { %3309 = vmatpush.msrb.mxu0 %v3294_v20  ;;  %3352 = vmatpush.msrb.mxu1 %v3325_v18 }
 0x6e6   :  { %3310 = vmatpush.msrb.mxu0 %v3293_v29  ;;  %3353 = vmatpush.msrb.mxu1 %v3324_v14 }
 0x6e8   :  { %3311 = vmatpush.msrb.mxu0 %v3292_v56 }
 0x6ea   :  { %3312 = vmatpush.msrb.mxu0 %v3291_v60 }
 0x6eb   :  { %v2981_v38 = vpop.f32.mrf.mxu0 }
 0x6ec   :  { %v2982_v8 = vadd.f32 %v2981_v38, %v2962_v42  ;;  %3313 = vmatpush.msrb.mxu0 %v3290_v9 }
 0x6ee   :  { %v3001_v24 = vpop.f32.mrf.mxu1  ;;  %3314 = vmatpush.msrb.mxu0 %v3289_v23 }
 0x6ef   :  { %v3002_v30 = vadd.f32 %v3001_v24, %v2982_v8 }
 0x6f0   :  { %3315 = vmatpush.msrb.mxu0 %v3288_v37 }
 0x6f1   :  { %v3021_v44 = vpop.f32.mrf.mxu2 }
 0x6f2   :  { %v3022_v39 = vadd.f32 %v3021_v44, %v3002_v30  ;;  %3316 = vmatpush.msrb.mxu0 %v3287_v4 }
 0x6f4   :  { %v3041_v52 = vpop.f32.mrf.mxu3  ;;  %3317 = vmatpush.msrb.mxu0 %v3286_v31 }
 0x6f5   :  { %v3042_v5 = vadd.f32 %v3041_v52, %v3022_v39 }
 0x6f6   :  { %3318 = vmatpush.msrb.mxu0 %v3285_v12 }
 0x70d   :  { %v3061_v16 = vpop.f32.mrf.mxu0 }
 0x70e   :  { %v3062_v13 = vadd.f32 %v3061_v16, %v3042_v5 }
 0x710   :  { %v3081_v10 = vpop.f32.mrf.mxu1 }
 0x711   :  { %v3082_v53 = vadd.f32 %v3081_v10, %v3062_v13 }
 0x713   :  { %v3101_v45 = vpop.f32.mrf.mxu2 }
 0x714   :  { %v3102_v61 = vadd.f32 %v3101_v45, %v3082_v53 }
 0x716   :  { %v3121_v63 = vpop.f32.mrf.mxu3 }
 0x717   :  { %v3122_v33 = vadd.f32 %v3121_v63, %v3102_v61 }
 0x72f   :  { %v3141_v21 = vpop.f32.mrf.mxu0 }
 0x730   :  { %v3142_v55 = vadd.f32 %v3141_v21, %v3122_v33 }
 0x732   :  { %v3161_v46 = vpop.f32.mrf.mxu1 }
 0x733   :  { %v3162_v49 = vadd.f32 %v3161_v46, %v3142_v55 }
 0x735   :  { %v3181_v2 = vpop.f32.mrf.mxu2 }
 0x736   :  { %v3182_v3 = vadd.f32 %v3181_v2, %v3162_v49 }
 0x738   :  { %v3201_v36 = vpop.f32.mrf.mxu3 }
 0x739   :  { %v3202_v48 = vadd.f32 %v3201_v36, %v3182_v3 }
 0x751   :  { %v3221_v54 = vpop.f32.mrf.mxu0 }
 0x752   :  { %v3222_v59 = vadd.f32 %v3221_v54, %v3202_v48 }
 0x753   :  { %v3241_v27 = vpop.f32.mrf.mxu1 }
 0x754   :  { %v3242_v62 = vadd.f32 %v3241_v27, %v3222_v59 }
 0x757   :  { %v3261_v51 = vpop.f32.mrf.mxu2 }
 0x758   :  { %v3262_v25 = vadd.f32 %v3261_v51, %v3242_v62 }
 0x759   :  { %v3281_v34 = vpop.f32.mrf.mxu3 }
 0x75a   :  { %v3282_v28 = vadd.f32 %v3281_v34, %v3262_v25 }
 0x75c   :  { %v3284_v11 = vmax.f32 %v3282_v28, 0.0 }
 0x75e   :  { %3319 = vmatmul.f32.vlgmr.msrb.gmra.mxu0 %v3284_v11 }
 0x7db   :  { %v3320_v15 = vpop.f32.mrf.mxu0 }
 0x7dc   :  { %v3321_v22 = vadd.f32 %v3531_v32, %v3320_v15 }
 0x7de   :  { %v3323_v19 = vmax.f32 %v3321_v22, 0.0 }
 0x7e0   :  { %3464 = vmatmul.msk.f32.vlgmr.msrb.gmra.mxu1 %vm3334_vm2, %v3323_v19 }
 0x85d   :  { %v3355_v40 = vpop.f32.mrf.mxu1 }
 0x85e   :  { %v3356_v57 = vadd.f32 %v3532_v35, %v3355_v40 }
 0x860   :  { %3359 = vrot.lane.b32.xlu0 %v3356_v57, %s3573_s18 }
 0x8d2   :  { %v3360_v17 = vpop.permute.xlu0 %3359 }
 0x8d3   :  { %v3362_v20 = vmax.f32 %v3356_v57, %v3360_v17 }
 0x8d5   :  { %3367 = vrot.lane.b32.xlu0 %v3362_v20, %s3576_s5  ;;  %v3363_v41 = vsub.f32 %v3356_v57, %v3362_v20 }
 0x8d7   :  { %v3364_v47 = vmul.f32 1.442695, %v3363_v41 }
 0x947   :  { %v3368_v6 = vpop.permute.xlu0 %3367 }
 0x948   :  { %v3370_v29 = vsub.f32 %v3356_v57, %v3368_v6 }
 0x94a   :  { %v3371_v43 = vmul.f32 1.442695, %v3370_v29 }
 0x94c   :  { %3533 = vpow2.f32 %v3371_v43 }
 0x94d   :  { %3535 = vpow2.f32 %v3364_v47 }
 0x952   :  { %v3534_v56 = vpop.eup %3533 }
 0x953   :  { %3374 = vrot.lane.b32.xlu1 %v3534_v56, %s3573_s18  ;;  %v3536_v38 = vpop.eup %3535 }
 0x9c5   :  { %v3375_v42 = vpop.permute.xlu1 %3374 }
 0x9c6   :  { %v3377_v8 = vadd.f32 %v3536_v38, %v3375_v42 }
 0x9c8   :  { %3537 = vlog2.f32 %v3377_v8 }
 0x9ce   :  { %v3538_v24 = vpop.eup %3537 }
 0x9cf   :  { %v3379_v60 = vmul.f32 0.6931472, %v3538_v24 }
 0x9d1   :  { %v3380_v44 = vadd.f32 %v3379_v60, %v3362_v20 }
 0x9d3   :  { %3383 = vperm.xlu1 %3528, %v3380_v44  }
 0xa45   :  { %v3384_v30 = vpop.permute.xlu1 %3383 }
 0xa46   :  { %v3386_v9 = vsub.f32 %v3356_v57, %v3384_v30 }
 0xa48   :  { %3388 = vst.msk [vmem:[#allocation5] sm:$0x3] %vm3387_vm3, %v3386_v9 }
 0xa49   :  { %3399 = dma.vmem_to_hbm [thread:$0]  %s3395_s9, 32, %s3397_s12, [#allocation6]  }
 0xa4a   :  { %3565 = dma.done.wait [#allocation6], 32  }
 0xa4b   :  { %3566 = vsyncadd [#allocation6], 4294967264 }
 0xa4c   :  { %3404 = vsyncpa [#allocation6], 1 }
 0xa4d   :  { %3405 = vsyncmov [#allocation4] }
 0xa50   :  { %s3406_s18 = vpop.sfrf %3405 }
 0xa51   :  { %p3465_p0 = scmp.ne.s32.totalorder %s3406_s18, 0 }
 0xa53   :  { %3410 = shalt.err (%p3465_p0)  }

</bundles_post_ra>
